<compile_context>
chip_gen: v6e
topology: v6e:2x2x1
jax: 0.10.0
libtpu: 0.0.40
codegen_flags: <defaults>
</compile_context>

<pallas_src>
import functools

import jax
import jax.numpy as jnp
from jax.experimental import pallas as pl
from jax.experimental.pallas import tpu as pltpu


def _bridge_rnn_kernel(
    hidden_ref,   # (BT, encL*encH)   f32   flattened encoder hidden (batch block)
    wb_ref,       # (L, encIn, H)     bf16  bridger weight per decoder layer
    bb_ref,       # (L, 1, H)         f32
    x_ref,        # (T-1, BT, E)      bf16  pre-embedded decoder inputs tgt[:, :-1]
    tgt_ref,      # (T-1, BT, 1)      i32   targets tgt[:, 1:]
    wih_ref,      # (L, E, 3H)        bf16  fused GRU input weights, columns [r | z | n]
    whh_ref,      # (L, H, 3H)        bf16  fused GRU hidden weights, columns [r | z | n]
    bx_ref,       # (L, 1, 3H)        f32   x-side bias (r,z hidden biases pre-summed in)
    bhn_ref,      # (L, 1, H)         f32   hidden-side n bias (stays inside r*(...))
    wout_ref,     # (H, V)            bf16  output projection
    bout_ref,     # (1, V)            f32
    loss_ref,     # (BT, 1)           f32   output: per-row CE summed over time
    h_state,      # (L, BT, H)        f32   scratch: current GRU hidden per layer
    h_all,        # (T-1, BT, H)      f32   scratch: top-layer hidden per timestep
    *,
    pad_id,
):
    L = wih_ref.shape[0]
    H = whh_ref.shape[1]
    Tm1, BT, _ = x_ref.shape
    V = wout_ref.shape[1]

    # ---- MLP bridger: per-layer decoder initial hidden ----
    h0 = hidden_ref[...].astype(jnp.bfloat16)
    for l in range(L):
        h_state[l] = (
            jnp.dot(h0, wb_ref[l], preferred_element_type=jnp.float32) + bb_ref[l]
        )

    # ---- Teacher-forced stacked-GRU recurrence (serial over time) ----
    # Only GRU math lives in the serial loop; projection/CE are deferred.
    def step(t, carry):
        x = x_ref[t]                                                   # (BT, E) bf16
        h_new = None
        for l in range(L):
            h_prev = h_state[l]                                        # (BT, H) f32
            gx = jnp.dot(x, wih_ref[l],
                         preferred_element_type=jnp.float32) + bx_ref[l]     # (BT, 3H)
            gh = jnp.dot(h_prev.astype(jnp.bfloat16), whh_ref[l],
                         preferred_element_type=jnp.float32)                 # (BT, 3H)
            r = jax.nn.sigmoid(gx[:, :H] + gh[:, :H])
            z = jax.nn.sigmoid(gx[:, H:2 * H] + gh[:, H:2 * H])
            n = jnp.tanh(gx[:, 2 * H:] + r * (gh[:, 2 * H:] + bhn_ref[l]))
            h_new = (1.0 - z) * n + z * h_prev
            h_state[l] = h_new
            x = h_new.astype(jnp.bfloat16)
        h_all[t] = h_new
        return carry

    jax.lax.fori_loop(0, Tm1, step, 0, unroll=True)

    # ---- Deferred output projection + cross-entropy (one wide MXU pass) ----
    hs = h_all[...].reshape(Tm1 * BT, H).astype(jnp.bfloat16)
    logits = (
        jnp.dot(hs, wout_ref[...], preferred_element_type=jnp.float32) + bout_ref[...]
    )                                                                   # (Tm1*BT, V)
    m = jnp.max(logits, axis=-1, keepdims=True)
    lse = m + jnp.log(jnp.sum(jnp.exp(logits - m), axis=-1, keepdims=True))
    tgt = tgt_ref[...].reshape(Tm1 * BT, 1)                             # i32
    lane = jax.lax.broadcasted_iota(jnp.int32, (Tm1 * BT, V), 1)
    tgt_logit = jnp.sum(jnp.where(lane == tgt, logits, 0.0), axis=-1, keepdims=True)
    mask = (tgt != pad_id).astype(jnp.float32)                          # ignore_index
    ce = (lse - tgt_logit) * mask                                       # (Tm1*BT, 1)
    loss_ref[...] = jnp.sum(ce.reshape(Tm1, BT, 1), axis=0)             # (BT, 1)


def bridge_rnn_loss(hidden, tgt_var, params, pad_id, *, batch_tile=16):
    """hidden: (enc_layers, B, enc_hidden) f32; tgt_var: (B, T) int32 -> (B, 1) f32."""
    enc_l, batch, enc_h = hidden.shape
    enc_in = enc_l * enc_h
    dec_l, emb_dim, h3 = params["w_ih"].shape
    dec_h = h3 // 3
    vocab = params["w_out"].shape[1]
    t = tgt_var.shape[1]
    tm1 = t - 1

    bt = batch_tile
    pad_b = (-batch) % bt
    bp = batch + pad_b

    hidden_flat = jnp.transpose(hidden, (1, 0, 2)).reshape(batch, enc_in)
    if pad_b:
        # Padded rows get pad_id targets everywhere -> masked out -> loss 0.
        hidden_flat = jnp.pad(hidden_flat, ((0, pad_b), (0, 0)))
        tgt_var = jnp.pad(tgt_var, ((0, pad_b), (0, 0)), constant_values=pad_id)

    ids_in = jnp.transpose(tgt_var[:, :-1]).astype(jnp.int32)           # (tm1, bp)
    ids_tgt = jnp.transpose(tgt_var[:, 1:]).astype(jnp.int32)           # (tm1, bp)
    # Embedding lookup hoisted out of the kernel (single XLA gather, bf16 table).
    # TODO(synk): ids are assumed to be in [0, vocab); XLA clamps, torch would error.
    x_all = jnp.take(params["embedding"], ids_in, axis=0)               # (tm1, bp, E) bf16
    ids_tgt = ids_tgt.reshape(tm1, bp, 1)

    grid = (bp // bt,)

    def full(a):
        return pl.BlockSpec(a.shape, lambda i, _nd=a.ndim: (0,) * _nd)

    in_specs = [
        pl.BlockSpec((bt, enc_in), lambda i: (i, 0)),                   # hidden_flat
        full(params["w_bridge"]), full(params["b_bridge"]),
        pl.BlockSpec((tm1, bt, emb_dim), lambda i: (0, i, 0)),          # x_all
        pl.BlockSpec((tm1, bt, 1), lambda i: (0, i, 0)),                # ids_tgt
        full(params["w_ih"]), full(params["w_hh"]),
        full(params["b_x"]), full(params["b_hn"]),
        full(params["w_out"]), full(params["b_out"]),
    ]
    out_spec = pl.BlockSpec((bt, 1), lambda i: (i, 0))

    # Explicit scoped-VMEM budget (default is only 16/32 MiB depending on generation).
    nbytes = lambda a: int(a.size) * a.dtype.itemsize
    weight_bytes = sum(
        nbytes(params[k])
        for k in ("w_bridge", "b_bridge", "w_ih", "w_hh", "b_x", "b_hn", "w_out", "b_out")
    )
    block_bytes = bt * enc_in * 4 + tm1 * bt * emb_dim * 2 + tm1 * bt * 128 * 4
    scratch_bytes = (dec_l + tm1) * bt * dec_h * 4
    logits_bytes = 4 * tm1 * bt * vocab * 4
    est = 2 * (weight_bytes + block_bytes) + scratch_bytes + logits_bytes
    vmem_limit = int(min(max(2 * est, 32 << 20), 64 << 20))

    kernel = functools.partial(_bridge_rnn_kernel, pad_id=int(pad_id))

    loss = pl.pallas_call(
        kernel,
        out_shape=jax.ShapeDtypeStruct((bp, 1), jnp.float32),
        grid_spec=pltpu.PrefetchScalarGridSpec(
            num_scalar_prefetch=0,
            grid=grid,
            in_specs=in_specs,
            out_specs=out_spec,
            scratch_shapes=[
                pltpu.VMEM((dec_l, bt, dec_h), jnp.float32),   # GRU hidden state
                pltpu.VMEM((tm1, bt, dec_h), jnp.float32),     # top-layer h per step
            ],
        ),
        compiler_params=pltpu.CompilerParams(
            dimension_semantics=("parallel",),                  # batch blocks independent
            vmem_limit_bytes=vmem_limit,
        ),
    )(
        hidden_flat,
        params["w_bridge"], params["b_bridge"],
        x_all, ids_tgt,
        params["w_ih"], params["w_hh"], params["b_x"], params["b_hn"],
        params["w_out"], params["b_out"],
    )
    return loss[:batch]


def init_params(key, *, enc_layers, enc_hidden, dec_layers, dec_hidden, embed_dim, vocab):
    # Stacked GRU layers all consume a dec_hidden-wide input, so require embed == hidden.
    assert embed_dim == dec_hidden
    h = dec_hidden
    enc_in = enc_layers * enc_hidden
    ks = jax.random.split(key, 9)
    s = 0.1
    w_bridge = s * jax.random.normal(ks[0], (dec_layers, enc_in, h), jnp.float32)
    b_bridge = s * jax.random.normal(ks[1], (dec_layers, 1, h), jnp.float32)
    embedding = s * jax.random.normal(ks[2], (vocab, embed_dim), jnp.float32)
    # Fused gate layout: columns are [r | z | n] (PyTorch nn.GRU gate order).
    w_ih = s * jax.random.normal(ks[3], (dec_layers, embed_dim, 3 * h), jnp.float32)
    w_hh = s * jax.random.normal(ks[4], (dec_layers, h, 3 * h), jnp.float32)
    b_ih = s * jax.random.normal(ks[5], (dec_layers, 1, 3 * h), jnp.float32)
    b_hh = s * jax.random.normal(ks[6], (dec_layers, 1, 3 * h), jnp.float32)
    w_out = s * jax.random.normal(ks[7], (h, vocab), jnp.float32)
    b_out = s * jax.random.normal(ks[8], (1, vocab), jnp.float32)

    # Pre-sum biases that are always added together (r, z gates); the hidden-side n
    # bias must stay separate because it sits inside r * (...).
    b_x = jnp.concatenate(
        [b_ih[:, :, :2 * h] + b_hh[:, :, :2 * h], b_ih[:, :, 2 * h:]], axis=-1
    )
    b_hn = b_hh[:, :, 2 * h:]

    bf16 = jnp.bfloat16
    return dict(
        w_bridge=w_bridge.astype(bf16), b_bridge=b_bridge,
        embedding=embedding.astype(bf16),
        w_ih=w_ih.astype(bf16), w_hh=w_hh.astype(bf16),
        b_x=b_x, b_hn=b_hn,
        w_out=w_out.astype(bf16), b_out=b_out,
    )


if __name__ == "__main__":
    ENC_L, ENC_H = 1, 128          # enc_num_layers, enc_hidden_dim (lane-aligned)
    DEC_L, DEC_H, EMB = 2, 128, 128  # dec_num_layers, dec_hidden_dim, dec_embed_dim
    VOCAB, B, T = 256, 32, 8       # vocab size, batch, tgt_max_time_step
    PAD_ID = 0
    BATCH_TILE = 16                # batch block per grid step (multiple of sublane tile)

    key = jax.random.PRNGKey(0)
    k_h, k_t, k_p = jax.random.split(key, 3)

    hidden = jax.random.normal(k_h, (ENC_L, B, ENC_H), jnp.float32)
    tgt_var = jax.random.randint(k_t, (B, T), 1, VOCAB, dtype=jnp.int32)
    tgt_var = tgt_var.at[:, 0].set(1)           # sos-like first token
    tgt_var = tgt_var.at[:, -2:].set(PAD_ID)    # trailing pads exercise ignore_index

    params = init_params(
        k_p,
        enc_layers=ENC_L, enc_hidden=ENC_H,
        dec_layers=DEC_L, dec_hidden=DEC_H,
        embed_dim=EMB, vocab=VOCAB,
    )

    loss = bridge_rnn_loss(hidden, tgt_var, params, PAD_ID, batch_tile=BATCH_TILE)
    jax.block_until_ready(loss)
    assert loss.shape == (B, 1) and loss.dtype == jnp.float32
    assert bool(jnp.all(jnp.isfinite(loss)))
    print("KERNEL_OK")
</pallas_src>

<mosaic_0001>
module attributes {stable_mosaic.version = 11 : i64} {
  func.func @_bridge_rnn_kernel(%arg0: i32, %arg1: memref<16x128xf32, #tpu.memory_space<vmem>>, %arg2: memref<2x128x128xbf16, #tpu.memory_space<vmem>>, %arg3: memref<2x1x128xf32, #tpu.memory_space<vmem>>, %arg4: memref<7x16x128xbf16, #tpu.memory_space<vmem>>, %arg5: memref<7x16x1xi32, #tpu.memory_space<vmem>>, %arg6: memref<2x128x384xbf16, #tpu.memory_space<vmem>>, %arg7: memref<2x128x384xbf16, #tpu.memory_space<vmem>>, %arg8: memref<2x1x384xf32, #tpu.memory_space<vmem>>, %arg9: memref<2x1x128xf32, #tpu.memory_space<vmem>>, %arg10: memref<128x256xbf16, #tpu.memory_space<vmem>>, %arg11: memref<1x256xf32, #tpu.memory_space<vmem>>, %arg12: memref<16x1xf32, #tpu.memory_space<vmem>>, %arg13: memref<2x16x128xf32, #tpu.memory_space<vmem>>, %arg14: memref<7x16x128xf32, #tpu.memory_space<vmem>>) attributes {dimension_semantics = [#tpu.dimension_semantics<parallel>], iteration_bounds = array<i64: 2>, scalar_prefetch = 0 : i64, scratch_operands = 2 : i64, tpu.core_type = #tpu.core_type<tc>, window_params = [{transform_indices = @transform_0, window_bounds = array<i64: 16, 128>}, {pipeline_mode = #tpu.pipeline_mode<synchronous>, transform_indices = @transform_1, window_bounds = array<i64: 2, 128, 128>}, {pipeline_mode = #tpu.pipeline_mode<synchronous>, transform_indices = @transform_2, window_bounds = array<i64: 2, 1, 128>}, {transform_indices = @transform_3, window_bounds = array<i64: 7, 16, 128>}, {transform_indices = @transform_4, window_bounds = array<i64: 7, 16, 1>}, {pipeline_mode = #tpu.pipeline_mode<synchronous>, transform_indices = @transform_5, window_bounds = array<i64: 2, 128, 384>}, {pipeline_mode = #tpu.pipeline_mode<synchronous>, transform_indices = @transform_6, window_bounds = array<i64: 2, 128, 384>}, {pipeline_mode = #tpu.pipeline_mode<synchronous>, transform_indices = @transform_7, window_bounds = array<i64: 2, 1, 384>}, {pipeline_mode = #tpu.pipeline_mode<synchronous>, transform_indices = @transform_8, window_bounds = array<i64: 2, 1, 128>}, {pipeline_mode = #tpu.pipeline_mode<synchronous>, transform_indices = @transform_9, window_bounds = array<i64: 128, 256>}, {pipeline_mode = #tpu.pipeline_mode<synchronous>, transform_indices = @transform_10, window_bounds = array<i64: 1, 256>}, {transform_indices = @transform_11, window_bounds = array<i64: 16, 1>}]} {
    %c0 = arith.constant 0 : index
    %c0_0 = arith.constant 0 : index
    %0 = vector.load %arg1[%c0, %c0_0] : memref<16x128xf32, #tpu.memory_space<vmem>>, vector<16x128xf32>
    %1 = arith.truncf %0 : vector<16x128xf32> to vector<16x128xbf16>
    %c0_1 = arith.constant 0 : index
    %c0_2 = arith.constant 0 : index
    %c0_3 = arith.constant 0 : index
    %2 = vector.load %arg2[%c0_1, %c0_2, %c0_3] : memref<2x128x128xbf16, #tpu.memory_space<vmem>>, vector<1x128x128xbf16>
    %3 = vector.shape_cast %2 : vector<1x128x128xbf16> to vector<128x128xbf16>
    %cst = arith.constant dense<0.000000e+00> : vector<16x128xf32>
    %4 = tpu.matmul %1, %3, %cst {dimension_numbers = #tpu.dot_dimension_numbers<[1], [0], [0], [1], [0, 0, 1, 1], [], []>} : vector<16x128xbf16>, vector<128x128xbf16>, vector<16x128xf32> -> vector<16x128xf32>
    %c0_4 = arith.constant 0 : index
    %c0_5 = arith.constant 0 : index
    %c0_6 = arith.constant 0 : index
    %5 = vector.load %arg3[%c0_4, %c0_5, %c0_6] : memref<2x1x128xf32, #tpu.memory_space<vmem>>, vector<1x1x128xf32>
    %6 = vector.shape_cast %5 : vector<1x1x128xf32> to vector<1x128xf32>
    %7 = vector.broadcast %6 : vector<1x128xf32> to vector<16x128xf32>
    %8 = arith.addf %4, %7 : vector<16x128xf32>
    %c0_7 = arith.constant 0 : index
    %c0_8 = arith.constant 0 : index
    %c0_9 = arith.constant 0 : index
    %9 = vector.load %arg13[%c0_7, %c0_8, %c0_9] : memref<2x16x128xf32, #tpu.memory_space<vmem>>, vector<1x16x128xf32>
    %10 = vector.shape_cast %9 : vector<1x16x128xf32> to vector<16x128xf32>
    %11 = vector.shape_cast %8 : vector<16x128xf32> to vector<1x16x128xf32>
    tpu.vector_store %arg13[%c0_7, %c0_8, %c0_9], %11 {strides = array<i32>} : memref<2x16x128xf32, #tpu.memory_space<vmem>>, vector<1x16x128xf32>,
    %c1 = arith.constant 1 : index
    %c0_10 = arith.constant 0 : index
    %c0_11 = arith.constant 0 : index
    %12 = vector.load %arg2[%c1, %c0_10, %c0_11] : memref<2x128x128xbf16, #tpu.memory_space<vmem>>, vector<1x128x128xbf16>
    %13 = vector.shape_cast %12 : vector<1x128x128xbf16> to vector<128x128xbf16>
    %cst_12 = arith.constant dense<0.000000e+00> : vector<16x128xf32>
    %14 = tpu.matmul %1, %13, %cst_12 {dimension_numbers = #tpu.dot_dimension_numbers<[1], [0], [0], [1], [0, 0, 1, 1], [], []>} : vector<16x128xbf16>, vector<128x128xbf16>, vector<16x128xf32> -> vector<16x128xf32>
    %c1_13 = arith.constant 1 : index
    %c0_14 = arith.constant 0 : index
    %c0_15 = arith.constant 0 : index
    %15 = vector.load %arg3[%c1_13, %c0_14, %c0_15] : memref<2x1x128xf32, #tpu.memory_space<vmem>>, vector<1x1x128xf32>
    %16 = vector.shape_cast %15 : vector<1x1x128xf32> to vector<1x128xf32>
    %17 = vector.broadcast %16 : vector<1x128xf32> to vector<16x128xf32>
    %18 = arith.addf %14, %17 : vector<16x128xf32>
    %c1_16 = arith.constant 1 : index
    %c0_17 = arith.constant 0 : index
    %c0_18 = arith.constant 0 : index
    %19 = vector.load %arg13[%c1_16, %c0_17, %c0_18] : memref<2x16x128xf32, #tpu.memory_space<vmem>>, vector<1x16x128xf32>
    %20 = vector.shape_cast %19 : vector<1x16x128xf32> to vector<16x128xf32>
    %21 = vector.shape_cast %18 : vector<16x128xf32> to vector<1x16x128xf32>
    tpu.vector_store %arg13[%c1_16, %c0_17, %c0_18], %21 {strides = array<i32>} : memref<2x16x128xf32, #tpu.memory_space<vmem>>, vector<1x16x128xf32>,
    %c0_i32 = arith.constant 0 : i32
    %22 = arith.index_cast %c0_i32 : i32 to index
    %c0_19 = arith.constant 0 : index
    %c0_20 = arith.constant 0 : index
    %23 = vector.load %arg4[%22, %c0_19, %c0_20] : memref<7x16x128xbf16, #tpu.memory_space<vmem>>, vector<1x16x128xbf16>
    %24 = vector.shape_cast %23 : vector<1x16x128xbf16> to vector<16x128xbf16>
    %c0_21 = arith.constant 0 : index
    %c0_22 = arith.constant 0 : index
    %c0_23 = arith.constant 0 : index
    %25 = vector.load %arg13[%c0_21, %c0_22, %c0_23] : memref<2x16x128xf32, #tpu.memory_space<vmem>>, vector<1x16x128xf32>
    %26 = vector.shape_cast %25 : vector<1x16x128xf32> to vector<16x128xf32>
    %c0_24 = arith.constant 0 : index
    %c0_25 = arith.constant 0 : index
    %c0_26 = arith.constant 0 : index
    %27 = vector.load %arg6[%c0_24, %c0_25, %c0_26] : memref<2x128x384xbf16, #tpu.memory_space<vmem>>, vector<1x128x384xbf16>
    %28 = vector.shape_cast %27 : vector<1x128x384xbf16> to vector<128x384xbf16>
    %cst_27 = arith.constant dense<0.000000e+00> : vector<16x384xf32>
    %29 = tpu.matmul %24, %28, %cst_27 {dimension_numbers = #tpu.dot_dimension_numbers<[1], [0], [0], [1], [0, 0, 1, 1], [], []>} : vector<16x128xbf16>, vector<128x384xbf16>, vector<16x384xf32> -> vector<16x384xf32>
    %c0_28 = arith.constant 0 : index
    %c0_29 = arith.constant 0 : index
    %c0_30 = arith.constant 0 : index
    %30 = vector.load %arg8[%c0_28, %c0_29, %c0_30] : memref<2x1x384xf32, #tpu.memory_space<vmem>>, vector<1x1x384xf32>
    %31 = vector.shape_cast %30 : vector<1x1x384xf32> to vector<1x384xf32>
    %32 = vector.broadcast %31 : vector<1x384xf32> to vector<16x384xf32>
    %33 = arith.addf %29, %32 : vector<16x384xf32>
    %34 = arith.truncf %26 : vector<16x128xf32> to vector<16x128xbf16>
    %c0_31 = arith.constant 0 : index
    %c0_32 = arith.constant 0 : index
    %c0_33 = arith.constant 0 : index
    %35 = vector.load %arg7[%c0_31, %c0_32, %c0_33] : memref<2x128x384xbf16, #tpu.memory_space<vmem>>, vector<1x128x384xbf16>
    %36 = vector.shape_cast %35 : vector<1x128x384xbf16> to vector<128x384xbf16>
    %cst_34 = arith.constant dense<0.000000e+00> : vector<16x384xf32>
    %37 = tpu.matmul %34, %36, %cst_34 {dimension_numbers = #tpu.dot_dimension_numbers<[1], [0], [0], [1], [0, 0, 1, 1], [], []>} : vector<16x128xbf16>, vector<128x384xbf16>, vector<16x384xf32> -> vector<16x384xf32>
    %38 = vector.extract_strided_slice %33 {offsets = [0, 0], sizes = [16, 128], strides = [1, 1]} : vector<16x384xf32> to vector<16x128xf32>
    %39 = vector.extract_strided_slice %37 {offsets = [0, 0], sizes = [16, 128], strides = [1, 1]} : vector<16x384xf32> to vector<16x128xf32>
    %40 = arith.addf %38, %39 : vector<16x128xf32>
    %41 = arith.negf %40 : vector<16x128xf32>
    %42 = math.exp %41 : vector<16x128xf32>
    %cst_35 = arith.constant 1.000000e+00 : f32
    %43 = vector.broadcast %cst_35 : f32 to vector<16x128xf32>
    %44 = arith.addf %43, %42 : vector<16x128xf32>
    %45 = arith.divf %43, %44 : vector<16x128xf32>
    %46 = vector.extract_strided_slice %33 {offsets = [0, 128], sizes = [16, 128], strides = [1, 1]} : vector<16x384xf32> to vector<16x128xf32>
    %47 = vector.extract_strided_slice %37 {offsets = [0, 128], sizes = [16, 128], strides = [1, 1]} : vector<16x384xf32> to vector<16x128xf32>
    %48 = arith.addf %46, %47 : vector<16x128xf32>
    %49 = arith.negf %48 : vector<16x128xf32>
    %50 = math.exp %49 : vector<16x128xf32>
    %cst_36 = arith.constant 1.000000e+00 : f32
    %51 = vector.broadcast %cst_36 : f32 to vector<16x128xf32>
    %52 = arith.addf %51, %50 : vector<16x128xf32>
    %53 = arith.divf %51, %52 : vector<16x128xf32>
    %54 = vector.extract_strided_slice %33 {offsets = [0, 256], sizes = [16, 128], strides = [1, 1]} : vector<16x384xf32> to vector<16x128xf32>
    %55 = vector.extract_strided_slice %37 {offsets = [0, 256], sizes = [16, 128], strides = [1, 1]} : vector<16x384xf32> to vector<16x128xf32>
    %c0_37 = arith.constant 0 : index
    %c0_38 = arith.constant 0 : index
    %c0_39 = arith.constant 0 : index
    %56 = vector.load %arg9[%c0_37, %c0_38, %c0_39] : memref<2x1x128xf32, #tpu.memory_space<vmem>>, vector<1x1x128xf32>
    %57 = vector.shape_cast %56 : vector<1x1x128xf32> to vector<1x128xf32>
    %58 = vector.broadcast %57 : vector<1x128xf32> to vector<16x128xf32>
    %59 = arith.addf %55, %58 : vector<16x128xf32>
    %60 = arith.mulf %45, %59 : vector<16x128xf32>
    %61 = arith.addf %54, %60 : vector<16x128xf32>
    %62 = math.tanh %61 : vector<16x128xf32>
    %cst_40 = arith.constant 1.000000e+00 : f32
    %63 = vector.broadcast %cst_40 : f32 to vector<16x128xf32>
    %64 = arith.subf %63, %53 : vector<16x128xf32>
    %65 = arith.mulf %64, %62 : vector<16x128xf32>
    %66 = arith.mulf %53, %26 : vector<16x128xf32>
    %67 = arith.addf %65, %66 : vector<16x128xf32>
    %c0_41 = arith.constant 0 : index
    %c0_42 = arith.constant 0 : index
    %c0_43 = arith.constant 0 : index
    %68 = vector.load %arg13[%c0_41, %c0_42, %c0_43] : memref<2x16x128xf32, #tpu.memory_space<vmem>>, vector<1x16x128xf32>
    %69 = vector.shape_cast %68 : vector<1x16x128xf32> to vector<16x128xf32>
    %70 = vector.shape_cast %67 : vector<16x128xf32> to vector<1x16x128xf32>
    tpu.vector_store %arg13[%c0_41, %c0_42, %c0_43], %70 {strides = array<i32>} : memref<2x16x128xf32, #tpu.memory_space<vmem>>, vector<1x16x128xf32>,
    %71 = arith.truncf %67 : vector<16x128xf32> to vector<16x128xbf16>
    %c1_44 = arith.constant 1 : index
    %c0_45 = arith.constant 0 : index
    %c0_46 = arith.constant 0 : index
    %72 = vector.load %arg13[%c1_44, %c0_45, %c0_46] : memref<2x16x128xf32, #tpu.memory_space<vmem>>, vector<1x16x128xf32>
    %73 = vector.shape_cast %72 : vector<1x16x128xf32> to vector<16x128xf32>
    %c1_47 = arith.constant 1 : index
    %c0_48 = arith.constant 0 : index
    %c0_49 = arith.constant 0 : index
    %74 = vector.load %arg6[%c1_47, %c0_48, %c0_49] : memref<2x128x384xbf16, #tpu.memory_space<vmem>>, vector<1x128x384xbf16>
    %75 = vector.shape_cast %74 : vector<1x128x384xbf16> to vector<128x384xbf16>
    %cst_50 = arith.constant dense<0.000000e+00> : vector<16x384xf32>
    %76 = tpu.matmul %71, %75, %cst_50 {dimension_numbers = #tpu.dot_dimension_numbers<[1], [0], [0], [1], [0, 0, 1, 1], [], []>} : vector<16x128xbf16>, vector<128x384xbf16>, vector<16x384xf32> -> vector<16x384xf32>
    %c1_51 = arith.constant 1 : index
    %c0_52 = arith.constant 0 : index
    %c0_53 = arith.constant 0 : index
    %77 = vector.load %arg8[%c1_51, %c0_52, %c0_53] : memref<2x1x384xf32, #tpu.memory_space<vmem>>, vector<1x1x384xf32>
    %78 = vector.shape_cast %77 : vector<1x1x384xf32> to vector<1x384xf32>
    %79 = vector.broadcast %78 : vector<1x384xf32> to vector<16x384xf32>
    %80 = arith.addf %76, %79 : vector<16x384xf32>
    %81 = arith.truncf %73 : vector<16x128xf32> to vector<16x128xbf16>
    %c1_54 = arith.constant 1 : index
    %c0_55 = arith.constant 0 : index
    %c0_56 = arith.constant 0 : index
    %82 = vector.load %arg7[%c1_54, %c0_55, %c0_56] : memref<2x128x384xbf16, #tpu.memory_space<vmem>>, vector<1x128x384xbf16>
    %83 = vector.shape_cast %82 : vector<1x128x384xbf16> to vector<128x384xbf16>
    %cst_57 = arith.constant dense<0.000000e+00> : vector<16x384xf32>
    %84 = tpu.matmul %81, %83, %cst_57 {dimension_numbers = #tpu.dot_dimension_numbers<[1], [0], [0], [1], [0, 0, 1, 1], [], []>} : vector<16x128xbf16>, vector<128x384xbf16>, vector<16x384xf32> -> vector<16x384xf32>
    %85 = vector.extract_strided_slice %80 {offsets = [0, 0], sizes = [16, 128], strides = [1, 1]} : vector<16x384xf32> to vector<16x128xf32>
    %86 = vector.extract_strided_slice %84 {offsets = [0, 0], sizes = [16, 128], strides = [1, 1]} : vector<16x384xf32> to vector<16x128xf32>
    %87 = arith.addf %85, %86 : vector<16x128xf32>
    %88 = arith.negf %87 : vector<16x128xf32>
    %89 = math.exp %88 : vector<16x128xf32>
    %cst_58 = arith.constant 1.000000e+00 : f32
    %90 = vector.broadcast %cst_58 : f32 to vector<16x128xf32>
    %91 = arith.addf %90, %89 : vector<16x128xf32>
    %92 = arith.divf %90, %91 : vector<16x128xf32>
    %93 = vector.extract_strided_slice %80 {offsets = [0, 128], sizes = [16, 128], strides = [1, 1]} : vector<16x384xf32> to vector<16x128xf32>
    %94 = vector.extract_strided_slice %84 {offsets = [0, 128], sizes = [16, 128], strides = [1, 1]} : vector<16x384xf32> to vector<16x128xf32>
    %95 = arith.addf %93, %94 : vector<16x128xf32>
    %96 = arith.negf %95 : vector<16x128xf32>
    %97 = math.exp %96 : vector<16x128xf32>
    %cst_59 = arith.constant 1.000000e+00 : f32
    %98 = vector.broadcast %cst_59 : f32 to vector<16x128xf32>
    %99 = arith.addf %98, %97 : vector<16x128xf32>
    %100 = arith.divf %98, %99 : vector<16x128xf32>
    %101 = vector.extract_strided_slice %80 {offsets = [0, 256], sizes = [16, 128], strides = [1, 1]} : vector<16x384xf32> to vector<16x128xf32>
    %102 = vector.extract_strided_slice %84 {offsets = [0, 256], sizes = [16, 128], strides = [1, 1]} : vector<16x384xf32> to vector<16x128xf32>
    %c1_60 = arith.constant 1 : index
    %c0_61 = arith.constant 0 : index
    %c0_62 = arith.constant 0 : index
    %103 = vector.load %arg9[%c1_60, %c0_61, %c0_62] : memref<2x1x128xf32, #tpu.memory_space<vmem>>, vector<1x1x128xf32>
    %104 = vector.shape_cast %103 : vector<1x1x128xf32> to vector<1x128xf32>
    %105 = vector.broadcast %104 : vector<1x128xf32> to vector<16x128xf32>
    %106 = arith.addf %102, %105 : vector<16x128xf32>
    %107 = arith.mulf %92, %106 : vector<16x128xf32>
    %108 = arith.addf %101, %107 : vector<16x128xf32>
    %109 = math.tanh %108 : vector<16x128xf32>
    %cst_63 = arith.constant 1.000000e+00 : f32
    %110 = vector.broadcast %cst_63 : f32 to vector<16x128xf32>
    %111 = arith.subf %110, %100 : vector<16x128xf32>
    %112 = arith.mulf %111, %109 : vector<16x128xf32>
    %113 = arith.mulf %100, %73 : vector<16x128xf32>
    %114 = arith.addf %112, %113 : vector<16x128xf32>
    %c1_64 = arith.constant 1 : index
    %c0_65 = arith.constant 0 : index
    %c0_66 = arith.constant 0 : index
    %115 = vector.load %arg13[%c1_64, %c0_65, %c0_66] : memref<2x16x128xf32, #tpu.memory_space<vmem>>, vector<1x16x128xf32>
    %116 = vector.shape_cast %115 : vector<1x16x128xf32> to vector<16x128xf32>
    %117 = vector.shape_cast %114 : vector<16x128xf32> to vector<1x16x128xf32>
    tpu.vector_store %arg13[%c1_64, %c0_65, %c0_66], %117 {strides = array<i32>} : memref<2x16x128xf32, #tpu.memory_space<vmem>>, vector<1x16x128xf32>,
    %118 = arith.index_cast %c0_i32 : i32 to index
    %c0_67 = arith.constant 0 : index
    %c0_68 = arith.constant 0 : index
    %119 = vector.load %arg14[%118, %c0_67, %c0_68] : memref<7x16x128xf32, #tpu.memory_space<vmem>>, vector<1x16x128xf32>
    %120 = vector.shape_cast %119 : vector<1x16x128xf32> to vector<16x128xf32>
    %121 = vector.shape_cast %114 : vector<16x128xf32> to vector<1x16x128xf32>
    tpu.vector_store %arg14[%118, %c0_67, %c0_68], %121 {strides = array<i32>} : memref<7x16x128xf32, #tpu.memory_space<vmem>>, vector<1x16x128xf32>,
    %c1_i32 = arith.constant 1 : i32
    %122 = arith.index_cast %c1_i32 : i32 to index
    %c0_69 = arith.constant 0 : index
    %c0_70 = arith.constant 0 : index
    %123 = vector.load %arg4[%122, %c0_69, %c0_70] : memref<7x16x128xbf16, #tpu.memory_space<vmem>>, vector<1x16x128xbf16>
    %124 = vector.shape_cast %123 : vector<1x16x128xbf16> to vector<16x128xbf16>
    %c0_71 = arith.constant 0 : index
    %c0_72 = arith.constant 0 : index
    %c0_73 = arith.constant 0 : index
    %125 = vector.load %arg13[%c0_71, %c0_72, %c0_73] : memref<2x16x128xf32, #tpu.memory_space<vmem>>, vector<1x16x128xf32>
    %126 = vector.shape_cast %125 : vector<1x16x128xf32> to vector<16x128xf32>
    %c0_74 = arith.constant 0 : index
    %c0_75 = arith.constant 0 : index
    %c0_76 = arith.constant 0 : index
    %127 = vector.load %arg6[%c0_74, %c0_75, %c0_76] : memref<2x128x384xbf16, #tpu.memory_space<vmem>>, vector<1x128x384xbf16>
    %128 = vector.shape_cast %127 : vector<1x128x384xbf16> to vector<128x384xbf16>
    %cst_77 = arith.constant dense<0.000000e+00> : vector<16x384xf32>
    %129 = tpu.matmul %124, %128, %cst_77 {dimension_numbers = #tpu.dot_dimension_numbers<[1], [0], [0], [1], [0, 0, 1, 1], [], []>} : vector<16x128xbf16>, vector<128x384xbf16>, vector<16x384xf32> -> vector<16x384xf32>
    %c0_78 = arith.constant 0 : index
    %c0_79 = arith.constant 0 : index
    %c0_80 = arith.constant 0 : index
    %130 = vector.load %arg8[%c0_78, %c0_79, %c0_80] : memref<2x1x384xf32, #tpu.memory_space<vmem>>, vector<1x1x384xf32>
    %131 = vector.shape_cast %130 : vector<1x1x384xf32> to vector<1x384xf32>
    %132 = vector.broadcast %131 : vector<1x384xf32> to vector<16x384xf32>
    %133 = arith.addf %129, %132 : vector<16x384xf32>
    %134 = arith.truncf %126 : vector<16x128xf32> to vector<16x128xbf16>
    %c0_81 = arith.constant 0 : index
    %c0_82 = arith.constant 0 : index
    %c0_83 = arith.constant 0 : index
    %135 = vector.load %arg7[%c0_81, %c0_82, %c0_83] : memref<2x128x384xbf16, #tpu.memory_space<vmem>>, vector<1x128x384xbf16>
    %136 = vector.shape_cast %135 : vector<1x128x384xbf16> to vector<128x384xbf16>
    %cst_84 = arith.constant dense<0.000000e+00> : vector<16x384xf32>
    %137 = tpu.matmul %134, %136, %cst_84 {dimension_numbers = #tpu.dot_dimension_numbers<[1], [0], [0], [1], [0, 0, 1, 1], [], []>} : vector<16x128xbf16>, vector<128x384xbf16>, vector<16x384xf32> -> vector<16x384xf32>
    %138 = vector.extract_strided_slice %133 {offsets = [0, 0], sizes = [16, 128], strides = [1, 1]} : vector<16x384xf32> to vector<16x128xf32>
    %139 = vector.extract_strided_slice %137 {offsets = [0, 0], sizes = [16, 128], strides = [1, 1]} : vector<16x384xf32> to vector<16x128xf32>
    %140 = arith.addf %138, %139 : vector<16x128xf32>
    %141 = arith.negf %140 : vector<16x128xf32>
    %142 = math.exp %141 : vector<16x128xf32>
    %cst_85 = arith.constant 1.000000e+00 : f32
    %143 = vector.broadcast %cst_85 : f32 to vector<16x128xf32>
    %144 = arith.addf %143, %142 : vector<16x128xf32>
    %145 = arith.divf %143, %144 : vector<16x128xf32>
    %146 = vector.extract_strided_slice %133 {offsets = [0, 128], sizes = [16, 128], strides = [1, 1]} : vector<16x384xf32> to vector<16x128xf32>
    %147 = vector.extract_strided_slice %137 {offsets = [0, 128], sizes = [16, 128], strides = [1, 1]} : vector<16x384xf32> to vector<16x128xf32>
    %148 = arith.addf %146, %147 : vector<16x128xf32>
    %149 = arith.negf %148 : vector<16x128xf32>
    %150 = math.exp %149 : vector<16x128xf32>
    %cst_86 = arith.constant 1.000000e+00 : f32
    %151 = vector.broadcast %cst_86 : f32 to vector<16x128xf32>
    %152 = arith.addf %151, %150 : vector<16x128xf32>
    %153 = arith.divf %151, %152 : vector<16x128xf32>
    %154 = vector.extract_strided_slice %133 {offsets = [0, 256], sizes = [16, 128], strides = [1, 1]} : vector<16x384xf32> to vector<16x128xf32>
    %155 = vector.extract_strided_slice %137 {offsets = [0, 256], sizes = [16, 128], strides = [1, 1]} : vector<16x384xf32> to vector<16x128xf32>
    %c0_87 = arith.constant 0 : index
    %c0_88 = arith.constant 0 : index
    %c0_89 = arith.constant 0 : index
    %156 = vector.load %arg9[%c0_87, %c0_88, %c0_89] : memref<2x1x128xf32, #tpu.memory_space<vmem>>, vector<1x1x128xf32>
    %157 = vector.shape_cast %156 : vector<1x1x128xf32> to vector<1x128xf32>
    %158 = vector.broadcast %157 : vector<1x128xf32> to vector<16x128xf32>
    %159 = arith.addf %155, %158 : vector<16x128xf32>
    %160 = arith.mulf %145, %159 : vector<16x128xf32>
    %161 = arith.addf %154, %160 : vector<16x128xf32>
    %162 = math.tanh %161 : vector<16x128xf32>
    %cst_90 = arith.constant 1.000000e+00 : f32
    %163 = vector.broadcast %cst_90 : f32 to vector<16x128xf32>
    %164 = arith.subf %163, %153 : vector<16x128xf32>
    %165 = arith.mulf %164, %162 : vector<16x128xf32>
    %166 = arith.mulf %153, %126 : vector<16x128xf32>
    %167 = arith.addf %165, %166 : vector<16x128xf32>
    %c0_91 = arith.constant 0 : index
    %c0_92 = arith.constant 0 : index
    %c0_93 = arith.constant 0 : index
    %168 = vector.load %arg13[%c0_91, %c0_92, %c0_93] : memref<2x16x128xf32, #tpu.memory_space<vmem>>, vector<1x16x128xf32>
    %169 = vector.shape_cast %168 : vector<1x16x128xf32> to vector<16x128xf32>
    %170 = vector.shape_cast %167 : vector<16x128xf32> to vector<1x16x128xf32>
    tpu.vector_store %arg13[%c0_91, %c0_92, %c0_93], %170 {strides = array<i32>} : memref<2x16x128xf32, #tpu.memory_space<vmem>>, vector<1x16x128xf32>,
    %171 = arith.truncf %167 : vector<16x128xf32> to vector<16x128xbf16>
    %c1_94 = arith.constant 1 : index
    %c0_95 = arith.constant 0 : index
    %c0_96 = arith.constant 0 : index
    %172 = vector.load %arg13[%c1_94, %c0_95, %c0_96] : memref<2x16x128xf32, #tpu.memory_space<vmem>>, vector<1x16x128xf32>
    %173 = vector.shape_cast %172 : vector<1x16x128xf32> to vector<16x128xf32>
    %c1_97 = arith.constant 1 : index
    %c0_98 = arith.constant 0 : index
    %c0_99 = arith.constant 0 : index
    %174 = vector.load %arg6[%c1_97, %c0_98, %c0_99] : memref<2x128x384xbf16, #tpu.memory_space<vmem>>, vector<1x128x384xbf16>
    %175 = vector.shape_cast %174 : vector<1x128x384xbf16> to vector<128x384xbf16>
    %cst_100 = arith.constant dense<0.000000e+00> : vector<16x384xf32>
    %176 = tpu.matmul %171, %175, %cst_100 {dimension_numbers = #tpu.dot_dimension_numbers<[1], [0], [0], [1], [0, 0, 1, 1], [], []>} : vector<16x128xbf16>, vector<128x384xbf16>, vector<16x384xf32> -> vector<16x384xf32>
    %c1_101 = arith.constant 1 : index
    %c0_102 = arith.constant 0 : index
    %c0_103 = arith.constant 0 : index
    %177 = vector.load %arg8[%c1_101, %c0_102, %c0_103] : memref<2x1x384xf32, #tpu.memory_space<vmem>>, vector<1x1x384xf32>
    %178 = vector.shape_cast %177 : vector<1x1x384xf32> to vector<1x384xf32>
    %179 = vector.broadcast %178 : vector<1x384xf32> to vector<16x384xf32>
    %180 = arith.addf %176, %179 : vector<16x384xf32>
    %181 = arith.truncf %173 : vector<16x128xf32> to vector<16x128xbf16>
    %c1_104 = arith.constant 1 : index
    %c0_105 = arith.constant 0 : index
    %c0_106 = arith.constant 0 : index
    %182 = vector.load %arg7[%c1_104, %c0_105, %c0_106] : memref<2x128x384xbf16, #tpu.memory_space<vmem>>, vector<1x128x384xbf16>
    %183 = vector.shape_cast %182 : vector<1x128x384xbf16> to vector<128x384xbf16>
    %cst_107 = arith.constant dense<0.000000e+00> : vector<16x384xf32>
    %184 = tpu.matmul %181, %183, %cst_107 {dimension_numbers = #tpu.dot_dimension_numbers<[1], [0], [0], [1], [0, 0, 1, 1], [], []>} : vector<16x128xbf16>, vector<128x384xbf16>, vector<16x384xf32> -> vector<16x384xf32>
    %185 = vector.extract_strided_slice %180 {offsets = [0, 0], sizes = [16, 128], strides = [1, 1]} : vector<16x384xf32> to vector<16x128xf32>
    %186 = vector.extract_strided_slice %184 {offsets = [0, 0], sizes = [16, 128], strides = [1, 1]} : vector<16x384xf32> to vector<16x128xf32>
    %187 = arith.addf %185, %186 : vector<16x128xf32>
    %188 = arith.negf %187 : vector<16x128xf32>
    %189 = math.exp %188 : vector<16x128xf32>
    %cst_108 = arith.constant 1.000000e+00 : f32
    %190 = vector.broadcast %cst_108 : f32 to vector<16x128xf32>
    %191 = arith.addf %190, %189 : vector<16x128xf32>
    %192 = arith.divf %190, %191 : vector<16x128xf32>
    %193 = vector.extract_strided_slice %180 {offsets = [0, 128], sizes = [16, 128], strides = [1, 1]} : vector<16x384xf32> to vector<16x128xf32>
    %194 = vector.extract_strided_slice %184 {offsets = [0, 128], sizes = [16, 128], strides = [1, 1]} : vector<16x384xf32> to vector<16x128xf32>
    %195 = arith.addf %193, %194 : vector<16x128xf32>
    %196 = arith.negf %195 : vector<16x128xf32>
    %197 = math.exp %196 : vector<16x128xf32>
    %cst_109 = arith.constant 1.000000e+00 : f32
    %198 = vector.broadcast %cst_109 : f32 to vector<16x128xf32>
    %199 = arith.addf %198, %197 : vector<16x128xf32>
    %200 = arith.divf %198, %199 : vector<16x128xf32>
    %201 = vector.extract_strided_slice %180 {offsets = [0, 256], sizes = [16, 128], strides = [1, 1]} : vector<16x384xf32> to vector<16x128xf32>
    %202 = vector.extract_strided_slice %184 {offsets = [0, 256], sizes = [16, 128], strides = [1, 1]} : vector<16x384xf32> to vector<16x128xf32>
    %c1_110 = arith.constant 1 : index
    %c0_111 = arith.constant 0 : index
    %c0_112 = arith.constant 0 : index
    %203 = vector.load %arg9[%c1_110, %c0_111, %c0_112] : memref<2x1x128xf32, #tpu.memory_space<vmem>>, vector<1x1x128xf32>
    %204 = vector.shape_cast %203 : vector<1x1x128xf32> to vector<1x128xf32>
    %205 = vector.broadcast %204 : vector<1x128xf32> to vector<16x128xf32>
    %206 = arith.addf %202, %205 : vector<16x128xf32>
    %207 = arith.mulf %192, %206 : vector<16x128xf32>
    %208 = arith.addf %201, %207 : vector<16x128xf32>
    %209 = math.tanh %208 : vector<16x128xf32>
    %cst_113 = arith.constant 1.000000e+00 : f32
    %210 = vector.broadcast %cst_113 : f32 to vector<16x128xf32>
    %211 = arith.subf %210, %200 : vector<16x128xf32>
    %212 = arith.mulf %211, %209 : vector<16x128xf32>
    %213 = arith.mulf %200, %173 : vector<16x128xf32>
    %214 = arith.addf %212, %213 : vector<16x128xf32>
    %c1_114 = arith.constant 1 : index
    %c0_115 = arith.constant 0 : index
    %c0_116 = arith.constant 0 : index
    %215 = vector.load %arg13[%c1_114, %c0_115, %c0_116] : memref<2x16x128xf32, #tpu.memory_space<vmem>>, vector<1x16x128xf32>
    %216 = vector.shape_cast %215 : vector<1x16x128xf32> to vector<16x128xf32>
    %217 = vector.shape_cast %214 : vector<16x128xf32> to vector<1x16x128xf32>
    tpu.vector_store %arg13[%c1_114, %c0_115, %c0_116], %217 {strides = array<i32>} : memref<2x16x128xf32, #tpu.memory_space<vmem>>, vector<1x16x128xf32>,
    %218 = arith.index_cast %c1_i32 : i32 to index
    %c0_117 = arith.constant 0 : index
    %c0_118 = arith.constant 0 : index
    %219 = vector.load %arg14[%218, %c0_117, %c0_118] : memref<7x16x128xf32, #tpu.memory_space<vmem>>, vector<1x16x128xf32>
    %220 = vector.shape_cast %219 : vector<1x16x128xf32> to vector<16x128xf32>
    %221 = vector.shape_cast %214 : vector<16x128xf32> to vector<1x16x128xf32>
    tpu.vector_store %arg14[%218, %c0_117, %c0_118], %221 {strides = array<i32>} : memref<7x16x128xf32, #tpu.memory_space<vmem>>, vector<1x16x128xf32>,
    %c2_i32 = arith.constant 2 : i32
    %222 = arith.index_cast %c2_i32 : i32 to index
    %c0_119 = arith.constant 0 : index
    %c0_120 = arith.constant 0 : index
    %223 = vector.load %arg4[%222, %c0_119, %c0_120] : memref<7x16x128xbf16, #tpu.memory_space<vmem>>, vector<1x16x128xbf16>
    %224 = vector.shape_cast %223 : vector<1x16x128xbf16> to vector<16x128xbf16>
    %c0_121 = arith.constant 0 : index
    %c0_122 = arith.constant 0 : index
    %c0_123 = arith.constant 0 : index
    %225 = vector.load %arg13[%c0_121, %c0_122, %c0_123] : memref<2x16x128xf32, #tpu.memory_space<vmem>>, vector<1x16x128xf32>
    %226 = vector.shape_cast %225 : vector<1x16x128xf32> to vector<16x128xf32>
    %c0_124 = arith.constant 0 : index
    %c0_125 = arith.constant 0 : index
    %c0_126 = arith.constant 0 : index
    %227 = vector.load %arg6[%c0_124, %c0_125, %c0_126] : memref<2x128x384xbf16, #tpu.memory_space<vmem>>, vector<1x128x384xbf16>
    %228 = vector.shape_cast %227 : vector<1x128x384xbf16> to vector<128x384xbf16>
    %cst_127 = arith.constant dense<0.000000e+00> : vector<16x384xf32>
    %229 = tpu.matmul %224, %228, %cst_127 {dimension_numbers = #tpu.dot_dimension_numbers<[1], [0], [0], [1], [0, 0, 1, 1], [], []>} : vector<16x128xbf16>, vector<128x384xbf16>, vector<16x384xf32> -> vector<16x384xf32>
    %c0_128 = arith.constant 0 : index
    %c0_129 = arith.constant 0 : index
    %c0_130 = arith.constant 0 : index
    %230 = vector.load %arg8[%c0_128, %c0_129, %c0_130] : memref<2x1x384xf32, #tpu.memory_space<vmem>>, vector<1x1x384xf32>
    %231 = vector.shape_cast %230 : vector<1x1x384xf32> to vector<1x384xf32>
    %232 = vector.broadcast %231 : vector<1x384xf32> to vector<16x384xf32>
    %233 = arith.addf %229, %232 : vector<16x384xf32>
    %234 = arith.truncf %226 : vector<16x128xf32> to vector<16x128xbf16>
    %c0_131 = arith.constant 0 : index
    %c0_132 = arith.constant 0 : index
    %c0_133 = arith.constant 0 : index
    %235 = vector.load %arg7[%c0_131, %c0_132, %c0_133] : memref<2x128x384xbf16, #tpu.memory_space<vmem>>, vector<1x128x384xbf16>
    %236 = vector.shape_cast %235 : vector<1x128x384xbf16> to vector<128x384xbf16>
    %cst_134 = arith.constant dense<0.000000e+00> : vector<16x384xf32>
    %237 = tpu.matmul %234, %236, %cst_134 {dimension_numbers = #tpu.dot_dimension_numbers<[1], [0], [0], [1], [0, 0, 1, 1], [], []>} : vector<16x128xbf16>, vector<128x384xbf16>, vector<16x384xf32> -> vector<16x384xf32>
    %238 = vector.extract_strided_slice %233 {offsets = [0, 0], sizes = [16, 128], strides = [1, 1]} : vector<16x384xf32> to vector<16x128xf32>
    %239 = vector.extract_strided_slice %237 {offsets = [0, 0], sizes = [16, 128], strides = [1, 1]} : vector<16x384xf32> to vector<16x128xf32>
    %240 = arith.addf %238, %239 : vector<16x128xf32>
    %241 = arith.negf %240 : vector<16x128xf32>
    %242 = math.exp %241 : vector<16x128xf32>
    %cst_135 = arith.constant 1.000000e+00 : f32
    %243 = vector.broadcast %cst_135 : f32 to vector<16x128xf32>
    %244 = arith.addf %243, %242 : vector<16x128xf32>
    %245 = arith.divf %243, %244 : vector<16x128xf32>
    %246 = vector.extract_strided_slice %233 {offsets = [0, 128], sizes = [16, 128], strides = [1, 1]} : vector<16x384xf32> to vector<16x128xf32>
    %247 = vector.extract_strided_slice %237 {offsets = [0, 128], sizes = [16, 128], strides = [1, 1]} : vector<16x384xf32> to vector<16x128xf32>
    %248 = arith.addf %246, %247 : vector<16x128xf32>
    %249 = arith.negf %248 : vector<16x128xf32>
    %250 = math.exp %249 : vector<16x128xf32>
    %cst_136 = arith.constant 1.000000e+00 : f32
    %251 = vector.broadcast %cst_136 : f32 to vector<16x128xf32>
    %252 = arith.addf %251, %250 : vector<16x128xf32>
    %253 = arith.divf %251, %252 : vector<16x128xf32>
    %254 = vector.extract_strided_slice %233 {offsets = [0, 256], sizes = [16, 128], strides = [1, 1]} : vector<16x384xf32> to vector<16x128xf32>
    %255 = vector.extract_strided_slice %237 {offsets = [0, 256], sizes = [16, 128], strides = [1, 1]} : vector<16x384xf32> to vector<16x128xf32>
    %c0_137 = arith.constant 0 : index
    %c0_138 = arith.constant 0 : index
    %c0_139 = arith.constant 0 : index
    %256 = vector.load %arg9[%c0_137, %c0_138, %c0_139] : memref<2x1x128xf32, #tpu.memory_space<vmem>>, vector<1x1x128xf32>
    %257 = vector.shape_cast %256 : vector<1x1x128xf32> to vector<1x128xf32>
    %258 = vector.broadcast %257 : vector<1x128xf32> to vector<16x128xf32>
    %259 = arith.addf %255, %258 : vector<16x128xf32>
    %260 = arith.mulf %245, %259 : vector<16x128xf32>
    %261 = arith.addf %254, %260 : vector<16x128xf32>
    %262 = math.tanh %261 : vector<16x128xf32>
    %cst_140 = arith.constant 1.000000e+00 : f32
    %263 = vector.broadcast %cst_140 : f32 to vector<16x128xf32>
    %264 = arith.subf %263, %253 : vector<16x128xf32>
    %265 = arith.mulf %264, %262 : vector<16x128xf32>
    %266 = arith.mulf %253, %226 : vector<16x128xf32>
    %267 = arith.addf %265, %266 : vector<16x128xf32>
    %c0_141 = arith.constant 0 : index
    %c0_142 = arith.constant 0 : index
    %c0_143 = arith.constant 0 : index
    %268 = vector.load %arg13[%c0_141, %c0_142, %c0_143] : memref<2x16x128xf32, #tpu.memory_space<vmem>>, vector<1x16x128xf32>
    %269 = vector.shape_cast %268 : vector<1x16x128xf32> to vector<16x128xf32>
    %270 = vector.shape_cast %267 : vector<16x128xf32> to vector<1x16x128xf32>
    tpu.vector_store %arg13[%c0_141, %c0_142, %c0_143], %270 {strides = array<i32>} : memref<2x16x128xf32, #tpu.memory_space<vmem>>, vector<1x16x128xf32>,
    %271 = arith.truncf %267 : vector<16x128xf32> to vector<16x128xbf16>
    %c1_144 = arith.constant 1 : index
    %c0_145 = arith.constant 0 : index
    %c0_146 = arith.constant 0 : index
    %272 = vector.load %arg13[%c1_144, %c0_145, %c0_146] : memref<2x16x128xf32, #tpu.memory_space<vmem>>, vector<1x16x128xf32>
    %273 = vector.shape_cast %272 : vector<1x16x128xf32> to vector<16x128xf32>
    %c1_147 = arith.constant 1 : index
    %c0_148 = arith.constant 0 : index
    %c0_149 = arith.constant 0 : index
    %274 = vector.load %arg6[%c1_147, %c0_148, %c0_149] : memref<2x128x384xbf16, #tpu.memory_space<vmem>>, vector<1x128x384xbf16>
    %275 = vector.shape_cast %274 : vector<1x128x384xbf16> to vector<128x384xbf16>
    %cst_150 = arith.constant dense<0.000000e+00> : vector<16x384xf32>
    %276 = tpu.matmul %271, %275, %cst_150 {dimension_numbers = #tpu.dot_dimension_numbers<[1], [0], [0], [1], [0, 0, 1, 1], [], []>} : vector<16x128xbf16>, vector<128x384xbf16>, vector<16x384xf32> -> vector<16x384xf32>
    %c1_151 = arith.constant 1 : index
    %c0_152 = arith.constant 0 : index
    %c0_153 = arith.constant 0 : index
    %277 = vector.load %arg8[%c1_151, %c0_152, %c0_153] : memref<2x1x384xf32, #tpu.memory_space<vmem>>, vector<1x1x384xf32>
    %278 = vector.shape_cast %277 : vector<1x1x384xf32> to vector<1x384xf32>
    %279 = vector.broadcast %278 : vector<1x384xf32> to vector<16x384xf32>
    %280 = arith.addf %276, %279 : vector<16x384xf32>
    %281 = arith.truncf %273 : vector<16x128xf32> to vector<16x128xbf16>
    %c1_154 = arith.constant 1 : index
    %c0_155 = arith.constant 0 : index
    %c0_156 = arith.constant 0 : index
    %282 = vector.load %arg7[%c1_154, %c0_155, %c0_156] : memref<2x128x384xbf16, #tpu.memory_space<vmem>>, vector<1x128x384xbf16>
    %283 = vector.shape_cast %282 : vector<1x128x384xbf16> to vector<128x384xbf16>
    %cst_157 = arith.constant dense<0.000000e+00> : vector<16x384xf32>
    %284 = tpu.matmul %281, %283, %cst_157 {dimension_numbers = #tpu.dot_dimension_numbers<[1], [0], [0], [1], [0, 0, 1, 1], [], []>} : vector<16x128xbf16>, vector<128x384xbf16>, vector<16x384xf32> -> vector<16x384xf32>
    %285 = vector.extract_strided_slice %280 {offsets = [0, 0], sizes = [16, 128], strides = [1, 1]} : vector<16x384xf32> to vector<16x128xf32>
    %286 = vector.extract_strided_slice %284 {offsets = [0, 0], sizes = [16, 128], strides = [1, 1]} : vector<16x384xf32> to vector<16x128xf32>
    %287 = arith.addf %285, %286 : vector<16x128xf32>
    %288 = arith.negf %287 : vector<16x128xf32>
    %289 = math.exp %288 : vector<16x128xf32>
    %cst_158 = arith.constant 1.000000e+00 : f32
    %290 = vector.broadcast %cst_158 : f32 to vector<16x128xf32>
    %291 = arith.addf %290, %289 : vector<16x128xf32>
    %292 = arith.divf %290, %291 : vector<16x128xf32>
    %293 = vector.extract_strided_slice %280 {offsets = [0, 128], sizes = [16, 128], strides = [1, 1]} : vector<16x384xf32> to vector<16x128xf32>
    %294 = vector.extract_strided_slice %284 {offsets = [0, 128], sizes = [16, 128], strides = [1, 1]} : vector<16x384xf32> to vector<16x128xf32>
    %295 = arith.addf %293, %294 : vector<16x128xf32>
    %296 = arith.negf %295 : vector<16x128xf32>
    %297 = math.exp %296 : vector<16x128xf32>
    %cst_159 = arith.constant 1.000000e+00 : f32
    %298 = vector.broadcast %cst_159 : f32 to vector<16x128xf32>
    %299 = arith.addf %298, %297 : vector<16x128xf32>
    %300 = arith.divf %298, %299 : vector<16x128xf32>
    %301 = vector.extract_strided_slice %280 {offsets = [0, 256], sizes = [16, 128], strides = [1, 1]} : vector<16x384xf32> to vector<16x128xf32>
    %302 = vector.extract_strided_slice %284 {offsets = [0, 256], sizes = [16, 128], strides = [1, 1]} : vector<16x384xf32> to vector<16x128xf32>
    %c1_160 = arith.constant 1 : index
    %c0_161 = arith.constant 0 : index
    %c0_162 = arith.constant 0 : index
    %303 = vector.load %arg9[%c1_160, %c0_161, %c0_162] : memref<2x1x128xf32, #tpu.memory_space<vmem>>, vector<1x1x128xf32>
    %304 = vector.shape_cast %303 : vector<1x1x128xf32> to vector<1x128xf32>
    %305 = vector.broadcast %304 : vector<1x128xf32> to vector<16x128xf32>
    %306 = arith.addf %302, %305 : vector<16x128xf32>
    %307 = arith.mulf %292, %306 : vector<16x128xf32>
    %308 = arith.addf %301, %307 : vector<16x128xf32>
    %309 = math.tanh %308 : vector<16x128xf32>
    %cst_163 = arith.constant 1.000000e+00 : f32
    %310 = vector.broadcast %cst_163 : f32 to vector<16x128xf32>
    %311 = arith.subf %310, %300 : vector<16x128xf32>
    %312 = arith.mulf %311, %309 : vector<16x128xf32>
    %313 = arith.mulf %300, %273 : vector<16x128xf32>
    %314 = arith.addf %312, %313 : vector<16x128xf32>
    %c1_164 = arith.constant 1 : index
    %c0_165 = arith.constant 0 : index
    %c0_166 = arith.constant 0 : index
    %315 = vector.load %arg13[%c1_164, %c0_165, %c0_166] : memref<2x16x128xf32, #tpu.memory_space<vmem>>, vector<1x16x128xf32>
    %316 = vector.shape_cast %315 : vector<1x16x128xf32> to vector<16x128xf32>
    %317 = vector.shape_cast %314 : vector<16x128xf32> to vector<1x16x128xf32>
    tpu.vector_store %arg13[%c1_164, %c0_165, %c0_166], %317 {strides = array<i32>} : memref<2x16x128xf32, #tpu.memory_space<vmem>>, vector<1x16x128xf32>,
    %318 = arith.index_cast %c2_i32 : i32 to index
    %c0_167 = arith.constant 0 : index
    %c0_168 = arith.constant 0 : index
    %319 = vector.load %arg14[%318, %c0_167, %c0_168] : memref<7x16x128xf32, #tpu.memory_space<vmem>>, vector<1x16x128xf32>
    %320 = vector.shape_cast %319 : vector<1x16x128xf32> to vector<16x128xf32>
    %321 = vector.shape_cast %314 : vector<16x128xf32> to vector<1x16x128xf32>
    tpu.vector_store %arg14[%318, %c0_167, %c0_168], %321 {strides = array<i32>} : memref<7x16x128xf32, #tpu.memory_space<vmem>>, vector<1x16x128xf32>,
    %c3_i32 = arith.constant 3 : i32
    %322 = arith.index_cast %c3_i32 : i32 to index
    %c0_169 = arith.constant 0 : index
    %c0_170 = arith.constant 0 : index
    %323 = vector.load %arg4[%322, %c0_169, %c0_170] : memref<7x16x128xbf16, #tpu.memory_space<vmem>>, vector<1x16x128xbf16>
    %324 = vector.shape_cast %323 : vector<1x16x128xbf16> to vector<16x128xbf16>
    %c0_171 = arith.constant 0 : index
    %c0_172 = arith.constant 0 : index
    %c0_173 = arith.constant 0 : index
    %325 = vector.load %arg13[%c0_171, %c0_172, %c0_173] : memref<2x16x128xf32, #tpu.memory_space<vmem>>, vector<1x16x128xf32>
    %326 = vector.shape_cast %325 : vector<1x16x128xf32> to vector<16x128xf32>
    %c0_174 = arith.constant 0 : index
    %c0_175 = arith.constant 0 : index
    %c0_176 = arith.constant 0 : index
    %327 = vector.load %arg6[%c0_174, %c0_175, %c0_176] : memref<2x128x384xbf16, #tpu.memory_space<vmem>>, vector<1x128x384xbf16>
    %328 = vector.shape_cast %327 : vector<1x128x384xbf16> to vector<128x384xbf16>
    %cst_177 = arith.constant dense<0.000000e+00> : vector<16x384xf32>
    %329 = tpu.matmul %324, %328, %cst_177 {dimension_numbers = #tpu.dot_dimension_numbers<[1], [0], [0], [1], [0, 0, 1, 1], [], []>} : vector<16x128xbf16>, vector<128x384xbf16>, vector<16x384xf32> -> vector<16x384xf32>
    %c0_178 = arith.constant 0 : index
    %c0_179 = arith.constant 0 : index
    %c0_180 = arith.constant 0 : index
    %330 = vector.load %arg8[%c0_178, %c0_179, %c0_180] : memref<2x1x384xf32, #tpu.memory_space<vmem>>, vector<1x1x384xf32>
    %331 = vector.shape_cast %330 : vector<1x1x384xf32> to vector<1x384xf32>
    %332 = vector.broadcast %331 : vector<1x384xf32> to vector<16x384xf32>
    %333 = arith.addf %329, %332 : vector<16x384xf32>
    %334 = arith.truncf %326 : vector<16x128xf32> to vector<16x128xbf16>
    %c0_181 = arith.constant 0 : index
    %c0_182 = arith.constant 0 : index
    %c0_183 = arith.constant 0 : index
    %335 = vector.load %arg7[%c0_181, %c0_182, %c0_183] : memref<2x128x384xbf16, #tpu.memory_space<vmem>>, vector<1x128x384xbf16>
    %336 = vector.shape_cast %335 : vector<1x128x384xbf16> to vector<128x384xbf16>
    %cst_184 = arith.constant dense<0.000000e+00> : vector<16x384xf32>
    %337 = tpu.matmul %334, %336, %cst_184 {dimension_numbers = #tpu.dot_dimension_numbers<[1], [0], [0], [1], [0, 0, 1, 1], [], []>} : vector<16x128xbf16>, vector<128x384xbf16>, vector<16x384xf32> -> vector<16x384xf32>
    %338 = vector.extract_strided_slice %333 {offsets = [0, 0], sizes = [16, 128], strides = [1, 1]} : vector<16x384xf32> to vector<16x128xf32>
    %339 = vector.extract_strided_slice %337 {offsets = [0, 0], sizes = [16, 128], strides = [1, 1]} : vector<16x384xf32> to vector<16x128xf32>
    %340 = arith.addf %338, %339 : vector<16x128xf32>
    %341 = arith.negf %340 : vector<16x128xf32>
    %342 = math.exp %341 : vector<16x128xf32>
    %cst_185 = arith.constant 1.000000e+00 : f32
    %343 = vector.broadcast %cst_185 : f32 to vector<16x128xf32>
    %344 = arith.addf %343, %342 : vector<16x128xf32>
    %345 = arith.divf %343, %344 : vector<16x128xf32>
    %346 = vector.extract_strided_slice %333 {offsets = [0, 128], sizes = [16, 128], strides = [1, 1]} : vector<16x384xf32> to vector<16x128xf32>
    %347 = vector.extract_strided_slice %337 {offsets = [0, 128], sizes = [16, 128], strides = [1, 1]} : vector<16x384xf32> to vector<16x128xf32>
    %348 = arith.addf %346, %347 : vector<16x128xf32>
    %349 = arith.negf %348 : vector<16x128xf32>
    %350 = math.exp %349 : vector<16x128xf32>
    %cst_186 = arith.constant 1.000000e+00 : f32
    %351 = vector.broadcast %cst_186 : f32 to vector<16x128xf32>
    %352 = arith.addf %351, %350 : vector<16x128xf32>
    %353 = arith.divf %351, %352 : vector<16x128xf32>
    %354 = vector.extract_strided_slice %333 {offsets = [0, 256], sizes = [16, 128], strides = [1, 1]} : vector<16x384xf32> to vector<16x128xf32>
    %355 = vector.extract_strided_slice %337 {offsets = [0, 256], sizes = [16, 128], strides = [1, 1]} : vector<16x384xf32> to vector<16x128xf32>
    %c0_187 = arith.constant 0 : index
    %c0_188 = arith.constant 0 : index
    %c0_189 = arith.constant 0 : index
    %356 = vector.load %arg9[%c0_187, %c0_188, %c0_189] : memref<2x1x128xf32, #tpu.memory_space<vmem>>, vector<1x1x128xf32>
    %357 = vector.shape_cast %356 : vector<1x1x128xf32> to vector<1x128xf32>
    %358 = vector.broadcast %357 : vector<1x128xf32> to vector<16x128xf32>
    %359 = arith.addf %355, %358 : vector<16x128xf32>
    %360 = arith.mulf %345, %359 : vector<16x128xf32>
    %361 = arith.addf %354, %360 : vector<16x128xf32>
    %362 = math.tanh %361 : vector<16x128xf32>
    %cst_190 = arith.constant 1.000000e+00 : f32
    %363 = vector.broadcast %cst_190 : f32 to vector<16x128xf32>
    %364 = arith.subf %363, %353 : vector<16x128xf32>
    %365 = arith.mulf %364, %362 : vector<16x128xf32>
    %366 = arith.mulf %353, %326 : vector<16x128xf32>
    %367 = arith.addf %365, %366 : vector<16x128xf32>
    %c0_191 = arith.constant 0 : index
    %c0_192 = arith.constant 0 : index
    %c0_193 = arith.constant 0 : index
    %368 = vector.load %arg13[%c0_191, %c0_192, %c0_193] : memref<2x16x128xf32, #tpu.memory_space<vmem>>, vector<1x16x128xf32>
    %369 = vector.shape_cast %368 : vector<1x16x128xf32> to vector<16x128xf32>
    %370 = vector.shape_cast %367 : vector<16x128xf32> to vector<1x16x128xf32>
    tpu.vector_store %arg13[%c0_191, %c0_192, %c0_193], %370 {strides = array<i32>} : memref<2x16x128xf32, #tpu.memory_space<vmem>>, vector<1x16x128xf32>,
    %371 = arith.truncf %367 : vector<16x128xf32> to vector<16x128xbf16>
    %c1_194 = arith.constant 1 : index
    %c0_195 = arith.constant 0 : index
    %c0_196 = arith.constant 0 : index
    %372 = vector.load %arg13[%c1_194, %c0_195, %c0_196] : memref<2x16x128xf32, #tpu.memory_space<vmem>>, vector<1x16x128xf32>
    %373 = vector.shape_cast %372 : vector<1x16x128xf32> to vector<16x128xf32>
    %c1_197 = arith.constant 1 : index
    %c0_198 = arith.constant 0 : index
    %c0_199 = arith.constant 0 : index
    %374 = vector.load %arg6[%c1_197, %c0_198, %c0_199] : memref<2x128x384xbf16, #tpu.memory_space<vmem>>, vector<1x128x384xbf16>
    %375 = vector.shape_cast %374 : vector<1x128x384xbf16> to vector<128x384xbf16>
    %cst_200 = arith.constant dense<0.000000e+00> : vector<16x384xf32>
    %376 = tpu.matmul %371, %375, %cst_200 {dimension_numbers = #tpu.dot_dimension_numbers<[1], [0], [0], [1], [0, 0, 1, 1], [], []>} : vector<16x128xbf16>, vector<128x384xbf16>, vector<16x384xf32> -> vector<16x384xf32>
    %c1_201 = arith.constant 1 : index
    %c0_202 = arith.constant 0 : index
    %c0_203 = arith.constant 0 : index
    %377 = vector.load %arg8[%c1_201, %c0_202, %c0_203] : memref<2x1x384xf32, #tpu.memory_space<vmem>>, vector<1x1x384xf32>
    %378 = vector.shape_cast %377 : vector<1x1x384xf32> to vector<1x384xf32>
    %379 = vector.broadcast %378 : vector<1x384xf32> to vector<16x384xf32>
    %380 = arith.addf %376, %379 : vector<16x384xf32>
    %381 = arith.truncf %373 : vector<16x128xf32> to vector<16x128xbf16>
    %c1_204 = arith.constant 1 : index
    %c0_205 = arith.constant 0 : index
    %c0_206 = arith.constant 0 : index
    %382 = vector.load %arg7[%c1_204, %c0_205, %c0_206] : memref<2x128x384xbf16, #tpu.memory_space<vmem>>, vector<1x128x384xbf16>
    %383 = vector.shape_cast %382 : vector<1x128x384xbf16> to vector<128x384xbf16>
    %cst_207 = arith.constant dense<0.000000e+00> : vector<16x384xf32>
    %384 = tpu.matmul %381, %383, %cst_207 {dimension_numbers = #tpu.dot_dimension_numbers<[1], [0], [0], [1], [0, 0, 1, 1], [], []>} : vector<16x128xbf16>, vector<128x384xbf16>, vector<16x384xf32> -> vector<16x384xf32>
    %385 = vector.extract_strided_slice %380 {offsets = [0, 0], sizes = [16, 128], strides = [1, 1]} : vector<16x384xf32> to vector<16x128xf32>
    %386 = vector.extract_strided_slice %384 {offsets = [0, 0], sizes = [16, 128], strides = [1, 1]} : vector<16x384xf32> to vector<16x128xf32>
    %387 = arith.addf %385, %386 : vector<16x128xf32>
    %388 = arith.negf %387 : vector<16x128xf32>
    %389 = math.exp %388 : vector<16x128xf32>
    %cst_208 = arith.constant 1.000000e+00 : f32
    %390 = vector.broadcast %cst_208 : f32 to vector<16x128xf32>
    %391 = arith.addf %390, %389 : vector<16x128xf32>
    %392 = arith.divf %390, %391 : vector<16x128xf32>
    %393 = vector.extract_strided_slice %380 {offsets = [0, 128], sizes = [16, 128], strides = [1, 1]} : vector<16x384xf32> to vector<16x128xf32>
    %394 = vector.extract_strided_slice %384 {offsets = [0, 128], sizes = [16, 128], strides = [1, 1]} : vector<16x384xf32> to vector<16x128xf32>
    %395 = arith.addf %393, %394 : vector<16x128xf32>
    %396 = arith.negf %395 : vector<16x128xf32>
    %397 = math.exp %396 : vector<16x128xf32>
    %cst_209 = arith.constant 1.000000e+00 : f32
    %398 = vector.broadcast %cst_209 : f32 to vector<16x128xf32>
    %399 = arith.addf %398, %397 : vector<16x128xf32>
    %400 = arith.divf %398, %399 : vector<16x128xf32>
    %401 = vector.extract_strided_slice %380 {offsets = [0, 256], sizes = [16, 128], strides = [1, 1]} : vector<16x384xf32> to vector<16x128xf32>
    %402 = vector.extract_strided_slice %384 {offsets = [0, 256], sizes = [16, 128], strides = [1, 1]} : vector<16x384xf32> to vector<16x128xf32>
    %c1_210 = arith.constant 1 : index
    %c0_211 = arith.constant 0 : index
    %c0_212 = arith.constant 0 : index
    %403 = vector.load %arg9[%c1_210, %c0_211, %c0_212] : memref<2x1x128xf32, #tpu.memory_space<vmem>>, vector<1x1x128xf32>
    %404 = vector.shape_cast %403 : vector<1x1x128xf32> to vector<1x128xf32>
    %405 = vector.broadcast %404 : vector<1x128xf32> to vector<16x128xf32>
    %406 = arith.addf %402, %405 : vector<16x128xf32>
    %407 = arith.mulf %392, %406 : vector<16x128xf32>
    %408 = arith.addf %401, %407 : vector<16x128xf32>
    %409 = math.tanh %408 : vector<16x128xf32>
    %cst_213 = arith.constant 1.000000e+00 : f32
    %410 = vector.broadcast %cst_213 : f32 to vector<16x128xf32>
    %411 = arith.subf %410, %400 : vector<16x128xf32>
    %412 = arith.mulf %411, %409 : vector<16x128xf32>
    %413 = arith.mulf %400, %373 : vector<16x128xf32>
    %414 = arith.addf %412, %413 : vector<16x128xf32>
    %c1_214 = arith.constant 1 : index
    %c0_215 = arith.constant 0 : index
    %c0_216 = arith.constant 0 : index
    %415 = vector.load %arg13[%c1_214, %c0_215, %c0_216] : memref<2x16x128xf32, #tpu.memory_space<vmem>>, vector<1x16x128xf32>
    %416 = vector.shape_cast %415 : vector<1x16x128xf32> to vector<16x128xf32>
    %417 = vector.shape_cast %414 : vector<16x128xf32> to vector<1x16x128xf32>
    tpu.vector_store %arg13[%c1_214, %c0_215, %c0_216], %417 {strides = array<i32>} : memref<2x16x128xf32, #tpu.memory_space<vmem>>, vector<1x16x128xf32>,
    %418 = arith.index_cast %c3_i32 : i32 to index
    %c0_217 = arith.constant 0 : index
    %c0_218 = arith.constant 0 : index
    %419 = vector.load %arg14[%418, %c0_217, %c0_218] : memref<7x16x128xf32, #tpu.memory_space<vmem>>, vector<1x16x128xf32>
    %420 = vector.shape_cast %419 : vector<1x16x128xf32> to vector<16x128xf32>
    %421 = vector.shape_cast %414 : vector<16x128xf32> to vector<1x16x128xf32>
    tpu.vector_store %arg14[%418, %c0_217, %c0_218], %421 {strides = array<i32>} : memref<7x16x128xf32, #tpu.memory_space<vmem>>, vector<1x16x128xf32>,
    %c4_i32 = arith.constant 4 : i32
    %422 = arith.index_cast %c4_i32 : i32 to index
    %c0_219 = arith.constant 0 : index
    %c0_220 = arith.constant 0 : index
    %423 = vector.load %arg4[%422, %c0_219, %c0_220] : memref<7x16x128xbf16, #tpu.memory_space<vmem>>, vector<1x16x128xbf16>
    %424 = vector.shape_cast %423 : vector<1x16x128xbf16> to vector<16x128xbf16>
    %c0_221 = arith.constant 0 : index
    %c0_222 = arith.constant 0 : index
    %c0_223 = arith.constant 0 : index
    %425 = vector.load %arg13[%c0_221, %c0_222, %c0_223] : memref<2x16x128xf32, #tpu.memory_space<vmem>>, vector<1x16x128xf32>
    %426 = vector.shape_cast %425 : vector<1x16x128xf32> to vector<16x128xf32>
    %c0_224 = arith.constant 0 : index
    %c0_225 = arith.constant 0 : index
    %c0_226 = arith.constant 0 : index
    %427 = vector.load %arg6[%c0_224, %c0_225, %c0_226] : memref<2x128x384xbf16, #tpu.memory_space<vmem>>, vector<1x128x384xbf16>
    %428 = vector.shape_cast %427 : vector<1x128x384xbf16> to vector<128x384xbf16>
    %cst_227 = arith.constant dense<0.000000e+00> : vector<16x384xf32>
    %429 = tpu.matmul %424, %428, %cst_227 {dimension_numbers = #tpu.dot_dimension_numbers<[1], [0], [0], [1], [0, 0, 1, 1], [], []>} : vector<16x128xbf16>, vector<128x384xbf16>, vector<16x384xf32> -> vector<16x384xf32>
    %c0_228 = arith.constant 0 : index
    %c0_229 = arith.constant 0 : index
    %c0_230 = arith.constant 0 : index
    %430 = vector.load %arg8[%c0_228, %c0_229, %c0_230] : memref<2x1x384xf32, #tpu.memory_space<vmem>>, vector<1x1x384xf32>
    %431 = vector.shape_cast %430 : vector<1x1x384xf32> to vector<1x384xf32>
    %432 = vector.broadcast %431 : vector<1x384xf32> to vector<16x384xf32>
    %433 = arith.addf %429, %432 : vector<16x384xf32>
    %434 = arith.truncf %426 : vector<16x128xf32> to vector<16x128xbf16>
    %c0_231 = arith.constant 0 : index
    %c0_232 = arith.constant 0 : index
    %c0_233 = arith.constant 0 : index
    %435 = vector.load %arg7[%c0_231, %c0_232, %c0_233] : memref<2x128x384xbf16, #tpu.memory_space<vmem>>, vector<1x128x384xbf16>
    %436 = vector.shape_cast %435 : vector<1x128x384xbf16> to vector<128x384xbf16>
    %cst_234 = arith.constant dense<0.000000e+00> : vector<16x384xf32>
    %437 = tpu.matmul %434, %436, %cst_234 {dimension_numbers = #tpu.dot_dimension_numbers<[1], [0], [0], [1], [0, 0, 1, 1], [], []>} : vector<16x128xbf16>, vector<128x384xbf16>, vector<16x384xf32> -> vector<16x384xf32>
    %438 = vector.extract_strided_slice %433 {offsets = [0, 0], sizes = [16, 128], strides = [1, 1]} : vector<16x384xf32> to vector<16x128xf32>
    %439 = vector.extract_strided_slice %437 {offsets = [0, 0], sizes = [16, 128], strides = [1, 1]} : vector<16x384xf32> to vector<16x128xf32>
    %440 = arith.addf %438, %439 : vector<16x128xf32>
    %441 = arith.negf %440 : vector<16x128xf32>
    %442 = math.exp %441 : vector<16x128xf32>
    %cst_235 = arith.constant 1.000000e+00 : f32
    %443 = vector.broadcast %cst_235 : f32 to vector<16x128xf32>
    %444 = arith.addf %443, %442 : vector<16x128xf32>
    %445 = arith.divf %443, %444 : vector<16x128xf32>
    %446 = vector.extract_strided_slice %433 {offsets = [0, 128], sizes = [16, 128], strides = [1, 1]} : vector<16x384xf32> to vector<16x128xf32>
    %447 = vector.extract_strided_slice %437 {offsets = [0, 128], sizes = [16, 128], strides = [1, 1]} : vector<16x384xf32> to vector<16x128xf32>
    %448 = arith.addf %446, %447 : vector<16x128xf32>
    %449 = arith.negf %448 : vector<16x128xf32>
    %450 = math.exp %449 : vector<16x128xf32>
    %cst_236 = arith.constant 1.000000e+00 : f32
    %451 = vector.broadcast %cst_236 : f32 to vector<16x128xf32>
    %452 = arith.addf %451, %450 : vector<16x128xf32>
    %453 = arith.divf %451, %452 : vector<16x128xf32>
    %454 = vector.extract_strided_slice %433 {offsets = [0, 256], sizes = [16, 128], strides = [1, 1]} : vector<16x384xf32> to vector<16x128xf32>
    %455 = vector.extract_strided_slice %437 {offsets = [0, 256], sizes = [16, 128], strides = [1, 1]} : vector<16x384xf32> to vector<16x128xf32>
    %c0_237 = arith.constant 0 : index
    %c0_238 = arith.constant 0 : index
    %c0_239 = arith.constant 0 : index
    %456 = vector.load %arg9[%c0_237, %c0_238, %c0_239] : memref<2x1x128xf32, #tpu.memory_space<vmem>>, vector<1x1x128xf32>
    %457 = vector.shape_cast %456 : vector<1x1x128xf32> to vector<1x128xf32>
    %458 = vector.broadcast %457 : vector<1x128xf32> to vector<16x128xf32>
    %459 = arith.addf %455, %458 : vector<16x128xf32>
    %460 = arith.mulf %445, %459 : vector<16x128xf32>
    %461 = arith.addf %454, %460 : vector<16x128xf32>
    %462 = math.tanh %461 : vector<16x128xf32>
    %cst_240 = arith.constant 1.000000e+00 : f32
    %463 = vector.broadcast %cst_240 : f32 to vector<16x128xf32>
    %464 = arith.subf %463, %453 : vector<16x128xf32>
    %465 = arith.mulf %464, %462 : vector<16x128xf32>
    %466 = arith.mulf %453, %426 : vector<16x128xf32>
    %467 = arith.addf %465, %466 : vector<16x128xf32>
    %c0_241 = arith.constant 0 : index
    %c0_242 = arith.constant 0 : index
    %c0_243 = arith.constant 0 : index
    %468 = vector.load %arg13[%c0_241, %c0_242, %c0_243] : memref<2x16x128xf32, #tpu.memory_space<vmem>>, vector<1x16x128xf32>
    %469 = vector.shape_cast %468 : vector<1x16x128xf32> to vector<16x128xf32>
    %470 = vector.shape_cast %467 : vector<16x128xf32> to vector<1x16x128xf32>
    tpu.vector_store %arg13[%c0_241, %c0_242, %c0_243], %470 {strides = array<i32>} : memref<2x16x128xf32, #tpu.memory_space<vmem>>, vector<1x16x128xf32>,
    %471 = arith.truncf %467 : vector<16x128xf32> to vector<16x128xbf16>
    %c1_244 = arith.constant 1 : index
    %c0_245 = arith.constant 0 : index
    %c0_246 = arith.constant 0 : index
    %472 = vector.load %arg13[%c1_244, %c0_245, %c0_246] : memref<2x16x128xf32, #tpu.memory_space<vmem>>, vector<1x16x128xf32>
    %473 = vector.shape_cast %472 : vector<1x16x128xf32> to vector<16x128xf32>
    %c1_247 = arith.constant 1 : index
    %c0_248 = arith.constant 0 : index
    %c0_249 = arith.constant 0 : index
    %474 = vector.load %arg6[%c1_247, %c0_248, %c0_249] : memref<2x128x384xbf16, #tpu.memory_space<vmem>>, vector<1x128x384xbf16>
    %475 = vector.shape_cast %474 : vector<1x128x384xbf16> to vector<128x384xbf16>
    %cst_250 = arith.constant dense<0.000000e+00> : vector<16x384xf32>
    %476 = tpu.matmul %471, %475, %cst_250 {dimension_numbers = #tpu.dot_dimension_numbers<[1], [0], [0], [1], [0, 0, 1, 1], [], []>} : vector<16x128xbf16>, vector<128x384xbf16>, vector<16x384xf32> -> vector<16x384xf32>
    %c1_251 = arith.constant 1 : index
    %c0_252 = arith.constant 0 : index
    %c0_253 = arith.constant 0 : index
    %477 = vector.load %arg8[%c1_251, %c0_252, %c0_253] : memref<2x1x384xf32, #tpu.memory_space<vmem>>, vector<1x1x384xf32>
    %478 = vector.shape_cast %477 : vector<1x1x384xf32> to vector<1x384xf32>
    %479 = vector.broadcast %478 : vector<1x384xf32> to vector<16x384xf32>
    %480 = arith.addf %476, %479 : vector<16x384xf32>
    %481 = arith.truncf %473 : vector<16x128xf32> to vector<16x128xbf16>
    %c1_254 = arith.constant 1 : index
    %c0_255 = arith.constant 0 : index
    %c0_256 = arith.constant 0 : index
    %482 = vector.load %arg7[%c1_254, %c0_255, %c0_256] : memref<2x128x384xbf16, #tpu.memory_space<vmem>>, vector<1x128x384xbf16>
    %483 = vector.shape_cast %482 : vector<1x128x384xbf16> to vector<128x384xbf16>
    %cst_257 = arith.constant dense<0.000000e+00> : vector<16x384xf32>
    %484 = tpu.matmul %481, %483, %cst_257 {dimension_numbers = #tpu.dot_dimension_numbers<[1], [0], [0], [1], [0, 0, 1, 1], [], []>} : vector<16x128xbf16>, vector<128x384xbf16>, vector<16x384xf32> -> vector<16x384xf32>
    %485 = vector.extract_strided_slice %480 {offsets = [0, 0], sizes = [16, 128], strides = [1, 1]} : vector<16x384xf32> to vector<16x128xf32>
    %486 = vector.extract_strided_slice %484 {offsets = [0, 0], sizes = [16, 128], strides = [1, 1]} : vector<16x384xf32> to vector<16x128xf32>
    %487 = arith.addf %485, %486 : vector<16x128xf32>
    %488 = arith.negf %487 : vector<16x128xf32>
    %489 = math.exp %488 : vector<16x128xf32>
    %cst_258 = arith.constant 1.000000e+00 : f32
    %490 = vector.broadcast %cst_258 : f32 to vector<16x128xf32>
    %491 = arith.addf %490, %489 : vector<16x128xf32>
    %492 = arith.divf %490, %491 : vector<16x128xf32>
    %493 = vector.extract_strided_slice %480 {offsets = [0, 128], sizes = [16, 128], strides = [1, 1]} : vector<16x384xf32> to vector<16x128xf32>
    %494 = vector.extract_strided_slice %484 {offsets = [0, 128], sizes = [16, 128], strides = [1, 1]} : vector<16x384xf32> to vector<16x128xf32>
    %495 = arith.addf %493, %494 : vector<16x128xf32>
    %496 = arith.negf %495 : vector<16x128xf32>
    %497 = math.exp %496 : vector<16x128xf32>
    %cst_259 = arith.constant 1.000000e+00 : f32
    %498 = vector.broadcast %cst_259 : f32 to vector<16x128xf32>
    %499 = arith.addf %498, %497 : vector<16x128xf32>
    %500 = arith.divf %498, %499 : vector<16x128xf32>
    %501 = vector.extract_strided_slice %480 {offsets = [0, 256], sizes = [16, 128], strides = [1, 1]} : vector<16x384xf32> to vector<16x128xf32>
    %502 = vector.extract_strided_slice %484 {offsets = [0, 256], sizes = [16, 128], strides = [1, 1]} : vector<16x384xf32> to vector<16x128xf32>
    %c1_260 = arith.constant 1 : index
    %c0_261 = arith.constant 0 : index
    %c0_262 = arith.constant 0 : index
    %503 = vector.load %arg9[%c1_260, %c0_261, %c0_262] : memref<2x1x128xf32, #tpu.memory_space<vmem>>, vector<1x1x128xf32>
    %504 = vector.shape_cast %503 : vector<1x1x128xf32> to vector<1x128xf32>
    %505 = vector.broadcast %504 : vector<1x128xf32> to vector<16x128xf32>
    %506 = arith.addf %502, %505 : vector<16x128xf32>
    %507 = arith.mulf %492, %506 : vector<16x128xf32>
    %508 = arith.addf %501, %507 : vector<16x128xf32>
    %509 = math.tanh %508 : vector<16x128xf32>
    %cst_263 = arith.constant 1.000000e+00 : f32
    %510 = vector.broadcast %cst_263 : f32 to vector<16x128xf32>
    %511 = arith.subf %510, %500 : vector<16x128xf32>
    %512 = arith.mulf %511, %509 : vector<16x128xf32>
    %513 = arith.mulf %500, %473 : vector<16x128xf32>
    %514 = arith.addf %512, %513 : vector<16x128xf32>
    %c1_264 = arith.constant 1 : index
    %c0_265 = arith.constant 0 : index
    %c0_266 = arith.constant 0 : index
    %515 = vector.load %arg13[%c1_264, %c0_265, %c0_266] : memref<2x16x128xf32, #tpu.memory_space<vmem>>, vector<1x16x128xf32>
    %516 = vector.shape_cast %515 : vector<1x16x128xf32> to vector<16x128xf32>
    %517 = vector.shape_cast %514 : vector<16x128xf32> to vector<1x16x128xf32>
    tpu.vector_store %arg13[%c1_264, %c0_265, %c0_266], %517 {strides = array<i32>} : memref<2x16x128xf32, #tpu.memory_space<vmem>>, vector<1x16x128xf32>,
    %518 = arith.index_cast %c4_i32 : i32 to index
    %c0_267 = arith.constant 0 : index
    %c0_268 = arith.constant 0 : index
    %519 = vector.load %arg14[%518, %c0_267, %c0_268] : memref<7x16x128xf32, #tpu.memory_space<vmem>>, vector<1x16x128xf32>
    %520 = vector.shape_cast %519 : vector<1x16x128xf32> to vector<16x128xf32>
    %521 = vector.shape_cast %514 : vector<16x128xf32> to vector<1x16x128xf32>
    tpu.vector_store %arg14[%518, %c0_267, %c0_268], %521 {strides = array<i32>} : memref<7x16x128xf32, #tpu.memory_space<vmem>>, vector<1x16x128xf32>,
    %c5_i32 = arith.constant 5 : i32
    %522 = arith.index_cast %c5_i32 : i32 to index
    %c0_269 = arith.constant 0 : index
    %c0_270 = arith.constant 0 : index
    %523 = vector.load %arg4[%522, %c0_269, %c0_270] : memref<7x16x128xbf16, #tpu.memory_space<vmem>>, vector<1x16x128xbf16>
    %524 = vector.shape_cast %523 : vector<1x16x128xbf16> to vector<16x128xbf16>
    %c0_271 = arith.constant 0 : index
    %c0_272 = arith.constant 0 : index
    %c0_273 = arith.constant 0 : index
    %525 = vector.load %arg13[%c0_271, %c0_272, %c0_273] : memref<2x16x128xf32, #tpu.memory_space<vmem>>, vector<1x16x128xf32>
    %526 = vector.shape_cast %525 : vector<1x16x128xf32> to vector<16x128xf32>
    %c0_274 = arith.constant 0 : index
    %c0_275 = arith.constant 0 : index
    %c0_276 = arith.constant 0 : index
    %527 = vector.load %arg6[%c0_274, %c0_275, %c0_276] : memref<2x128x384xbf16, #tpu.memory_space<vmem>>, vector<1x128x384xbf16>
    %528 = vector.shape_cast %527 : vector<1x128x384xbf16> to vector<128x384xbf16>
    %cst_277 = arith.constant dense<0.000000e+00> : vector<16x384xf32>
    %529 = tpu.matmul %524, %528, %cst_277 {dimension_numbers = #tpu.dot_dimension_numbers<[1], [0], [0], [1], [0, 0, 1, 1], [], []>} : vector<16x128xbf16>, vector<128x384xbf16>, vector<16x384xf32> -> vector<16x384xf32>
    %c0_278 = arith.constant 0 : index
    %c0_279 = arith.constant 0 : index
    %c0_280 = arith.constant 0 : index
    %530 = vector.load %arg8[%c0_278, %c0_279, %c0_280] : memref<2x1x384xf32, #tpu.memory_space<vmem>>, vector<1x1x384xf32>
    %531 = vector.shape_cast %530 : vector<1x1x384xf32> to vector<1x384xf32>
    %532 = vector.broadcast %531 : vector<1x384xf32> to vector<16x384xf32>
    %533 = arith.addf %529, %532 : vector<16x384xf32>
    %534 = arith.truncf %526 : vector<16x128xf32> to vector<16x128xbf16>
    %c0_281 = arith.constant 0 : index
    %c0_282 = arith.constant 0 : index
    %c0_283 = arith.constant 0 : index
    %535 = vector.load %arg7[%c0_281, %c0_282, %c0_283] : memref<2x128x384xbf16, #tpu.memory_space<vmem>>, vector<1x128x384xbf16>
    %536 = vector.shape_cast %535 : vector<1x128x384xbf16> to vector<128x384xbf16>
    %cst_284 = arith.constant dense<0.000000e+00> : vector<16x384xf32>
    %537 = tpu.matmul %534, %536, %cst_284 {dimension_numbers = #tpu.dot_dimension_numbers<[1], [0], [0], [1], [0, 0, 1, 1], [], []>} : vector<16x128xbf16>, vector<128x384xbf16>, vector<16x384xf32> -> vector<16x384xf32>
    %538 = vector.extract_strided_slice %533 {offsets = [0, 0], sizes = [16, 128], strides = [1, 1]} : vector<16x384xf32> to vector<16x128xf32>
    %539 = vector.extract_strided_slice %537 {offsets = [0, 0], sizes = [16, 128], strides = [1, 1]} : vector<16x384xf32> to vector<16x128xf32>
    %540 = arith.addf %538, %539 : vector<16x128xf32>
    %541 = arith.negf %540 : vector<16x128xf32>
    %542 = math.exp %541 : vector<16x128xf32>
    %cst_285 = arith.constant 1.000000e+00 : f32
    %543 = vector.broadcast %cst_285 : f32 to vector<16x128xf32>
    %544 = arith.addf %543, %542 : vector<16x128xf32>
    %545 = arith.divf %543, %544 : vector<16x128xf32>
    %546 = vector.extract_strided_slice %533 {offsets = [0, 128], sizes = [16, 128], strides = [1, 1]} : vector<16x384xf32> to vector<16x128xf32>
    %547 = vector.extract_strided_slice %537 {offsets = [0, 128], sizes = [16, 128], strides = [1, 1]} : vector<16x384xf32> to vector<16x128xf32>
    %548 = arith.addf %546, %547 : vector<16x128xf32>
    %549 = arith.negf %548 : vector<16x128xf32>
    %550 = math.exp %549 : vector<16x128xf32>
    %cst_286 = arith.constant 1.000000e+00 : f32
    %551 = vector.broadcast %cst_286 : f32 to vector<16x128xf32>
    %552 = arith.addf %551, %550 : vector<16x128xf32>
    %553 = arith.divf %551, %552 : vector<16x128xf32>
    %554 = vector.extract_strided_slice %533 {offsets = [0, 256], sizes = [16, 128], strides = [1, 1]} : vector<16x384xf32> to vector<16x128xf32>
    %555 = vector.extract_strided_slice %537 {offsets = [0, 256], sizes = [16, 128], strides = [1, 1]} : vector<16x384xf32> to vector<16x128xf32>
    %c0_287 = arith.constant 0 : index
    %c0_288 = arith.constant 0 : index
    %c0_289 = arith.constant 0 : index
    %556 = vector.load %arg9[%c0_287, %c0_288, %c0_289] : memref<2x1x128xf32, #tpu.memory_space<vmem>>, vector<1x1x128xf32>
    %557 = vector.shape_cast %556 : vector<1x1x128xf32> to vector<1x128xf32>
    %558 = vector.broadcast %557 : vector<1x128xf32> to vector<16x128xf32>
    %559 = arith.addf %555, %558 : vector<16x128xf32>
    %560 = arith.mulf %545, %559 : vector<16x128xf32>
    %561 = arith.addf %554, %560 : vector<16x128xf32>
    %562 = math.tanh %561 : vector<16x128xf32>
    %cst_290 = arith.constant 1.000000e+00 : f32
    %563 = vector.broadcast %cst_290 : f32 to vector<16x128xf32>
    %564 = arith.subf %563, %553 : vector<16x128xf32>
    %565 = arith.mulf %564, %562 : vector<16x128xf32>
    %566 = arith.mulf %553, %526 : vector<16x128xf32>
    %567 = arith.addf %565, %566 : vector<16x128xf32>
    %c0_291 = arith.constant 0 : index
    %c0_292 = arith.constant 0 : index
    %c0_293 = arith.constant 0 : index
    %568 = vector.load %arg13[%c0_291, %c0_292, %c0_293] : memref<2x16x128xf32, #tpu.memory_space<vmem>>, vector<1x16x128xf32>
    %569 = vector.shape_cast %568 : vector<1x16x128xf32> to vector<16x128xf32>
    %570 = vector.shape_cast %567 : vector<16x128xf32> to vector<1x16x128xf32>
    tpu.vector_store %arg13[%c0_291, %c0_292, %c0_293], %570 {strides = array<i32>} : memref<2x16x128xf32, #tpu.memory_space<vmem>>, vector<1x16x128xf32>,
    %571 = arith.truncf %567 : vector<16x128xf32> to vector<16x128xbf16>
    %c1_294 = arith.constant 1 : index
    %c0_295 = arith.constant 0 : index
    %c0_296 = arith.constant 0 : index
    %572 = vector.load %arg13[%c1_294, %c0_295, %c0_296] : memref<2x16x128xf32, #tpu.memory_space<vmem>>, vector<1x16x128xf32>
    %573 = vector.shape_cast %572 : vector<1x16x128xf32> to vector<16x128xf32>
    %c1_297 = arith.constant 1 : index
    %c0_298 = arith.constant 0 : index
    %c0_299 = arith.constant 0 : index
    %574 = vector.load %arg6[%c1_297, %c0_298, %c0_299] : memref<2x128x384xbf16, #tpu.memory_space<vmem>>, vector<1x128x384xbf16>
    %575 = vector.shape_cast %574 : vector<1x128x384xbf16> to vector<128x384xbf16>
    %cst_300 = arith.constant dense<0.000000e+00> : vector<16x384xf32>
    %576 = tpu.matmul %571, %575, %cst_300 {dimension_numbers = #tpu.dot_dimension_numbers<[1], [0], [0], [1], [0, 0, 1, 1], [], []>} : vector<16x128xbf16>, vector<128x384xbf16>, vector<16x384xf32> -> vector<16x384xf32>
    %c1_301 = arith.constant 1 : index
    %c0_302 = arith.constant 0 : index
    %c0_303 = arith.constant 0 : index
    %577 = vector.load %arg8[%c1_301, %c0_302, %c0_303] : memref<2x1x384xf32, #tpu.memory_space<vmem>>, vector<1x1x384xf32>
    %578 = vector.shape_cast %577 : vector<1x1x384xf32> to vector<1x384xf32>
    %579 = vector.broadcast %578 : vector<1x384xf32> to vector<16x384xf32>
    %580 = arith.addf %576, %579 : vector<16x384xf32>
    %581 = arith.truncf %573 : vector<16x128xf32> to vector<16x128xbf16>
    %c1_304 = arith.constant 1 : index
    %c0_305 = arith.constant 0 : index
    %c0_306 = arith.constant 0 : index
    %582 = vector.load %arg7[%c1_304, %c0_305, %c0_306] : memref<2x128x384xbf16, #tpu.memory_space<vmem>>, vector<1x128x384xbf16>
    %583 = vector.shape_cast %582 : vector<1x128x384xbf16> to vector<128x384xbf16>
    %cst_307 = arith.constant dense<0.000000e+00> : vector<16x384xf32>
    %584 = tpu.matmul %581, %583, %cst_307 {dimension_numbers = #tpu.dot_dimension_numbers<[1], [0], [0], [1], [0, 0, 1, 1], [], []>} : vector<16x128xbf16>, vector<128x384xbf16>, vector<16x384xf32> -> vector<16x384xf32>
    %585 = vector.extract_strided_slice %580 {offsets = [0, 0], sizes = [16, 128], strides = [1, 1]} : vector<16x384xf32> to vector<16x128xf32>
    %586 = vector.extract_strided_slice %584 {offsets = [0, 0], sizes = [16, 128], strides = [1, 1]} : vector<16x384xf32> to vector<16x128xf32>
    %587 = arith.addf %585, %586 : vector<16x128xf32>
    %588 = arith.negf %587 : vector<16x128xf32>
    %589 = math.exp %588 : vector<16x128xf32>
    %cst_308 = arith.constant 1.000000e+00 : f32
    %590 = vector.broadcast %cst_308 : f32 to vector<16x128xf32>
    %591 = arith.addf %590, %589 : vector<16x128xf32>
    %592 = arith.divf %590, %591 : vector<16x128xf32>
    %593 = vector.extract_strided_slice %580 {offsets = [0, 128], sizes = [16, 128], strides = [1, 1]} : vector<16x384xf32> to vector<16x128xf32>
    %594 = vector.extract_strided_slice %584 {offsets = [0, 128], sizes = [16, 128], strides = [1, 1]} : vector<16x384xf32> to vector<16x128xf32>
    %595 = arith.addf %593, %594 : vector<16x128xf32>
    %596 = arith.negf %595 : vector<16x128xf32>
    %597 = math.exp %596 : vector<16x128xf32>
    %cst_309 = arith.constant 1.000000e+00 : f32
    %598 = vector.broadcast %cst_309 : f32 to vector<16x128xf32>
    %599 = arith.addf %598, %597 : vector<16x128xf32>
    %600 = arith.divf %598, %599 : vector<16x128xf32>
    %601 = vector.extract_strided_slice %580 {offsets = [0, 256], sizes = [16, 128], strides = [1, 1]} : vector<16x384xf32> to vector<16x128xf32>
    %602 = vector.extract_strided_slice %584 {offsets = [0, 256], sizes = [16, 128], strides = [1, 1]} : vector<16x384xf32> to vector<16x128xf32>
    %c1_310 = arith.constant 1 : index
    %c0_311 = arith.constant 0 : index
    %c0_312 = arith.constant 0 : index
    %603 = vector.load %arg9[%c1_310, %c0_311, %c0_312] : memref<2x1x128xf32, #tpu.memory_space<vmem>>, vector<1x1x128xf32>
    %604 = vector.shape_cast %603 : vector<1x1x128xf32> to vector<1x128xf32>
    %605 = vector.broadcast %604 : vector<1x128xf32> to vector<16x128xf32>
    %606 = arith.addf %602, %605 : vector<16x128xf32>
    %607 = arith.mulf %592, %606 : vector<16x128xf32>
    %608 = arith.addf %601, %607 : vector<16x128xf32>
    %609 = math.tanh %608 : vector<16x128xf32>
    %cst_313 = arith.constant 1.000000e+00 : f32
    %610 = vector.broadcast %cst_313 : f32 to vector<16x128xf32>
    %611 = arith.subf %610, %600 : vector<16x128xf32>
    %612 = arith.mulf %611, %609 : vector<16x128xf32>
    %613 = arith.mulf %600, %573 : vector<16x128xf32>
    %614 = arith.addf %612, %613 : vector<16x128xf32>
    %c1_314 = arith.constant 1 : index
    %c0_315 = arith.constant 0 : index
    %c0_316 = arith.constant 0 : index
    %615 = vector.load %arg13[%c1_314, %c0_315, %c0_316] : memref<2x16x128xf32, #tpu.memory_space<vmem>>, vector<1x16x128xf32>
    %616 = vector.shape_cast %615 : vector<1x16x128xf32> to vector<16x128xf32>
    %617 = vector.shape_cast %614 : vector<16x128xf32> to vector<1x16x128xf32>
    tpu.vector_store %arg13[%c1_314, %c0_315, %c0_316], %617 {strides = array<i32>} : memref<2x16x128xf32, #tpu.memory_space<vmem>>, vector<1x16x128xf32>,
    %618 = arith.index_cast %c5_i32 : i32 to index
    %c0_317 = arith.constant 0 : index
    %c0_318 = arith.constant 0 : index
    %619 = vector.load %arg14[%618, %c0_317, %c0_318] : memref<7x16x128xf32, #tpu.memory_space<vmem>>, vector<1x16x128xf32>
    %620 = vector.shape_cast %619 : vector<1x16x128xf32> to vector<16x128xf32>
    %621 = vector.shape_cast %614 : vector<16x128xf32> to vector<1x16x128xf32>
    tpu.vector_store %arg14[%618, %c0_317, %c0_318], %621 {strides = array<i32>} : memref<7x16x128xf32, #tpu.memory_space<vmem>>, vector<1x16x128xf32>,
    %c6_i32 = arith.constant 6 : i32
    %622 = arith.index_cast %c6_i32 : i32 to index
    %c0_319 = arith.constant 0 : index
    %c0_320 = arith.constant 0 : index
    %623 = vector.load %arg4[%622, %c0_319, %c0_320] : memref<7x16x128xbf16, #tpu.memory_space<vmem>>, vector<1x16x128xbf16>
    %624 = vector.shape_cast %623 : vector<1x16x128xbf16> to vector<16x128xbf16>
    %c0_321 = arith.constant 0 : index
    %c0_322 = arith.constant 0 : index
    %c0_323 = arith.constant 0 : index
    %625 = vector.load %arg13[%c0_321, %c0_322, %c0_323] : memref<2x16x128xf32, #tpu.memory_space<vmem>>, vector<1x16x128xf32>
    %626 = vector.shape_cast %625 : vector<1x16x128xf32> to vector<16x128xf32>
    %c0_324 = arith.constant 0 : index
    %c0_325 = arith.constant 0 : index
    %c0_326 = arith.constant 0 : index
    %627 = vector.load %arg6[%c0_324, %c0_325, %c0_326] : memref<2x128x384xbf16, #tpu.memory_space<vmem>>, vector<1x128x384xbf16>
    %628 = vector.shape_cast %627 : vector<1x128x384xbf16> to vector<128x384xbf16>
    %cst_327 = arith.constant dense<0.000000e+00> : vector<16x384xf32>
    %629 = tpu.matmul %624, %628, %cst_327 {dimension_numbers = #tpu.dot_dimension_numbers<[1], [0], [0], [1], [0, 0, 1, 1], [], []>} : vector<16x128xbf16>, vector<128x384xbf16>, vector<16x384xf32> -> vector<16x384xf32>
    %c0_328 = arith.constant 0 : index
    %c0_329 = arith.constant 0 : index
    %c0_330 = arith.constant 0 : index
    %630 = vector.load %arg8[%c0_328, %c0_329, %c0_330] : memref<2x1x384xf32, #tpu.memory_space<vmem>>, vector<1x1x384xf32>
    %631 = vector.shape_cast %630 : vector<1x1x384xf32> to vector<1x384xf32>
    %632 = vector.broadcast %631 : vector<1x384xf32> to vector<16x384xf32>
    %633 = arith.addf %629, %632 : vector<16x384xf32>
    %634 = arith.truncf %626 : vector<16x128xf32> to vector<16x128xbf16>
    %c0_331 = arith.constant 0 : index
    %c0_332 = arith.constant 0 : index
    %c0_333 = arith.constant 0 : index
    %635 = vector.load %arg7[%c0_331, %c0_332, %c0_333] : memref<2x128x384xbf16, #tpu.memory_space<vmem>>, vector<1x128x384xbf16>
    %636 = vector.shape_cast %635 : vector<1x128x384xbf16> to vector<128x384xbf16>
    %cst_334 = arith.constant dense<0.000000e+00> : vector<16x384xf32>
    %637 = tpu.matmul %634, %636, %cst_334 {dimension_numbers = #tpu.dot_dimension_numbers<[1], [0], [0], [1], [0, 0, 1, 1], [], []>} : vector<16x128xbf16>, vector<128x384xbf16>, vector<16x384xf32> -> vector<16x384xf32>
    %638 = vector.extract_strided_slice %633 {offsets = [0, 0], sizes = [16, 128], strides = [1, 1]} : vector<16x384xf32> to vector<16x128xf32>
    %639 = vector.extract_strided_slice %637 {offsets = [0, 0], sizes = [16, 128], strides = [1, 1]} : vector<16x384xf32> to vector<16x128xf32>
    %640 = arith.addf %638, %639 : vector<16x128xf32>
    %641 = arith.negf %640 : vector<16x128xf32>
    %642 = math.exp %641 : vector<16x128xf32>
    %cst_335 = arith.constant 1.000000e+00 : f32
    %643 = vector.broadcast %cst_335 : f32 to vector<16x128xf32>
    %644 = arith.addf %643, %642 : vector<16x128xf32>
    %645 = arith.divf %643, %644 : vector<16x128xf32>
    %646 = vector.extract_strided_slice %633 {offsets = [0, 128], sizes = [16, 128], strides = [1, 1]} : vector<16x384xf32> to vector<16x128xf32>
    %647 = vector.extract_strided_slice %637 {offsets = [0, 128], sizes = [16, 128], strides = [1, 1]} : vector<16x384xf32> to vector<16x128xf32>
    %648 = arith.addf %646, %647 : vector<16x128xf32>
    %649 = arith.negf %648 : vector<16x128xf32>
    %650 = math.exp %649 : vector<16x128xf32>
    %cst_336 = arith.constant 1.000000e+00 : f32
    %651 = vector.broadcast %cst_336 : f32 to vector<16x128xf32>
    %652 = arith.addf %651, %650 : vector<16x128xf32>
    %653 = arith.divf %651, %652 : vector<16x128xf32>
    %654 = vector.extract_strided_slice %633 {offsets = [0, 256], sizes = [16, 128], strides = [1, 1]} : vector<16x384xf32> to vector<16x128xf32>
    %655 = vector.extract_strided_slice %637 {offsets = [0, 256], sizes = [16, 128], strides = [1, 1]} : vector<16x384xf32> to vector<16x128xf32>
    %c0_337 = arith.constant 0 : index
    %c0_338 = arith.constant 0 : index
    %c0_339 = arith.constant 0 : index
    %656 = vector.load %arg9[%c0_337, %c0_338, %c0_339] : memref<2x1x128xf32, #tpu.memory_space<vmem>>, vector<1x1x128xf32>
    %657 = vector.shape_cast %656 : vector<1x1x128xf32> to vector<1x128xf32>
    %658 = vector.broadcast %657 : vector<1x128xf32> to vector<16x128xf32>
    %659 = arith.addf %655, %658 : vector<16x128xf32>
    %660 = arith.mulf %645, %659 : vector<16x128xf32>
    %661 = arith.addf %654, %660 : vector<16x128xf32>
    %662 = math.tanh %661 : vector<16x128xf32>
    %cst_340 = arith.constant 1.000000e+00 : f32
    %663 = vector.broadcast %cst_340 : f32 to vector<16x128xf32>
    %664 = arith.subf %663, %653 : vector<16x128xf32>
    %665 = arith.mulf %664, %662 : vector<16x128xf32>
    %666 = arith.mulf %653, %626 : vector<16x128xf32>
    %667 = arith.addf %665, %666 : vector<16x128xf32>
    %c0_341 = arith.constant 0 : index
    %c0_342 = arith.constant 0 : index
    %c0_343 = arith.constant 0 : index
    %668 = vector.load %arg13[%c0_341, %c0_342, %c0_343] : memref<2x16x128xf32, #tpu.memory_space<vmem>>, vector<1x16x128xf32>
    %669 = vector.shape_cast %668 : vector<1x16x128xf32> to vector<16x128xf32>
    %670 = vector.shape_cast %667 : vector<16x128xf32> to vector<1x16x128xf32>
    tpu.vector_store %arg13[%c0_341, %c0_342, %c0_343], %670 {strides = array<i32>} : memref<2x16x128xf32, #tpu.memory_space<vmem>>, vector<1x16x128xf32>,
    %671 = arith.truncf %667 : vector<16x128xf32> to vector<16x128xbf16>
    %c1_344 = arith.constant 1 : index
    %c0_345 = arith.constant 0 : index
    %c0_346 = arith.constant 0 : index
    %672 = vector.load %arg13[%c1_344, %c0_345, %c0_346] : memref<2x16x128xf32, #tpu.memory_space<vmem>>, vector<1x16x128xf32>
    %673 = vector.shape_cast %672 : vector<1x16x128xf32> to vector<16x128xf32>
    %c1_347 = arith.constant 1 : index
    %c0_348 = arith.constant 0 : index
    %c0_349 = arith.constant 0 : index
    %674 = vector.load %arg6[%c1_347, %c0_348, %c0_349] : memref<2x128x384xbf16, #tpu.memory_space<vmem>>, vector<1x128x384xbf16>
    %675 = vector.shape_cast %674 : vector<1x128x384xbf16> to vector<128x384xbf16>
    %cst_350 = arith.constant dense<0.000000e+00> : vector<16x384xf32>
    %676 = tpu.matmul %671, %675, %cst_350 {dimension_numbers = #tpu.dot_dimension_numbers<[1], [0], [0], [1], [0, 0, 1, 1], [], []>} : vector<16x128xbf16>, vector<128x384xbf16>, vector<16x384xf32> -> vector<16x384xf32>
    %c1_351 = arith.constant 1 : index
    %c0_352 = arith.constant 0 : index
    %c0_353 = arith.constant 0 : index
    %677 = vector.load %arg8[%c1_351, %c0_352, %c0_353] : memref<2x1x384xf32, #tpu.memory_space<vmem>>, vector<1x1x384xf32>
    %678 = vector.shape_cast %677 : vector<1x1x384xf32> to vector<1x384xf32>
    %679 = vector.broadcast %678 : vector<1x384xf32> to vector<16x384xf32>
    %680 = arith.addf %676, %679 : vector<16x384xf32>
    %681 = arith.truncf %673 : vector<16x128xf32> to vector<16x128xbf16>
    %c1_354 = arith.constant 1 : index
    %c0_355 = arith.constant 0 : index
    %c0_356 = arith.constant 0 : index
    %682 = vector.load %arg7[%c1_354, %c0_355, %c0_356] : memref<2x128x384xbf16, #tpu.memory_space<vmem>>, vector<1x128x384xbf16>
    %683 = vector.shape_cast %682 : vector<1x128x384xbf16> to vector<128x384xbf16>
    %cst_357 = arith.constant dense<0.000000e+00> : vector<16x384xf32>
    %684 = tpu.matmul %681, %683, %cst_357 {dimension_numbers = #tpu.dot_dimension_numbers<[1], [0], [0], [1], [0, 0, 1, 1], [], []>} : vector<16x128xbf16>, vector<128x384xbf16>, vector<16x384xf32> -> vector<16x384xf32>
    %685 = vector.extract_strided_slice %680 {offsets = [0, 0], sizes = [16, 128], strides = [1, 1]} : vector<16x384xf32> to vector<16x128xf32>
    %686 = vector.extract_strided_slice %684 {offsets = [0, 0], sizes = [16, 128], strides = [1, 1]} : vector<16x384xf32> to vector<16x128xf32>
    %687 = arith.addf %685, %686 : vector<16x128xf32>
    %688 = arith.negf %687 : vector<16x128xf32>
    %689 = math.exp %688 : vector<16x128xf32>
    %cst_358 = arith.constant 1.000000e+00 : f32
    %690 = vector.broadcast %cst_358 : f32 to vector<16x128xf32>
    %691 = arith.addf %690, %689 : vector<16x128xf32>
    %692 = arith.divf %690, %691 : vector<16x128xf32>
    %693 = vector.extract_strided_slice %680 {offsets = [0, 128], sizes = [16, 128], strides = [1, 1]} : vector<16x384xf32> to vector<16x128xf32>
    %694 = vector.extract_strided_slice %684 {offsets = [0, 128], sizes = [16, 128], strides = [1, 1]} : vector<16x384xf32> to vector<16x128xf32>
    %695 = arith.addf %693, %694 : vector<16x128xf32>
    %696 = arith.negf %695 : vector<16x128xf32>
    %697 = math.exp %696 : vector<16x128xf32>
    %cst_359 = arith.constant 1.000000e+00 : f32
    %698 = vector.broadcast %cst_359 : f32 to vector<16x128xf32>
    %699 = arith.addf %698, %697 : vector<16x128xf32>
    %700 = arith.divf %698, %699 : vector<16x128xf32>
    %701 = vector.extract_strided_slice %680 {offsets = [0, 256], sizes = [16, 128], strides = [1, 1]} : vector<16x384xf32> to vector<16x128xf32>
    %702 = vector.extract_strided_slice %684 {offsets = [0, 256], sizes = [16, 128], strides = [1, 1]} : vector<16x384xf32> to vector<16x128xf32>
    %c1_360 = arith.constant 1 : index
    %c0_361 = arith.constant 0 : index
    %c0_362 = arith.constant 0 : index
    %703 = vector.load %arg9[%c1_360, %c0_361, %c0_362] : memref<2x1x128xf32, #tpu.memory_space<vmem>>, vector<1x1x128xf32>
    %704 = vector.shape_cast %703 : vector<1x1x128xf32> to vector<1x128xf32>
    %705 = vector.broadcast %704 : vector<1x128xf32> to vector<16x128xf32>
    %706 = arith.addf %702, %705 : vector<16x128xf32>
    %707 = arith.mulf %692, %706 : vector<16x128xf32>
    %708 = arith.addf %701, %707 : vector<16x128xf32>
    %709 = math.tanh %708 : vector<16x128xf32>
    %cst_363 = arith.constant 1.000000e+00 : f32
    %710 = vector.broadcast %cst_363 : f32 to vector<16x128xf32>
    %711 = arith.subf %710, %700 : vector<16x128xf32>
    %712 = arith.mulf %711, %709 : vector<16x128xf32>
    %713 = arith.mulf %700, %673 : vector<16x128xf32>
    %714 = arith.addf %712, %713 : vector<16x128xf32>
    %c1_364 = arith.constant 1 : index
    %c0_365 = arith.constant 0 : index
    %c0_366 = arith.constant 0 : index
    %715 = vector.load %arg13[%c1_364, %c0_365, %c0_366] : memref<2x16x128xf32, #tpu.memory_space<vmem>>, vector<1x16x128xf32>
    %716 = vector.shape_cast %715 : vector<1x16x128xf32> to vector<16x128xf32>
    %717 = vector.shape_cast %714 : vector<16x128xf32> to vector<1x16x128xf32>
    tpu.vector_store %arg13[%c1_364, %c0_365, %c0_366], %717 {strides = array<i32>} : memref<2x16x128xf32, #tpu.memory_space<vmem>>, vector<1x16x128xf32>,
    %718 = arith.index_cast %c6_i32 : i32 to index
    %c0_367 = arith.constant 0 : index
    %c0_368 = arith.constant 0 : index
    %719 = vector.load %arg14[%718, %c0_367, %c0_368] : memref<7x16x128xf32, #tpu.memory_space<vmem>>, vector<1x16x128xf32>
    %720 = vector.shape_cast %719 : vector<1x16x128xf32> to vector<16x128xf32>
    %721 = vector.shape_cast %714 : vector<16x128xf32> to vector<1x16x128xf32>
    tpu.vector_store %arg14[%718, %c0_367, %c0_368], %721 {strides = array<i32>} : memref<7x16x128xf32, #tpu.memory_space<vmem>>, vector<1x16x128xf32>,
    %c7_i32 = arith.constant 7 : i32
    %c0_369 = arith.constant 0 : index
    %c0_370 = arith.constant 0 : index
    %c0_371 = arith.constant 0 : index
    %722 = vector.load %arg14[%c0_369, %c0_370, %c0_371] : memref<7x16x128xf32, #tpu.memory_space<vmem>>, vector<7x16x128xf32>
    %723 = vector.shape_cast %722 : vector<7x16x128xf32> to vector<112x128xf32>
    %724 = arith.truncf %723 : vector<112x128xf32> to vector<112x128xbf16>
    %c0_372 = arith.constant 0 : index
    %c0_373 = arith.constant 0 : index
    %725 = vector.load %arg10[%c0_372, %c0_373] : memref<128x256xbf16, #tpu.memory_space<vmem>>, vector<128x256xbf16>
    %cst_374 = arith.constant dense<0.000000e+00> : vector<112x256xf32>
    %726 = tpu.matmul %724, %725, %cst_374 {dimension_numbers = #tpu.dot_dimension_numbers<[1], [0], [0], [1], [0, 0, 1, 1], [], []>} : vector<112x128xbf16>, vector<128x256xbf16>, vector<112x256xf32> -> vector<112x256xf32>
    %c0_375 = arith.constant 0 : index
    %c0_376 = arith.constant 0 : index
    %727 = vector.load %arg11[%c0_375, %c0_376] : memref<1x256xf32, #tpu.memory_space<vmem>>, vector<1x256xf32>
    %728 = vector.broadcast %727 : vector<1x256xf32> to vector<112x256xf32>
    %729 = arith.addf %726, %728 : vector<112x256xf32>
    %cst_377 = arith.constant dense<0xFF800000> : vector<112xf32>
    %730 = vector.multi_reduction <maximumf>, %729, %cst_377 [1] : vector<112x256xf32> to vector<112xf32>
    %731 = vector.shape_cast %730 : vector<112xf32> to vector<112x1xf32>
    %732 = vector.broadcast %731 : vector<112x1xf32> to vector<112x256xf32>
    %733 = arith.subf %729, %732 : vector<112x256xf32>
    %734 = math.exp %733 : vector<112x256xf32>
    %cst_378 = arith.constant dense<0.000000e+00> : vector<112xf32>
    %735 = vector.multi_reduction <add>, %734, %cst_378 [1] : vector<112x256xf32> to vector<112xf32>
    %736 = vector.shape_cast %735 : vector<112xf32> to vector<112x1xf32>
    %737 = math.log %736 : vector<112x1xf32>
    %738 = arith.addf %731, %737 : vector<112x1xf32>
    %c0_379 = arith.constant 0 : index
    %c0_380 = arith.constant 0 : index
    %c0_381 = arith.constant 0 : index
    %739 = vector.load %arg5[%c0_379, %c0_380, %c0_381] : memref<7x16x1xi32, #tpu.memory_space<vmem>>, vector<7x16x1xi32>
    %740 = vector.shape_cast %739 : vector<7x16x1xi32> to vector<112x1xi32>
    %741 = tpu.iota {dimensions = array<i32: 1>} : vector<112x256xi32>
    %742 = vector.broadcast %740 : vector<112x1xi32> to vector<112x256xi32>
    %743 = arith.cmpi eq, %741, %742 : vector<112x256xi32>
    %cst_382 = arith.constant 0.000000e+00 : f32
    %744 = vector.broadcast %cst_382 : f32 to vector<112x256xf32>
    %745 = arith.select %743, %729, %744 : vector<112x256xi1>, vector<112x256xf32>
    %cst_383 = arith.constant dense<0.000000e+00> : vector<112xf32>
    %746 = vector.multi_reduction <add>, %745, %cst_383 [1] : vector<112x256xf32> to vector<112xf32>
    %747 = vector.shape_cast %746 : vector<112xf32> to vector<112x1xf32>
    %c0_i32_384 = arith.constant 0 : i32
    %748 = vector.broadcast %c0_i32_384 : i32 to vector<112x1xi32>
    %749 = arith.cmpi ne, %740, %748 : vector<112x1xi32>
    %750 = arith.extui %749 : vector<112x1xi1> to vector<112x1xi32>
    %751 = arith.sitofp %750 : vector<112x1xi32> to vector<112x1xf32>
    %752 = arith.subf %738, %747 : vector<112x1xf32>
    %753 = arith.mulf %752, %751 : vector<112x1xf32>
    %754 = vector.shape_cast %753 : vector<112x1xf32> to vector<7x16x1xf32>
    %cst_385 = arith.constant dense<0.000000e+00> : vector<16x1xf32>
    %755 = vector.multi_reduction <add>, %754, %cst_385 [0] : vector<7x16x1xf32> to vector<16x1xf32>
    %c0_386 = arith.constant 0 : index
    %c0_387 = arith.constant 0 : index
    %756 = vector.load %arg12[%c0_386, %c0_387] : memref<16x1xf32, #tpu.memory_space<vmem>>, vector<16x1xf32>
    tpu.vector_store %arg12[%c0_386, %c0_387], %755 {strides = array<i32>} : memref<16x1xf32, #tpu.memory_space<vmem>>, vector<16x1xf32>,
    return
  }
  func.func @transform_0(%arg0: i32) -> (i32, i32) {
    %c0_i32 = arith.constant 0 : i32
    %c0_i32_0 = arith.constant 0 : i32
    return %arg0, %c0_i32 : i32, i32
  }
  func.func @transform_1(%arg0: i32) -> (i32, i32, i32) {
    %c0_i32 = arith.constant 0 : i32
    %c0_i32_0 = arith.constant 0 : i32
    %c0_i32_1 = arith.constant 0 : i32
    %c0_i32_2 = arith.constant 0 : i32
    return %c0_i32, %c0_i32_0, %c0_i32_1 : i32, i32, i32
  }
  func.func @transform_2(%arg0: i32) -> (i32, i32, i32) {
    %c0_i32 = arith.constant 0 : i32
    %c0_i32_0 = arith.constant 0 : i32
    %c0_i32_1 = arith.constant 0 : i32
    %c0_i32_2 = arith.constant 0 : i32
    return %c0_i32, %c0_i32_0, %c0_i32_1 : i32, i32, i32
  }
  func.func @transform_3(%arg0: i32) -> (i32, i32, i32) {
    %c0_i32 = arith.constant 0 : i32
    %c0_i32_0 = arith.constant 0 : i32
    %c0_i32_1 = arith.constant 0 : i32
    return %c0_i32, %arg0, %c0_i32_0 : i32, i32, i32
  }
  func.func @transform_4(%arg0: i32) -> (i32, i32, i32) {
    %c0_i32 = arith.constant 0 : i32
    %c0_i32_0 = arith.constant 0 : i32
    %c0_i32_1 = arith.constant 0 : i32
    return %c0_i32, %arg0, %c0_i32_0 : i32, i32, i32
  }
  func.func @transform_5(%arg0: i32) -> (i32, i32, i32) {
    %c0_i32 = arith.constant 0 : i32
    %c0_i32_0 = arith.constant 0 : i32
    %c0_i32_1 = arith.constant 0 : i32
    %c0_i32_2 = arith.constant 0 : i32
    return %c0_i32, %c0_i32_0, %c0_i32_1 : i32, i32, i32
  }
  func.func @transform_6(%arg0: i32) -> (i32, i32, i32) {
    %c0_i32 = arith.constant 0 : i32
    %c0_i32_0 = arith.constant 0 : i32
    %c0_i32_1 = arith.constant 0 : i32
    %c0_i32_2 = arith.constant 0 : i32
    return %c0_i32, %c0_i32_0, %c0_i32_1 : i32, i32, i32
  }
  func.func @transform_7(%arg0: i32) -> (i32, i32, i32) {
    %c0_i32 = arith.constant 0 : i32
    %c0_i32_0 = arith.constant 0 : i32
    %c0_i32_1 = arith.constant 0 : i32
    %c0_i32_2 = arith.constant 0 : i32
    return %c0_i32, %c0_i32_0, %c0_i32_1 : i32, i32, i32
  }
  func.func @transform_8(%arg0: i32) -> (i32, i32, i32) {
    %c0_i32 = arith.constant 0 : i32
    %c0_i32_0 = arith.constant 0 : i32
    %c0_i32_1 = arith.constant 0 : i32
    %c0_i32_2 = arith.constant 0 : i32
    return %c0_i32, %c0_i32_0, %c0_i32_1 : i32, i32, i32
  }
  func.func @transform_9(%arg0: i32) -> (i32, i32) {
    %c0_i32 = arith.constant 0 : i32
    %c0_i32_0 = arith.constant 0 : i32
    %c0_i32_1 = arith.constant 0 : i32
    return %c0_i32, %c0_i32_0 : i32, i32
  }
  func.func @transform_10(%arg0: i32) -> (i32, i32) {
    %c0_i32 = arith.constant 0 : i32
    %c0_i32_0 = arith.constant 0 : i32
    %c0_i32_1 = arith.constant 0 : i32
    return %c0_i32, %c0_i32_0 : i32, i32
  }
  func.func @transform_11(%arg0: i32) -> (i32, i32) {
    %c0_i32 = arith.constant 0 : i32
    %c0_i32_0 = arith.constant 0 : i32
    return %arg0, %c0_i32 : i32, i32
  }
}

</mosaic_0001>

<bundles_post_ra>
// kernel: tpu_custom_call.1
= control target key start
LH: loop header
LB: loop body
LE: loop exit
PB: predicated region body
PF: predicated region fallthrough
CT: control target
= control target key end

     0   :  { %s14745_s0 = inlined_call_operand.vmem [shape: f32[32,128], index: 0, kind: input, shape index: {}]   ;;  %s14746_s1 = inlined_call_operand.vmem [shape: bf16[2,128,128], index: 1, kind: input, shape index: {}]   ;;  %s14747_s2 = inlined_call_operand.vmem [shape: f32[2,1,128], index: 2, kind: input, shape index: {}]   ;;  %s14748_s3 = inlined_call_operand.hbm [shape: bf16[7,32,128], index: 3, kind: input, shape index: {}]   ;;  %s14749_s4 = inlined_call_operand.vmem [shape: s32[7,32,1], index: 4, kind: input, shape index: {}]   ;;  %s14750_s5 = inlined_call_operand.hbm [shape: bf16[2,128,384], index: 5, kind: input, shape index: {}]   ;;  %s14751_s6 = inlined_call_operand.hbm [shape: bf16[2,128,384], index: 6, kind: input, shape index: {}]   ;;  %s14752_s7 = inlined_call_operand.vmem [shape: f32[2,1,384], index: 7, kind: input, shape index: {}]   ;;  %s14753_s8 = inlined_call_operand.vmem [shape: f32[2,1,128], index: 8, kind: input, shape index: {}]   ;;  %s14754_s9 = inlined_call_operand.hbm [shape: bf16[128,256], index: 9, kind: input, shape index: {}]   ;;  %s14755_s10 = inlined_call_operand.vmem [shape: f32[1,256], index: 10, kind: input, shape index: {}]   ;;  %s14756_s11 = inlined_call_operand.vmem [shape: f32[32,1], index: 11, kind: output, shape index: {}]  }
   0x1   :  { %14835 = sst [smem:[#allocation45_spill]] %s14750_s5 }
   0x2   :  { %14836 = sst [smem:[#allocation46_spill]] %s14751_s6 }
   0x3   :  { %14837 = sst [smem:[#allocation47_spill]] %s14754_s9 }
   0x4   :  { %16 = vsyncpa [#allocation5], 0 }
   0x5   :  { %18 = vsyncpa [#allocation5 + $0x1], 0 }
   0x6   :  { %19 = vsyncpa [#allocation8], 0 }
   0x7   :  { %20 = vsyncpa [#allocation11], 0  ;;  %s12700_s17 = smov 0   ;;  %s12702_s18 = smov 0  }
   0x8   :  { %s12704_s19 = smov 0   ;;  %s12706_s20 = smov 0  }
   0x9 LB: > { %s14757_s21 = sadd.s32 4294967295, %s12622_s20   ;;  %s12720_s22 = sadd.s32 1, %s12622_s20   ;;  %s12622_s20 = sphi %s12706_s20, %s14986_s20   ;;  %s12618_s19 = sphi %s12704_s19, %s14985_s19   ;;  %s12614_s18 = sphi %s12702_s18, %s14984_s18   ;;  %s12610_s17 = sphi %s12700_s17, %s14983_s17  }
   0xa   : > { %s98_s23 = ssub.s32 %s12622_s20, %s12720_s22  ;;  %s101_s24 = sadd.s32 1, %s12618_s19 }
   0xb   : > { %p99_p0 = scmp.eq.s32.totalorder %s98_s23, 0  ;;  %p108_p1 = scmp.ne.s32.totalorder %s12618_s19, %s12614_s18 }
   0xc   : > { %p109_p2 = scmp.eq.s32.totalorder %s12622_s20, 0  ;;  %p114_p3 = scmp.ne.s32.totalorder %s12614_s18, %s12610_s17 }
   0xd   : > { %s12730_s25 = scalar_select %p99_p0, %s12618_s19, %s101_s24  }
   0xe   : > { %p12732_p4 = por %p109_p2, %p108_p1  ;;  %p12738_p5 = scmp.eq.s32.totalorder %s14757_s21, 0 }
   0xf   : > { %14838 = sst [smem:[#allocation18_spill]] %s12730_s25  ;;  %p9617_p6 = scmp.ge.s32.totalorder %s12622_s20, 1 }
  0x10   : > { %s14840_s27 = scalar_select %p12738_p5, 1, 0 }
  0x11   : > { %p303_p7 = scmp.lt.s32.totalorder %s12622_s20, 3  ;;  %p12746_p8 = por %p12738_p5, %p114_p3 }
  0x12   : > { %s12624_s30 = smov [#allocation7]   ;;  %s12625_s14 = smov [#allocation9]  }
  0x13   : > { %s14841_s28 = scalar_select %p12746_p8, 1, 0 }
  0x14   : > { %p12750_p9 = pnand %p9617_p6, %p303_p7  ;;  %s321_s12 = sshll.u32 %s12624_s30, 4  ;;  %s322_s12 = int_to_ptr.vmem [resolvable:$true] %s321_s12 }
  0x15   : > { %s334_s15 = sshll.u32 %s12625_s14, 4  ;;  %s12626_s16 = smov [#allocation10]   ;;  %s335_s15 = int_to_ptr.vmem [resolvable:$true] %s334_s15 }
  0x16   : > { %s14842_s29 = scalar_select %p12750_p9, 1, 0 }
  0x17   : > { %p11375_p10 = pneg %p12750_p9  ;;  %s353_s17 = sshll.u32 %s12626_s16, 4  ;;  %s354_s17 = int_to_ptr.vmem [resolvable:$true] %s353_s17 }
  0x18   : > { %s12513_s23 = scalar_lea.vmem %s322_s12, 6144  ;;  %p12521_p2 = scmp.lt.s32.totalorder %s322_s12, %s322_s12 }
  0x19   : > { %p12758_p11 = pnand %p11375_p10, %p12738_p5  ;;  %p12514_p13 = scmp.ne.s32.totalorder %s322_s12, %s12513_s23 }
  0x1a   : > { %p12522_p3 = scmp.lt.s32.totalorder %s12513_s23, %s12513_s23 }
  0x1b   : > { %p12504_p12 = pneg %p12758_p11 }
  0x1c   : > { %p12523_p6 = por %p12522_p3, %p12521_p2 }
  0x1d   : > { %p12516_p0 = pnand %p12514_p13, %p12504_p12 }
  0x1f   : > { %p12517_p1 = pneg %p12516_p0 }
  0x21   : > { %p12524_p7 = pnand %p12523_p6, %p12517_p1 }
  0x23   : > { %12527 = shalt.err (!%p12524_p7)
}
  0x24   : > { %s12627_s24 = smov 192   ;;  %s12628_s30 = smov 12  }
  0x25   : > { %s14844_s5 = sld [smem:[#allocation45_spill]]  ;;  %s12539_s21 = scalar_lea.vmem %s335_s15, 6144 }
  0x26   : > { %p12540_p10 = scmp.ne.s32.totalorder %s335_s15, %s12539_s21  ;;  %p12547_p5 = scmp.lt.s32.totalorder %s335_s15, %s335_s15 }
  0x27   : > { %p12548_p8 = scmp.lt.s32.totalorder %s12539_s21, %s12539_s21 }
  0x28   : > { %p12542_p13 = pnand %p12540_p10, %p12504_p12 }
  0x29   : > { %p12549_p2 = por %p12548_p8, %p12547_p5 }
  0x2a   : > { %p12543_p0 = pneg %p12542_p13 }
  0x2b   : > { %11378 = dma.hbm_to_vmem [thread:$0]  (!%p12758_p11), %s14844_s5, 6144, %s322_s12, [#allocation8], %s12627_s24, %s12627_s24, %s12628_s30  }
  0x2c   : > { %p12550_p1 = pnand %p12549_p2, %p12543_p0 }
  0x2e   : > { %12553 = shalt.err (!%p12550_p1)
}
  0x2f   : > { %s14845_s6 = sld [smem:[#allocation46_spill]]  ;;  %s12565_s12 = scalar_lea.vmem %s354_s17, 2048 }
  0x30   : > { %p12566_p3 = scmp.ne.s32.totalorder %s354_s17, %s12565_s12  ;;  %p12573_p10 = scmp.lt.s32.totalorder %s354_s17, %s354_s17 }
  0x31   : > { %p12574_p13 = scmp.lt.s32.totalorder %s12565_s12, %s12565_s12 }
  0x32   : > { %p12568_p6 = pnand %p12566_p3, %p12504_p12 }
  0x33   : > { %p12575_p9 = por %p12574_p13, %p12573_p10 }
  0x34   : > { %p12569_p7 = pneg %p12568_p6 }
  0x35   : > { %11381 = dma.hbm_to_vmem [thread:$0]  (!%p12758_p11), %s14845_s6, 6144, %s335_s15, [#allocation8], %s12627_s24, %s12627_s24, %s12628_s30  }
  0x36   : > { %p12576_p5 = pnand %p12575_p9, %p12569_p7 }
  0x38   : > { %12579 = shalt.err (!%p12576_p5)
}
  0x39   : > { %s12629_s21 = smov 128   ;;  %s12630_s14 = smov 8  }
  0x3a   : > { %s14846_s9 = sld [smem:[#allocation47_spill]]  ;;  %p9621_p8 = scmp.ge.s32.totalorder %s12622_s20, 2 }
  0x3c   : > { %366 = sbr.rel (%p9621_p8) target bundleno = 89 (0x59), region = 48 }
  0x40   : > { %11384 = dma.hbm_to_vmem [thread:$0]  (!%p12758_p11), %s14846_s9, 2048, %s354_s17, [#allocation11], %s12629_s21, %s12629_s21, %s12630_s14  }
  0x41   : > { %s12790_s15 = sand.u32 1, %s12618_s19   ;;  %s10478_s13 = sshll.u32 %s12622_s20, 7 }
  0x42   : > { %s11350_s24 = smul.u32 56, %s12790_s15  ;;  %s12631_s30 = smov 256  }
  0x43   : > { %11361 = sst [smem:[#allocation13]] (%p12732_p4), %s12631_s30  ;;  %s389_s21 = scalar_lea.hbm %s14748_s3, %s10478_s13 }
  0x44   : > { %s11360_s17 = scalar_select %p12732_p4, [#allocation0], [#allocation14] }
  0x45   : > { %s383_s16 = scalar_lea.vmem [#allocation4], %s11350_s24  ;;  %s12632_s5 = smov 128  }
  0x46   : > { %s394_s14 = sld [smem:[%s11360_s17]]   ;;  %s402_s25 = sshll.u32 %s383_s16, 4  ;;  %s403_s25 = int_to_ptr.vmem [resolvable:$true] %s402_s25 }
  0x47   : > { %11362 = sst [smem:[#allocation13 + $0x1]] (%p12732_p4), %s12632_s5  ;;  %s12633_s6 = smov 2  }
  0x48   : > { %11363 = sst [smem:[#allocation13 + $0x2]] (%p12732_p4), %s12633_s6  ;;  %s12634_s9 = smov 64  }
  0x49   : > { %11364 = sst [smem:[#allocation13 + $0x3]] (%p12732_p4), %s12634_s9  ;;  %s12635_s30 = smov 4  }
  0x4a   : > { %11365 = sst [smem:[#allocation13 + $0x4]] (%p12732_p4), %s12634_s9  ;;  %s380_s24 = scalar_lea.sflag [#allocation5], %s12790_s15 }
  0x4b   : > { %11366 = sst [smem:[#allocation13 + $0x5]] (%p12732_p4), %s12635_s30  ;;  %s12636_s23 = smov 131072  }
  0x4c   : > { %s9624_s13 = sshll.u32 %s394_s14, 26  ;;  %424 = sbr.rel (!%p12732_p4) target bundleno = 89 (0x59), region = 60 }
  0x4d   : > { %s9625_s17 = sadd.s32 134217728, %s9624_s13  ;;  %s11351_s5 = smul.u32 (%p12732_p4), 112, %s12790_s15 }
  0x4e   : > { %11367 = dma.general (%p12732_p4), %s389_s21, 896, %s403_s25, %s380_s24, %s12636_s23, [#allocation13], %s9625_s17, 0  }
  0x4f   : > { %s10479_s6 = sshll.u32 (%p12732_p4), %s12622_s20, 4  ;;  %s428_s14 = scalar_lea.vmem (%p12732_p4), [#allocation6], %s11351_s5 }
  0x50   : > { %s431_s9 = scalar_lea.vmem (%p12732_p4), %s14749_s4, %s10479_s6 }
  0x51   : > { %v486_v0 = vld [vmem:[%s431_s9] sm:$0xff]  ;;  %v488_v1 = vld [vmem:[%s431_s9 + $0x8] sm:$0xff] }
  0x52   : > { %v490_v2 = vld [vmem:[%s431_s9 + $0x20] sm:$0xff]  ;;  %487 = vst [vmem:[%s428_s14] sm:$0xff] %v486_v0  ;;  %489 = vst [vmem:[%s428_s14 + $0x8] sm:$0xff] %v488_v1  ;;  %v492_v3 = vld [vmem:[%s431_s9 + $0x28] sm:$0xff] }
  0x53   : > { %491 = vst [vmem:[%s428_s14 + $0x10] sm:$0xff] %v490_v2  ;;  %v494_v4 = vld [vmem:[%s431_s9 + $0x40] sm:$0xff]  ;;  %v496_v5 = vld [vmem:[%s431_s9 + $0x48] sm:$0xff]  ;;  %493 = vst [vmem:[%s428_s14 + $0x18] sm:$0xff] %v492_v3 }
  0x54   : > { %495 = vst [vmem:[%s428_s14 + $0x20] sm:$0xff] %v494_v4  ;;  %497 = vst [vmem:[%s428_s14 + $0x28] sm:$0xff] %v496_v5  ;;  %v498_v6 = vld [vmem:[%s431_s9 + $0x60] sm:$0xff]  ;;  %v500_v7 = vld [vmem:[%s431_s9 + $0x68] sm:$0xff] }
  0x55   : > { %v502_v8 = vld [vmem:[%s431_s9 + $0x80] sm:$0xff]  ;;  %499 = vst [vmem:[%s428_s14 + $0x30] sm:$0xff] %v498_v6  ;;  %501 = vst [vmem:[%s428_s14 + $0x38] sm:$0xff] %v500_v7  ;;  %v504_v9 = vld [vmem:[%s431_s9 + $0x88] sm:$0xff] }
  0x56   : > { %503 = vst [vmem:[%s428_s14 + $0x40] sm:$0xff] %v502_v8  ;;  %v506_v10 = vld [vmem:[%s431_s9 + $0xa0] sm:$0xff]  ;;  %v508_v11 = vld [vmem:[%s431_s9 + $0xa8] sm:$0xff]  ;;  %505 = vst [vmem:[%s428_s14 + $0x48] sm:$0xff] %v504_v9 }
  0x57   : > { %507 = vst [vmem:[%s428_s14 + $0x50] sm:$0xff] %v506_v10  ;;  %509 = vst [vmem:[%s428_s14 + $0x58] sm:$0xff] %v508_v11  ;;  %v510_v12 = vld [vmem:[%s431_s9 + $0xc0] sm:$0xff]  ;;  %v512_v13 = vld [vmem:[%s431_s9 + $0xc8] sm:$0xff] }
  0x58   : > { %511 = vst [vmem:[%s428_s14 + $0x60] sm:$0xff] %v510_v12  ;;  %513 = vst [vmem:[%s428_s14 + $0x68] sm:$0xff] %v512_v13 }
  0x59 PF: > { %p14847_p4 = scmp.ne.s32.totalorder %s14842_s29, 0 }
  0x5b   : > { %522 = sbr.rel (%p14847_p4) target bundleno = 3518 (0xdbe), region = 98 }
  0x60   : > { %s524_s26 = sand.u32 1, %s12614_s18   ;;  %p14848_p9 = scmp.ne.s32.totalorder %s14841_s28, 0 }
  0x61   : > { %s11352_s15 = smul.u32 56, %s524_s26  ;;  %s525_s21 = scalar_lea.sflag [#allocation5], %s524_s26 }
  0x63   : > { %s12824_s25 = scalar_lea.vmem [#allocation4], %s11352_s15 }
  0x64   : > { %12597 = dma.done.wait (%p14848_p9), %s525_s21, 896  }
  0x65   : > { %12599 = vsyncadd (%p14848_p9), %s525_s21, 4294966400  ;;  %s11353_s30 = smul.u32 112, %s524_s26  ;;  %p14849_p11 = scmp.ne.s32.totalorder %s14840_s27, 0 }
  0x67   : > { %s12830_s13 = scalar_lea.vmem [#allocation6], %s11353_s30 }
  0x68   : > { %12601 = dma.done.wait (%p14849_p11), [#allocation8], 12288  }
  0x69   : > { %12603 = vsyncadd (%p14849_p11), [#allocation8], 4294955008 }
  0x6a   : > { %12605 = dma.done.wait (%p14849_p11), [#allocation11], 2048  }
  0x6b   : > { %12607 = vsyncadd (%p14849_p11), [#allocation11], 4294965248  ;;  %v14781_v14 = vmov 0.0   ;;  %vm12638_vm0 = vmmov 0   ;;  %v14763_v15 = vmov 0   ;;  %v11441_v16 = vld [vmem:[%s14746_s1 + $0x38] sm:$0xff]  }
  0x6c   : > { %10750 = vmatprep.subr.bf16.mxu1 %v14781_v14  ;;  %10766 = vmatprep.mubr.msk.bf16.mxu1 %vm12638_vm0, %v14781_v14  ;;  %v11442_v17 = vld [vmem:[%s14746_s1 + $0x30] sm:$0xff]   ;;  %v11443_v18 = vld [vmem:[%s14746_s1 + $0x28] sm:$0xff]   ;;  %s14850_s5 = sadd.s32 4294967295, %s12622_s20   ;;  %v11444_v19 = vld [vmem:[%s14746_s1 + $0x20] sm:$0xff]  }
  0x6d   : > { %1063 = vmatprep.mubr.bf16.mxu0 %v14763_v15  ;;  %11440 = vset.pattern.permute.xlu1 %v14763_v15  ;;  %s9632_s6 = sshll.u32 %s14850_s5, 1  ;;  %v11445_v20 = vld [vmem:[%s14746_s1 + $0x18] sm:$0xff]   ;;  %v11446_v23 = vld [vmem:[%s14746_s1 + $0x10] sm:$0xff]   ;;  %v11462_v25 = vld [vmem:[#allocation7 + $0x90] ss:$12 sps:$4 sm:$0xff]  }
  0x6e   : > { %11439 = vset.pattern.permute.xlu0 %v14763_v15  ;;  %10751 = vmatpush3.bf16.msra.mxu1 %v11441_v16  ;;  %p596_p12 = scmp.lt.s32.totalorder %s9632_s6, 3  ;;  %v11456_v21 = vld [vmem:[#allocation7 + $0xac] ss:$12 sps:$4 sm:$0xff]   ;;  %v11458_v22 = vld [vmem:[#allocation7 + $0xa8] ss:$12 sps:$4 sm:$0xff]   ;;  %v11450_v39 = vld [vmem:[%s14746_s1 + $0x70] sm:$0xff]  }
  0x6f   : > { %10752 = vmatprep.subr.bf16.mxu1 %v14781_v14  ;;  %1031 = vmatprep.subr.bf16.mxu0 %v11456_v21  ;;  %v11460_v24 = vld [vmem:[#allocation7 + $0x94] ss:$12 sps:$4 sm:$0xff]   ;;  %v11464_v26 = vld [vmem:[#allocation7 + $0x7c] ss:$12 sps:$4 sm:$0xff]   ;;  %v11466_v28 = vld [vmem:[#allocation7 + $0x78] ss:$12 sps:$4 sm:$0xff]  }
  0x70   : > { %s14988_s6 = smov (!%p596_p12, %s9632_s6), 3  ;;  %1032 = vmatpush1.bf16.msra.mxu0 %v11458_v22  ;;  %v11447_v27 = vld [vmem:[%s14746_s1 + $0x8] sm:$0xff]   ;;  %v11448_v29 = vld [vmem:[%s14746_s1] sm:$0xff]   ;;  %v11470_v33 = vld [vmem:[#allocation7 + $0x60] ss:$12 sps:$4 sm:$0xff]  }
  0x71   : > { %s9633_s15 = sshll.u32 %s14988_s6, 3  ;;  %1033 = vmatprep.subr.bf16.mxu0 %v11460_v24  ;;  %v11468_v30 = vld [vmem:[#allocation7 + $0x64] ss:$12 sps:$4 sm:$0xff]   ;;  %v11472_v34 = vld [vmem:[#allocation7 + $0x4c] ss:$12 sps:$4 sm:$0xff]  }
  0x72   : > { %10753 = vmatpush3.bf16.msra.mxu1 %v11442_v17  ;;  %s599_s27 = scalar_lea.vmem %s14745_s0, %s9633_s15  ;;  %v11449_v36 = vld [vmem:[%s14746_s1 + $0x78] sm:$0xff]   ;;  %v11476_v38 = vld [vmem:[#allocation7 + $0x34] ss:$12 sps:$4 sm:$0xff]   ;;  %v11478_v40 = vld [vmem:[#allocation7 + $0x30] ss:$12 sps:$4 sm:$0xff]   ;;  %s607_s20 = scalar_lea.vmem %s14756_s11, %s9633_s15 }
  0x73   : > { %10754 = vmatprep.subr.bf16.mxu1 %v14781_v14  ;;  %v610_v31 = vld [vmem:[%s599_s27] sm:$0xff]  ;;  %v611_v32 = vld [vmem:[%s599_s27 + $0x8] sm:$0xff]  ;;  %v11486_v46 = vld [vmem:[#allocation7] ss:$12 sps:$4 sm:$0xff]  }
  0x74   : > { %1034 = vmatpush1.bf16.msra.mxu0 %v11462_v25  ;;  %v12887_v35 = vpack.c.bf16 %v611_v32, %v610_v31  ;;  %v11474_v37 = vld [vmem:[#allocation7 + $0x48] ss:$12 sps:$4 sm:$0xff]   ;;  %v11451_v42 = vld [vmem:[%s14746_s1 + $0x68] sm:$0xff]   ;;  %v11484_v44 = vld [vmem:[#allocation7 + $0x4] ss:$12 sps:$4 sm:$0xff]  }
  0x75   : > { %1035 = vmatprep.subr.bf16.mxu0 %v11464_v26  ;;  %v11480_v41 = vld [vmem:[#allocation7 + $0x1c] ss:$12 sps:$4 sm:$0xff]   ;;  %v11482_v43 = vld [vmem:[#allocation7 + $0x18] ss:$12 sps:$4 sm:$0xff]   ;;  %v11452_v45 = vld [vmem:[%s14746_s1 + $0x60] sm:$0xff]  }
  0x76   : > { %10755 = vmatpush3.bf16.msra.mxu1 %v11443_v18  ;;  %v11492_v47 = vld [vmem:[#allocation9 + $0xac] ss:$12 sps:$4 sm:$0xff]   ;;  %v11490_v50 = vld [vmem:[#allocation9 + $0xa8] ss:$12 sps:$4 sm:$0xff]   ;;  %v11454_v52 = vld [vmem:[%s14746_s1 + $0x50] sm:$0xff]  }
  0x77   : > { %10756 = vmatprep.subr.bf16.mxu1 %v14781_v14  ;;  %v11453_v48 = vld [vmem:[%s14746_s1 + $0x58] sm:$0xff]   ;;  %v11496_v51 = vld [vmem:[#allocation9 + $0x94] ss:$12 sps:$4 sm:$0xff]   ;;  %v11494_v53 = vld [vmem:[#allocation9 + $0x90] ss:$12 sps:$4 sm:$0xff]  }
  0x78   : > { %1036 = vmatpush1.bf16.msra.mxu0 %v11466_v28  ;;  %v12912_v49 = vld [vmem:[%s12824_s25] sm:$0xff]   ;;  %v11455_v55 = vld [vmem:[%s14746_s1 + $0x48] sm:$0xff]  }
  0x79   : > { %1037 = vmatprep.subr.bf16.mxu0 %v11468_v30  ;;  %v11500_v54 = vld [vmem:[#allocation9 + $0x7c] ss:$12 sps:$4 sm:$0xff]   ;;  %v11498_v56 = vld [vmem:[#allocation9 + $0x78] ss:$12 sps:$4 sm:$0xff]   ;;  %v11459_v58 = vld [vmem:[%s14746_s1 + $0x40] sm:$0xff]  }
  0x7a   : > { %10757 = vmatpush3.bf16.msra.mxu1 %v11444_v19  ;;  %v11504_v57 = vld [vmem:[#allocation9 + $0x64] ss:$12 sps:$4 sm:$0xff]   ;;  %v11502_v59 = vld [vmem:[#allocation9 + $0x60] ss:$12 sps:$4 sm:$0xff]   ;;  %v11506_v62 = vld [vmem:[#allocation9 + $0x48] ss:$12 sps:$4 sm:$0xff]  }
  0x7b   : > { %10758 = vmatprep.subr.bf16.mxu1 %v14781_v14  ;;  %v11508_v60 = vld [vmem:[#allocation9 + $0x4c] ss:$12 sps:$4 sm:$0xff]   ;;  %v11463_v61 = vld [vmem:[#allocation7 + $0xb0] ss:$12 sps:$4 sm:$0xff]   ;;  %v11512_v63 = vld [vmem:[#allocation9 + $0x34] ss:$12 sps:$4 sm:$0xff]  }
  0x7c   : > { %1038 = vmatpush1.bf16.msra.mxu0 %v11470_v33  ;;  %v11467_v0 = vld [vmem:[#allocation7 + $0x98] ss:$12 sps:$4 sm:$0xff]   ;;  %v11510_v1 = vld [vmem:[#allocation9 + $0x30] ss:$12 sps:$4 sm:$0xff]   ;;  %v11471_v2 = vld [vmem:[#allocation7 + $0x80] ss:$12 sps:$4 sm:$0xff]  }
  0x7d   : > { %1039 = vmatprep.subr.bf16.mxu0 %v11472_v34  ;;  %v11475_v3 = vld [vmem:[#allocation7 + $0x68] ss:$12 sps:$4 sm:$0xff]   ;;  %v11479_v4 = vld [vmem:[#allocation7 + $0x50] ss:$12 sps:$4 sm:$0xff]   ;;  %v11483_v5 = vld [vmem:[#allocation7 + $0x38] ss:$12 sps:$4 sm:$0xff]  }
  0x7e   : > { %10759 = vmatpush3.bf16.msra.mxu1 %v11445_v20  ;;  %v11487_v6 = vld [vmem:[#allocation7 + $0x20] ss:$12 sps:$4 sm:$0xff]   ;;  %v11489_v7 = vld [vmem:[#allocation7 + $0x8] ss:$12 sps:$4 sm:$0xff]   ;;  %v11493_v8 = vld [vmem:[#allocation9 + $0xb0] ss:$12 sps:$4 sm:$0xff]  }
  0x7f   : > { %10760 = vmatprep.subr.bf16.mxu1 %v14781_v14  ;;  %v11516_v9 = vld [vmem:[#allocation9 + $0x1c] ss:$12 sps:$4 sm:$0xff]   ;;  %v11497_v10 = vld [vmem:[#allocation9 + $0x98] ss:$12 sps:$4 sm:$0xff]   ;;  %v11501_v13 = vld [vmem:[#allocation9 + $0x80] ss:$12 sps:$4 sm:$0xff]  }
  0x80   : > { %1040 = vmatpush1.bf16.msra.mxu0 %v11474_v37  ;;  %v11514_v11 = vld [vmem:[#allocation9 + $0x18] ss:$12 sps:$4 sm:$0xff]   ;;  %v11518_v16 = vld [vmem:[#allocation9] ss:$12 sps:$4 sm:$0xff]   ;;  %v11505_v17 = vld [vmem:[#allocation9 + $0x68] ss:$12 sps:$4 sm:$0xff]  }
  0x81   : > { %1041 = vmatprep.subr.bf16.mxu0 %v11476_v38  ;;  %v11520_v12 = vld [vmem:[#allocation9 + $0x4] ss:$12 sps:$4 sm:$0xff]   ;;  %v11517_v20 = vld [vmem:[#allocation9 + $0x20] ss:$12 sps:$4 sm:$0xff]   ;;  %v11521_v21 = vld [vmem:[#allocation9 + $0x8] ss:$12 sps:$4 sm:$0xff]  }
  0x82   : > { %10761 = vmatpush3.bf16.msra.mxu1 %v11446_v23  ;;  %v11509_v18 = vld [vmem:[#allocation9 + $0x50] ss:$12 sps:$4 sm:$0xff]   ;;  %v11513_v19 = vld [vmem:[#allocation9 + $0x38] ss:$12 sps:$4 sm:$0xff]  }
  0x83   : > { %10762 = vmatprep.subr.bf16.mxu1 %v14781_v14  ;;  %v9636_v22 = vld [vmem:[%s14747_s2] ss:$0 sm:$0xff]  ;;  %v12972_v38 = vld [vmem:[#allocation7 + $0x16c] ss:$12 sps:$4 sm:$0xff]  }
  0x84   : > { %1042 = vmatpush1.bf16.msra.mxu0 %v11478_v40  ;;  %v11525_v40 = vld [vmem:[#allocation7 + $0x170] ss:$12 sps:$4 sm:$0xff]  }
  0x85   : > { %1043 = vmatprep.subr.bf16.mxu0 %v11480_v41  ;;  %v12978_v41 = vld [vmem:[#allocation7 + $0x154] ss:$12 sps:$4 sm:$0xff]  }
  0x86   : > { %10763 = vmatpush3.bf16.msra.mxu1 %v11447_v27 }
  0x87   : > { %10764 = vmatprep.subr.bf16.mxu1 %v14781_v14 }
  0x88   : > { %1044 = vmatpush1.bf16.msra.mxu0 %v11482_v43  ;;  %v11529_v43 = vld [vmem:[#allocation7 + $0x158] ss:$12 sps:$4 sm:$0xff]  }
  0x89   : > { %1045 = vmatprep.subr.bf16.mxu0 %v11484_v44  ;;  %v12985_v44 = vld [vmem:[#allocation7 + $0x13c] ss:$12 sps:$4 sm:$0xff]  }
  0x8a   : > { %10765 = vmatpush3.bf16.msra.mxu1 %v11448_v29 }
  0x8b   : > { %10770 = vmatprep.subr.bf16.mxu1 %v14781_v14 }
  0x8c   : > { %1046 = vmatpush1.bf16.msra.mxu0 %v11486_v46  ;;  %v11533_v46 = vld [vmem:[#allocation7 + $0x140] ss:$12 sps:$4 sm:$0xff]  }
  0x8d   : > { %10767 = vmatmul.mubr.bf16.vlgmr.msra.gmra.mxu1 %v12887_v35  ;;  %1276 = vmatprep.subr.bf16.mxu0 %v11492_v47  ;;  %v12992_v47 = vld [vmem:[#allocation7 + $0x124] ss:$12 sps:$4 sm:$0xff]  }
  0x8e   : > { %10771 = vmatpush3.bf16.msra.mxu1 %v11449_v36  ;;  %10786 = vmatprep.mubr.msk.bf16.mxu1 %vm12638_vm0, %v14781_v14 }
  0x8f   : > { %10772 = vmatprep.subr.bf16.mxu1 %v14781_v14  ;;  %1064 = vmatmul.mubr.bf16.vlgmr.msra.gmra.mxu0 %v12912_v49 }
  0x90   : > { %1277 = vmatpush1.bf16.msra.mxu0 %v11490_v50  ;;  %1308 = vmatprep.mubr.bf16.mxu0 %v14763_v15  ;;  %v12999_v50 = vld [vmem:[#allocation7 + $0x108] ss:$12 sps:$4 sm:$0xff]  }
  0x91   : > { %1278 = vmatprep.subr.bf16.mxu0 %v11496_v51  ;;  %v13001_v51 = vld [vmem:[#allocation7 + $0x10c] ss:$12 sps:$4 sm:$0xff]  }
  0x92   : > { %10773 = vmatpush3.bf16.msra.mxu1 %v11450_v39  ;;  %v12974_v39 = vld [vmem:[#allocation7 + $0x168] ss:$12 sps:$4 sm:$0xff]  }
  0x93   : > { %10774 = vmatprep.subr.bf16.mxu1 %v14781_v14 }
  0x94   : > { %1279 = vmatpush1.bf16.msra.mxu0 %v11494_v53  ;;  %v13004_v53 = vld [vmem:[#allocation7 + $0xf4] ss:$12 sps:$4 sm:$0xff]  }
  0x95   : > { %1280 = vmatprep.subr.bf16.mxu0 %v11500_v54  ;;  %v13008_v54 = vld [vmem:[#allocation7 + $0xf0] ss:$12 sps:$4 sm:$0xff]  }
  0x96   : > { %10775 = vmatpush3.bf16.msra.mxu1 %v11451_v42  ;;  %v12981_v42 = vld [vmem:[#allocation7 + $0x150] ss:$12 sps:$4 sm:$0xff]  }
  0x97   : > { %10776 = vmatprep.subr.bf16.mxu1 %v14781_v14 }
  0x98   : > { %1281 = vmatpush1.bf16.msra.mxu0 %v11498_v56  ;;  %v13012_v56 = vld [vmem:[#allocation7 + $0xdc] ss:$12 sps:$4 sm:$0xff]  }
  0x99   : > { %1282 = vmatprep.subr.bf16.mxu0 %v11504_v57  ;;  %v13015_v57 = vld [vmem:[#allocation7 + $0xd8] ss:$12 sps:$4 sm:$0xff]  }
  0x9a   : > { %10777 = vmatpush3.bf16.msra.mxu1 %v11452_v45  ;;  %v12988_v45 = vld [vmem:[#allocation7 + $0x138] ss:$12 sps:$4 sm:$0xff]  }
  0x9b   : > { %10778 = vmatprep.subr.bf16.mxu1 %v14781_v14 }
  0x9c   : > { %1283 = vmatpush1.bf16.msra.mxu0 %v11502_v59  ;;  %v13019_v59 = vld [vmem:[#allocation7 + $0xc4] ss:$12 sps:$4 sm:$0xff]  }
  0x9d   : > { %1284 = vmatprep.subr.bf16.mxu0 %v11508_v60  ;;  %v13022_v60 = vld [vmem:[#allocation7 + $0xc0] ss:$12 sps:$4 sm:$0xff]  }
  0x9e   : > { %10779 = vmatpush3.bf16.msra.mxu1 %v11453_v48  ;;  %v12995_v48 = vld [vmem:[#allocation7 + $0x120] ss:$12 sps:$4 sm:$0xff]  }
  0x9f   : > { %10780 = vmatprep.subr.bf16.mxu1 %v14781_v14 }
  0xa0   : > { %1285 = vmatpush1.bf16.msra.mxu0 %v11506_v62  ;;  %v13026_v62 = vld [vmem:[#allocation9 + $0x16c] ss:$12 sps:$4 sm:$0xff]  }
  0xa1   : > { %1286 = vmatprep.subr.bf16.mxu0 %v11512_v63  ;;  %v14762_v63 = vlaneseq }
  0xa2   : > { %10781 = vmatpush3.bf16.msra.mxu1 %v11454_v52  ;;  %v11541_v52 = vld [vmem:[#allocation7 + $0x110] ss:$12 sps:$4 sm:$0xff]  }
  0xa3   : > { %10782 = vmatprep.subr.bf16.mxu1 %v14781_v14 }
  0xa4   : > { %1287 = vmatpush1.bf16.msra.mxu0 %v11510_v1  ;;  %v883_v1 = vshrl.u32 %v14762_v63, 7 }
  0xa5   : > { %1288 = vmatprep.subr.bf16.mxu0 %v11516_v9 }
  0xa6   : > { %10783 = vmatpush3.bf16.msra.mxu1 %v11455_v55  ;;  %v11545_v55 = vld [vmem:[#allocation7 + $0xf8] ss:$12 sps:$4 sm:$0xff]   ;;  %v13038_v9 = vsub.s32 1, %v883_v1 }
  0xa7   : > { %10784 = vmatprep.subr.bf16.mxu1 %v14781_v14 }
  0xa8   : > { %1289 = vmatpush1.bf16.msra.mxu0 %v11514_v11 }
  0xa9   : > { %1290 = vmatprep.subr.bf16.mxu0 %v11520_v12 }
  0xaa   : > { %10785 = vmatpush3.bf16.msra.mxu1 %v11459_v58  ;;  %v11549_v58 = vld [vmem:[#allocation7 + $0xe0] ss:$12 sps:$4 sm:$0xff]  }
  0xab   : > { %10790 = vmatprep.subr.bf16.mxu1 %v14781_v14 }
  0xac   : > { %1291 = vmatpush1.bf16.msra.mxu0 %v11518_v16 }
  0xad   : > { %10787 = vmatmul.mubr.bf16.vlgmr.msra.gmra.mxu1 %v12887_v35  ;;  %1595 = vmatprep.subr.bf16.mxu0 %v12972_v38 }
  0xae   : > { %10791 = vmatpush3.bf16.msra.mxu1 %v11463_v61  ;;  %10806 = vmatprep.mubr.msk.bf16.mxu1 %vm12638_vm0, %v14781_v14  ;;  %v11553_v61 = vld [vmem:[#allocation7 + $0xc8] ss:$12 sps:$4 sm:$0xff]  }
  0xaf   : > { %10792 = vmatprep.subr.bf16.mxu1 %v14781_v14 }
  0xb2   : > { %10793 = vmatpush3.bf16.msra.mxu1 %v11467_v0 }
  0xb3   : > { %10794 = vmatprep.subr.bf16.mxu1 %v14781_v14 }
  0xb6   : > { %10795 = vmatpush3.bf16.msra.mxu1 %v11471_v2 }
  0xb7   : > { %10796 = vmatprep.subr.bf16.mxu1 %v14781_v14 }
  0xba   : > { %10797 = vmatpush3.bf16.msra.mxu1 %v11475_v3  ;;  %v13032_v3 = vsub.s32 0, %v883_v1 }
  0xbb   : > { %10798 = vmatprep.subr.bf16.mxu1 %v14781_v14 }
  0xbc   : > { %14851 = vst [vmem:[#allocation19_spill] sm:$0xff] %v13032_v3 }
  0xbe   : > { %10799 = vmatpush3.bf16.msra.mxu1 %v11479_v4  ;;  %v880_v4 = vld [vmem:[%s14752_s7] sm:$0x7] }
  0xbf   : > { %10800 = vmatprep.subr.bf16.mxu1 %v14781_v14 }
  0xc2   : > { %10801 = vmatpush3.bf16.msra.mxu1 %v11483_v5 }
  0xc3   : > { %10802 = vmatprep.subr.bf16.mxu1 %v14781_v14 }
  0xc6   : > { %10803 = vmatpush3.bf16.msra.mxu1 %v11487_v6  ;;  %v885_v6 = vrot.slane %v880_v4, %v13032_v3 }
  0xc7   : > { %10804 = vmatprep.subr.bf16.mxu1 %v14781_v14 }
  0xca   : > { %10805 = vmatpush3.bf16.msra.mxu1 %v11489_v7 }
  0xcb   : > { %10810 = vmatprep.subr.bf16.mxu1 %v14781_v14 }
  0xcd   : > { %10807 = vmatmul.mubr.bf16.vlgmr.msra.gmra.mxu1 %v12912_v49  ;;  %v11537_v49 = vld [vmem:[#allocation7 + $0x128] ss:$12 sps:$4 sm:$0xff]  }
  0xce   : > { %10811 = vmatpush3.bf16.msra.mxu1 %v11493_v8  ;;  %10826 = vmatprep.mubr.msk.bf16.mxu1 %vm12638_vm0, %v14781_v14 }
  0xcf   : > { %10812 = vmatprep.subr.bf16.mxu1 %v14781_v14 }
  0xd2   : > { %10813 = vmatpush3.bf16.msra.mxu1 %v11497_v10 }
  0xd3   : > { %10814 = vmatprep.subr.bf16.mxu1 %v14781_v14 }
  0xd6   : > { %10815 = vmatpush3.bf16.msra.mxu1 %v11501_v13 }
  0xd7   : > { %10816 = vmatprep.subr.bf16.mxu1 %v14781_v14 }
  0xda   : > { %10817 = vmatpush3.bf16.msra.mxu1 %v11505_v17  ;;  %v889_v17 = vrot.slane %v880_v4, %v13038_v9 }
  0xdb   : > { %10818 = vmatprep.subr.bf16.mxu1 %v14781_v14 }
  0xde   : > { %10819 = vmatpush3.bf16.msra.mxu1 %v11509_v18 }
  0xdf   : > { %10820 = vmatprep.subr.bf16.mxu1 %v14781_v14 }
  0xe2   : > { %10821 = vmatpush3.bf16.msra.mxu1 %v11513_v19 }
  0xe3   : > { %10822 = vmatprep.subr.bf16.mxu1 %v14781_v14 }
  0xe6   : > { %10823 = vmatpush3.bf16.msra.mxu1 %v11517_v20 }
  0xe7   : > { %10824 = vmatprep.subr.bf16.mxu1 %v14781_v14 }
  0xea   : > { %10825 = vmatpush3.bf16.msra.mxu1 %v11521_v21 }
  0xeb   : > { %10830 = vmatprep.subr.bf16.mxu1 %v14781_v14 }
 0x14d   : > { %v718_v23 = vpop.f32.mrf.mxu1 }
 0x14e   : > { %v12955_v26 = vadd.f32 %v9636_v22, %v718_v23 }
 0x14f   : > { %v10768_v24 = vpop.f32.mrf.mxu1  ;;  %v1065_v0 = vpop.f32.mrf.mxu0 }
 0x150   : > { %v1066_v8 = vadd.f32 %v1065_v0, %v885_v6 }
 0x151   : > { %v721_v25 = vpop.f32.mrf.mxu1  ;;  %v1067_v2 = vpop.f32.mrf.mxu0 }
 0x152   : > { %v12957_v27 = vadd.f32 %v9636_v22, %v721_v25  ;;  %v1068_v24 = vadd.f32 %v1067_v2, %v889_v17 }
 0x153   : > { %v10769_v28 = vpop.f32.mrf.mxu1  ;;  %v1069_v5 = vpop.f32.mrf.mxu0 }
 0x154   : > { %v1115_v29 = vpack.c.bf16 %v12957_v27, %v12955_v26  ;;  %v1070_v18 = vadd.f32 %v1069_v5, %v885_v6 }
 0x155   : > { %v1071_v7 = vpop.f32.mrf.mxu0 }
 0x156   : > { %1309 = vmatmul.mubr.bf16.vlgmr.msra.gmra.mxu0 %v1115_v29  ;;  %10827 = vmatmul.mubr.bf16.vlgmr.msra.gmra.mxu1 %v1115_v29  ;;  %v1072_v29 = vadd.f32 %v1071_v7, %v889_v17 }
 0x157   : > { %1627 = vmatprep.mubr.bf16.mxu0 %v14763_v15  ;;  %10846 = vmatprep.mubr.msk.bf16.mxu1 %vm12638_vm0, %v14781_v14 }
 0x158   : > { %1596 = vmatpush1.bf16.msra.mxu0 %v12974_v39  ;;  %10831 = vmatpush3.bf16.msra.mxu1 %v11525_v40 }
 0x159   : > { %10832 = vmatprep.subr.bf16.mxu1 %v14781_v14  ;;  %1597 = vmatprep.subr.bf16.mxu0 %v12978_v41 }
 0x15c   : > { %1598 = vmatpush1.bf16.msra.mxu0 %v12981_v42  ;;  %10833 = vmatpush3.bf16.msra.mxu1 %v11529_v43 }
 0x15d   : > { %10834 = vmatprep.subr.bf16.mxu1 %v14781_v14  ;;  %1599 = vmatprep.subr.bf16.mxu0 %v12985_v44 }
 0x160   : > { %1600 = vmatpush1.bf16.msra.mxu0 %v12988_v45  ;;  %10835 = vmatpush3.bf16.msra.mxu1 %v11533_v46 }
 0x161   : > { %10836 = vmatprep.subr.bf16.mxu1 %v14781_v14  ;;  %1601 = vmatprep.subr.bf16.mxu0 %v12992_v47 }
 0x164   : > { %1602 = vmatpush1.bf16.msra.mxu0 %v12995_v48  ;;  %10837 = vmatpush3.bf16.msra.mxu1 %v11537_v49 }
 0x165   : > { %10838 = vmatprep.subr.bf16.mxu1 %v14781_v14  ;;  %1603 = vmatprep.subr.bf16.mxu0 %v13001_v51 }
 0x168   : > { %1604 = vmatpush1.bf16.msra.mxu0 %v12999_v50  ;;  %10839 = vmatpush3.bf16.msra.mxu1 %v11541_v52  ;;  %v13041_v52 = vsub.s32 2, %v883_v1 }
 0x169   : > { %1605 = vmatprep.subr.bf16.mxu0 %v13004_v53  ;;  %10840 = vmatprep.subr.bf16.mxu1 %v14781_v14 }
 0x16a   : > { %v893_v0 = vrot.slane %v880_v4, %v13041_v52 }
 0x16c   : > { %1606 = vmatpush1.bf16.msra.mxu0 %v13008_v54  ;;  %10841 = vmatpush3.bf16.msra.mxu1 %v11545_v55 }
 0x16d   : > { %v12964_v30 = vpop.f32.mrf.mxu1  ;;  %1607 = vmatprep.subr.bf16.mxu0 %v13012_v56  ;;  %10842 = vmatprep.subr.bf16.mxu1 %v14781_v14 }
 0x16f   : > { %v10788_v31 = vpop.f32.mrf.mxu1 }
 0x170   : > { %1608 = vmatpush1.bf16.msra.mxu0 %v13015_v57  ;;  %10843 = vmatpush3.bf16.msra.mxu1 %v11549_v58  ;;  %v13046_v58 = vld [vmem:[%s14753_s8] ss:$0 sm:$0xff] }
 0x171   : > { %v12966_v32 = vpop.f32.mrf.mxu1  ;;  %1609 = vmatprep.subr.bf16.mxu0 %v13019_v59  ;;  %10844 = vmatprep.subr.bf16.mxu1 %v14781_v14 }
 0x173   : > { %v10789_v33 = vpop.f32.mrf.mxu1 }
 0x174   : > { %1610 = vmatpush1.bf16.msra.mxu0 %v13022_v60  ;;  %10845 = vmatpush3.bf16.msra.mxu1 %v11553_v61 }
 0x175   : > { %1841 = vmatprep.subr.bf16.mxu0 %v13026_v62  ;;  %10850 = vmatprep.subr.bf16.mxu1 %v14781_v14 }
 0x18d   : > { %v12968_v34 = vpop.f32.mrf.mxu1 }
 0x18f   : > { %v10808_v35 = vpop.f32.mrf.mxu1 }
 0x191   : > { %v12970_v36 = vpop.f32.mrf.mxu1 }
 0x193   : > { %v10809_v37 = vpop.f32.mrf.mxu1 }
 0x216   : > { %v1310_v10 = vpop.f32.mrf.mxu0  ;;  %v1353_v11 = vpop.f32.mrf.mxu1 }
 0x217   : > { %v1360_v12 = vadd.f32 %v1310_v10, %v1066_v8  ;;  %v1395_v2 = vadd.f32 %v13046_v58, %v1353_v11  ;;  %v1109_v8 = vadd.f32 %v12968_v34, %v893_v0 }
 0x218   : > { %v1312_v13 = vpop.f32.mrf.mxu0  ;;  %v10828_v16 = vpop.f32.mrf.mxu1 }
 0x219   : > { %v9720_v19 = vmul.f32 -1.442695, %v1360_v12  ;;  %v1374_v31 = vadd.f32 %v1312_v13, %v1068_v24  ;;  %v1112_v16 = vadd.f32 %v12970_v36, %v893_v0  ;;  %v13059_v36 = vld [vmem:[#allocation9 + $0x168] ss:$12 sps:$4 sm:$0xff]  }
 0x21a   : > { %v1314_v20 = vpop.f32.mrf.mxu0  ;;  %v1356_v21 = vpop.f32.mrf.mxu1  ;;  %v13094_v0 = vld [vmem:[#allocation9 + $0x108] ss:$12 sps:$4 sm:$0xff]  }
 0x21b   : > { %12096 = vpow2.f32 %v9720_v19  ;;  %v1361_v22 = vadd.f32 %v1314_v20, %v1070_v18  ;;  %v9722_v35 = vmul.f32 -1.442695, %v1374_v31  ;;  %v1396_v1 = vadd.f32 %v13046_v58, %v1356_v21  ;;  %v11557_v31 = vld [vmem:[#allocation9 + $0x170] ss:$12 sps:$4 sm:$0xff]  }
 0x21c   : > { %v10829_v23 = vpop.f32.mrf.mxu1  ;;  %v1316_v28 = vpop.f32.mrf.mxu0 }
 0x21d   : > { %v9721_v25 = vmul.f32 -1.442695, %v1361_v22  ;;  %v1375_v33 = vadd.f32 %v1316_v28, %v1072_v29 }
 0x21f   : > { %12098 = vpow2.f32 %v9721_v25  ;;  %v9723_v37 = vmul.f32 -1.442695, %v1375_v33 }
 0x220   : > { %12100 = vpow2.f32 %v9722_v35  ;;  %v13065_v35 = vld [vmem:[#allocation9 + $0x154] ss:$12 sps:$4 sm:$0xff]  }
 0x221   : > { %12102 = vpow2.f32 %v9723_v37  ;;  %v13074_v37 = vld [vmem:[#allocation9 + $0x13c] ss:$12 sps:$4 sm:$0xff]  }
 0x228   : > { %v12097_v40 = vpop.eup %12096 }
 0x229   : > { %v1368_v43 = vadd.f32 1.0, %v12097_v40  ;;  %v13080_v40 = vld [vmem:[#allocation9 + $0x138] ss:$12 sps:$4 sm:$0xff]  }
 0x22b   : > { %12104 = vrcp.f32 %v1368_v43  ;;  %v11565_v43 = vld [vmem:[#allocation9 + $0x140] ss:$12 sps:$4 sm:$0xff]  }
 0x22c   : > { %v12099_v46 = vpop.eup %12098 }
 0x22d   : > { %v1369_v49 = vadd.f32 1.0, %v12099_v46  ;;  %v12101_v55 = vpop.eup %12100  ;;  %v13084_v46 = vld [vmem:[#allocation9 + $0x124] ss:$12 sps:$4 sm:$0xff]  }
 0x22e   : > { %v12103_v61 = vpop.eup %12102  ;;  %v1382_v5 = vadd.f32 1.0, %v12101_v55  ;;  %v11569_v55 = vld [vmem:[#allocation9 + $0x128] ss:$12 sps:$4 sm:$0xff]  }
 0x22f   : > { %12106 = vrcp.f32 %v1369_v49  ;;  %v1383_v7 = vadd.f32 1.0, %v12103_v61  ;;  %v13087_v49 = vld [vmem:[#allocation9 + $0x120] ss:$12 sps:$4 sm:$0xff]  }
 0x230   : > { %12108 = vrcp.f32 %v1382_v5  ;;  %v13091_v61 = vld [vmem:[#allocation9 + $0x10c] ss:$12 sps:$4 sm:$0xff]   ;;  %v13098_v5 = vld [vmem:[#allocation9 + $0xf4] ss:$12 sps:$4 sm:$0xff]  }
 0x231   : > { %12110 = vrcp.f32 %v1383_v7  ;;  %v11577_v7 = vld [vmem:[#allocation9 + $0xf8] ss:$12 sps:$4 sm:$0xff]  }
 0x238   : > { %v12105_v6 = vpop.eup %12104 }
 0x239   : > { %v1397_v10 = vmul.f32 %v12105_v6, %v1395_v2  ;;  %v11573_v2 = vld [vmem:[#allocation9 + $0x110] ss:$12 sps:$4 sm:$0xff]  }
 0x23a   : > { %v13101_v6 = vld [vmem:[#allocation9 + $0xf0] ss:$12 sps:$4 sm:$0xff]  }
 0x23b   : > { %v1399_v12 = vadd.f32 %v1397_v10, %v1109_v8  ;;  %v13105_v8 = vld [vmem:[#allocation9 + $0xdc] ss:$12 sps:$4 sm:$0xff]   ;;  %v13108_v10 = vld [vmem:[#allocation9 + $0xd8] ss:$12 sps:$4 sm:$0xff]  }
 0x23c   : > { %v12107_v13 = vpop.eup %12106 }
 0x23d   : > { %12112 = vtanh.f32 %v1399_v12  ;;  %v1398_v17 = vmul.f32 %v12107_v13, %v1396_v1  ;;  %v12109_v4 = vpop.eup %12108  ;;  %v11581_v12 = vld [vmem:[#allocation9 + $0xe0] ss:$12 sps:$4 sm:$0xff]   ;;  %v13112_v1 = vld [vmem:[#allocation9 + $0xc4] ss:$12 sps:$4 sm:$0xff]  }
 0x23e   : > { %v12111_v11 = vpop.eup %12110  ;;  %v1403_v20 = vsub.f32 1.0, %v12109_v4  ;;  %v1407_v25 = vmul.f32 %v12109_v4, %v12955_v26  ;;  %v13070_v26 = vld [vmem:[#allocation9 + $0x150] ss:$12 sps:$4 sm:$0xff]  }
 0x23f   : > { %v1400_v18 = vadd.f32 %v1398_v17, %v1112_v16  ;;  %v1404_v22 = vsub.f32 1.0, %v12111_v11  ;;  %v1408_v21 = vmul.f32 %v12111_v11, %v12957_v27  ;;  %v11561_v27 = vld [vmem:[#allocation9 + $0x158] ss:$12 sps:$4 sm:$0xff]   ;;  %v9662_v13 = vld [vmem:[%s14747_s2 + $0x1] ss:$0 sm:$0xff] }
 0x240   : > { %v13118_v16 = vld [vmem:[#allocation9 + $0xc0] ss:$12 sps:$4 sm:$0xff]   ;;  %v11585_v17 = vld [vmem:[#allocation9 + $0xc8] ss:$12 sps:$4 sm:$0xff]   ;;  %v13124_v4 = vadd.f32 %v9662_v13, %v12966_v32  ;;  %v11586_v11 = vld [vmem:[#allocation7 + $0xb0] ss:$12 sps:$4 sm:$0xff]  }
 0x241   : > { %12114 = vtanh.f32 %v1400_v18  ;;  %v13121_v18 = vadd.f32 %v9662_v13, %v12964_v30  ;;  %v12461_v30 = vld [vmem:[#allocation7 + $0xa8] ss:$12 sps:$4 sm:$0xff]   ;;  %v11587_v32 = vld [vmem:[#allocation7 + $0x98] ss:$12 sps:$4 sm:$0xff]   ;;  %v12471_v13 = vld [vmem:[#allocation7 + $0x30] ss:$12 sps:$4 sm:$0xff]  }
 0x24a   : > { %v12113_v19 = vpop.eup %12112 }
 0x24b   : > { %v1405_v23 = vmul.f32 %v12113_v19, %v1403_v20  ;;  %v1679_v19 = vpack.c.bf16 %v13124_v4, %v13121_v18  ;;  %v12460_v20 = vld [vmem:[#allocation7 + $0xac] ss:$12 sps:$4 sm:$0xff]  }
 0x24d   : > { %v13055_v28 = vadd.f32 %v1407_v25, %v1405_v23  ;;  %v12463_v23 = vld [vmem:[#allocation7 + $0x90] ss:$12 sps:$4 sm:$0xff]   ;;  %v12465_v25 = vld [vmem:[#allocation7 + $0x78] ss:$12 sps:$4 sm:$0xff]  }
 0x24e   : > { %v12115_v34 = vpop.eup %12114 }
 0x24f   : > { %v1406_v24 = vmul.f32 %v12115_v34, %v1404_v22  ;;  %v12462_v22 = vld [vmem:[#allocation7 + $0x94] ss:$12 sps:$4 sm:$0xff]  }
 0x250   : > { %v11588_v34 = vld [vmem:[#allocation7 + $0x80] ss:$12 sps:$4 sm:$0xff]  }
 0x251   : > { %v13057_v29 = vadd.f32 %v1408_v21, %v1406_v24  ;;  %v12464_v24 = vld [vmem:[#allocation7 + $0x7c] ss:$12 sps:$4 sm:$0xff]  }
 0x252   : > { %v11589_v21 = vld [vmem:[#allocation7 + $0x68] ss:$12 sps:$4 sm:$0xff]  }
 0x253   : > { %v13063_v33 = vpack.c.bf16 %v13057_v29, %v13055_v28 }
 0x255   : > { %1628 = vmatmul.mubr.bf16.vlgmr.msra.gmra.mxu0 %v13063_v33  ;;  %10847 = vmatmul.mubr.bf16.vlgmr.msra.gmra.mxu1 %v13063_v33 }
 0x256   : > { %1842 = vmatpush1.bf16.msra.mxu0 %v13059_v36  ;;  %10851 = vmatpush3.bf16.msra.mxu1 %v11557_v31  ;;  %v12466_v31 = vld [vmem:[#allocation7 + $0x64] ss:$12 sps:$4 sm:$0xff]  }
 0x257   : > { %1843 = vmatprep.subr.bf16.mxu0 %v13065_v35  ;;  %10852 = vmatprep.subr.bf16.mxu1 %v14781_v14 }
 0x258   : > { %1873 = vmatprep.mubr.bf16.mxu0 %v14763_v15  ;;  %10866 = vmatprep.mubr.msk.bf16.mxu1 %vm12638_vm0, %v14781_v14 }
 0x25a   : > { %1844 = vmatpush1.bf16.msra.mxu0 %v13070_v26  ;;  %10853 = vmatpush3.bf16.msra.mxu1 %v11561_v27  ;;  %v12467_v27 = vld [vmem:[#allocation7 + $0x60] ss:$12 sps:$4 sm:$0xff]  }
 0x25b   : > { %1845 = vmatprep.subr.bf16.mxu0 %v13074_v37  ;;  %10854 = vmatprep.subr.bf16.mxu1 %v14781_v14 }
 0x25e   : > { %1846 = vmatpush1.bf16.msra.mxu0 %v13080_v40  ;;  %10855 = vmatpush3.bf16.msra.mxu1 %v11565_v43  ;;  %v11590_v43 = vld [vmem:[#allocation7 + $0x50] ss:$12 sps:$4 sm:$0xff]  }
 0x25f   : > { %1847 = vmatprep.subr.bf16.mxu0 %v13084_v46  ;;  %10856 = vmatprep.subr.bf16.mxu1 %v14781_v14 }
 0x262   : > { %1848 = vmatpush1.bf16.msra.mxu0 %v13087_v49  ;;  %10857 = vmatpush3.bf16.msra.mxu1 %v11569_v55  ;;  %v12468_v55 = vld [vmem:[#allocation7 + $0x4c] ss:$12 sps:$4 sm:$0xff]  }
 0x263   : > { %1849 = vmatprep.subr.bf16.mxu0 %v13091_v61  ;;  %10858 = vmatprep.subr.bf16.mxu1 %v14781_v14 }
 0x266   : > { %1850 = vmatpush1.bf16.msra.mxu0 %v13094_v0  ;;  %10859 = vmatpush3.bf16.msra.mxu1 %v11573_v2  ;;  %v12469_v2 = vld [vmem:[#allocation7 + $0x48] ss:$12 sps:$4 sm:$0xff]  }
 0x267   : > { %1851 = vmatprep.subr.bf16.mxu0 %v13098_v5  ;;  %10860 = vmatprep.subr.bf16.mxu1 %v14781_v14 }
 0x26a   : > { %1852 = vmatpush1.bf16.msra.mxu0 %v13101_v6  ;;  %10861 = vmatpush3.bf16.msra.mxu1 %v11577_v7  ;;  %v11591_v7 = vld [vmem:[#allocation7 + $0x38] ss:$12 sps:$4 sm:$0xff]  }
 0x26b   : > { %1853 = vmatprep.subr.bf16.mxu0 %v13105_v8  ;;  %10862 = vmatprep.subr.bf16.mxu1 %v14781_v14 }
 0x26e   : > { %1854 = vmatpush1.bf16.msra.mxu0 %v13108_v10  ;;  %10863 = vmatpush3.bf16.msra.mxu1 %v11581_v12  ;;  %v12470_v12 = vld [vmem:[#allocation7 + $0x34] ss:$12 sps:$4 sm:$0xff]  }
 0x26f   : > { %1855 = vmatprep.subr.bf16.mxu0 %v13112_v1  ;;  %10864 = vmatprep.subr.bf16.mxu1 %v14781_v14 }
 0x272   : > { %1856 = vmatpush1.bf16.msra.mxu0 %v13118_v16  ;;  %10865 = vmatpush3.bf16.msra.mxu1 %v11585_v17  ;;  %v11592_v17 = vld [vmem:[#allocation7 + $0x20] ss:$12 sps:$4 sm:$0xff]  }
 0x273   : > { %2169 = vmatprep.subr.bf16.mxu0 %v12460_v20  ;;  %10870 = vmatprep.subr.bf16.mxu1 %v14781_v14  ;;  %v11593_v20 = vld [vmem:[#allocation7 + $0x8] ss:$12 sps:$4 sm:$0xff]  }
 0x275   : > { %1874 = vmatmul.mubr.bf16.vlgmr.msra.gmra.mxu0 %v1679_v19  ;;  %10867 = vmatmul.mubr.bf16.vlgmr.msra.gmra.mxu1 %v1679_v19  ;;  %v12473_v19 = vld [vmem:[#allocation7 + $0x18] ss:$12 sps:$4 sm:$0xff]  }
 0x276   : > { %2170 = vmatpush1.bf16.msra.mxu0 %v12461_v30  ;;  %10871 = vmatpush3.bf16.msra.mxu1 %v11586_v11  ;;  %v12472_v11 = vld [vmem:[#allocation7 + $0x1c] ss:$12 sps:$4 sm:$0xff]   ;;  %v12474_v30 = vld [vmem:[#allocation7 + $0x4] ss:$12 sps:$4 sm:$0xff]  }
 0x277   : > { %2171 = vmatprep.subr.bf16.mxu0 %v12462_v22  ;;  %10872 = vmatprep.subr.bf16.mxu1 %v14781_v14  ;;  %v12475_v22 = vld [vmem:[#allocation7] ss:$12 sps:$4 sm:$0xff]  }
 0x278   : > { %2201 = vmatprep.mubr.bf16.mxu0 %v14763_v15  ;;  %10886 = vmatprep.mubr.msk.bf16.mxu1 %vm12638_vm0, %v14781_v14 }
 0x27a   : > { %2172 = vmatpush1.bf16.msra.mxu0 %v12463_v23  ;;  %10873 = vmatpush3.bf16.msra.mxu1 %v11587_v32  ;;  %v11594_v32 = vld [vmem:[%s12824_s25 + $0x8] sm:$0xff]  }
 0x27b   : > { %2173 = vmatprep.subr.bf16.mxu0 %v12464_v24  ;;  %10874 = vmatprep.subr.bf16.mxu1 %v14781_v14  ;;  %v11595_v23 = vld [vmem:[#allocation9 + $0xb0] ss:$12 sps:$4 sm:$0xff]   ;;  %v12477_v24 = vld [vmem:[#allocation9 + $0xa8] ss:$12 sps:$4 sm:$0xff]  }
 0x27e   : > { %2174 = vmatpush1.bf16.msra.mxu0 %v12465_v25  ;;  %10875 = vmatpush3.bf16.msra.mxu1 %v11588_v34  ;;  %v12476_v34 = vld [vmem:[#allocation9 + $0xac] ss:$12 sps:$4 sm:$0xff]  }
 0x27f   : > { %2175 = vmatprep.subr.bf16.mxu0 %v12466_v31  ;;  %10876 = vmatprep.subr.bf16.mxu1 %v14781_v14  ;;  %v11596_v25 = vld [vmem:[#allocation9 + $0x98] ss:$12 sps:$4 sm:$0xff]   ;;  %v12479_v31 = vld [vmem:[#allocation9 + $0x90] ss:$12 sps:$4 sm:$0xff]  }
 0x282   : > { %2176 = vmatpush1.bf16.msra.mxu0 %v12467_v27  ;;  %10877 = vmatpush3.bf16.msra.mxu1 %v11589_v21  ;;  %v12478_v21 = vld [vmem:[#allocation9 + $0x94] ss:$12 sps:$4 sm:$0xff]  }
 0x283   : > { %2177 = vmatprep.subr.bf16.mxu0 %v12468_v55  ;;  %10878 = vmatprep.subr.bf16.mxu1 %v14781_v14  ;;  %v11597_v27 = vld [vmem:[#allocation9 + $0x80] ss:$12 sps:$4 sm:$0xff]   ;;  %v12481_v55 = vld [vmem:[#allocation9 + $0x78] ss:$12 sps:$4 sm:$0xff]  }
 0x286   : > { %2178 = vmatpush1.bf16.msra.mxu0 %v12469_v2  ;;  %10879 = vmatpush3.bf16.msra.mxu1 %v11590_v43  ;;  %v12480_v43 = vld [vmem:[#allocation9 + $0x7c] ss:$12 sps:$4 sm:$0xff]  }
 0x287   : > { %2179 = vmatprep.subr.bf16.mxu0 %v12470_v12  ;;  %10880 = vmatprep.subr.bf16.mxu1 %v14781_v14  ;;  %v11598_v2 = vld [vmem:[#allocation9 + $0x68] ss:$12 sps:$4 sm:$0xff]   ;;  %v12483_v12 = vld [vmem:[#allocation9 + $0x60] ss:$12 sps:$4 sm:$0xff]  }
 0x28a   : > { %2180 = vmatpush1.bf16.msra.mxu0 %v12471_v13  ;;  %10881 = vmatpush3.bf16.msra.mxu1 %v11591_v7  ;;  %v12482_v7 = vld [vmem:[#allocation9 + $0x64] ss:$12 sps:$4 sm:$0xff]  }
 0x28b   : > { %2181 = vmatprep.subr.bf16.mxu0 %v12472_v11  ;;  %10882 = vmatprep.subr.bf16.mxu1 %v14781_v14  ;;  %v11599_v13 = vld [vmem:[#allocation9 + $0x50] ss:$12 sps:$4 sm:$0xff]   ;;  %v12485_v11 = vld [vmem:[#allocation9 + $0x48] ss:$12 sps:$4 sm:$0xff]  }
 0x28e   : > { %2182 = vmatpush1.bf16.msra.mxu0 %v12473_v19  ;;  %10883 = vmatpush3.bf16.msra.mxu1 %v11592_v17  ;;  %v12484_v17 = vld [vmem:[#allocation9 + $0x4c] ss:$12 sps:$4 sm:$0xff]  }
 0x28f   : > { %2183 = vmatprep.subr.bf16.mxu0 %v12474_v30  ;;  %10884 = vmatprep.subr.bf16.mxu1 %v14781_v14  ;;  %v11600_v19 = vld [vmem:[#allocation9 + $0x38] ss:$12 sps:$4 sm:$0xff]   ;;  %v12487_v30 = vld [vmem:[#allocation9 + $0x30] ss:$12 sps:$4 sm:$0xff]  }
 0x292   : > { %2184 = vmatpush1.bf16.msra.mxu0 %v12475_v22  ;;  %10885 = vmatpush3.bf16.msra.mxu1 %v11593_v20  ;;  %v12486_v20 = vld [vmem:[#allocation9 + $0x34] ss:$12 sps:$4 sm:$0xff]   ;;  %v12488_v22 = vld [vmem:[#allocation9 + $0x1c] ss:$12 sps:$4 sm:$0xff]  }
 0x293   : > { %2414 = vmatprep.subr.bf16.mxu0 %v12476_v34  ;;  %10890 = vmatprep.subr.bf16.mxu1 %v14781_v14  ;;  %v11602_v34 = vld [vmem:[#allocation9 + $0x8] ss:$12 sps:$4 sm:$0xff]  }
 0x295   : > { %2202 = vmatmul.mubr.bf16.vlgmr.msra.gmra.mxu0 %v11594_v32  ;;  %10887 = vmatmul.mubr.bf16.vlgmr.msra.gmra.mxu1 %v11594_v32  ;;  %v11601_v32 = vld [vmem:[#allocation9 + $0x20] ss:$12 sps:$4 sm:$0xff]  }
 0x296   : > { %2415 = vmatpush1.bf16.msra.mxu0 %v12477_v24  ;;  %10891 = vmatpush3.bf16.msra.mxu1 %v11595_v23  ;;  %v12489_v23 = vld [vmem:[#allocation9 + $0x18] ss:$12 sps:$4 sm:$0xff]  }
 0x297   : > { %2416 = vmatprep.subr.bf16.mxu0 %v12478_v21  ;;  %10892 = vmatprep.subr.bf16.mxu1 %v14781_v14  ;;  %v12490_v24 = vld [vmem:[#allocation9 + $0x4] ss:$12 sps:$4 sm:$0xff]  }
 0x298   : > { %2446 = vmatprep.mubr.bf16.mxu0 %v14763_v15  ;;  %10906 = vmatprep.mubr.msk.bf16.mxu1 %vm12638_vm0, %v14781_v14 }
 0x29a   : > { %2417 = vmatpush1.bf16.msra.mxu0 %v12479_v31  ;;  %10893 = vmatpush3.bf16.msra.mxu1 %v11596_v25  ;;  %v12491_v25 = vld [vmem:[#allocation9] ss:$12 sps:$4 sm:$0xff]  }
 0x29b   : > { %2418 = vmatprep.subr.bf16.mxu0 %v12480_v43  ;;  %10894 = vmatprep.subr.bf16.mxu1 %v14781_v14 }
 0x29e   : > { %2419 = vmatpush1.bf16.msra.mxu0 %v12481_v55  ;;  %10895 = vmatpush3.bf16.msra.mxu1 %v11597_v27 }
 0x29f   : > { %2420 = vmatprep.subr.bf16.mxu0 %v12482_v7  ;;  %10896 = vmatprep.subr.bf16.mxu1 %v14781_v14 }
 0x2a2   : > { %2421 = vmatpush1.bf16.msra.mxu0 %v12483_v12  ;;  %10897 = vmatpush3.bf16.msra.mxu1 %v11598_v2 }
 0x2a3   : > { %2422 = vmatprep.subr.bf16.mxu0 %v12484_v17  ;;  %10898 = vmatprep.subr.bf16.mxu1 %v14781_v14 }
 0x2a6   : > { %2423 = vmatpush1.bf16.msra.mxu0 %v12485_v11  ;;  %10899 = vmatpush3.bf16.msra.mxu1 %v11599_v13 }
 0x2a7   : > { %2424 = vmatprep.subr.bf16.mxu0 %v12486_v20  ;;  %10900 = vmatprep.subr.bf16.mxu1 %v14781_v14 }
 0x2aa   : > { %2425 = vmatpush1.bf16.msra.mxu0 %v12487_v30  ;;  %10901 = vmatpush3.bf16.msra.mxu1 %v11600_v19 }
 0x2ab   : > { %2426 = vmatprep.subr.bf16.mxu0 %v12488_v22  ;;  %10902 = vmatprep.subr.bf16.mxu1 %v14781_v14 }
 0x2ae   : > { %2427 = vmatpush1.bf16.msra.mxu0 %v12489_v23  ;;  %10903 = vmatpush3.bf16.msra.mxu1 %v11601_v32 }
 0x2af   : > { %2428 = vmatprep.subr.bf16.mxu0 %v12490_v24  ;;  %10904 = vmatprep.subr.bf16.mxu1 %v14781_v14 }
 0x2b2   : > { %2429 = vmatpush1.bf16.msra.mxu0 %v12491_v25  ;;  %10905 = vmatpush3.bf16.msra.mxu1 %v11602_v34 }
 0x2b3   : > { %2731 = vmatprep.subr.bf16.mxu0 %v12972_v38  ;;  %10910 = vmatprep.subr.bf16.mxu1 %v14781_v14  ;;  %v11603_v38 = vld [vmem:[#allocation7 + $0x170] ss:$12 sps:$4 sm:$0xff]  }
 0x2b5   : > { %2447 = vmatmul.mubr.bf16.vlgmr.msra.gmra.mxu0 %v13063_v33  ;;  %10907 = vmatmul.mubr.bf16.vlgmr.msra.gmra.mxu1 %v13063_v33 }
 0x2b6   : > { %2732 = vmatpush1.bf16.msra.mxu0 %v12974_v39  ;;  %2763 = vmatprep.mubr.bf16.mxu0 %v14763_v15 }
 0x2b7   : > { %2733 = vmatprep.subr.bf16.mxu0 %v12978_v41  ;;  %10926 = vmatprep.mubr.msk.bf16.mxu1 %vm12638_vm0, %v14781_v14  ;;  %v11604_v41 = vld [vmem:[#allocation7 + $0x158] ss:$12 sps:$4 sm:$0xff]  }
 0x2b8   : > { %10911 = vmatpush3.bf16.msra.mxu1 %v11603_v38 }
 0x2b9   : > { %10912 = vmatprep.subr.bf16.mxu1 %v14781_v14 }
 0x2ba   : > { %2734 = vmatpush1.bf16.msra.mxu0 %v12981_v42 }
 0x2bb   : > { %2735 = vmatprep.subr.bf16.mxu0 %v12985_v44 }
 0x2bc   : > { %10913 = vmatpush3.bf16.msra.mxu1 %v11604_v41 }
 0x2bd   : > { %10914 = vmatprep.subr.bf16.mxu1 %v14781_v14 }
 0x2be   : > { %2736 = vmatpush1.bf16.msra.mxu0 %v12988_v45  ;;  %v11605_v45 = vld [vmem:[#allocation7 + $0x140] ss:$12 sps:$4 sm:$0xff]  }
 0x2bf   : > { %2737 = vmatprep.subr.bf16.mxu0 %v12992_v47 }
 0x2c0   : > { %10915 = vmatpush3.bf16.msra.mxu1 %v11605_v45 }
 0x2c1   : > { %10916 = vmatprep.subr.bf16.mxu1 %v14781_v14 }
 0x2c2   : > { %2738 = vmatpush1.bf16.msra.mxu0 %v12995_v48  ;;  %v11606_v48 = vld [vmem:[#allocation7 + $0x128] ss:$12 sps:$4 sm:$0xff]  }
 0x2c3   : > { %2739 = vmatprep.subr.bf16.mxu0 %v13001_v51  ;;  %v11608_v51 = vld [vmem:[#allocation7 + $0xf8] ss:$12 sps:$4 sm:$0xff]  }
 0x2c4   : > { %10917 = vmatpush3.bf16.msra.mxu1 %v11606_v48 }
 0x2c5   : > { %10918 = vmatprep.subr.bf16.mxu1 %v14781_v14 }
 0x2c6   : > { %2740 = vmatpush1.bf16.msra.mxu0 %v12999_v50  ;;  %v11607_v50 = vld [vmem:[#allocation7 + $0x110] ss:$12 sps:$4 sm:$0xff]  }
 0x2c7   : > { %2741 = vmatprep.subr.bf16.mxu0 %v13004_v53 }
 0x2c8   : > { %10919 = vmatpush3.bf16.msra.mxu1 %v11607_v50 }
 0x2c9   : > { %10920 = vmatprep.subr.bf16.mxu1 %v14781_v14 }
 0x2ca   : > { %2742 = vmatpush1.bf16.msra.mxu0 %v13008_v54  ;;  %v11609_v54 = vld [vmem:[#allocation7 + $0xe0] ss:$12 sps:$4 sm:$0xff]  }
 0x2cb   : > { %2743 = vmatprep.subr.bf16.mxu0 %v13012_v56 }
 0x2cc   : > { %10921 = vmatpush3.bf16.msra.mxu1 %v11608_v51 }
 0x2cd   : > { %10922 = vmatprep.subr.bf16.mxu1 %v14781_v14 }
 0x2ce   : > { %2744 = vmatpush1.bf16.msra.mxu0 %v13015_v57  ;;  %v11610_v57 = vld [vmem:[#allocation7 + $0xc8] ss:$12 sps:$4 sm:$0xff]  }
 0x2cf   : > { %2745 = vmatprep.subr.bf16.mxu0 %v13019_v59  ;;  %v9725_v59 = vld [vmem:[%s14752_s7 + $0x3] sm:$0x7] }
 0x2d0   : > { %10923 = vmatpush3.bf16.msra.mxu1 %v11609_v54  ;;  %v13194_v33 = vrot.slane %v9725_v59, %v13038_v9  ;;  %v1463_v45 = vrot.slane %v9725_v59, %v13041_v52 }
 0x2d1   : > { %10924 = vmatprep.subr.bf16.mxu1 %v14781_v14 }
 0x2d2   : > { %2746 = vmatpush1.bf16.msra.mxu0 %v13022_v60 }
 0x2d3   : > { %2976 = vmatprep.subr.bf16.mxu0 %v13026_v62  ;;  %v1455_v62 = vrot.slane %v9725_v59, %v13032_v3 }
 0x2d4   : > { %10925 = vmatpush3.bf16.msra.mxu1 %v11610_v57 }
 0x2d5   : > { %10930 = vmatprep.subr.bf16.mxu1 %v14781_v14 }
 0x315   : > { %v13177_v39 = vpop.f32.mrf.mxu1  ;;  %v1629_v53 = vpop.f32.mrf.mxu0 }
 0x316   : > { %v1630_v31 = vadd.f32 %v1629_v53, %v1455_v62  ;;  %v1673_v54 = vadd.f32 %v13177_v39, %v1463_v45 }
 0x317   : > { %v10848_v42 = vpop.f32.mrf.mxu1  ;;  %v1631_v56 = vpop.f32.mrf.mxu0 }
 0x318   : > { %v1632_v55 = vadd.f32 %v1631_v56, %v13194_v33  ;;  %v13202_v42 = vld [vmem:[%s14753_s8 + $0x1] ss:$0 sm:$0xff] }
 0x319   : > { %v13180_v44 = vpop.f32.mrf.mxu1  ;;  %v1633_v60 = vpop.f32.mrf.mxu0 }
 0x31a   : > { %v1634_v13 = vadd.f32 %v1633_v60, %v1455_v62  ;;  %v1676_v59 = vadd.f32 %v13180_v44, %v1463_v45 }
 0x31b   : > { %v10849_v47 = vpop.f32.mrf.mxu1  ;;  %v13196_v21 = vpop.f32.mrf.mxu0 }
 0x335   : > { %v1875_v27 = vpop.f32.mrf.mxu0  ;;  %v1918_v43 = vpop.f32.mrf.mxu1 }
 0x336   : > { %v1925_v2 = vadd.f32 %v1875_v27, %v1630_v31  ;;  %v1961_v50 = vadd.f32 %v13202_v42, %v1918_v43 }
 0x337   : > { %v1877_v7 = vpop.f32.mrf.mxu0  ;;  %v10868_v12 = vpop.f32.mrf.mxu1 }
 0x338   : > { %v9774_v17 = vmul.f32 -1.442695, %v1925_v2  ;;  %v1939_v11 = vadd.f32 %v1877_v7, %v1632_v55 }
 0x339   : > { %v1879_v19 = vpop.f32.mrf.mxu0  ;;  %v1921_v20 = vpop.f32.mrf.mxu1 }
 0x33a   : > { %12116 = vpow2.f32 %v9774_v17  ;;  %v1926_v30 = vadd.f32 %v1879_v19, %v1634_v13  ;;  %v9776_v23 = vmul.f32 -1.442695, %v1939_v11  ;;  %v1962_v62 = vadd.f32 %v13202_v42, %v1921_v20  ;;  %v2018_v20 = vld [vmem:[%s14752_s7] sm:$0x7] }
 0x33b   : > { %v10869_v32 = vpop.f32.mrf.mxu1  ;;  %v1881_v7 = vpop.f32.mrf.mxu0  ;;  %v2027_v45 = vrot.slane %v2018_v20, %v13038_v9 }
 0x33c   : > { %v9775_v22 = vmul.f32 -1.442695, %v1926_v30  ;;  %v2023_v32 = vrot.slane %v2018_v20, %v13032_v3 }
 0x33e   : > { %12118 = vpow2.f32 %v9775_v22 }
 0x33f   : > { %12120 = vpow2.f32 %v9776_v23 }
 0x347   : > { %v12117_v34 = vpop.eup %12116 }
 0x348   : > { %v1933_v24 = vadd.f32 1.0, %v12117_v34 }
 0x34a   : > { %12122 = vrcp.f32 %v1933_v24 }
 0x34b   : > { %v12119_v25 = vpop.eup %12118 }
 0x34c   : > { %v1934_v38 = vadd.f32 1.0, %v12119_v25  ;;  %v12121_v41 = vpop.eup %12120 }
 0x34d   : > { %v1947_v47 = vadd.f32 1.0, %v12121_v41 }
 0x34e   : > { %12124 = vrcp.f32 %v1934_v38 }
 0x34f   : > { %12126 = vrcp.f32 %v1947_v47 }
 0x355   : > { %v13205_v48 = vpop.f32.mrf.mxu1  ;;  %v2203_v12 = vpop.f32.mrf.mxu0 }
 0x356   : > { %v2204_v23 = vadd.f32 %v2203_v12, %v2023_v32 }
 0x357   : > { %v12123_v51 = vpop.eup %12122  ;;  %v10888_v53 = vpop.f32.mrf.mxu1 }
 0x358   : > { %v1963_v56 = vmul.f32 %v12123_v51, %v1961_v50  ;;  %v2205_v19 = vpop.f32.mrf.mxu0 }
 0x359   : > { %v13209_v57 = vpop.f32.mrf.mxu1 }
 0x35a   : > { %v1965_v60 = vadd.f32 %v1963_v56, %v1673_v54  ;;  %v2207_v44 = vpop.f32.mrf.mxu0  ;;  %v2206_v56 = vadd.f32 %v2205_v19, %v2027_v45  ;;  %v2031_v19 = vrot.slane %v2018_v20, %v13041_v52 }
 0x35b   : > { %v12125_v31 = vpop.eup %12124  ;;  %v10889_v27 = vpop.f32.mrf.mxu1 }
 0x35c   : > { %12128 = vtanh.f32 %v1965_v60  ;;  %v1964_v55 = vmul.f32 %v12125_v31, %v1962_v62  ;;  %v12127_v43 = vpop.eup %12126  ;;  %v2209_v22 = vpop.f32.mrf.mxu0  ;;  %v2250_v20 = vadd.f32 %v13209_v57, %v2031_v19 }
 0x35d   : > { %v1969_v13 = vsub.f32 1.0, %v12127_v43  ;;  %v1973_v11 = vmul.f32 %v12127_v43, %v13121_v18  ;;  %v2208_v18 = vadd.f32 %v2207_v44, %v2023_v32  ;;  %v2210_v31 = vadd.f32 %v2209_v22, %v2027_v45 }
 0x35e   : > { %v13213_v2 = vadd.f32 %v1964_v55, %v1676_v59 }
 0x369   : > { %v12129_v39 = vpop.eup %12128 }
 0x36a   : > { %v1971_v17 = vmul.f32 %v12129_v39, %v1969_v13 }
 0x36c   : > { %v13216_v30 = vadd.f32 %v1973_v11, %v1971_v17 }
 0x375   : > { %v2448_v34 = vpop.f32.mrf.mxu0  ;;  %v2491_v24 = vpop.f32.mrf.mxu1 }
 0x376   : > { %v2498_v25 = vadd.f32 %v2448_v34, %v2204_v23  ;;  %v2533_v32 = vadd.f32 %v13046_v58, %v2491_v24 }
 0x377   : > { %v2450_v38 = vpop.f32.mrf.mxu0  ;;  %v10908_v41 = vpop.f32.mrf.mxu1 }
 0x378   : > { %v9831_v47 = vmul.f32 -1.442695, %v2498_v25  ;;  %v2512_v27 = vadd.f32 %v2450_v38, %v2206_v56  ;;  %v2247_v25 = vadd.f32 %v13205_v48, %v2031_v19  ;;  %v1636_v41 = vadd.f32 %v13196_v21, %v13194_v33  ;;  %v13303_v19 = vld [vmem:[#allocation7 + $0x60] ss:$12 sps:$4 sm:$0xff]  }
 0x379   : > { %v2452_v50 = vpop.f32.mrf.mxu0  ;;  %v2494_v51 = vpop.f32.mrf.mxu1 }
 0x37a   : > { %12130 = vpow2.f32 %v9831_v47  ;;  %v2499_v53 = vadd.f32 %v2452_v50, %v2208_v18  ;;  %v9833_v55 = vmul.f32 -1.442695, %v2512_v27  ;;  %v2534_v18 = vadd.f32 %v13046_v58, %v2494_v51 }
 0x37b   : > { %v10909_v54 = vpop.f32.mrf.mxu1  ;;  %v2454_v62 = vpop.f32.mrf.mxu0  ;;  %v1940_v50 = vadd.f32 %v1881_v7, %v1636_v41  ;;  %v11642_v41 = vld [vmem:[#allocation7 + $0x38] ss:$12 sps:$4 sm:$0xff]  }
 0x37c   : > { %v9832_v60 = vmul.f32 -1.442695, %v2499_v53  ;;  %v2513_v59 = vadd.f32 %v2454_v62, %v2210_v31 }
 0x37d   : > { %v9777_v54 = vmul.f32 -1.442695, %v1940_v50  ;;  %v13328_v50 = vld [vmem:[#allocation7 + $0x4] ss:$12 sps:$4 sm:$0xff]  }
 0x37e   : > { %12132 = vpow2.f32 %v9832_v60  ;;  %v9834_v43 = vmul.f32 -1.442695, %v2513_v59 }
 0x37f   : > { %12134 = vpow2.f32 %v9833_v55  ;;  %v11611_v55 = vld [vmem:[#allocation9 + $0x170] ss:$12 sps:$4 sm:$0xff]  }
 0x380   : > { %12136 = vpow2.f32 %v9834_v43 }
 0x387   : > { %v12131_v12 = vpop.eup %12130 }
 0x388   : > { %v2506_v13 = vadd.f32 1.0, %v12131_v12 }
 0x38a   : > { %12138 = vrcp.f32 %v2506_v13  ;;  %v11622_v13 = vld [vmem:[#allocation7 + $0xb0] ss:$12 sps:$4 sm:$0xff]  }
 0x38b   : > { %v12133_v39 = vpop.eup %12132 }
 0x38c   : > { %v2507_v17 = vadd.f32 1.0, %v12133_v39  ;;  %v12135_v11 = vpop.eup %12134  ;;  %v13290_v39 = vld [vmem:[#allocation7 + $0x7c] ss:$12 sps:$4 sm:$0xff]  }
 0x38d   : > { %v12137_v44 = vpop.eup %12136  ;;  %v2520_v22 = vadd.f32 1.0, %v12135_v11  ;;  %v11630_v11 = vld [vmem:[#allocation7 + $0x80] ss:$12 sps:$4 sm:$0xff]  }
 0x38e   : > { %12140 = vrcp.f32 %v2507_v17  ;;  %v2521_v34 = vadd.f32 1.0, %v12137_v44  ;;  %v13296_v17 = vld [vmem:[#allocation7 + $0x78] ss:$12 sps:$4 sm:$0xff]  }
 0x38f   : > { %12142 = vrcp.f32 %v2520_v22  ;;  %v13300_v44 = vld [vmem:[#allocation7 + $0x64] ss:$12 sps:$4 sm:$0xff]   ;;  %v13307_v22 = vld [vmem:[#allocation7 + $0x4c] ss:$12 sps:$4 sm:$0xff]  }
 0x390   : > { %12144 = vrcp.f32 %v2521_v34  ;;  %v11638_v34 = vld [vmem:[#allocation7 + $0x50] ss:$12 sps:$4 sm:$0xff]  }
 0x397   : > { %v12139_v23 = vpop.eup %12138 }
 0x398   : > { %v2535_v38 = vmul.f32 %v12139_v23, %v2533_v32  ;;  %v11634_v32 = vld [vmem:[#allocation7 + $0x68] ss:$12 sps:$4 sm:$0xff]  }
 0x399   : > { %v13310_v23 = vld [vmem:[#allocation7 + $0x48] ss:$12 sps:$4 sm:$0xff]  }
 0x39a   : > { %v2537_v45 = vadd.f32 %v2535_v38, %v2247_v25  ;;  %v13314_v25 = vld [vmem:[#allocation7 + $0x34] ss:$12 sps:$4 sm:$0xff]   ;;  %v13317_v38 = vld [vmem:[#allocation7 + $0x30] ss:$12 sps:$4 sm:$0xff]  }
 0x39b   : > { %v12141_v47 = vpop.eup %12140 }
 0x39c   : > { %12146 = vtanh.f32 %v2537_v45  ;;  %v2536_v24 = vmul.f32 %v12141_v47, %v2534_v18  ;;  %v12143_v48 = vpop.eup %12142  ;;  %v13321_v45 = vld [vmem:[#allocation7 + $0x1c] ss:$12 sps:$4 sm:$0xff]   ;;  %v13324_v18 = vld [vmem:[#allocation7 + $0x18] ss:$12 sps:$4 sm:$0xff]   ;;  %v11646_v47 = vld [vmem:[#allocation7 + $0x20] ss:$12 sps:$4 sm:$0xff]  }
 0x39d   : > { %v12145_v56 = vpop.eup %12144  ;;  %v2541_v62 = vsub.f32 1.0, %v12143_v48  ;;  %v2545_v58 = vmul.f32 %v12143_v48, %v13055_v28  ;;  %v11612_v28 = vld [vmem:[#allocation9 + $0x158] ss:$12 sps:$4 sm:$0xff]   ;;  %v13339_v48 = vld [vmem:[#allocation9 + $0xa8] ss:$12 sps:$4 sm:$0xff]  }
 0x39e   : > { %v2538_v53 = vadd.f32 %v2536_v24, %v2250_v20  ;;  %v2542_v33 = vsub.f32 1.0, %v12145_v56  ;;  %v2546_v7 = vmul.f32 %v12145_v56, %v13057_v29  ;;  %v11613_v29 = vld [vmem:[#allocation9 + $0x140] ss:$12 sps:$4 sm:$0xff]   ;;  %v11650_v24 = vld [vmem:[#allocation7 + $0x8] ss:$12 sps:$4 sm:$0xff]  }
 0x39f   : > { %v13331_v20 = vld [vmem:[#allocation7] ss:$12 sps:$4 sm:$0xff]   ;;  %v11655_v56 = vld [vmem:[#allocation9 + $0xb0] ss:$12 sps:$4 sm:$0xff]  }
 0x3a0   : > { %12148 = vtanh.f32 %v2538_v53  ;;  %v13335_v53 = vld [vmem:[#allocation9 + $0xac] ss:$12 sps:$4 sm:$0xff]  }
 0x3a1   : > { %12150 = vpow2.f32 %v9777_v54  ;;  %v11651_v54 = vld [vmem:[%s12824_s25 + $0x10] sm:$0xff]  }
 0x3a9   : > { %v12147_v60 = vpop.eup %12146 }
 0x3aa   : > { %v2543_v21 = vmul.f32 %v12147_v60, %v2541_v62  ;;  %v13343_v60 = vld [vmem:[#allocation9 + $0x94] ss:$12 sps:$4 sm:$0xff]   ;;  %v13346_v62 = vld [vmem:[#allocation9 + $0x90] ss:$12 sps:$4 sm:$0xff]  }
 0x3ac   : > { %v13232_v51 = vadd.f32 %v2545_v58, %v2543_v21  ;;  %v13350_v21 = vld [vmem:[#allocation9 + $0x7c] ss:$12 sps:$4 sm:$0xff]   ;;  %v13360_v58 = vld [vmem:[#allocation9 + $0x64] ss:$12 sps:$4 sm:$0xff]  }
 0x3ad   : > { %v12149_v31 = vpop.eup %12148 }
 0x3ae   : > { %v2544_v27 = vmul.f32 %v12149_v31, %v2542_v33  ;;  %v12151_v59 = vpop.eup %12150  ;;  %v11659_v33 = vld [vmem:[#allocation9 + $0x98] ss:$12 sps:$4 sm:$0xff]  }
 0x3af   : > { %v1948_v12 = vadd.f32 1.0, %v12151_v59  ;;  %v13356_v31 = vld [vmem:[#allocation9 + $0x78] ss:$12 sps:$4 sm:$0xff]   ;;  %v11667_v59 = vld [vmem:[#allocation9 + $0x68] ss:$12 sps:$4 sm:$0xff]  }
 0x3b0   : > { %v13234_v57 = vadd.f32 %v2546_v7, %v2544_v27  ;;  %v11663_v27 = vld [vmem:[#allocation9 + $0x80] ss:$12 sps:$4 sm:$0xff]  }
 0x3b1   : > { %12152 = vrcp.f32 %v1948_v12  ;;  %v13363_v7 = vld [vmem:[#allocation9 + $0x60] ss:$12 sps:$4 sm:$0xff]   ;;  %v13370_v12 = vld [vmem:[#allocation9 + $0x48] ss:$12 sps:$4 sm:$0xff]  }
 0x3b2   : > { %v13238_v43 = vpack.c.bf16 %v13234_v57, %v13232_v51  ;;  %12154 = vtanh.f32 %v13213_v2 }
 0x3b4   : > { %2764 = vmatmul.mubr.bf16.vlgmr.msra.gmra.mxu0 %v13238_v43  ;;  %10927 = vmatmul.mubr.bf16.vlgmr.msra.gmra.mxu1 %v13238_v43 }
 0x3b5   : > { %2977 = vmatpush1.bf16.msra.mxu0 %v13059_v36  ;;  %10931 = vmatpush3.bf16.msra.mxu1 %v11611_v55  ;;  %v11614_v36 = vld [vmem:[#allocation9 + $0x128] ss:$12 sps:$4 sm:$0xff]   ;;  %v13367_v55 = vld [vmem:[#allocation9 + $0x4c] ss:$12 sps:$4 sm:$0xff]  }
 0x3b6   : > { %2978 = vmatprep.subr.bf16.mxu0 %v13065_v35  ;;  %10932 = vmatprep.subr.bf16.mxu1 %v14781_v14  ;;  %v11615_v35 = vld [vmem:[#allocation9 + $0x110] ss:$12 sps:$4 sm:$0xff]  }
 0x3b7   : > { %3008 = vmatprep.mubr.bf16.mxu0 %v14763_v15  ;;  %10946 = vmatprep.mubr.msk.bf16.mxu1 %vm12638_vm0, %v14781_v14 }
 0x3b9   : > { %2979 = vmatpush1.bf16.msra.mxu0 %v13070_v26  ;;  %10933 = vmatpush3.bf16.msra.mxu1 %v11612_v28  ;;  %v11671_v28 = vld [vmem:[#allocation9 + $0x50] ss:$12 sps:$4 sm:$0xff]  }
 0x3ba   : > { %2980 = vmatprep.subr.bf16.mxu0 %v13074_v37  ;;  %10934 = vmatprep.subr.bf16.mxu1 %v14781_v14  ;;  %v11616_v37 = vld [vmem:[#allocation9 + $0xf8] ss:$12 sps:$4 sm:$0xff]  }
 0x3bd   : > { %2981 = vmatpush1.bf16.msra.mxu0 %v13080_v40  ;;  %10935 = vmatpush3.bf16.msra.mxu1 %v11613_v29  ;;  %v13374_v29 = vld [vmem:[#allocation9 + $0x34] ss:$12 sps:$4 sm:$0xff]  }
 0x3be   : > { %2982 = vmatprep.subr.bf16.mxu0 %v13084_v46  ;;  %10936 = vmatprep.subr.bf16.mxu1 %v14781_v14  ;;  %v12153_v26 = vpop.eup %12152 }
 0x3bf   : > { %v12155_v40 = vpop.eup %12154  ;;  %v1970_v46 = vsub.f32 1.0, %v12153_v26  ;;  %v1974_v2 = vmul.f32 %v12153_v26, %v13124_v4  ;;  %v13381_v26 = vld [vmem:[#allocation9 + $0x1c] ss:$12 sps:$4 sm:$0xff]  }
 0x3c0   : > { %14854 = vst [vmem:[#allocation22_spill] sm:$0xff] %v13381_v26 }
 0x3c1   : > { %2983 = vmatpush1.bf16.msra.mxu0 %v13087_v49  ;;  %10937 = vmatpush3.bf16.msra.mxu1 %v11614_v36  ;;  %v11617_v49 = vld [vmem:[#allocation9 + $0xe0] ss:$12 sps:$4 sm:$0xff]   ;;  %v13377_v36 = vld [vmem:[#allocation9 + $0x30] ss:$12 sps:$4 sm:$0xff]  }
 0x3c2   : > { %2984 = vmatprep.subr.bf16.mxu0 %v13091_v61  ;;  %10938 = vmatprep.subr.bf16.mxu1 %v14781_v14  ;;  %v1972_v61 = vmul.f32 %v12155_v40, %v1970_v46  ;;  %14853 = vst [vmem:[#allocation21_spill] sm:$0xff] %v13377_v36  ;;  %v11679_v40 = vld [vmem:[#allocation9 + $0x20] ss:$12 sps:$4 sm:$0xff]   ;;  %v13388_v46 = vld [vmem:[#allocation9 + $0x4] ss:$12 sps:$4 sm:$0xff]  }
 0x3c3   : > { %14856 = vst [vmem:[#allocation24_spill] sm:$0xff] %v13388_v46 }
 0x3c5   : > { %2985 = vmatpush1.bf16.msra.mxu0 %v13094_v0  ;;  %10939 = vmatpush3.bf16.msra.mxu1 %v11615_v35  ;;  %v11618_v0 = vld [vmem:[#allocation9 + $0xc8] ss:$12 sps:$4 sm:$0xff]   ;;  %v11675_v35 = vld [vmem:[#allocation9 + $0x38] ss:$12 sps:$4 sm:$0xff]  }
 0x3c6   : > { %2986 = vmatprep.subr.bf16.mxu0 %v13098_v5  ;;  %10940 = vmatprep.subr.bf16.mxu1 %v14781_v14  ;;  %v13268_v5 = vadd.f32 %v1974_v2, %v1972_v61  ;;  %v11683_v61 = vld [vmem:[#allocation9 + $0x8] ss:$12 sps:$4 sm:$0xff]   ;;  %v13402_v2 = vld [vmem:[#allocation7 + $0x16c] ss:$12 sps:$4 sm:$0xff]  }
 0x3c7   : > { %14858 = vst [vmem:[#allocation26_spill] sm:$0xff] %v13402_v2 }
 0x3c8   : > { %v13277_v4 = vpack.c.bf16 %v13268_v5, %v13216_v30 }
 0x3c9   : > { %2987 = vmatpush1.bf16.msra.mxu0 %v13101_v6  ;;  %10941 = vmatpush3.bf16.msra.mxu1 %v11616_v37  ;;  %v13270_v6 = vld [vmem:[#allocation7 + $0xac] ss:$12 sps:$4 sm:$0xff]  }
 0x3ca   : > { %2988 = vmatprep.subr.bf16.mxu0 %v13105_v8  ;;  %10942 = vmatprep.subr.bf16.mxu1 %v14781_v14  ;;  %v13273_v8 = vld [vmem:[#allocation7 + $0xa8] ss:$12 sps:$4 sm:$0xff]   ;;  %14852 = vst [vmem:[#allocation20_spill] sm:$0xff] %v13277_v4  ;;  %v13384_v37 = vld [vmem:[#allocation9 + $0x18] ss:$12 sps:$4 sm:$0xff]  }
 0x3cb   : > { %14855 = vst [vmem:[#allocation23_spill] sm:$0xff] %v13384_v37 }
 0x3cd   : > { %2989 = vmatpush1.bf16.msra.mxu0 %v13108_v10  ;;  %10943 = vmatpush3.bf16.msra.mxu1 %v11617_v49  ;;  %v13281_v10 = vld [vmem:[#allocation7 + $0x94] ss:$12 sps:$4 sm:$0xff]  }
 0x3ce   : > { %2990 = vmatprep.subr.bf16.mxu0 %v13112_v1  ;;  %10944 = vmatprep.subr.bf16.mxu1 %v14781_v14  ;;  %v13286_v1 = vld [vmem:[#allocation7 + $0x90] ss:$12 sps:$4 sm:$0xff]   ;;  %v13391_v49 = vld [vmem:[#allocation9] ss:$12 sps:$4 sm:$0xff]  }
 0x3cf   : > { %14857 = vst [vmem:[#allocation25_spill] sm:$0xff] %v13391_v49 }
 0x3d1   : > { %2991 = vmatpush1.bf16.msra.mxu0 %v13118_v16  ;;  %10945 = vmatpush3.bf16.msra.mxu1 %v11618_v0  ;;  %v11626_v16 = vld [vmem:[#allocation7 + $0x98] ss:$12 sps:$4 sm:$0xff]   ;;  %v13404_v0 = vld [vmem:[#allocation7 + $0x168] ss:$12 sps:$4 sm:$0xff]  }
 0x3d2   : > { %3304 = vmatprep.subr.bf16.mxu0 %v13270_v6  ;;  %10950 = vmatprep.subr.bf16.mxu1 %v14781_v14  ;;  %14859 = vst [vmem:[#allocation27_spill] sm:$0xff] %v13404_v0 }
 0x3d4   : > { %3009 = vmatmul.mubr.bf16.vlgmr.msra.gmra.mxu0 %v13277_v4  ;;  %10947 = vmatmul.mubr.bf16.vlgmr.msra.gmra.mxu1 %v13277_v4  ;;  %v11715_v4 = vld [vmem:[#allocation7 + $0xc8] ss:$12 sps:$4 sm:$0xff]  }
 0x3d5   : > { %3305 = vmatpush1.bf16.msra.mxu0 %v13273_v8  ;;  %10951 = vmatpush3.bf16.msra.mxu1 %v11622_v13  ;;  %v11687_v13 = vld [vmem:[#allocation7 + $0x170] ss:$12 sps:$4 sm:$0xff]  }
 0x3d6   : > { %3306 = vmatprep.subr.bf16.mxu0 %v13281_v10  ;;  %10952 = vmatprep.subr.bf16.mxu1 %v14781_v14 }
 0x3d7   : > { %3336 = vmatprep.mubr.bf16.mxu0 %v14763_v15  ;;  %10966 = vmatprep.mubr.msk.bf16.mxu1 %vm12638_vm0, %v14781_v14 }
 0x3d9   : > { %3307 = vmatpush1.bf16.msra.mxu0 %v13286_v1  ;;  %10953 = vmatpush3.bf16.msra.mxu1 %v11626_v16 }
 0x3da   : > { %3308 = vmatprep.subr.bf16.mxu0 %v13290_v39  ;;  %10954 = vmatprep.subr.bf16.mxu1 %v14781_v14 }
 0x3dd   : > { %3309 = vmatpush1.bf16.msra.mxu0 %v13296_v17  ;;  %10955 = vmatpush3.bf16.msra.mxu1 %v11630_v11  ;;  %v13410_v11 = vld [vmem:[#allocation7 + $0x154] ss:$12 sps:$4 sm:$0xff]  }
 0x3de   : > { %3310 = vmatprep.subr.bf16.mxu0 %v13300_v44  ;;  %10956 = vmatprep.subr.bf16.mxu1 %v14781_v14  ;;  %14860 = vst [vmem:[#allocation28_spill] sm:$0xff] %v13410_v11 }
 0x3e1   : > { %3311 = vmatpush1.bf16.msra.mxu0 %v13303_v19  ;;  %10957 = vmatpush3.bf16.msra.mxu1 %v11634_v32  ;;  %v11691_v32 = vld [vmem:[#allocation7 + $0x158] ss:$12 sps:$4 sm:$0xff]  }
 0x3e2   : > { %3312 = vmatprep.subr.bf16.mxu0 %v13307_v22  ;;  %10958 = vmatprep.subr.bf16.mxu1 %v14781_v14 }
 0x3e5   : > { %3313 = vmatpush1.bf16.msra.mxu0 %v13310_v23  ;;  %10959 = vmatpush3.bf16.msra.mxu1 %v11638_v34 }
 0x3e6   : > { %3314 = vmatprep.subr.bf16.mxu0 %v13314_v25  ;;  %10960 = vmatprep.subr.bf16.mxu1 %v14781_v14 }
 0x3e9   : > { %3315 = vmatpush1.bf16.msra.mxu0 %v13317_v38  ;;  %10961 = vmatpush3.bf16.msra.mxu1 %v11642_v41 }
 0x3ea   : > { %3316 = vmatprep.subr.bf16.mxu0 %v13321_v45  ;;  %10962 = vmatprep.subr.bf16.mxu1 %v14781_v14 }
 0x3ed   : > { %3317 = vmatpush1.bf16.msra.mxu0 %v13324_v18  ;;  %10963 = vmatpush3.bf16.msra.mxu1 %v11646_v47  ;;  %v13419_v47 = vld [vmem:[#allocation7 + $0x13c] ss:$12 sps:$4 sm:$0xff]  }
 0x3ee   : > { %3318 = vmatprep.subr.bf16.mxu0 %v13328_v50  ;;  %10964 = vmatprep.subr.bf16.mxu1 %v14781_v14  ;;  %14862 = vst [vmem:[#allocation30_spill] sm:$0xff] %v13419_v47 }
 0x3f1   : > { %3319 = vmatpush1.bf16.msra.mxu0 %v13331_v20  ;;  %10965 = vmatpush3.bf16.msra.mxu1 %v11650_v24  ;;  %v13422_v24 = vld [vmem:[#allocation7 + $0x138] ss:$12 sps:$4 sm:$0xff]  }
 0x3f2   : > { %3549 = vmatprep.subr.bf16.mxu0 %v13335_v53  ;;  %10970 = vmatprep.subr.bf16.mxu1 %v14781_v14  ;;  %14863 = vst [vmem:[#allocation31_spill] sm:$0xff] %v13422_v24 }
 0x3f4   : > { %3337 = vmatmul.mubr.bf16.vlgmr.msra.gmra.mxu0 %v11651_v54  ;;  %10967 = vmatmul.mubr.bf16.vlgmr.msra.gmra.mxu1 %v11651_v54  ;;  %v11695_v54 = vld [vmem:[#allocation7 + $0x140] ss:$12 sps:$4 sm:$0xff]  }
 0x3f5   : > { %3550 = vmatpush1.bf16.msra.mxu0 %v13339_v48  ;;  %10971 = vmatpush3.bf16.msra.mxu1 %v11655_v56 }
 0x3f6   : > { %3551 = vmatprep.subr.bf16.mxu0 %v13343_v60  ;;  %10972 = vmatprep.subr.bf16.mxu1 %v14781_v14 }
 0x3f7   : > { %3581 = vmatprep.mubr.bf16.mxu0 %v14763_v15  ;;  %10986 = vmatprep.mubr.msk.bf16.mxu1 %vm12638_vm0, %v14781_v14 }
 0x3f9   : > { %3552 = vmatpush1.bf16.msra.mxu0 %v13346_v62  ;;  %10973 = vmatpush3.bf16.msra.mxu1 %v11659_v33  ;;  %v13426_v33 = vld [vmem:[#allocation7 + $0x124] ss:$12 sps:$4 sm:$0xff]  }
 0x3fa   : > { %3553 = vmatprep.subr.bf16.mxu0 %v13350_v21  ;;  %10974 = vmatprep.subr.bf16.mxu1 %v14781_v14  ;;  %14864 = vst [vmem:[#allocation32_spill] sm:$0xff] %v13426_v33 }
 0x3fd   : > { %3554 = vmatpush1.bf16.msra.mxu0 %v13356_v31  ;;  %10975 = vmatpush3.bf16.msra.mxu1 %v11663_v27  ;;  %v13429_v27 = vld [vmem:[#allocation7 + $0x120] ss:$12 sps:$4 sm:$0xff]  }
 0x3fe   : > { %3555 = vmatprep.subr.bf16.mxu0 %v13360_v58  ;;  %10976 = vmatprep.subr.bf16.mxu1 %v14781_v14  ;;  %14865 = vst [vmem:[#allocation33_spill] sm:$0xff] %v13429_v27 }
 0x401   : > { %3556 = vmatpush1.bf16.msra.mxu0 %v13363_v7  ;;  %10977 = vmatpush3.bf16.msra.mxu1 %v11667_v59  ;;  %v11699_v59 = vld [vmem:[#allocation7 + $0x128] ss:$12 sps:$4 sm:$0xff]  }
 0x402   : > { %3557 = vmatprep.subr.bf16.mxu0 %v13367_v55  ;;  %10978 = vmatprep.subr.bf16.mxu1 %v14781_v14 }
 0x405   : > { %3558 = vmatpush1.bf16.msra.mxu0 %v13370_v12  ;;  %10979 = vmatpush3.bf16.msra.mxu1 %v11671_v28  ;;  %v13433_v28 = vld [vmem:[#allocation7 + $0x108] ss:$12 sps:$4 sm:$0xff]  }
 0x406   : > { %3559 = vmatprep.subr.bf16.mxu0 %v13374_v29  ;;  %10980 = vmatprep.subr.bf16.mxu1 %v14781_v14  ;;  %14866 = vst [vmem:[#allocation34_spill] sm:$0xff] %v13433_v28 }
 0x409   : > { %3560 = vmatpush1.bf16.msra.mxu0 %v13377_v36  ;;  %10981 = vmatpush3.bf16.msra.mxu1 %v11675_v35  ;;  %v13435_v35 = vld [vmem:[#allocation7 + $0x10c] ss:$12 sps:$4 sm:$0xff]  }
 0x40a   : > { %3561 = vmatprep.subr.bf16.mxu0 %v13381_v26  ;;  %10982 = vmatprep.subr.bf16.mxu1 %v14781_v14  ;;  %14867 = vst [vmem:[#allocation35_spill] sm:$0xff] %v13435_v35 }
 0x40d   : > { %3562 = vmatpush1.bf16.msra.mxu0 %v13384_v37  ;;  %10983 = vmatpush3.bf16.msra.mxu1 %v11679_v40  ;;  %v11703_v40 = vld [vmem:[#allocation7 + $0x110] ss:$12 sps:$4 sm:$0xff]  }
 0x40e   : > { %3563 = vmatprep.subr.bf16.mxu0 %v13388_v46  ;;  %10984 = vmatprep.subr.bf16.mxu1 %v14781_v14 }
 0x411   : > { %3564 = vmatpush1.bf16.msra.mxu0 %v13391_v49  ;;  %10985 = vmatpush3.bf16.msra.mxu1 %v11683_v61  ;;  %v13438_v61 = vld [vmem:[#allocation7 + $0xf4] ss:$12 sps:$4 sm:$0xff]  }
 0x412   : > { %10990 = vmatprep.subr.bf16.mxu1 %v14781_v14  ;;  %3866 = vmatprep.subr.bf16.mxu0 %v13402_v2  ;;  %14868 = vst [vmem:[#allocation36_spill] sm:$0xff] %v13438_v61 }
 0x414   : > { %3582 = vmatmul.mubr.bf16.vlgmr.msra.gmra.mxu0 %v13238_v43  ;;  %10987 = vmatmul.mubr.bf16.vlgmr.msra.gmra.mxu1 %v13238_v43  ;;  %v13413_v43 = vld [vmem:[#allocation7 + $0x150] ss:$12 sps:$4 sm:$0xff]  }
 0x415   : > { %3898 = vmatprep.mubr.bf16.mxu0 %v14763_v15  ;;  %11006 = vmatprep.mubr.msk.bf16.mxu1 %vm12638_vm0, %v14781_v14  ;;  %14861 = vst [vmem:[#allocation29_spill] sm:$0xff] %v13413_v43  ;;  %v13456_v15 = vld [vmem:[#allocation7 + $0xc0] ss:$12 sps:$4 sm:$0xff]  }
 0x416   : > { %3867 = vmatpush1.bf16.msra.mxu0 %v13404_v0  ;;  %10991 = vmatpush3.bf16.msra.mxu1 %v11687_v13  ;;  %v13442_v13 = vld [vmem:[#allocation7 + $0xf0] ss:$12 sps:$4 sm:$0xff]   ;;  %14873 = vst [vmem:[#allocation41_spill] sm:$0xff] %v13456_v15 }
 0x417   : > { %10992 = vmatprep.subr.bf16.mxu1 %v14781_v14  ;;  %3868 = vmatprep.subr.bf16.mxu0 %v13410_v11  ;;  %14869 = vst [vmem:[#allocation37_spill] sm:$0xff] %v13442_v13 }
 0x41a   : > { %3869 = vmatpush1.bf16.msra.mxu0 %v13413_v43  ;;  %10993 = vmatpush3.bf16.msra.mxu1 %v11691_v32  ;;  %v11707_v32 = vld [vmem:[#allocation7 + $0xf8] ss:$12 sps:$4 sm:$0xff]  }
 0x41b   : > { %10994 = vmatprep.subr.bf16.mxu1 %v14781_v14  ;;  %3870 = vmatprep.subr.bf16.mxu0 %v13419_v47 }
 0x41e   : > { %3871 = vmatpush1.bf16.msra.mxu0 %v13422_v24  ;;  %10995 = vmatpush3.bf16.msra.mxu1 %v11695_v54 }
 0x41f   : > { %10996 = vmatprep.subr.bf16.mxu1 %v14781_v14  ;;  %3872 = vmatprep.subr.bf16.mxu0 %v13426_v33 }
 0x422   : > { %3873 = vmatpush1.bf16.msra.mxu0 %v13429_v27  ;;  %10997 = vmatpush3.bf16.msra.mxu1 %v11699_v59  ;;  %v11711_v59 = vld [vmem:[#allocation7 + $0xe0] ss:$12 sps:$4 sm:$0xff]  }
 0x423   : > { %10998 = vmatprep.subr.bf16.mxu1 %v14781_v14  ;;  %3874 = vmatprep.subr.bf16.mxu0 %v13435_v35 }
 0x426   : > { %3875 = vmatpush1.bf16.msra.mxu0 %v13433_v28  ;;  %10999 = vmatpush3.bf16.msra.mxu1 %v11703_v40  ;;  %v13453_v40 = vld [vmem:[#allocation7 + $0xc4] ss:$12 sps:$4 sm:$0xff]  }
 0x427   : > { %3876 = vmatprep.subr.bf16.mxu0 %v13438_v61  ;;  %11000 = vmatprep.subr.bf16.mxu1 %v14781_v14  ;;  %14872 = vst [vmem:[#allocation40_spill] sm:$0xff] %v13453_v40 }
 0x42a   : > { %3877 = vmatpush1.bf16.msra.mxu0 %v13442_v13  ;;  %11001 = vmatpush3.bf16.msra.mxu1 %v11707_v32  ;;  %v9836_v32 = vld [vmem:[%s14752_s7 + $0x3] sm:$0x7] }
 0x42b   : > { %11002 = vmatprep.subr.bf16.mxu1 %v14781_v14  ;;  %v2591_v61 = vrot.slane %v9836_v32, %v13032_v3 }
 0x42e   : > { %11003 = vmatpush3.bf16.msra.mxu1 %v11711_v59  ;;  %v13470_v59 = vrot.slane %v9836_v32, %v13038_v9 }
 0x42f   : > { %11004 = vmatprep.subr.bf16.mxu1 %v14781_v14 }
 0x432   : > { %11005 = vmatpush3.bf16.msra.mxu1 %v11715_v4 }
 0x433   : > { %11010 = vmatprep.subr.bf16.mxu1 %v14781_v14 }
 0x474   : > { %v13408_v16 = vpop.f32.mrf.mxu1  ;;  %v2765_v54 = vpop.f32.mrf.mxu0 }
 0x476   : > { %v10928_v34 = vpop.f32.mrf.mxu1  ;;  %v2767_v63 = vpop.f32.mrf.mxu0 }
 0x477   : > { %v13446_v34 = vld [vmem:[#allocation7 + $0xdc] ss:$12 sps:$4 sm:$0xff]   ;;  %v2768_v27 = vadd.f32 %v2767_v63, %v13470_v59 }
 0x478   : > { %v13417_v41 = vpop.f32.mrf.mxu1  ;;  %14870 = vst [vmem:[#allocation38_spill] sm:$0xff] %v13446_v34  ;;  %3878 = vmatprep.subr.bf16.mxu0 %v13446_v34  ;;  %v13463_v34 = vld [vmem:[#allocation9 + $0x16c] ss:$12 sps:$4 sm:$0xff]   ;;  %v2769_v13 = vpop.f32.mrf.mxu0 }
 0x479   : > { %14874 = vst [vmem:[#allocation42_spill] sm:$0xff] %v13463_v34  ;;  %v2770_v43 = vadd.f32 %v2769_v13, %v2591_v61 }
 0x47a   : > { %v10929_v56 = vpop.f32.mrf.mxu1 }
 0x47b   : > { %v13449_v56 = vld [vmem:[#allocation7 + $0xd8] ss:$12 sps:$4 sm:$0xff]  }
 0x47c   : > { %14871 = vst [vmem:[#allocation39_spill] sm:$0xff] %v13449_v56  ;;  %3879 = vmatpush1.bf16.msra.mxu0 %v13449_v56  ;;  %v13472_v56 = vpop.f32.mrf.mxu0 }
 0x47d   : > { %3880 = vmatprep.subr.bf16.mxu0 %v13453_v40  ;;  %v2766_v40 = vadd.f32 %v2765_v54, %v2591_v61 }
 0x480   : > { %3881 = vmatpush1.bf16.msra.mxu0 %v13456_v15 }
 0x481   : > { %4111 = vmatprep.subr.bf16.mxu0 %v13463_v34 }
 0x494   : > { %v3010_v28 = vpop.f32.mrf.mxu0  ;;  %v3053_v35 = vpop.f32.mrf.mxu1 }
 0x495   : > { %v3060_v33 = vadd.f32 %v3010_v28, %v2766_v40 }
 0x496   : > { %v3012_v24 = vpop.f32.mrf.mxu0  ;;  %v10948_v47 = vpop.f32.mrf.mxu1 }
 0x497   : > { %v9885_v15 = vmul.f32 -1.442695, %v3060_v33  ;;  %v3074_v4 = vadd.f32 %v3012_v24, %v2768_v27  ;;  %v2599_v47 = vrot.slane %v9836_v32, %v13041_v52 }
 0x498   : > { %v3014_v11 = vpop.f32.mrf.mxu0  ;;  %v3056_v34 = vpop.f32.mrf.mxu1 }
 0x499   : > { %12156 = vpow2.f32 %v9885_v15  ;;  %v3061_v14 = vadd.f32 %v3014_v11, %v2770_v43  ;;  %v9887_v49 = vmul.f32 -1.442695, %v3074_v4  ;;  %v3095_v15 = vadd.f32 %v13202_v42, %v3053_v35 }
 0x49a   : > { %v10949_v0 = vpop.f32.mrf.mxu1  ;;  %v2812_v61 = vadd.f32 %v13417_v41, %v2599_v47  ;;  %v3016_v32 = vpop.f32.mrf.mxu0 }
 0x49b   : > { %v9886_v2 = vmul.f32 -1.442695, %v3061_v14  ;;  %v2809_v14 = vadd.f32 %v13408_v16, %v2599_v47 }
 0x49d   : > { %12158 = vpow2.f32 %v9886_v2 }
 0x49e   : > { %12160 = vpow2.f32 %v9887_v49 }
 0x4a6   : > { %v12157_v54 = vpop.eup %12156 }
 0x4a7   : > { %v3068_v46 = vadd.f32 1.0, %v12157_v54 }
 0x4a9   : > { %12162 = vrcp.f32 %v3068_v46 }
 0x4aa   : > { %v12159_v37 = vpop.eup %12158 }
 0x4ab   : > { %v3069_v63 = vadd.f32 1.0, %v12159_v37  ;;  %v12161_v28 = vpop.eup %12160  ;;  %v3096_v37 = vadd.f32 %v13202_v42, %v3056_v34  ;;  %v3153_v42 = vld [vmem:[%s14752_s7] sm:$0x7] }
 0x4ac   : > { %v3082_v33 = vadd.f32 1.0, %v12161_v28  ;;  %v3158_v34 = vrot.slane %v3153_v42, %v13032_v3 }
 0x4ad   : > { %12164 = vrcp.f32 %v3069_v63 }
 0x4ae   : > { %12166 = vrcp.f32 %v3082_v33 }
 0x4b4   : > { %v13476_v24 = vpop.f32.mrf.mxu1  ;;  %v3338_v4 = vpop.f32.mrf.mxu0 }
 0x4b6   : > { %v12163_v11 = vpop.eup %12162  ;;  %v10968_v0 = vpop.f32.mrf.mxu1 }
 0x4b7   : > { %v3097_v2 = vmul.f32 %v12163_v11, %v3095_v15  ;;  %v3340_v33 = vpop.f32.mrf.mxu0  ;;  %v3339_v11 = vadd.f32 %v3338_v4, %v3158_v34 }
 0x4b8   : > { %v13480_v49 = vpop.f32.mrf.mxu1 }
 0x4b9   : > { %v3099_v46 = vadd.f32 %v3097_v2, %v2809_v14  ;;  %v3342_v41 = vpop.f32.mrf.mxu0 }
 0x4ba   : > { %v12165_v43 = vpop.eup %12164  ;;  %v10969_v27 = vpop.f32.mrf.mxu1 }
 0x4bb   : > { %12168 = vtanh.f32 %v3099_v46  ;;  %v3098_v13 = vmul.f32 %v12165_v43, %v3096_v37  ;;  %v12167_v35 = vpop.eup %12166  ;;  %v3344_v47 = vpop.f32.mrf.mxu0  ;;  %v3162_v43 = vrot.slane %v3153_v42, %v13038_v9 }
 0x4bc   : > { %v3103_v54 = vsub.f32 1.0, %v12167_v35  ;;  %v3107_v28 = vmul.f32 %v12167_v35, %v13216_v30  ;;  %v3343_v30 = vadd.f32 %v3342_v41, %v3158_v34 }
 0x4bd   : > { %v13484_v40 = vadd.f32 %v3098_v13, %v2812_v61  ;;  %v3345_v3 = vadd.f32 %v3344_v47, %v3162_v43 }
 0x4c8   : > { %v12169_v16 = vpop.eup %12168 }
 0x4c9   : > { %v3105_v63 = vmul.f32 %v12169_v16, %v3103_v54  ;;  %v3341_v16 = vadd.f32 %v3340_v33, %v3162_v43  ;;  %v13497_v33 = vld [vmem:[%s14753_s8] ss:$0 sm:$0xff] }
 0x4cb   : > { %v13487_v15 = vadd.f32 %v3107_v28, %v3105_v63 }
 0x4d4   : > { %v3583_v0 = vpop.f32.mrf.mxu0  ;;  %v3626_v14 = vpop.f32.mrf.mxu1 }
 0x4d5   : > { %v3633_v2 = vadd.f32 %v3583_v0, %v3339_v11 }
 0x4d6   : > { %v3585_v46 = vpop.f32.mrf.mxu0  ;;  %v10988_v37 = vpop.f32.mrf.mxu1 }
 0x4d7   : > { %v9942_v27 = vmul.f32 -1.442695, %v3633_v2  ;;  %v3647_v26 = vadd.f32 %v3585_v46, %v3341_v16  ;;  %v3166_v46 = vrot.slane %v3153_v42, %v13041_v52 }
 0x4d8   : > { %v3587_v61 = vpop.f32.mrf.mxu0  ;;  %v3629_v13 = vpop.f32.mrf.mxu1 }
 0x4d9   : > { %12170 = vpow2.f32 %v9942_v27  ;;  %v3634_v35 = vadd.f32 %v3587_v61, %v3343_v30  ;;  %v9944_v36 = vmul.f32 -1.442695, %v3647_v26  ;;  %v3382_v30 = vadd.f32 %v13476_v24, %v3166_v46 }
 0x4da   : > { %v10989_v54 = vpop.f32.mrf.mxu1  ;;  %v3589_v28 = vpop.f32.mrf.mxu0  ;;  %v2772_v61 = vadd.f32 %v13472_v56, %v13470_v59  ;;  %v3385_v42 = vadd.f32 %v13480_v49, %v3166_v46  ;;  %v13512_v46 = vld [vmem:[#allocation9 + $0x168] ss:$12 sps:$4 sm:$0xff]  }
 0x4db   : > { %v9943_v63 = vmul.f32 -1.442695, %v3634_v35  ;;  %v3648_v4 = vadd.f32 %v3589_v28, %v3345_v3  ;;  %v3668_v3 = vadd.f32 %v13497_v33, %v3626_v14  ;;  %v3669_v54 = vadd.f32 %v13497_v33, %v3629_v13 }
 0x4dd   : > { %12172 = vpow2.f32 %v9943_v63  ;;  %v9945_v11 = vmul.f32 -1.442695, %v3648_v4  ;;  %v3075_v63 = vadd.f32 %v3016_v32, %v2772_v61  ;;  %v14876_v61 = vmov 0  }
 0x4de   : > { %12174 = vpow2.f32 %v9944_v36 }
 0x4df   : > { %12176 = vpow2.f32 %v9945_v11  ;;  %v9888_v4 = vmul.f32 -1.442695, %v3075_v63  ;;  %v13541_v63 = vld [vmem:[#allocation9 + $0x120] ss:$12 sps:$4 sm:$0xff]  }
 0x4e6   : > { %v12171_v0 = vpop.eup %12170 }
 0x4e7   : > { %v3641_v37 = vadd.f32 1.0, %v12171_v0 }
 0x4e9   : > { %12178 = vrcp.f32 %v3641_v37 }
 0x4ea   : > { %v12173_v41 = vpop.eup %12172 }
 0x4eb   : > { %v3642_v34 = vadd.f32 1.0, %v12173_v41  ;;  %v12175_v2 = vpop.eup %12174 }
 0x4ec   : > { %v12177_v47 = vpop.eup %12176  ;;  %v3655_v26 = vadd.f32 1.0, %v12175_v2 }
 0x4ed   : > { %12180 = vrcp.f32 %v3642_v34  ;;  %v3656_v43 = vadd.f32 1.0, %v12177_v47 }
 0x4ee   : > { %12182 = vrcp.f32 %v3655_v26 }
 0x4ef   : > { %12184 = vrcp.f32 %v3656_v43 }
 0x4f6   : > { %v12179_v36 = vpop.eup %12178 }
 0x4f7   : > { %v3670_v27 = vmul.f32 %v12179_v36, %v3668_v3  ;;  %v11719_v3 = vld [vmem:[#allocation9 + $0x170] ss:$12 sps:$4 sm:$0xff]   ;;  %v13518_v36 = vld [vmem:[#allocation9 + $0x154] ss:$12 sps:$4 sm:$0xff]  }
 0x4f9   : > { %v3672_v35 = vadd.f32 %v3670_v27, %v3382_v30  ;;  %v14875_v30 = vmov 0.0   ;;  %v13527_v27 = vld [vmem:[#allocation9 + $0x13c] ss:$12 sps:$4 sm:$0xff]  }
 0x4fa   : > { %v12181_v16 = vpop.eup %12180 }
 0x4fb   : > { %12186 = vtanh.f32 %v3672_v35  ;;  %v3671_v14 = vmul.f32 %v12181_v16, %v3669_v54  ;;  %v12183_v24 = vpop.eup %12182  ;;  %v13533_v35 = vld [vmem:[#allocation9 + $0x138] ss:$12 sps:$4 sm:$0xff]   ;;  %v11727_v54 = vld [vmem:[#allocation9 + $0x140] ss:$12 sps:$4 sm:$0xff]  }
 0x4fc   : > { %v12185_v11 = vpop.eup %12184  ;;  %v3676_v37 = vsub.f32 1.0, %v12183_v24  ;;  %v3680_v13 = vmul.f32 %v12183_v24, %v13232_v51  ;;  %v13523_v51 = vld [vmem:[#allocation9 + $0x150] ss:$12 sps:$4 sm:$0xff]  }
 0x4fd   : > { %v3673_v28 = vadd.f32 %v3671_v14, %v3385_v42  ;;  %v3677_v56 = vsub.f32 1.0, %v12185_v11  ;;  %v3681_v32 = vmul.f32 %v12185_v11, %v13234_v57  ;;  %v11723_v57 = vld [vmem:[#allocation9 + $0x158] ss:$12 sps:$4 sm:$0xff]   ;;  %v11731_v42 = vld [vmem:[#allocation9 + $0x128] ss:$12 sps:$4 sm:$0xff]  }
 0x4fe   : > { %v13538_v16 = vld [vmem:[#allocation9 + $0x124] ss:$12 sps:$4 sm:$0xff]   ;;  %v13545_v14 = vld [vmem:[#allocation9 + $0x10c] ss:$12 sps:$4 sm:$0xff]  }
 0x4ff   : > { %12188 = vtanh.f32 %v3673_v28  ;;  %v11735_v28 = vld [vmem:[#allocation9 + $0x110] ss:$12 sps:$4 sm:$0xff]  }
 0x500   : > { %12190 = vpow2.f32 %v9888_v4  ;;  %v13552_v4 = vld [vmem:[#allocation9 + $0xf4] ss:$12 sps:$4 sm:$0xff]   ;;  %v13555_v11 = vld [vmem:[#allocation9 + $0xf0] ss:$12 sps:$4 sm:$0xff]  }
 0x508   : > { %v12187_v0 = vpop.eup %12186 }
 0x509   : > { %v3678_v59 = vmul.f32 %v12187_v0, %v3676_v37  ;;  %v11739_v0 = vld [vmem:[#allocation9 + $0xf8] ss:$12 sps:$4 sm:$0xff]   ;;  %v13559_v37 = vld [vmem:[#allocation9 + $0xdc] ss:$12 sps:$4 sm:$0xff]  }
 0x50b   : > { %v13508_v2 = vadd.f32 %v3680_v13, %v3678_v59  ;;  %v13566_v13 = vld [vmem:[#allocation9 + $0xc4] ss:$12 sps:$4 sm:$0xff]  }
 0x50c   : > { %v12189_v41 = vpop.eup %12188 }
 0x50d   : > { %v3679_v34 = vmul.f32 %v12189_v41, %v3677_v56  ;;  %v12191_v47 = vpop.eup %12190  ;;  %v13562_v41 = vld [vmem:[#allocation9 + $0xd8] ss:$12 sps:$4 sm:$0xff]  }
 0x50e   : > { %v3083_v43 = vadd.f32 1.0, %v12191_v47 }
 0x50f   : > { %v13510_v49 = vadd.f32 %v3681_v32, %v3679_v34  ;;  %v11743_v34 = vld [vmem:[#allocation9 + $0xe0] ss:$12 sps:$4 sm:$0xff]  }
 0x510   : > { %12192 = vrcp.f32 %v3083_v43  ;;  %v11747_v43 = vld [vmem:[#allocation9 + $0xc8] ss:$12 sps:$4 sm:$0xff]  }
 0x511   : > { %v13516_v26 = vpack.c.bf16 %v13510_v49, %v13508_v2  ;;  %12194 = vtanh.f32 %v13484_v40  ;;  %v13548_v40 = vld [vmem:[#allocation9 + $0x108] ss:$12 sps:$4 sm:$0xff]  }
 0x513   : > { %3899 = vmatmul.mubr.bf16.vlgmr.msra.gmra.mxu0 %v13516_v26  ;;  %11007 = vmatmul.mubr.bf16.vlgmr.msra.gmra.mxu1 %v13516_v26 }
 0x514   : > { %4112 = vmatpush1.bf16.msra.mxu0 %v13512_v46  ;;  %11011 = vmatpush3.bf16.msra.mxu1 %v11719_v3  ;;  %v13570_v3 = vld [vmem:[#allocation9 + $0xc0] ss:$12 sps:$4 sm:$0xff]  }
 0x515   : > { %4113 = vmatprep.subr.bf16.mxu0 %v13518_v36  ;;  %11012 = vmatprep.subr.bf16.mxu1 %v14875_v30 }
 0x516   : > { %4143 = vmatprep.mubr.bf16.mxu0 %v14876_v61  ;;  %11026 = vmatprep.mubr.msk.bf16.mxu1 %vm12638_vm0, %v14875_v30 }
 0x518   : > { %4114 = vmatpush1.bf16.msra.mxu0 %v13523_v51  ;;  %11013 = vmatpush3.bf16.msra.mxu1 %v11723_v57 }
 0x519   : > { %4115 = vmatprep.subr.bf16.mxu0 %v13527_v27  ;;  %11014 = vmatprep.subr.bf16.mxu1 %v14875_v30 }
 0x51c   : > { %4116 = vmatpush1.bf16.msra.mxu0 %v13533_v35  ;;  %11015 = vmatpush3.bf16.msra.mxu1 %v11727_v54  ;;  %v11748_v54 = vld [vmem:[#allocation7 + $0xb0] ss:$12 sps:$4 sm:$0xff]  }
 0x51d   : > { %4117 = vmatprep.subr.bf16.mxu0 %v13538_v16  ;;  %11016 = vmatprep.subr.bf16.mxu1 %v14875_v30  ;;  %v12193_v24 = vpop.eup %12192 }
 0x51e   : > { %v12195_v56 = vpop.eup %12194  ;;  %v3104_v59 = vsub.f32 1.0, %v12193_v24  ;;  %v3108_v47 = vmul.f32 %v12193_v24, %v13268_v5  ;;  %v11749_v5 = vld [vmem:[#allocation7 + $0x98] ss:$12 sps:$4 sm:$0xff]  }
 0x51f   : > { %v14892_v24 = vld [vmem:[#allocation34_spill] sm:$0xff] }
 0x520   : > { %4118 = vmatpush1.bf16.msra.mxu0 %v13541_v63  ;;  %11017 = vmatpush3.bf16.msra.mxu1 %v11731_v42  ;;  %v3106_v32 = vmul.f32 %v12195_v56, %v3104_v59  ;;  %v14894_v56 = vld [vmem:[#allocation37_spill] sm:$0xff]  ;;  %v14895_v59 = vld [vmem:[#allocation38_spill] sm:$0xff] }
 0x521   : > { %4119 = vmatprep.subr.bf16.mxu0 %v13545_v14  ;;  %11018 = vmatprep.subr.bf16.mxu1 %v14875_v30 }
 0x522   : > { %v13574_v57 = vadd.f32 %v3108_v47, %v3106_v32  ;;  %v14897_v32 = vld [vmem:[#allocation40_spill] sm:$0xff]  ;;  %v14898_v47 = vld [vmem:[#allocation41_spill] sm:$0xff] }
 0x524   : > { %4120 = vmatpush1.bf16.msra.mxu0 %v13548_v40  ;;  %11019 = vmatpush3.bf16.msra.mxu1 %v11735_v28  ;;  %v13579_v42 = vpack.c.bf16 %v13574_v57, %v13487_v15  ;;  %v14890_v28 = vld [vmem:[#allocation33_spill] sm:$0xff] }
 0x525   : > { %4121 = vmatprep.subr.bf16.mxu0 %v13552_v4  ;;  %11020 = vmatprep.subr.bf16.mxu1 %v14875_v30 }
 0x526   : > { %14877 = vst [vmem:[#allocation43_spill] sm:$0xff] %v13579_v42 }
 0x528   : > { %4122 = vmatpush1.bf16.msra.mxu0 %v13555_v11  ;;  %11021 = vmatpush3.bf16.msra.mxu1 %v11739_v0  ;;  %v14893_v0 = vld [vmem:[#allocation36_spill] sm:$0xff] }
 0x529   : > { %4123 = vmatprep.subr.bf16.mxu0 %v13559_v37  ;;  %11022 = vmatprep.subr.bf16.mxu1 %v14875_v30 }
 0x52c   : > { %4124 = vmatpush1.bf16.msra.mxu0 %v13562_v41  ;;  %11023 = vmatpush3.bf16.msra.mxu1 %v11743_v34  ;;  %v14896_v34 = vld [vmem:[#allocation39_spill] sm:$0xff] }
 0x52d   : > { %4125 = vmatprep.subr.bf16.mxu0 %v13566_v13  ;;  %11024 = vmatprep.subr.bf16.mxu1 %v14875_v30 }
 0x530   : > { %4126 = vmatpush1.bf16.msra.mxu0 %v13570_v3  ;;  %11025 = vmatpush3.bf16.msra.mxu1 %v11747_v43  ;;  %v14899_v43 = vld [vmem:[#allocation42_spill] sm:$0xff] }
 0x531   : > { %4439 = vmatprep.subr.bf16.mxu0 %v13270_v6  ;;  %11030 = vmatprep.subr.bf16.mxu1 %v14875_v30  ;;  %v11750_v6 = vld [vmem:[#allocation7 + $0x80] ss:$12 sps:$4 sm:$0xff]  }
 0x533   : > { %4144 = vmatmul.mubr.bf16.vlgmr.msra.gmra.mxu0 %v13579_v42  ;;  %11027 = vmatmul.mubr.bf16.vlgmr.msra.gmra.mxu1 %v13579_v42  ;;  %v13930_v42 = vld [vmem:[#allocation7 + $0xc0] ss:$12 sps:$4 sm:$0xff]  }
 0x534   : > { %4440 = vmatpush1.bf16.msra.mxu0 %v13273_v8  ;;  %11031 = vmatpush3.bf16.msra.mxu1 %v11748_v54  ;;  %v11751_v8 = vld [vmem:[#allocation7 + $0x68] ss:$12 sps:$4 sm:$0xff]   ;;  %v11765_v54 = vld [vmem:[#allocation7 + $0x170] ss:$12 sps:$4 sm:$0xff]  }
 0x535   : > { %4441 = vmatprep.subr.bf16.mxu0 %v13281_v10  ;;  %11032 = vmatprep.subr.bf16.mxu1 %v14875_v30  ;;  %v11752_v10 = vld [vmem:[#allocation7 + $0x50] ss:$12 sps:$4 sm:$0xff]  }
 0x536   : > { %4471 = vmatprep.mubr.bf16.mxu0 %v14876_v61  ;;  %11046 = vmatprep.mubr.msk.bf16.mxu1 %vm12638_vm0, %v14875_v30 }
 0x538   : > { %4442 = vmatpush1.bf16.msra.mxu0 %v13286_v1  ;;  %11033 = vmatpush3.bf16.msra.mxu1 %v11749_v5  ;;  %v11753_v1 = vld [vmem:[#allocation7 + $0x38] ss:$12 sps:$4 sm:$0xff]  }
 0x539   : > { %4443 = vmatprep.subr.bf16.mxu0 %v13290_v39  ;;  %11034 = vmatprep.subr.bf16.mxu1 %v14875_v30  ;;  %v11754_v39 = vld [vmem:[#allocation7 + $0x20] ss:$12 sps:$4 sm:$0xff]  }
 0x53c   : > { %4444 = vmatpush1.bf16.msra.mxu0 %v13296_v17  ;;  %11035 = vmatpush3.bf16.msra.mxu1 %v11750_v6  ;;  %v11755_v17 = vld [vmem:[#allocation7 + $0x8] ss:$12 sps:$4 sm:$0xff]   ;;  %v11766_v6 = vld [vmem:[#allocation7 + $0x158] ss:$12 sps:$4 sm:$0xff]  }
 0x53d   : > { %4445 = vmatprep.subr.bf16.mxu0 %v13300_v44  ;;  %11036 = vmatprep.subr.bf16.mxu1 %v14875_v30  ;;  %v11756_v44 = vld [vmem:[%s12824_s25 + $0x18] sm:$0xff]  }
 0x540   : > { %4446 = vmatpush1.bf16.msra.mxu0 %v13303_v19  ;;  %11037 = vmatpush3.bf16.msra.mxu1 %v11751_v8  ;;  %v11757_v19 = vld [vmem:[#allocation9 + $0xb0] ss:$12 sps:$4 sm:$0xff]  }
 0x541   : > { %4447 = vmatprep.subr.bf16.mxu0 %v13307_v22  ;;  %11038 = vmatprep.subr.bf16.mxu1 %v14875_v30  ;;  %v11758_v22 = vld [vmem:[#allocation9 + $0x98] ss:$12 sps:$4 sm:$0xff]  }
 0x544   : > { %4448 = vmatpush1.bf16.msra.mxu0 %v13310_v23  ;;  %11039 = vmatpush3.bf16.msra.mxu1 %v11752_v10  ;;  %v11759_v23 = vld [vmem:[#allocation9 + $0x80] ss:$12 sps:$4 sm:$0xff]  }
 0x545   : > { %4449 = vmatprep.subr.bf16.mxu0 %v13314_v25  ;;  %11040 = vmatprep.subr.bf16.mxu1 %v14875_v30  ;;  %v11760_v25 = vld [vmem:[#allocation9 + $0x68] ss:$12 sps:$4 sm:$0xff]  }
 0x548   : > { %4450 = vmatpush1.bf16.msra.mxu0 %v13317_v38  ;;  %11041 = vmatpush3.bf16.msra.mxu1 %v11753_v1  ;;  %v11761_v38 = vld [vmem:[#allocation9 + $0x50] ss:$12 sps:$4 sm:$0xff]   ;;  %v11767_v1 = vld [vmem:[#allocation7 + $0x140] ss:$12 sps:$4 sm:$0xff]  }
 0x549   : > { %4451 = vmatprep.subr.bf16.mxu0 %v13321_v45  ;;  %11042 = vmatprep.subr.bf16.mxu1 %v14875_v30  ;;  %v11762_v45 = vld [vmem:[#allocation9 + $0x38] ss:$12 sps:$4 sm:$0xff]  }
 0x54c   : > { %4452 = vmatpush1.bf16.msra.mxu0 %v13324_v18  ;;  %11043 = vmatpush3.bf16.msra.mxu1 %v11754_v39  ;;  %v14878_v18 = vld [vmem:[#allocation21_spill] sm:$0xff] }
 0x54d   : > { %4453 = vmatprep.subr.bf16.mxu0 %v13328_v50  ;;  %11044 = vmatprep.subr.bf16.mxu1 %v14875_v30  ;;  %v11763_v50 = vld [vmem:[#allocation9 + $0x20] ss:$12 sps:$4 sm:$0xff]  }
 0x550   : > { %4454 = vmatpush1.bf16.msra.mxu0 %v13331_v20  ;;  %11045 = vmatpush3.bf16.msra.mxu1 %v11755_v17  ;;  %v14879_v20 = vld [vmem:[#allocation22_spill] sm:$0xff]  ;;  %v11768_v17 = vld [vmem:[#allocation7 + $0x128] ss:$12 sps:$4 sm:$0xff]  }
 0x551   : > { %4684 = vmatprep.subr.bf16.mxu0 %v13335_v53  ;;  %11050 = vmatprep.subr.bf16.mxu1 %v14875_v30  ;;  %v14880_v53 = vld [vmem:[#allocation23_spill] sm:$0xff] }
 0x553   : > { %4472 = vmatmul.mubr.bf16.vlgmr.msra.gmra.mxu0 %v11756_v44  ;;  %11047 = vmatmul.mubr.bf16.vlgmr.msra.gmra.mxu1 %v11756_v44  ;;  %v11769_v44 = vld [vmem:[#allocation7 + $0x110] ss:$12 sps:$4 sm:$0xff]  }
 0x554   : > { %4685 = vmatpush1.bf16.msra.mxu0 %v13339_v48  ;;  %11051 = vmatpush3.bf16.msra.mxu1 %v11757_v19  ;;  %v11764_v48 = vld [vmem:[#allocation9 + $0x8] ss:$12 sps:$4 sm:$0xff]   ;;  %v11770_v19 = vld [vmem:[#allocation7 + $0xf8] ss:$12 sps:$4 sm:$0xff]  }
 0x555   : > { %4686 = vmatprep.subr.bf16.mxu0 %v13343_v60  ;;  %11052 = vmatprep.subr.bf16.mxu1 %v14875_v30  ;;  %v14881_v60 = vld [vmem:[#allocation24_spill] sm:$0xff] }
 0x556   : > { %4716 = vmatprep.mubr.bf16.mxu0 %v14876_v61  ;;  %11066 = vmatprep.mubr.msk.bf16.mxu1 %vm12638_vm0, %v14875_v30 }
 0x558   : > { %4687 = vmatpush1.bf16.msra.mxu0 %v13346_v62  ;;  %11053 = vmatpush3.bf16.msra.mxu1 %v11758_v22  ;;  %v14882_v62 = vld [vmem:[#allocation25_spill] sm:$0xff] }
 0x559   : > { %4688 = vmatprep.subr.bf16.mxu0 %v13350_v21  ;;  %11054 = vmatprep.subr.bf16.mxu1 %v14875_v30  ;;  %v14883_v21 = vld [vmem:[#allocation26_spill] sm:$0xff] }
 0x55c   : > { %4689 = vmatpush1.bf16.msra.mxu0 %v13356_v31  ;;  %11055 = vmatpush3.bf16.msra.mxu1 %v11759_v23  ;;  %v14884_v31 = vld [vmem:[#allocation27_spill] sm:$0xff] }
 0x55d   : > { %4690 = vmatprep.subr.bf16.mxu0 %v13360_v58  ;;  %11056 = vmatprep.subr.bf16.mxu1 %v14875_v30  ;;  %v14885_v58 = vld [vmem:[#allocation28_spill] sm:$0xff] }
 0x55e   : > { %v11771_v23 = vld [vmem:[#allocation7 + $0xe0] ss:$12 sps:$4 sm:$0xff]  }
 0x560   : > { %4691 = vmatpush1.bf16.msra.mxu0 %v13363_v7  ;;  %11057 = vmatpush3.bf16.msra.mxu1 %v11760_v25  ;;  %v14886_v7 = vld [vmem:[#allocation29_spill] sm:$0xff] }
 0x561   : > { %4692 = vmatprep.subr.bf16.mxu0 %v13367_v55  ;;  %11058 = vmatprep.subr.bf16.mxu1 %v14875_v30  ;;  %v14887_v55 = vld [vmem:[#allocation30_spill] sm:$0xff] }
 0x564   : > { %4693 = vmatpush1.bf16.msra.mxu0 %v13370_v12  ;;  %11059 = vmatpush3.bf16.msra.mxu1 %v11761_v38  ;;  %v14888_v12 = vld [vmem:[#allocation31_spill] sm:$0xff]  ;;  %v11772_v38 = vld [vmem:[#allocation7 + $0xc8] ss:$12 sps:$4 sm:$0xff]  }
 0x565   : > { %4694 = vmatprep.subr.bf16.mxu0 %v13374_v29  ;;  %11060 = vmatprep.subr.bf16.mxu1 %v14875_v30  ;;  %v14889_v29 = vld [vmem:[#allocation32_spill] sm:$0xff] }
 0x568   : > { %4695 = vmatpush1.bf16.msra.mxu0 %v14878_v18  ;;  %11061 = vmatpush3.bf16.msra.mxu1 %v11762_v45  ;;  %v9947_v45 = vld [vmem:[%s14752_s7 + $0x3] sm:$0x7] }
 0x569   : > { %4696 = vmatprep.subr.bf16.mxu0 %v14879_v20  ;;  %11062 = vmatprep.subr.bf16.mxu1 %v14875_v30 }
 0x56c   : > { %4697 = vmatpush1.bf16.msra.mxu0 %v14880_v53  ;;  %11063 = vmatpush3.bf16.msra.mxu1 %v11763_v50  ;;  %v14900_v50 = vld [vmem:[#allocation19_spill] sm:$0xff]  ;;  %v3730_v53 = vrot.slane %v9947_v45, %v13038_v9 }
 0x56d   : > { %4698 = vmatprep.subr.bf16.mxu0 %v14881_v60  ;;  %11064 = vmatprep.subr.bf16.mxu1 %v14875_v30  ;;  %v3726_v20 = vrot.slane %v9947_v45, %v14900_v50  ;;  %14923 = vst [vmem:[#allocation19_spill] sm:$0xff] %v13930_v42 }
 0x570   : > { %4699 = vmatpush1.bf16.msra.mxu0 %v14882_v62  ;;  %11065 = vmatpush3.bf16.msra.mxu1 %v11764_v48 }
 0x571   : > { %5001 = vmatprep.subr.bf16.mxu0 %v14883_v21  ;;  %11070 = vmatprep.subr.bf16.mxu1 %v14875_v30 }
 0x573   : > { %4717 = vmatmul.mubr.bf16.vlgmr.msra.gmra.mxu0 %v13516_v26  ;;  %11067 = vmatmul.mubr.bf16.vlgmr.msra.gmra.mxu1 %v13516_v26  ;;  %v14891_v26 = vld [vmem:[#allocation35_spill] sm:$0xff] }
 0x574   : > { %5002 = vmatpush1.bf16.msra.mxu0 %v14884_v31  ;;  %5033 = vmatprep.mubr.bf16.mxu0 %v14876_v61 }
 0x575   : > { %5003 = vmatprep.subr.bf16.mxu0 %v14885_v58  ;;  %11086 = vmatprep.mubr.msk.bf16.mxu1 %vm12638_vm0, %v14875_v30 }
 0x576   : > { %11071 = vmatpush3.bf16.msra.mxu1 %v11765_v54 }
 0x577   : > { %11072 = vmatprep.subr.bf16.mxu1 %v14875_v30 }
 0x578   : > { %5004 = vmatpush1.bf16.msra.mxu0 %v14886_v7 }
 0x579   : > { %5005 = vmatprep.subr.bf16.mxu0 %v14887_v55 }
 0x57a   : > { %11073 = vmatpush3.bf16.msra.mxu1 %v11766_v6 }
 0x57b   : > { %11074 = vmatprep.subr.bf16.mxu1 %v14875_v30 }
 0x57c   : > { %5006 = vmatpush1.bf16.msra.mxu0 %v14888_v12 }
 0x57d   : > { %5007 = vmatprep.subr.bf16.mxu0 %v14889_v29 }
 0x57e   : > { %11075 = vmatpush3.bf16.msra.mxu1 %v11767_v1 }
 0x57f   : > { %11076 = vmatprep.subr.bf16.mxu1 %v14875_v30 }
 0x580   : > { %5008 = vmatpush1.bf16.msra.mxu0 %v14890_v28 }
 0x581   : > { %5009 = vmatprep.subr.bf16.mxu0 %v14891_v26 }
 0x582   : > { %11077 = vmatpush3.bf16.msra.mxu1 %v11768_v17 }
 0x583   : > { %11078 = vmatprep.subr.bf16.mxu1 %v14875_v30 }
 0x584   : > { %5010 = vmatpush1.bf16.msra.mxu0 %v14892_v24 }
 0x585   : > { %5011 = vmatprep.subr.bf16.mxu0 %v14893_v0 }
 0x586   : > { %11079 = vmatpush3.bf16.msra.mxu1 %v11769_v44  ;;  %v13681_v44 = vld [vmem:[%s14753_s8 + $0x1] ss:$0 sm:$0xff] }
 0x587   : > { %11080 = vmatprep.subr.bf16.mxu1 %v14875_v30 }
 0x588   : > { %5012 = vmatpush1.bf16.msra.mxu0 %v14894_v56 }
 0x589   : > { %5013 = vmatprep.subr.bf16.mxu0 %v14895_v59 }
 0x58a   : > { %11081 = vmatpush3.bf16.msra.mxu1 %v11770_v19 }
 0x58b   : > { %11082 = vmatprep.subr.bf16.mxu1 %v14875_v30 }
 0x58c   : > { %5014 = vmatpush1.bf16.msra.mxu0 %v14896_v34 }
 0x58d   : > { %5015 = vmatprep.subr.bf16.mxu0 %v14897_v32 }
 0x58e   : > { %11083 = vmatpush3.bf16.msra.mxu1 %v11771_v23 }
 0x58f   : > { %11084 = vmatprep.subr.bf16.mxu1 %v14875_v30 }
 0x590   : > { %5016 = vmatpush1.bf16.msra.mxu0 %v14898_v47 }
 0x591   : > { %5246 = vmatprep.subr.bf16.mxu0 %v14899_v43 }
 0x592   : > { %11085 = vmatpush3.bf16.msra.mxu1 %v11772_v38 }
 0x593   : > { %11090 = vmatprep.subr.bf16.mxu1 %v14875_v30 }
 0x5d3   : > { %v13661_v5 = vpop.f32.mrf.mxu1  ;;  %v3900_v22 = vpop.f32.mrf.mxu0 }
 0x5d4   : > { %v3901_v60 = vadd.f32 %v3900_v22, %v3726_v20  ;;  %v3734_v22 = vrot.slane %v9947_v45, %v13041_v52 }
 0x5d5   : > { %v11008_v8 = vpop.f32.mrf.mxu1  ;;  %v3902_v25 = vpop.f32.mrf.mxu0 }
 0x5d6   : > { %v3903_v31 = vadd.f32 %v3902_v25, %v3730_v53 }
 0x5d7   : > { %v13664_v10 = vpop.f32.mrf.mxu1  ;;  %v3904_v18 = vpop.f32.mrf.mxu0 }
 0x5d8   : > { %v3905_v12 = vadd.f32 %v3904_v18, %v3726_v20 }
 0x5d9   : > { %v11009_v39 = vpop.f32.mrf.mxu1  ;;  %v3906_v48 = vpop.f32.mrf.mxu0 }
 0x5da   : > { %v3907_v32 = vadd.f32 %v3906_v48, %v3730_v53  ;;  %v3944_v48 = vadd.f32 %v13661_v5, %v3734_v22 }
 0x5f3   : > { %v4145_v62 = vpop.f32.mrf.mxu0  ;;  %v4188_v21 = vpop.f32.mrf.mxu1 }
 0x5f4   : > { %v4195_v58 = vadd.f32 %v4145_v62, %v3901_v60  ;;  %v4230_v38 = vadd.f32 %v13681_v44, %v4188_v21 }
 0x5f5   : > { %v4147_v7 = vpop.f32.mrf.mxu0  ;;  %v11028_v55 = vpop.f32.mrf.mxu1 }
 0x5f6   : > { %v9996_v29 = vmul.f32 -1.442695, %v4195_v58  ;;  %v4209_v28 = vadd.f32 %v4147_v7, %v3903_v31  ;;  %v3947_v55 = vadd.f32 %v13664_v10, %v3734_v22  ;;  %v4288_v10 = vld [vmem:[%s14752_s7] sm:$0x7] }
 0x5f7   : > { %v4149_v26 = vpop.f32.mrf.mxu0  ;;  %v4191_v24 = vpop.f32.mrf.mxu1 }
 0x5f8   : > { %12196 = vpow2.f32 %v9996_v29  ;;  %v4196_v0 = vadd.f32 %v4149_v26, %v3905_v12  ;;  %v9998_v43 = vmul.f32 -1.442695, %v4209_v28  ;;  %v4231_v58 = vadd.f32 %v13681_v44, %v4191_v24 }
 0x5f9   : > { %v11029_v56 = vpop.f32.mrf.mxu1  ;;  %v4151_v34 = vpop.f32.mrf.mxu0 }
 0x5fa   : > { %v9997_v59 = vmul.f32 -1.442695, %v4196_v0  ;;  %v4210_v47 = vadd.f32 %v4151_v34, %v3907_v32 }
 0x5fc   : > { %12198 = vpow2.f32 %v9997_v59  ;;  %v9999_v54 = vmul.f32 -1.442695, %v4210_v47 }
 0x5fd   : > { %12200 = vpow2.f32 %v9998_v43 }
 0x5fe   : > { %12202 = vpow2.f32 %v9999_v54 }
 0x605   : > { %v12197_v6 = vpop.eup %12196 }
 0x606   : > { %v4203_v8 = vadd.f32 1.0, %v12197_v6 }
 0x608   : > { %12204 = vrcp.f32 %v4203_v8  ;;  %v4293_v8 = vrot.slane %v4288_v10, %v14900_v50 }
 0x609   : > { %v12199_v1 = vpop.eup %12198 }
 0x60a   : > { %v4204_v39 = vadd.f32 1.0, %v12199_v1  ;;  %v12201_v17 = vpop.eup %12200 }
 0x60b   : > { %v12203_v19 = vpop.eup %12202  ;;  %v4217_v23 = vadd.f32 1.0, %v12201_v17 }
 0x60c   : > { %12206 = vrcp.f32 %v4204_v39  ;;  %v4218_v20 = vadd.f32 1.0, %v12203_v19 }
 0x60d   : > { %12208 = vrcp.f32 %v4217_v23 }
 0x60e   : > { %12210 = vrcp.f32 %v4218_v20 }
 0x613   : > { %v13684_v25 = vpop.f32.mrf.mxu1  ;;  %v4473_v28 = vpop.f32.mrf.mxu0 }
 0x614   : > { %v4474_v17 = vadd.f32 %v4473_v28, %v4293_v8 }
 0x615   : > { %v12205_v18 = vpop.eup %12204  ;;  %v11048_v53 = vpop.f32.mrf.mxu1 }
 0x616   : > { %v4232_v60 = vmul.f32 %v12205_v18, %v4230_v38  ;;  %v4475_v34 = vpop.f32.mrf.mxu0  ;;  %v4297_v18 = vrot.slane %v4288_v10, %v13038_v9 }
 0x617   : > { %v13688_v62 = vpop.f32.mrf.mxu1 }
 0x618   : > { %v4234_v31 = vadd.f32 %v4232_v60, %v3944_v48  ;;  %v4477_v6 = vpop.f32.mrf.mxu0 }
 0x619   : > { %v12207_v7 = vpop.eup %12206  ;;  %v11049_v45 = vpop.f32.mrf.mxu1  ;;  %v4478_v20 = vadd.f32 %v4477_v6, %v4293_v8 }
 0x61a   : > { %12212 = vtanh.f32 %v4234_v31  ;;  %v4233_v12 = vmul.f32 %v12207_v7, %v4231_v58  ;;  %v12209_v29 = vpop.eup %12208  ;;  %v4479_v39 = vpop.f32.mrf.mxu0  ;;  %v4476_v58 = vadd.f32 %v4475_v34, %v4297_v18  ;;  %v4301_v34 = vrot.slane %v4288_v10, %v13041_v52 }
 0x61b   : > { %v12211_v26 = vpop.eup %12210  ;;  %v4238_v5 = vsub.f32 1.0, %v12209_v29  ;;  %v4242_v59 = vmul.f32 %v12209_v29, %v13487_v15 }
 0x61c   : > { %v4235_v21 = vadd.f32 %v4233_v12, %v3947_v55  ;;  %v4239_v32 = vsub.f32 1.0, %v12211_v26  ;;  %v4243_v54 = vmul.f32 %v12211_v26, %v13574_v57  ;;  %v4480_v55 = vadd.f32 %v4479_v39, %v4297_v18 }
 0x61d   : > { %v4517_v8 = vadd.f32 %v13684_v25, %v4301_v34 }
 0x61e   : > { %12214 = vtanh.f32 %v4235_v21 }
 0x627   : > { %v12213_v0 = vpop.eup %12212 }
 0x628   : > { %v4240_v56 = vmul.f32 %v12213_v0, %v4238_v5 }
 0x62a   : > { %v13693_v24 = vadd.f32 %v4242_v59, %v4240_v56 }
 0x62b   : > { %v12215_v47 = vpop.eup %12214 }
 0x62c   : > { %v4241_v43 = vmul.f32 %v12215_v47, %v4239_v32 }
 0x62e   : > { %v13700_v1 = vadd.f32 %v4243_v54, %v4241_v43 }
 0x633   : > { %v4718_v15 = vpop.f32.mrf.mxu0  ;;  %v4761_v19 = vpop.f32.mrf.mxu1 }
 0x634   : > { %v4768_v22 = vadd.f32 %v4718_v15, %v4474_v17  ;;  %v4803_v47 = vadd.f32 %v13497_v33, %v4761_v19 }
 0x635   : > { %v4720_v23 = vpop.f32.mrf.mxu0  ;;  %v11068_v38 = vpop.f32.mrf.mxu1 }
 0x636   : > { %v10053_v53 = vmul.f32 -1.442695, %v4768_v22  ;;  %v4782_v12 = vadd.f32 %v4720_v23, %v4476_v58  ;;  %v4520_v23 = vadd.f32 %v13688_v62, %v4301_v34  ;;  %v11773_v62 = vld [vmem:[#allocation9 + $0x170] ss:$12 sps:$4 sm:$0xff]   ;;  %v11808_v34 = vld [vmem:[#allocation7 + $0x20] ss:$12 sps:$4 sm:$0xff]  }
 0x637   : > { %v4722_v48 = vpop.f32.mrf.mxu0  ;;  %v4764_v60 = vpop.f32.mrf.mxu1 }
 0x638   : > { %12216 = vpow2.f32 %v10053_v53  ;;  %v4769_v57 = vadd.f32 %v4722_v48, %v4478_v20  ;;  %v10055_v29 = vmul.f32 -1.442695, %v4782_v12  ;;  %v4804_v15 = vadd.f32 %v13497_v33, %v4764_v60  ;;  %v13777_v12 = vld [vmem:[#allocation7 + $0x60] ss:$12 sps:$4 sm:$0xff]  }
 0x639   : > { %v11069_v31 = vpop.f32.mrf.mxu1  ;;  %v4724_v45 = vpop.f32.mrf.mxu0 }
 0x63a   : > { %v10054_v7 = vmul.f32 -1.442695, %v4769_v57  ;;  %v4783_v21 = vadd.f32 %v4724_v45, %v4480_v55  ;;  %v11774_v55 = vld [vmem:[#allocation9 + $0x158] ss:$12 sps:$4 sm:$0xff]  }
 0x63c   : > { %12218 = vpow2.f32 %v10054_v7  ;;  %v10056_v28 = vmul.f32 -1.442695, %v4783_v21  ;;  %v11796_v21 = vld [vmem:[#allocation7 + $0x68] ss:$12 sps:$4 sm:$0xff]  }
 0x63d   : > { %12220 = vpow2.f32 %v10055_v29  ;;  %v13781_v29 = vld [vmem:[#allocation7 + $0x4c] ss:$12 sps:$4 sm:$0xff]  }
 0x63e   : > { %12222 = vpow2.f32 %v10056_v28  ;;  %v13784_v28 = vld [vmem:[#allocation7 + $0x48] ss:$12 sps:$4 sm:$0xff]  }
 0x645   : > { %v12217_v26 = vpop.eup %12216 }
 0x646   : > { %v4776_v5 = vadd.f32 1.0, %v12217_v26  ;;  %v11800_v26 = vld [vmem:[#allocation7 + $0x50] ss:$12 sps:$4 sm:$0xff]  }
 0x648   : > { %12224 = vrcp.f32 %v4776_v5  ;;  %v13788_v5 = vld [vmem:[#allocation7 + $0x34] ss:$12 sps:$4 sm:$0xff]  }
 0x649   : > { %v12219_v0 = vpop.eup %12218 }
 0x64a   : > { %v4777_v56 = vadd.f32 1.0, %v12219_v0  ;;  %v12221_v59 = vpop.eup %12220  ;;  %v13791_v0 = vld [vmem:[#allocation7 + $0x30] ss:$12 sps:$4 sm:$0xff]  }
 0x64b   : > { %v12223_v32 = vpop.eup %12222  ;;  %v4790_v43 = vadd.f32 1.0, %v12221_v59  ;;  %v13795_v59 = vld [vmem:[#allocation7 + $0x1c] ss:$12 sps:$4 sm:$0xff]  }
 0x64c   : > { %12226 = vrcp.f32 %v4777_v56  ;;  %v4791_v6 = vadd.f32 1.0, %v12223_v32  ;;  %v11804_v56 = vld [vmem:[#allocation7 + $0x38] ss:$12 sps:$4 sm:$0xff]  }
 0x64d   : > { %12228 = vrcp.f32 %v4790_v43  ;;  %v13798_v32 = vld [vmem:[#allocation7 + $0x18] ss:$12 sps:$4 sm:$0xff]   ;;  %v13805_v43 = vld [vmem:[#allocation7] ss:$12 sps:$4 sm:$0xff]  }
 0x64e   : > { %12230 = vrcp.f32 %v4791_v6  ;;  %v13809_v6 = vld [vmem:[#allocation9 + $0xac] ss:$12 sps:$4 sm:$0xff]  }
 0x655   : > { %v12225_v54 = vpop.eup %12224 }
 0x656   : > { %v4805_v39 = vmul.f32 %v12225_v54, %v4803_v47  ;;  %v13802_v47 = vld [vmem:[#allocation7 + $0x4] ss:$12 sps:$4 sm:$0xff]   ;;  %v11812_v54 = vld [vmem:[#allocation7 + $0x8] ss:$12 sps:$4 sm:$0xff]  }
 0x658   : > { %v4807_v17 = vadd.f32 %v4805_v39, %v4517_v8  ;;  %v11813_v8 = vld [vmem:[%s12824_s25 + $0x20] sm:$0xff]  }
 0x659   : > { %v12227_v22 = vpop.eup %12226  ;;  %v13813_v39 = vld [vmem:[#allocation9 + $0xa8] ss:$12 sps:$4 sm:$0xff]  }
 0x65a   : > { %12232 = vtanh.f32 %v4807_v17  ;;  %v4806_v38 = vmul.f32 %v12227_v22, %v4804_v15  ;;  %v12229_v10 = vpop.eup %12228  ;;  %v11817_v17 = vld [vmem:[#allocation9 + $0xb0] ss:$12 sps:$4 sm:$0xff]   ;;  %v13817_v15 = vld [vmem:[#allocation9 + $0x94] ss:$12 sps:$4 sm:$0xff]  }
 0x65b   : > { %v12231_v19 = vpop.eup %12230  ;;  %v4811_v53 = vsub.f32 1.0, %v12229_v10  ;;  %v4815_v58 = vmul.f32 %v12229_v10, %v13508_v2  ;;  %v11775_v2 = vld [vmem:[#allocation9 + $0x140] ss:$12 sps:$4 sm:$0xff]   ;;  %v13820_v22 = vld [vmem:[#allocation9 + $0x90] ss:$12 sps:$4 sm:$0xff]  }
 0x65c   : > { %v4808_v18 = vadd.f32 %v4806_v38, %v4520_v23  ;;  %v4812_v48 = vsub.f32 1.0, %v12231_v19  ;;  %v4816_v33 = vmul.f32 %v12231_v19, %v13510_v49  ;;  %v11776_v49 = vld [vmem:[#allocation9 + $0x128] ss:$12 sps:$4 sm:$0xff]   ;;  %v11821_v23 = vld [vmem:[#allocation9 + $0x98] ss:$12 sps:$4 sm:$0xff]  }
 0x65d   : > { %v13824_v38 = vld [vmem:[#allocation9 + $0x7c] ss:$12 sps:$4 sm:$0xff]   ;;  %v11825_v10 = vld [vmem:[#allocation9 + $0x80] ss:$12 sps:$4 sm:$0xff]   ;;  %v13834_v19 = vld [vmem:[#allocation9 + $0x64] ss:$12 sps:$4 sm:$0xff]  }
 0x65e   : > { %12234 = vtanh.f32 %v4808_v18  ;;  %v13830_v18 = vld [vmem:[#allocation9 + $0x78] ss:$12 sps:$4 sm:$0xff]  }
 0x667   : > { %v12233_v20 = vpop.eup %12232 }
 0x668   : > { %v4813_v57 = vmul.f32 %v12233_v20, %v4811_v53  ;;  %v13837_v20 = vld [vmem:[#allocation9 + $0x60] ss:$12 sps:$4 sm:$0xff]   ;;  %v11829_v53 = vld [vmem:[#allocation9 + $0x68] ss:$12 sps:$4 sm:$0xff]  }
 0x66a   : > { %v13710_v60 = vadd.f32 %v4815_v58, %v4813_v57  ;;  %v13844_v57 = vld [vmem:[#allocation9 + $0x48] ss:$12 sps:$4 sm:$0xff]   ;;  %v13851_v58 = vld [vmem:[#allocation9 + $0x30] ss:$12 sps:$4 sm:$0xff]  }
 0x66b   : > { %v12235_v25 = vpop.eup %12234  ;;  %14903 = vst [vmem:[#allocation23_spill] sm:$0xff] %v13851_v58 }
 0x66c   : > { %v4814_v31 = vmul.f32 %v12235_v25, %v4812_v48  ;;  %v13841_v48 = vld [vmem:[#allocation9 + $0x4c] ss:$12 sps:$4 sm:$0xff]   ;;  %v11833_v25 = vld [vmem:[#allocation9 + $0x50] ss:$12 sps:$4 sm:$0xff]  }
 0x66e   : > { %v13712_v7 = vadd.f32 %v4816_v33, %v4814_v31  ;;  %v13848_v31 = vld [vmem:[#allocation9 + $0x34] ss:$12 sps:$4 sm:$0xff]   ;;  %v11837_v33 = vld [vmem:[#allocation9 + $0x38] ss:$12 sps:$4 sm:$0xff]  }
 0x66f   : > { %14902 = vst [vmem:[#allocation22_spill] sm:$0xff] %v13848_v31 }
 0x670   : > { %v13716_v45 = vpack.c.bf16 %v13712_v7, %v13710_v60 }
 0x672   : > { %5034 = vmatmul.mubr.bf16.vlgmr.msra.gmra.mxu0 %v13716_v45  ;;  %11087 = vmatmul.mubr.bf16.vlgmr.msra.gmra.mxu1 %v13716_v45 }
 0x673   : > { %5247 = vmatpush1.bf16.msra.mxu0 %v13512_v46  ;;  %11091 = vmatpush3.bf16.msra.mxu1 %v11773_v62  ;;  %v11777_v46 = vld [vmem:[#allocation9 + $0x110] ss:$12 sps:$4 sm:$0xff]  }
 0x674   : > { %5248 = vmatprep.subr.bf16.mxu0 %v13518_v36  ;;  %11092 = vmatprep.subr.bf16.mxu1 %v14875_v30  ;;  %v11778_v36 = vld [vmem:[#allocation9 + $0xf8] ss:$12 sps:$4 sm:$0xff]   ;;  %v13855_v62 = vld [vmem:[#allocation9 + $0x1c] ss:$12 sps:$4 sm:$0xff]  }
 0x675   : > { %5278 = vmatprep.mubr.bf16.mxu0 %v14876_v61  ;;  %11106 = vmatprep.mubr.msk.bf16.mxu1 %vm12638_vm0, %v14875_v30  ;;  %14904 = vst [vmem:[#allocation24_spill] sm:$0xff] %v13855_v62 }
 0x677   : > { %5249 = vmatpush1.bf16.msra.mxu0 %v13523_v51  ;;  %11093 = vmatpush3.bf16.msra.mxu1 %v11774_v55  ;;  %v11779_v51 = vld [vmem:[#allocation9 + $0xe0] ss:$12 sps:$4 sm:$0xff]   ;;  %v13858_v55 = vld [vmem:[#allocation9 + $0x18] ss:$12 sps:$4 sm:$0xff]  }
 0x678   : > { %5250 = vmatprep.subr.bf16.mxu0 %v13527_v27  ;;  %11094 = vmatprep.subr.bf16.mxu1 %v14875_v30  ;;  %v11780_v27 = vld [vmem:[#allocation9 + $0xc8] ss:$12 sps:$4 sm:$0xff]   ;;  %14905 = vst [vmem:[#allocation25_spill] sm:$0xff] %v13858_v55 }
 0x67b   : > { %5251 = vmatpush1.bf16.msra.mxu0 %v13533_v35  ;;  %11095 = vmatpush3.bf16.msra.mxu1 %v11775_v2  ;;  %v13744_v35 = vld [vmem:[#allocation7 + $0xac] ss:$12 sps:$4 sm:$0xff]  }
 0x67c   : > { %5252 = vmatprep.subr.bf16.mxu0 %v13538_v16  ;;  %11096 = vmatprep.subr.bf16.mxu1 %v14875_v30  ;;  %v13747_v16 = vld [vmem:[#allocation7 + $0xa8] ss:$12 sps:$4 sm:$0xff]   ;;  %v11841_v2 = vld [vmem:[#allocation9 + $0x20] ss:$12 sps:$4 sm:$0xff]  }
 0x67f   : > { %5253 = vmatpush1.bf16.msra.mxu0 %v13541_v63  ;;  %11097 = vmatpush3.bf16.msra.mxu1 %v11776_v49  ;;  %v11784_v63 = vld [vmem:[#allocation7 + $0xb0] ss:$12 sps:$4 sm:$0xff]  }
 0x680   : > { %5254 = vmatprep.subr.bf16.mxu0 %v13545_v14  ;;  %11098 = vmatprep.subr.bf16.mxu1 %v14875_v30  ;;  %v13751_v14 = vpack.c.bf16 %v13700_v1, %v13693_v24  ;;  %v13862_v49 = vld [vmem:[#allocation9 + $0x4] ss:$12 sps:$4 sm:$0xff]  }
 0x681   : > { %14906 = vst [vmem:[#allocation26_spill] sm:$0xff] %v13862_v49 }
 0x682   : > { %14901 = vst [vmem:[#allocation21_spill] sm:$0xff] %v13751_v14 }
 0x683   : > { %5255 = vmatpush1.bf16.msra.mxu0 %v13548_v40  ;;  %11099 = vmatpush3.bf16.msra.mxu1 %v11777_v46  ;;  %v13755_v40 = vld [vmem:[#allocation7 + $0x94] ss:$12 sps:$4 sm:$0xff]  }
 0x684   : > { %5256 = vmatprep.subr.bf16.mxu0 %v13552_v4  ;;  %11100 = vmatprep.subr.bf16.mxu1 %v14875_v30  ;;  %v13760_v4 = vld [vmem:[#allocation7 + $0x90] ss:$12 sps:$4 sm:$0xff]   ;;  %v13865_v46 = vld [vmem:[#allocation9] ss:$12 sps:$4 sm:$0xff]  }
 0x685   : > { %14907 = vst [vmem:[#allocation27_spill] sm:$0xff] %v13865_v46 }
 0x687   : > { %5257 = vmatpush1.bf16.msra.mxu0 %v13555_v11  ;;  %11101 = vmatpush3.bf16.msra.mxu1 %v11778_v36  ;;  %v11788_v11 = vld [vmem:[#allocation7 + $0x98] ss:$12 sps:$4 sm:$0xff]   ;;  %v11845_v36 = vld [vmem:[#allocation9 + $0x8] ss:$12 sps:$4 sm:$0xff]  }
 0x688   : > { %5258 = vmatprep.subr.bf16.mxu0 %v13559_v37  ;;  %11102 = vmatprep.subr.bf16.mxu1 %v14875_v30  ;;  %v13764_v37 = vld [vmem:[#allocation7 + $0x7c] ss:$12 sps:$4 sm:$0xff]  }
 0x68b   : > { %5259 = vmatpush1.bf16.msra.mxu0 %v13562_v41  ;;  %11103 = vmatpush3.bf16.msra.mxu1 %v11779_v51  ;;  %v13770_v41 = vld [vmem:[#allocation7 + $0x78] ss:$12 sps:$4 sm:$0xff]  }
 0x68c   : > { %5260 = vmatprep.subr.bf16.mxu0 %v13566_v13  ;;  %11104 = vmatprep.subr.bf16.mxu1 %v14875_v30  ;;  %v11792_v13 = vld [vmem:[#allocation7 + $0x80] ss:$12 sps:$4 sm:$0xff]  }
 0x68d   : > { %v13876_v51 = vld [vmem:[#allocation7 + $0x16c] ss:$12 sps:$4 sm:$0xff]  }
 0x68e   : > { %14908 = vst [vmem:[#allocation28_spill] sm:$0xff] %v13876_v51 }
 0x68f   : > { %5261 = vmatpush1.bf16.msra.mxu0 %v13570_v3  ;;  %11105 = vmatpush3.bf16.msra.mxu1 %v11780_v27  ;;  %v13774_v3 = vld [vmem:[#allocation7 + $0x64] ss:$12 sps:$4 sm:$0xff]   ;;  %v13878_v27 = vld [vmem:[#allocation7 + $0x168] ss:$12 sps:$4 sm:$0xff]  }
 0x690   : > { %5574 = vmatprep.subr.bf16.mxu0 %v13744_v35  ;;  %11110 = vmatprep.subr.bf16.mxu1 %v14875_v30  ;;  %14909 = vst [vmem:[#allocation29_spill] sm:$0xff] %v13878_v27 }
 0x692   : > { %5279 = vmatmul.mubr.bf16.vlgmr.msra.gmra.mxu0 %v13751_v14  ;;  %11107 = vmatmul.mubr.bf16.vlgmr.msra.gmra.mxu1 %v13751_v14 }
 0x693   : > { %5575 = vmatpush1.bf16.msra.mxu0 %v13747_v16  ;;  %11111 = vmatpush3.bf16.msra.mxu1 %v11784_v63  ;;  %v11849_v63 = vld [vmem:[#allocation7 + $0x170] ss:$12 sps:$4 sm:$0xff]  }
 0x694   : > { %5576 = vmatprep.subr.bf16.mxu0 %v13755_v40  ;;  %11112 = vmatprep.subr.bf16.mxu1 %v14875_v30 }
 0x695   : > { %5606 = vmatprep.mubr.bf16.mxu0 %v14876_v61  ;;  %11126 = vmatprep.mubr.msk.bf16.mxu1 %vm12638_vm0, %v14875_v30 }
 0x697   : > { %5577 = vmatpush1.bf16.msra.mxu0 %v13760_v4  ;;  %11113 = vmatpush3.bf16.msra.mxu1 %v11788_v11 }
 0x698   : > { %5578 = vmatprep.subr.bf16.mxu0 %v13764_v37  ;;  %11114 = vmatprep.subr.bf16.mxu1 %v14875_v30 }
 0x69b   : > { %5579 = vmatpush1.bf16.msra.mxu0 %v13770_v41  ;;  %11115 = vmatpush3.bf16.msra.mxu1 %v11792_v13  ;;  %v13884_v13 = vld [vmem:[#allocation7 + $0x154] ss:$12 sps:$4 sm:$0xff]  }
 0x69c   : > { %5580 = vmatprep.subr.bf16.mxu0 %v13774_v3  ;;  %11116 = vmatprep.subr.bf16.mxu1 %v14875_v30  ;;  %14910 = vst [vmem:[#allocation30_spill] sm:$0xff] %v13884_v13 }
 0x69f   : > { %5581 = vmatpush1.bf16.msra.mxu0 %v13777_v12  ;;  %11117 = vmatpush3.bf16.msra.mxu1 %v11796_v21  ;;  %v11853_v21 = vld [vmem:[#allocation7 + $0x158] ss:$12 sps:$4 sm:$0xff]  }
 0x6a0   : > { %5582 = vmatprep.subr.bf16.mxu0 %v13781_v29  ;;  %11118 = vmatprep.subr.bf16.mxu1 %v14875_v30 }
 0x6a3   : > { %5583 = vmatpush1.bf16.msra.mxu0 %v13784_v28  ;;  %11119 = vmatpush3.bf16.msra.mxu1 %v11800_v26 }
 0x6a4   : > { %5584 = vmatprep.subr.bf16.mxu0 %v13788_v5  ;;  %11120 = vmatprep.subr.bf16.mxu1 %v14875_v30 }
 0x6a7   : > { %5585 = vmatpush1.bf16.msra.mxu0 %v13791_v0  ;;  %11121 = vmatpush3.bf16.msra.mxu1 %v11804_v56 }
 0x6a8   : > { %5586 = vmatprep.subr.bf16.mxu0 %v13795_v59  ;;  %11122 = vmatprep.subr.bf16.mxu1 %v14875_v30 }
 0x6ab   : > { %5587 = vmatpush1.bf16.msra.mxu0 %v13798_v32  ;;  %11123 = vmatpush3.bf16.msra.mxu1 %v11808_v34  ;;  %v13893_v34 = vld [vmem:[#allocation7 + $0x13c] ss:$12 sps:$4 sm:$0xff]  }
 0x6ac   : > { %5588 = vmatprep.subr.bf16.mxu0 %v13802_v47  ;;  %11124 = vmatprep.subr.bf16.mxu1 %v14875_v30  ;;  %14912 = vst [vmem:[#allocation32_spill] sm:$0xff] %v13893_v34 }
 0x6af   : > { %5589 = vmatpush1.bf16.msra.mxu0 %v13805_v43  ;;  %11125 = vmatpush3.bf16.msra.mxu1 %v11812_v54  ;;  %v13896_v54 = vld [vmem:[#allocation7 + $0x138] ss:$12 sps:$4 sm:$0xff]  }
 0x6b0   : > { %5819 = vmatprep.subr.bf16.mxu0 %v13809_v6  ;;  %11130 = vmatprep.subr.bf16.mxu1 %v14875_v30  ;;  %14913 = vst [vmem:[#allocation33_spill] sm:$0xff] %v13896_v54 }
 0x6b2   : > { %5607 = vmatmul.mubr.bf16.vlgmr.msra.gmra.mxu0 %v11813_v8  ;;  %11127 = vmatmul.mubr.bf16.vlgmr.msra.gmra.mxu1 %v11813_v8  ;;  %v11857_v8 = vld [vmem:[#allocation7 + $0x140] ss:$12 sps:$4 sm:$0xff]  }
 0x6b3   : > { %5820 = vmatpush1.bf16.msra.mxu0 %v13813_v39  ;;  %11131 = vmatpush3.bf16.msra.mxu1 %v11817_v17 }
 0x6b4   : > { %5821 = vmatprep.subr.bf16.mxu0 %v13817_v15  ;;  %11132 = vmatprep.subr.bf16.mxu1 %v14875_v30 }
 0x6b5   : > { %5851 = vmatprep.mubr.bf16.mxu0 %v14876_v61  ;;  %11146 = vmatprep.mubr.msk.bf16.mxu1 %vm12638_vm0, %v14875_v30 }
 0x6b7   : > { %5822 = vmatpush1.bf16.msra.mxu0 %v13820_v22  ;;  %11133 = vmatpush3.bf16.msra.mxu1 %v11821_v23  ;;  %v13900_v23 = vld [vmem:[#allocation7 + $0x124] ss:$12 sps:$4 sm:$0xff]  }
 0x6b8   : > { %5823 = vmatprep.subr.bf16.mxu0 %v13824_v38  ;;  %11134 = vmatprep.subr.bf16.mxu1 %v14875_v30  ;;  %14914 = vst [vmem:[#allocation35_spill] sm:$0xff] %v13900_v23 }
 0x6bb   : > { %5824 = vmatpush1.bf16.msra.mxu0 %v13830_v18  ;;  %11135 = vmatpush3.bf16.msra.mxu1 %v11825_v10  ;;  %v13903_v10 = vld [vmem:[#allocation7 + $0x120] ss:$12 sps:$4 sm:$0xff]  }
 0x6bc   : > { %5825 = vmatprep.subr.bf16.mxu0 %v13834_v19  ;;  %11136 = vmatprep.subr.bf16.mxu1 %v14875_v30  ;;  %14915 = vst [vmem:[#allocation34_spill] sm:$0xff] %v13903_v10 }
 0x6bf   : > { %5826 = vmatpush1.bf16.msra.mxu0 %v13837_v20  ;;  %11137 = vmatpush3.bf16.msra.mxu1 %v11829_v53  ;;  %v11861_v53 = vld [vmem:[#allocation7 + $0x128] ss:$12 sps:$4 sm:$0xff]  }
 0x6c0   : > { %5827 = vmatprep.subr.bf16.mxu0 %v13841_v48  ;;  %11138 = vmatprep.subr.bf16.mxu1 %v14875_v30 }
 0x6c3   : > { %5828 = vmatpush1.bf16.msra.mxu0 %v13844_v57  ;;  %11139 = vmatpush3.bf16.msra.mxu1 %v11833_v25  ;;  %v13907_v25 = vld [vmem:[#allocation7 + $0x108] ss:$12 sps:$4 sm:$0xff]  }
 0x6c4   : > { %5829 = vmatprep.subr.bf16.mxu0 %v13848_v31  ;;  %11140 = vmatprep.subr.bf16.mxu1 %v14875_v30  ;;  %14916 = vst [vmem:[#allocation36_spill] sm:$0xff] %v13907_v25 }
 0x6c7   : > { %5830 = vmatpush1.bf16.msra.mxu0 %v13851_v58  ;;  %11141 = vmatpush3.bf16.msra.mxu1 %v11837_v33  ;;  %v13909_v33 = vld [vmem:[#allocation7 + $0x10c] ss:$12 sps:$4 sm:$0xff]  }
 0x6c8   : > { %5831 = vmatprep.subr.bf16.mxu0 %v13855_v62  ;;  %11142 = vmatprep.subr.bf16.mxu1 %v14875_v30  ;;  %14917 = vst [vmem:[#allocation37_spill] sm:$0xff] %v13909_v33 }
 0x6cb   : > { %5832 = vmatpush1.bf16.msra.mxu0 %v13858_v55  ;;  %11143 = vmatpush3.bf16.msra.mxu1 %v11841_v2  ;;  %v11865_v2 = vld [vmem:[#allocation7 + $0x110] ss:$12 sps:$4 sm:$0xff]  }
 0x6cc   : > { %5833 = vmatprep.subr.bf16.mxu0 %v13862_v49  ;;  %11144 = vmatprep.subr.bf16.mxu1 %v14875_v30 }
 0x6cf   : > { %5834 = vmatpush1.bf16.msra.mxu0 %v13865_v46  ;;  %11145 = vmatpush3.bf16.msra.mxu1 %v11845_v36  ;;  %v13912_v36 = vld [vmem:[#allocation7 + $0xf4] ss:$12 sps:$4 sm:$0xff]  }
 0x6d0   : > { %11150 = vmatprep.subr.bf16.mxu1 %v14875_v30  ;;  %6136 = vmatprep.subr.bf16.mxu0 %v13876_v51  ;;  %14918 = vst [vmem:[#allocation38_spill] sm:$0xff] %v13912_v36 }
 0x6d2   : > { %5852 = vmatmul.mubr.bf16.vlgmr.msra.gmra.mxu0 %v13716_v45  ;;  %11147 = vmatmul.mubr.bf16.vlgmr.msra.gmra.mxu1 %v13716_v45  ;;  %v13887_v45 = vld [vmem:[#allocation7 + $0x150] ss:$12 sps:$4 sm:$0xff]  }
 0x6d3   : > { %6168 = vmatprep.mubr.bf16.mxu0 %v14876_v61  ;;  %11166 = vmatprep.mubr.msk.bf16.mxu1 %vm12638_vm0, %v14875_v30  ;;  %14911 = vst [vmem:[#allocation31_spill] sm:$0xff] %v13887_v45 }
 0x6d4   : > { %6137 = vmatpush1.bf16.msra.mxu0 %v13878_v27  ;;  %11151 = vmatpush3.bf16.msra.mxu1 %v11849_v63  ;;  %v13916_v63 = vld [vmem:[#allocation7 + $0xf0] ss:$12 sps:$4 sm:$0xff]  }
 0x6d5   : > { %11152 = vmatprep.subr.bf16.mxu1 %v14875_v30  ;;  %6138 = vmatprep.subr.bf16.mxu0 %v13884_v13  ;;  %14919 = vst [vmem:[#allocation39_spill] sm:$0xff] %v13916_v63 }
 0x6d8   : > { %6139 = vmatpush1.bf16.msra.mxu0 %v13887_v45  ;;  %11153 = vmatpush3.bf16.msra.mxu1 %v11853_v21  ;;  %v11869_v21 = vld [vmem:[#allocation7 + $0xf8] ss:$12 sps:$4 sm:$0xff]  }
 0x6d9   : > { %11154 = vmatprep.subr.bf16.mxu1 %v14875_v30  ;;  %6140 = vmatprep.subr.bf16.mxu0 %v13893_v34 }
 0x6dc   : > { %6141 = vmatpush1.bf16.msra.mxu0 %v13896_v54  ;;  %11155 = vmatpush3.bf16.msra.mxu1 %v11857_v8 }
 0x6dd   : > { %11156 = vmatprep.subr.bf16.mxu1 %v14875_v30  ;;  %6142 = vmatprep.subr.bf16.mxu0 %v13900_v23 }
 0x6e0   : > { %6143 = vmatpush1.bf16.msra.mxu0 %v13903_v10  ;;  %11157 = vmatpush3.bf16.msra.mxu1 %v11861_v53  ;;  %v11873_v53 = vld [vmem:[#allocation7 + $0xe0] ss:$12 sps:$4 sm:$0xff]  }
 0x6e1   : > { %11158 = vmatprep.subr.bf16.mxu1 %v14875_v30  ;;  %6144 = vmatprep.subr.bf16.mxu0 %v13909_v33 }
 0x6e4   : > { %6145 = vmatpush1.bf16.msra.mxu0 %v13907_v25  ;;  %11159 = vmatpush3.bf16.msra.mxu1 %v11865_v2  ;;  %v13927_v2 = vld [vmem:[#allocation7 + $0xc4] ss:$12 sps:$4 sm:$0xff]  }
 0x6e5   : > { %6146 = vmatprep.subr.bf16.mxu0 %v13912_v36  ;;  %11160 = vmatprep.subr.bf16.mxu1 %v14875_v30  ;;  %14922 = vst [vmem:[#allocation42_spill] sm:$0xff] %v13927_v2  ;;  %v11877_v36 = vld [vmem:[#allocation7 + $0xc8] ss:$12 sps:$4 sm:$0xff]  }
 0x6e8   : > { %6147 = vmatpush1.bf16.msra.mxu0 %v13916_v63  ;;  %11161 = vmatpush3.bf16.msra.mxu1 %v11869_v21  ;;  %v10058_v21 = vld [vmem:[%s14752_s7 + $0x3] sm:$0x7] }
 0x6e9   : > { %11162 = vmatprep.subr.bf16.mxu1 %v14875_v30  ;;  %v4861_v25 = vrot.slane %v10058_v21, %v14900_v50 }
 0x6ec   : > { %11163 = vmatpush3.bf16.msra.mxu1 %v11873_v53  ;;  %v4865_v53 = vrot.slane %v10058_v21, %v13038_v9 }
 0x6ed   : > { %11164 = vmatprep.subr.bf16.mxu1 %v14875_v30 }
 0x6f0   : > { %11165 = vmatpush3.bf16.msra.mxu1 %v11877_v36 }
 0x6f1   : > { %11170 = vmatprep.subr.bf16.mxu1 %v14875_v30 }
 0x732   : > { %v13882_v11 = vpop.f32.mrf.mxu1  ;;  %v5035_v8 = vpop.f32.mrf.mxu0 }
 0x733   : > { %v5036_v33 = vadd.f32 %v5035_v8, %v4861_v25 }
 0x734   : > { %v11088_v26 = vpop.f32.mrf.mxu1  ;;  %v5037_v14 = vpop.f32.mrf.mxu0 }
 0x735   : > { %v13920_v26 = vld [vmem:[#allocation7 + $0xdc] ss:$12 sps:$4 sm:$0xff]   ;;  %v5038_v23 = vadd.f32 %v5037_v14, %v4865_v53 }
 0x736   : > { %v13891_v56 = vpop.f32.mrf.mxu1  ;;  %14920 = vst [vmem:[#allocation40_spill] sm:$0xff] %v13920_v26  ;;  %6148 = vmatprep.subr.bf16.mxu0 %v13920_v26  ;;  %v13937_v26 = vld [vmem:[#allocation9 + $0x16c] ss:$12 sps:$4 sm:$0xff]   ;;  %v5039_v63 = vpop.f32.mrf.mxu0 }
 0x737   : > { %14924 = vst [vmem:[#allocation44_spill] sm:$0xff] %v13937_v26  ;;  %v5040_v13 = vadd.f32 %v5039_v63, %v4861_v25 }
 0x738   : > { %v11089_v17 = vpop.f32.mrf.mxu1 }
 0x739   : > { %v13923_v17 = vld [vmem:[#allocation7 + $0xd8] ss:$12 sps:$4 sm:$0xff]  }
 0x73a   : > { %14921 = vst [vmem:[#allocation41_spill] sm:$0xff] %v13923_v17  ;;  %6149 = vmatpush1.bf16.msra.mxu0 %v13923_v17  ;;  %v5041_v17 = vpop.f32.mrf.mxu0 }
 0x73b   : > { %6150 = vmatprep.subr.bf16.mxu0 %v13927_v2  ;;  %v5042_v62 = vadd.f32 %v5041_v17, %v4865_v53 }
 0x73e   : > { %6151 = vmatpush1.bf16.msra.mxu0 %v13930_v42 }
 0x73f   : > { %6381 = vmatprep.subr.bf16.mxu0 %v13937_v26 }
 0x752   : > { %v5280_v10 = vpop.f32.mrf.mxu0  ;;  %v5323_v2 = vpop.f32.mrf.mxu1 }
 0x753   : > { %v5330_v54 = vadd.f32 %v5280_v10, %v5036_v33 }
 0x754   : > { %v5282_v34 = vpop.f32.mrf.mxu0  ;;  %v11108_v45 = vpop.f32.mrf.mxu1 }
 0x755   : > { %v10107_v27 = vmul.f32 -1.442695, %v5330_v54  ;;  %v5344_v51 = vadd.f32 %v5282_v34, %v5038_v23 }
 0x756   : > { %v5284_v46 = vpop.f32.mrf.mxu0  ;;  %v5326_v42 = vpop.f32.mrf.mxu1 }
 0x757   : > { %12236 = vpow2.f32 %v10107_v27  ;;  %v5331_v36 = vadd.f32 %v5284_v46, %v5040_v13  ;;  %v10109_v8 = vmul.f32 -1.442695, %v5344_v51  ;;  %v4869_v46 = vrot.slane %v10058_v21, %v13041_v52 }
 0x758   : > { %v11109_v26 = vpop.f32.mrf.mxu1  ;;  %v5286_v55 = vpop.f32.mrf.mxu0  ;;  %v5366_v63 = vadd.f32 %v13681_v44, %v5326_v42 }
 0x759   : > { %v10108_v49 = vmul.f32 -1.442695, %v5331_v36  ;;  %v5345_v58 = vadd.f32 %v5286_v55, %v5042_v62  ;;  %v5079_v51 = vadd.f32 %v13882_v11, %v4869_v46  ;;  %v5082_v21 = vadd.f32 %v13891_v56, %v4869_v46  ;;  %v5423_v56 = vld [vmem:[%s14752_s7] sm:$0x7] }
 0x75b   : > { %12238 = vpow2.f32 %v10108_v49  ;;  %v10110_v31 = vmul.f32 -1.442695, %v5345_v58  ;;  %v5365_v49 = vadd.f32 %v13681_v44, %v5323_v2 }
 0x75c   : > { %12240 = vpow2.f32 %v10109_v8 }
 0x75d   : > { %12242 = vpow2.f32 %v10110_v31 }
 0x764   : > { %v12237_v14 = vpop.eup %12236 }
 0x765   : > { %v5338_v10 = vadd.f32 1.0, %v12237_v14 }
 0x767   : > { %12244 = vrcp.f32 %v5338_v10 }
 0x768   : > { %v12239_v45 = vpop.eup %12238 }
 0x769   : > { %v5339_v54 = vadd.f32 1.0, %v12239_v45  ;;  %v12241_v34 = vpop.eup %12240 }
 0x76a   : > { %v12243_v23 = vpop.eup %12242  ;;  %v5352_v27 = vadd.f32 1.0, %v12241_v34 }
 0x76b   : > { %12246 = vrcp.f32 %v5339_v54  ;;  %v5353_v55 = vadd.f32 1.0, %v12243_v23 }
 0x76c   : > { %12248 = vrcp.f32 %v5352_v27 }
 0x76d   : > { %12250 = vrcp.f32 %v5353_v55 }
 0x772   : > { %v13945_v13 = vpop.f32.mrf.mxu1  ;;  %v5608_v8 = vpop.f32.mrf.mxu0 }
 0x774   : > { %v12245_v62 = vpop.eup %12244  ;;  %v11128_v58 = vpop.f32.mrf.mxu1 }
 0x775   : > { %v5367_v31 = vmul.f32 %v12245_v62, %v5365_v49  ;;  %v5610_v34 = vpop.f32.mrf.mxu0  ;;  %v5428_v62 = vrot.slane %v5423_v56, %v14900_v50 }
 0x776   : > { %v13949_v25 = vpop.f32.mrf.mxu1 }
 0x777   : > { %v5369_v33 = vadd.f32 %v5367_v31, %v5079_v51  ;;  %v5612_v49 = vpop.f32.mrf.mxu0  ;;  %v5609_v51 = vadd.f32 %v5608_v8, %v5428_v62 }
 0x778   : > { %v12247_v26 = vpop.eup %12246  ;;  %v11129_v17 = vpop.f32.mrf.mxu1 }
 0x779   : > { %12252 = vtanh.f32 %v5369_v33  ;;  %v5368_v53 = vmul.f32 %v12247_v26, %v5366_v63  ;;  %v12249_v36 = vpop.eup %12248  ;;  %v5614_v58 = vpop.f32.mrf.mxu0  ;;  %v5432_v17 = vrot.slane %v5423_v56, %v13038_v9 }
 0x77a   : > { %v12251_v14 = vpop.eup %12250  ;;  %v5373_v11 = vsub.f32 1.0, %v12249_v36  ;;  %v5377_v54 = vmul.f32 %v12249_v36, %v13693_v24 }
 0x77b   : > { %v5370_v2 = vadd.f32 %v5368_v53, %v5082_v21  ;;  %v5374_v23 = vsub.f32 1.0, %v12251_v14  ;;  %v5378_v27 = vmul.f32 %v12251_v14, %v13700_v1  ;;  %v5613_v21 = vadd.f32 %v5612_v49, %v5428_v62 }
 0x77d   : > { %12254 = vtanh.f32 %v5370_v2 }
 0x786   : > { %v12253_v10 = vpop.eup %12252 }
 0x787   : > { %v5375_v45 = vmul.f32 %v12253_v10, %v5373_v11  ;;  %v5611_v11 = vadd.f32 %v5610_v34, %v5432_v17  ;;  %v13967_v34 = vld [vmem:[%s14753_s8] ss:$0 sm:$0xff] }
 0x789   : > { %v13954_v42 = vadd.f32 %v5377_v54, %v5375_v45  ;;  %v5615_v54 = vadd.f32 %v5614_v58, %v5432_v17 }
 0x78a   : > { %v12255_v44 = vpop.eup %12254 }
 0x78b   : > { %v5376_v46 = vmul.f32 %v12255_v44, %v5374_v23 }
 0x78d   : > { %v13961_v55 = vadd.f32 %v5378_v27, %v5376_v46 }
 0x792   : > { %v5853_v24 = vpop.f32.mrf.mxu0  ;;  %v5896_v31 = vpop.f32.mrf.mxu1 }
 0x793   : > { %v5903_v33 = vadd.f32 %v5853_v24, %v5609_v51 }
 0x794   : > { %v5855_v63 = vpop.f32.mrf.mxu0  ;;  %v11148_v26 = vpop.f32.mrf.mxu1 }
 0x795   : > { %v10164_v53 = vmul.f32 -1.442695, %v5903_v33  ;;  %v5917_v23 = vadd.f32 %v5855_v63, %v5611_v11  ;;  %v5436_v33 = vrot.slane %v5423_v56, %v13041_v52  ;;  %v5938_v63 = vadd.f32 %v13967_v34, %v5896_v31 }
 0x796   : > { %v5857_v2 = vpop.f32.mrf.mxu0  ;;  %v5899_v36 = vpop.f32.mrf.mxu1 }
 0x797   : > { %12256 = vpow2.f32 %v10164_v53  ;;  %v5904_v1 = vadd.f32 %v5857_v2, %v5613_v21  ;;  %v10166_v44 = vmul.f32 -1.442695, %v5917_v23  ;;  %v5652_v53 = vadd.f32 %v13945_v13, %v5436_v33 }
 0x798   : > { %v11149_v14 = vpop.f32.mrf.mxu1  ;;  %v5859_v45 = vpop.f32.mrf.mxu0 }
 0x799   : > { %v10165_v10 = vmul.f32 -1.442695, %v5904_v1  ;;  %v5918_v8 = vadd.f32 %v5859_v45, %v5615_v54  ;;  %v5939_v14 = vadd.f32 %v13967_v34, %v5899_v36 }
 0x79b   : > { %12258 = vpow2.f32 %v10165_v10  ;;  %v10167_v46 = vmul.f32 -1.442695, %v5918_v8  ;;  %v5655_v10 = vadd.f32 %v13949_v25, %v5436_v33  ;;  %v13980_v25 = vld [vmem:[#allocation9 + $0x168] ss:$12 sps:$4 sm:$0xff]  }
 0x79c   : > { %12260 = vpow2.f32 %v10166_v44  ;;  %v13986_v33 = vld [vmem:[#allocation9 + $0x154] ss:$12 sps:$4 sm:$0xff]  }
 0x79d   : > { %12262 = vpow2.f32 %v10167_v46 }
 0x7a4   : > { %v12257_v27 = vpop.eup %12256 }
 0x7a5   : > { %v5911_v51 = vadd.f32 1.0, %v12257_v27 }
 0x7a7   : > { %12264 = vrcp.f32 %v5911_v51 }
 0x7a8   : > { %v12259_v49 = vpop.eup %12258 }
 0x7a9   : > { %v5912_v62 = vadd.f32 1.0, %v12259_v49  ;;  %v12261_v24 = vpop.eup %12260 }
 0x7aa   : > { %v12263_v58 = vpop.eup %12262  ;;  %v5925_v26 = vadd.f32 1.0, %v12261_v24  ;;  %v11881_v24 = vld [vmem:[#allocation9 + $0x170] ss:$12 sps:$4 sm:$0xff]  }
 0x7ab   : > { %12266 = vrcp.f32 %v5912_v62  ;;  %v5926_v21 = vadd.f32 1.0, %v12263_v58 }
 0x7ac   : > { %12268 = vrcp.f32 %v5925_v26  ;;  %v14001_v26 = vld [vmem:[#allocation9 + $0x138] ss:$12 sps:$4 sm:$0xff]  }
 0x7ad   : > { %12270 = vrcp.f32 %v5926_v21  ;;  %v14005_v21 = vld [vmem:[#allocation9 + $0x124] ss:$12 sps:$4 sm:$0xff]  }
 0x7b4   : > { %v12265_v17 = vpop.eup %12264 }
 0x7b5   : > { %v5940_v2 = vmul.f32 %v12265_v17, %v5938_v63  ;;  %v13995_v63 = vld [vmem:[#allocation9 + $0x13c] ss:$12 sps:$4 sm:$0xff]   ;;  %v11889_v17 = vld [vmem:[#allocation9 + $0x140] ss:$12 sps:$4 sm:$0xff]  }
 0x7b7   : > { %v5942_v1 = vadd.f32 %v5940_v2, %v5652_v53  ;;  %v14008_v53 = vld [vmem:[#allocation9 + $0x120] ss:$12 sps:$4 sm:$0xff]   ;;  %v11893_v2 = vld [vmem:[#allocation9 + $0x128] ss:$12 sps:$4 sm:$0xff]  }
 0x7b8   : > { %v12267_v11 = vpop.eup %12266 }
 0x7b9   : > { %12272 = vtanh.f32 %v5942_v1  ;;  %v5941_v45 = vmul.f32 %v12267_v11, %v5939_v14  ;;  %v12269_v56 = vpop.eup %12268  ;;  %v14012_v1 = vld [vmem:[#allocation9 + $0x10c] ss:$12 sps:$4 sm:$0xff]   ;;  %v14015_v14 = vld [vmem:[#allocation9 + $0x108] ss:$12 sps:$4 sm:$0xff]   ;;  %v11897_v11 = vld [vmem:[#allocation9 + $0x110] ss:$12 sps:$4 sm:$0xff]  }
 0x7ba   : > { %v12271_v31 = vpop.eup %12270  ;;  %v5946_v8 = vsub.f32 1.0, %v12269_v56  ;;  %v5950_v51 = vmul.f32 %v12269_v56, %v13710_v60  ;;  %v13991_v60 = vld [vmem:[#allocation9 + $0x150] ss:$12 sps:$4 sm:$0xff]  }
 0x7bb   : > { %v5943_v54 = vadd.f32 %v5941_v45, %v5655_v10  ;;  %v5947_v44 = vsub.f32 1.0, %v12271_v31  ;;  %v5951_v36 = vmul.f32 %v12271_v31, %v13712_v7  ;;  %v11885_v7 = vld [vmem:[#allocation9 + $0x158] ss:$12 sps:$4 sm:$0xff]   ;;  %v14019_v10 = vld [vmem:[#allocation9 + $0xf4] ss:$12 sps:$4 sm:$0xff]  }
 0x7bc   : > { %v14022_v45 = vld [vmem:[#allocation9 + $0xf0] ss:$12 sps:$4 sm:$0xff]   ;;  %v14029_v31 = vld [vmem:[#allocation9 + $0xd8] ss:$12 sps:$4 sm:$0xff]  }
 0x7bd   : > { %12274 = vtanh.f32 %v5943_v54  ;;  %v11901_v54 = vld [vmem:[#allocation9 + $0xf8] ss:$12 sps:$4 sm:$0xff]   ;;  %v14026_v56 = vld [vmem:[#allocation9 + $0xdc] ss:$12 sps:$4 sm:$0xff]  }
 0x7c6   : > { %v12273_v23 = vpop.eup %12272 }
 0x7c7   : > { %v5948_v46 = vmul.f32 %v12273_v23, %v5946_v8  ;;  %v11905_v23 = vld [vmem:[#allocation9 + $0xe0] ss:$12 sps:$4 sm:$0xff]   ;;  %v14033_v8 = vld [vmem:[#allocation9 + $0xc4] ss:$12 sps:$4 sm:$0xff]  }
 0x7c9   : > { %v13976_v49 = vadd.f32 %v5950_v51, %v5948_v46  ;;  %v11909_v46 = vld [vmem:[#allocation9 + $0xc8] ss:$12 sps:$4 sm:$0xff]   ;;  %v11911_v51 = vld [vmem:[#allocation7 + $0x98] ss:$12 sps:$4 sm:$0xff]  }
 0x7ca   : > { %v12275_v13 = vpop.eup %12274 }
 0x7cb   : > { %v5949_v27 = vmul.f32 %v12275_v13, %v5947_v44  ;;  %v14036_v44 = vld [vmem:[#allocation9 + $0xc0] ss:$12 sps:$4 sm:$0xff]   ;;  %v11910_v13 = vld [vmem:[#allocation7 + $0xb0] ss:$12 sps:$4 sm:$0xff]  }
 0x7cd   : > { %v13978_v62 = vadd.f32 %v5951_v36, %v5949_v27  ;;  %v14043_v27 = vpack.c.bf16 %v13961_v55, %v13954_v42  ;;  %v14936_v36 = vld [vmem:[#allocation33_spill] sm:$0xff] }
 0x7cf   : > { %v13984_v58 = vpack.c.bf16 %v13978_v62, %v13976_v49 }
 0x7d1   : > { %6169 = vmatmul.mubr.bf16.vlgmr.msra.gmra.mxu0 %v13984_v58  ;;  %11167 = vmatmul.mubr.bf16.vlgmr.msra.gmra.mxu1 %v13984_v58 }
 0x7d2   : > { %6382 = vmatpush1.bf16.msra.mxu0 %v13980_v25  ;;  %11171 = vmatpush3.bf16.msra.mxu1 %v11881_v24  ;;  %v14937_v24 = vld [vmem:[#allocation35_spill] sm:$0xff] }
 0x7d3   : > { %6383 = vmatprep.subr.bf16.mxu0 %v13986_v33  ;;  %11172 = vmatprep.subr.bf16.mxu1 %v14875_v30 }
 0x7d4   : > { %6413 = vmatprep.mubr.bf16.mxu0 %v14876_v61  ;;  %11186 = vmatprep.mubr.msk.bf16.mxu1 %vm12638_vm0, %v14875_v30 }
 0x7d6   : > { %6384 = vmatpush1.bf16.msra.mxu0 %v13991_v60  ;;  %11173 = vmatpush3.bf16.msra.mxu1 %v11885_v7  ;;  %v14938_v7 = vld [vmem:[#allocation34_spill] sm:$0xff] }
 0x7d7   : > { %6385 = vmatprep.subr.bf16.mxu0 %v13995_v63  ;;  %11174 = vmatprep.subr.bf16.mxu1 %v14875_v30 }
 0x7da   : > { %6386 = vmatpush1.bf16.msra.mxu0 %v14001_v26  ;;  %11175 = vmatpush3.bf16.msra.mxu1 %v11889_v17  ;;  %v14940_v17 = vld [vmem:[#allocation36_spill] sm:$0xff] }
 0x7db   : > { %6387 = vmatprep.subr.bf16.mxu0 %v14005_v21  ;;  %11176 = vmatprep.subr.bf16.mxu1 %v14875_v30 }
 0x7de   : > { %6388 = vmatpush1.bf16.msra.mxu0 %v14008_v53  ;;  %11177 = vmatpush3.bf16.msra.mxu1 %v11893_v2  ;;  %v14941_v2 = vld [vmem:[#allocation38_spill] sm:$0xff] }
 0x7df   : > { %6389 = vmatprep.subr.bf16.mxu0 %v14012_v1  ;;  %11178 = vmatprep.subr.bf16.mxu1 %v14875_v30 }
 0x7e2   : > { %6390 = vmatpush1.bf16.msra.mxu0 %v14015_v14  ;;  %11179 = vmatpush3.bf16.msra.mxu1 %v11897_v11  ;;  %v14942_v11 = vld [vmem:[#allocation39_spill] sm:$0xff] }
 0x7e3   : > { %6391 = vmatprep.subr.bf16.mxu0 %v14019_v10  ;;  %11180 = vmatprep.subr.bf16.mxu1 %v14875_v30 }
 0x7e6   : > { %6392 = vmatpush1.bf16.msra.mxu0 %v14022_v45  ;;  %11181 = vmatpush3.bf16.msra.mxu1 %v11901_v54  ;;  %v14943_v54 = vld [vmem:[#allocation40_spill] sm:$0xff] }
 0x7e7   : > { %6393 = vmatprep.subr.bf16.mxu0 %v14026_v56  ;;  %11182 = vmatprep.subr.bf16.mxu1 %v14875_v30 }
 0x7ea   : > { %6394 = vmatpush1.bf16.msra.mxu0 %v14029_v31  ;;  %11183 = vmatpush3.bf16.msra.mxu1 %v11905_v23  ;;  %v14944_v23 = vld [vmem:[#allocation41_spill] sm:$0xff] }
 0x7eb   : > { %6395 = vmatprep.subr.bf16.mxu0 %v14033_v8  ;;  %11184 = vmatprep.subr.bf16.mxu1 %v14875_v30 }
 0x7ee   : > { %6396 = vmatpush1.bf16.msra.mxu0 %v14036_v44  ;;  %11185 = vmatpush3.bf16.msra.mxu1 %v11909_v46  ;;  %v14945_v46 = vld [vmem:[#allocation42_spill] sm:$0xff] }
 0x7ef   : > { %6709 = vmatprep.subr.bf16.mxu0 %v13744_v35  ;;  %11190 = vmatprep.subr.bf16.mxu1 %v14875_v30  ;;  %v11912_v35 = vld [vmem:[#allocation7 + $0x80] ss:$12 sps:$4 sm:$0xff]  }
 0x7f1   : > { %6414 = vmatmul.mubr.bf16.vlgmr.msra.gmra.mxu0 %v14043_v27  ;;  %11187 = vmatmul.mubr.bf16.vlgmr.msra.gmra.mxu1 %v14043_v27 }
 0x7f2   : > { %6710 = vmatpush1.bf16.msra.mxu0 %v13747_v16  ;;  %11191 = vmatpush3.bf16.msra.mxu1 %v11910_v13  ;;  %v11913_v16 = vld [vmem:[#allocation7 + $0x68] ss:$12 sps:$4 sm:$0xff]   ;;  %v14946_v13 = vld [vmem:[#allocation19_spill] sm:$0xff] }
 0x7f3   : > { %6711 = vmatprep.subr.bf16.mxu0 %v13755_v40  ;;  %11192 = vmatprep.subr.bf16.mxu1 %v14875_v30  ;;  %v11914_v40 = vld [vmem:[#allocation7 + $0x50] ss:$12 sps:$4 sm:$0xff]  }
 0x7f4   : > { %6741 = vmatprep.mubr.bf16.mxu0 %v14876_v61  ;;  %11206 = vmatprep.mubr.msk.bf16.mxu1 %vm12638_vm0, %v14875_v30 }
 0x7f6   : > { %6712 = vmatpush1.bf16.msra.mxu0 %v13760_v4  ;;  %11193 = vmatpush3.bf16.msra.mxu1 %v11911_v51  ;;  %v11915_v4 = vld [vmem:[#allocation7 + $0x38] ss:$12 sps:$4 sm:$0xff]   ;;  %v14947_v51 = vld [vmem:[#allocation44_spill] sm:$0xff] }
 0x7f7   : > { %6713 = vmatprep.subr.bf16.mxu0 %v13764_v37  ;;  %11194 = vmatprep.subr.bf16.mxu1 %v14875_v30  ;;  %v11916_v37 = vld [vmem:[#allocation7 + $0x20] ss:$12 sps:$4 sm:$0xff]  }
 0x7fa   : > { %6714 = vmatpush1.bf16.msra.mxu0 %v13770_v41  ;;  %11195 = vmatpush3.bf16.msra.mxu1 %v11912_v35  ;;  %v11917_v41 = vld [vmem:[#allocation7 + $0x8] ss:$12 sps:$4 sm:$0xff]   ;;  %v11927_v35 = vld [vmem:[#allocation7 + $0x170] ss:$12 sps:$4 sm:$0xff]  }
 0x7fb   : > { %6715 = vmatprep.subr.bf16.mxu0 %v13774_v3  ;;  %11196 = vmatprep.subr.bf16.mxu1 %v14875_v30  ;;  %v11918_v3 = vld [vmem:[%s12824_s25 + $0x28] sm:$0xff]  }
 0x7fe   : > { %6716 = vmatpush1.bf16.msra.mxu0 %v13777_v12  ;;  %11197 = vmatpush3.bf16.msra.mxu1 %v11913_v16  ;;  %v11919_v12 = vld [vmem:[#allocation9 + $0xb0] ss:$12 sps:$4 sm:$0xff]  }
 0x7ff   : > { %6717 = vmatprep.subr.bf16.mxu0 %v13781_v29  ;;  %11198 = vmatprep.subr.bf16.mxu1 %v14875_v30  ;;  %v11920_v29 = vld [vmem:[#allocation9 + $0x98] ss:$12 sps:$4 sm:$0xff]  }
 0x802   : > { %6718 = vmatpush1.bf16.msra.mxu0 %v13784_v28  ;;  %11199 = vmatpush3.bf16.msra.mxu1 %v11914_v40  ;;  %v11921_v28 = vld [vmem:[#allocation9 + $0x80] ss:$12 sps:$4 sm:$0xff]   ;;  %v11928_v40 = vld [vmem:[#allocation7 + $0x158] ss:$12 sps:$4 sm:$0xff]  }
 0x803   : > { %6719 = vmatprep.subr.bf16.mxu0 %v13788_v5  ;;  %11200 = vmatprep.subr.bf16.mxu1 %v14875_v30  ;;  %v11922_v5 = vld [vmem:[#allocation9 + $0x68] ss:$12 sps:$4 sm:$0xff]  }
 0x806   : > { %6720 = vmatpush1.bf16.msra.mxu0 %v13791_v0  ;;  %11201 = vmatpush3.bf16.msra.mxu1 %v11915_v4  ;;  %v11923_v0 = vld [vmem:[#allocation9 + $0x50] ss:$12 sps:$4 sm:$0xff]  }
 0x807   : > { %6721 = vmatprep.subr.bf16.mxu0 %v13795_v59  ;;  %11202 = vmatprep.subr.bf16.mxu1 %v14875_v30  ;;  %v11924_v59 = vld [vmem:[#allocation9 + $0x38] ss:$12 sps:$4 sm:$0xff]  }
 0x80a   : > { %6722 = vmatpush1.bf16.msra.mxu0 %v13798_v32  ;;  %11203 = vmatpush3.bf16.msra.mxu1 %v11916_v37  ;;  %v14925_v32 = vld [vmem:[#allocation22_spill] sm:$0xff] }
 0x80b   : > { %6723 = vmatprep.subr.bf16.mxu0 %v13802_v47  ;;  %11204 = vmatprep.subr.bf16.mxu1 %v14875_v30  ;;  %v14926_v47 = vld [vmem:[#allocation23_spill] sm:$0xff] }
 0x80e   : > { %6724 = vmatpush1.bf16.msra.mxu0 %v13805_v43  ;;  %11205 = vmatpush3.bf16.msra.mxu1 %v11917_v41  ;;  %v11925_v43 = vld [vmem:[#allocation9 + $0x20] ss:$12 sps:$4 sm:$0xff]  }
 0x80f   : > { %6954 = vmatprep.subr.bf16.mxu0 %v13809_v6  ;;  %11210 = vmatprep.subr.bf16.mxu1 %v14875_v30  ;;  %v14927_v6 = vld [vmem:[#allocation24_spill] sm:$0xff] }
 0x810   : > { %v11929_v41 = vld [vmem:[#allocation7 + $0x140] ss:$12 sps:$4 sm:$0xff]  }
 0x811   : > { %6742 = vmatmul.mubr.bf16.vlgmr.msra.gmra.mxu0 %v11918_v3  ;;  %11207 = vmatmul.mubr.bf16.vlgmr.msra.gmra.mxu1 %v11918_v3 }
 0x812   : > { %6955 = vmatpush1.bf16.msra.mxu0 %v13813_v39  ;;  %11211 = vmatpush3.bf16.msra.mxu1 %v11919_v12  ;;  %v14928_v39 = vld [vmem:[#allocation25_spill] sm:$0xff] }
 0x813   : > { %6956 = vmatprep.subr.bf16.mxu0 %v13817_v15  ;;  %11212 = vmatprep.subr.bf16.mxu1 %v14875_v30  ;;  %v11926_v15 = vld [vmem:[#allocation9 + $0x8] ss:$12 sps:$4 sm:$0xff]  }
 0x814   : > { %6986 = vmatprep.mubr.bf16.mxu0 %v14876_v61  ;;  %11226 = vmatprep.mubr.msk.bf16.mxu1 %vm12638_vm0, %v14875_v30  ;;  %v11930_v12 = vld [vmem:[#allocation7 + $0x128] ss:$12 sps:$4 sm:$0xff]  }
 0x816   : > { %6957 = vmatpush1.bf16.msra.mxu0 %v13820_v22  ;;  %11213 = vmatpush3.bf16.msra.mxu1 %v11920_v29  ;;  %v14929_v22 = vld [vmem:[#allocation26_spill] sm:$0xff] }
 0x817   : > { %6958 = vmatprep.subr.bf16.mxu0 %v13824_v38  ;;  %11214 = vmatprep.subr.bf16.mxu1 %v14875_v30  ;;  %v14930_v38 = vld [vmem:[#allocation27_spill] sm:$0xff]  ;;  %v11931_v29 = vld [vmem:[#allocation7 + $0x110] ss:$12 sps:$4 sm:$0xff]  }
 0x81a   : > { %6959 = vmatpush1.bf16.msra.mxu0 %v13830_v18  ;;  %11215 = vmatpush3.bf16.msra.mxu1 %v11921_v28  ;;  %v14931_v18 = vld [vmem:[#allocation28_spill] sm:$0xff]  ;;  %v11932_v28 = vld [vmem:[#allocation7 + $0xf8] ss:$12 sps:$4 sm:$0xff]  }
 0x81b   : > { %6960 = vmatprep.subr.bf16.mxu0 %v13834_v19  ;;  %11216 = vmatprep.subr.bf16.mxu1 %v14875_v30  ;;  %v14932_v19 = vld [vmem:[#allocation29_spill] sm:$0xff] }
 0x81e   : > { %6961 = vmatpush1.bf16.msra.mxu0 %v13837_v20  ;;  %11217 = vmatpush3.bf16.msra.mxu1 %v11922_v5  ;;  %v14933_v20 = vld [vmem:[#allocation30_spill] sm:$0xff] }
 0x81f   : > { %6962 = vmatprep.subr.bf16.mxu0 %v13841_v48  ;;  %11218 = vmatprep.subr.bf16.mxu1 %v14875_v30  ;;  %v14934_v48 = vld [vmem:[#allocation31_spill] sm:$0xff] }
 0x822   : > { %6963 = vmatpush1.bf16.msra.mxu0 %v13844_v57  ;;  %11219 = vmatpush3.bf16.msra.mxu1 %v11923_v0  ;;  %v14935_v57 = vld [vmem:[#allocation32_spill] sm:$0xff] }
 0x823   : > { %6964 = vmatprep.subr.bf16.mxu0 %v14925_v32  ;;  %11220 = vmatprep.subr.bf16.mxu1 %v14875_v30  ;;  %v11933_v0 = vld [vmem:[#allocation7 + $0xe0] ss:$12 sps:$4 sm:$0xff]   ;;  %v11934_v32 = vld [vmem:[#allocation7 + $0xc8] ss:$12 sps:$4 sm:$0xff]  }
 0x826   : > { %6965 = vmatpush1.bf16.msra.mxu0 %v14926_v47  ;;  %11221 = vmatpush3.bf16.msra.mxu1 %v11924_v59  ;;  %v10169_v47 = vld [vmem:[%s14752_s7 + $0x3] sm:$0x7] }
 0x827   : > { %6966 = vmatprep.subr.bf16.mxu0 %v14927_v6  ;;  %11222 = vmatprep.subr.bf16.mxu1 %v14875_v30  ;;  %v5996_v6 = vrot.slane %v10169_v47, %v14900_v50 }
 0x82a   : > { %6967 = vmatpush1.bf16.msra.mxu0 %v14928_v39  ;;  %11223 = vmatpush3.bf16.msra.mxu1 %v11925_v43  ;;  %v6000_v39 = vrot.slane %v10169_v47, %v13038_v9 }
 0x82b   : > { %6968 = vmatprep.subr.bf16.mxu0 %v14929_v22  ;;  %11224 = vmatprep.subr.bf16.mxu1 %v14875_v30 }
 0x82e   : > { %6969 = vmatpush1.bf16.msra.mxu0 %v14930_v38  ;;  %11225 = vmatpush3.bf16.msra.mxu1 %v11926_v15 }
 0x82f   : > { %7271 = vmatprep.subr.bf16.mxu0 %v14931_v18  ;;  %11230 = vmatprep.subr.bf16.mxu1 %v14875_v30 }
 0x831   : > { %6987 = vmatmul.mubr.bf16.vlgmr.msra.gmra.mxu0 %v13984_v58  ;;  %11227 = vmatmul.mubr.bf16.vlgmr.msra.gmra.mxu1 %v13984_v58  ;;  %v14939_v58 = vld [vmem:[#allocation37_spill] sm:$0xff] }
 0x832   : > { %7272 = vmatpush1.bf16.msra.mxu0 %v14932_v19  ;;  %7303 = vmatprep.mubr.bf16.mxu0 %v14876_v61 }
 0x833   : > { %7273 = vmatprep.subr.bf16.mxu0 %v14933_v20  ;;  %11246 = vmatprep.mubr.msk.bf16.mxu1 %vm12638_vm0, %v14875_v30 }
 0x834   : > { %11231 = vmatpush3.bf16.msra.mxu1 %v11927_v35 }
 0x835   : > { %11232 = vmatprep.subr.bf16.mxu1 %v14875_v30 }
 0x836   : > { %7274 = vmatpush1.bf16.msra.mxu0 %v14934_v48 }
 0x837   : > { %7275 = vmatprep.subr.bf16.mxu0 %v14935_v57 }
 0x838   : > { %11233 = vmatpush3.bf16.msra.mxu1 %v11928_v40 }
 0x839   : > { %11234 = vmatprep.subr.bf16.mxu1 %v14875_v30 }
 0x83a   : > { %7276 = vmatpush1.bf16.msra.mxu0 %v14936_v36 }
 0x83b   : > { %7277 = vmatprep.subr.bf16.mxu0 %v14937_v24 }
 0x83c   : > { %11235 = vmatpush3.bf16.msra.mxu1 %v11929_v41 }
 0x83d   : > { %11236 = vmatprep.subr.bf16.mxu1 %v14875_v30 }
 0x83e   : > { %7278 = vmatpush1.bf16.msra.mxu0 %v14938_v7 }
 0x83f   : > { %7279 = vmatprep.subr.bf16.mxu0 %v14939_v58 }
 0x840   : > { %11237 = vmatpush3.bf16.msra.mxu1 %v11930_v12 }
 0x841   : > { %11238 = vmatprep.subr.bf16.mxu1 %v14875_v30 }
 0x842   : > { %7280 = vmatpush1.bf16.msra.mxu0 %v14940_v17 }
 0x843   : > { %7281 = vmatprep.subr.bf16.mxu0 %v14941_v2 }
 0x844   : > { %11239 = vmatpush3.bf16.msra.mxu1 %v11931_v29  ;;  %v14145_v29 = vld [vmem:[%s14753_s8 + $0x1] ss:$0 sm:$0xff] }
 0x845   : > { %11240 = vmatprep.subr.bf16.mxu1 %v14875_v30 }
 0x846   : > { %7282 = vmatpush1.bf16.msra.mxu0 %v14942_v11 }
 0x847   : > { %7283 = vmatprep.subr.bf16.mxu0 %v14943_v54 }
 0x848   : > { %11241 = vmatpush3.bf16.msra.mxu1 %v11932_v28 }
 0x849   : > { %11242 = vmatprep.subr.bf16.mxu1 %v14875_v30 }
 0x84a   : > { %7284 = vmatpush1.bf16.msra.mxu0 %v14944_v23 }
 0x84b   : > { %7285 = vmatprep.subr.bf16.mxu0 %v14945_v46 }
 0x84c   : > { %11243 = vmatpush3.bf16.msra.mxu1 %v11933_v0 }
 0x84d   : > { %11244 = vmatprep.subr.bf16.mxu1 %v14875_v30 }
 0x84e   : > { %7286 = vmatpush1.bf16.msra.mxu0 %v14946_v13 }
 0x84f   : > { %7516 = vmatprep.subr.bf16.mxu0 %v14947_v51 }
 0x850   : > { %11245 = vmatpush3.bf16.msra.mxu1 %v11934_v32 }
 0x851   : > { %11250 = vmatprep.subr.bf16.mxu1 %v14875_v30 }
 0x891   : > { %v14125_v16 = vpop.f32.mrf.mxu1  ;;  %v6170_v5 = vpop.f32.mrf.mxu0 }
 0x892   : > { %v6171_v22 = vadd.f32 %v6170_v5, %v5996_v6  ;;  %v6004_v5 = vrot.slane %v10169_v47, %v13041_v52 }
 0x893   : > { %v11168_v4 = vpop.f32.mrf.mxu1  ;;  %v6172_v59 = vpop.f32.mrf.mxu0 }
 0x894   : > { %v6173_v19 = vadd.f32 %v6172_v59, %v6000_v39 }
 0x895   : > { %v14128_v37 = vpop.f32.mrf.mxu1  ;;  %v6174_v43 = vpop.f32.mrf.mxu0 }
 0x896   : > { %v6175_v36 = vadd.f32 %v6174_v43, %v5996_v6 }
 0x897   : > { %v11169_v3 = vpop.f32.mrf.mxu1  ;;  %v6176_v15 = vpop.f32.mrf.mxu0 }
 0x898   : > { %v6177_v46 = vadd.f32 %v6176_v15, %v6000_v39  ;;  %v6214_v15 = vadd.f32 %v14125_v16, %v6004_v5 }
 0x8b1   : > { %v6415_v38 = vpop.f32.mrf.mxu0  ;;  %v6458_v18 = vpop.f32.mrf.mxu1 }
 0x8b2   : > { %v6465_v20 = vadd.f32 %v6415_v38, %v6171_v22  ;;  %v6500_v32 = vadd.f32 %v14145_v29, %v6458_v18 }
 0x8b3   : > { %v6417_v48 = vpop.f32.mrf.mxu0  ;;  %v11188_v57 = vpop.f32.mrf.mxu1 }
 0x8b4   : > { %v10218_v24 = vmul.f32 -1.442695, %v6465_v20  ;;  %v6479_v7 = vadd.f32 %v6417_v48, %v6173_v19  ;;  %v6217_v57 = vadd.f32 %v14128_v37, %v6004_v5  ;;  %v6558_v37 = vld [vmem:[%s14752_s7] sm:$0x7] }
 0x8b5   : > { %v6419_v58 = vpop.f32.mrf.mxu0  ;;  %v6461_v17 = vpop.f32.mrf.mxu1 }
 0x8b6   : > { %12276 = vpow2.f32 %v10218_v24  ;;  %v6466_v2 = vadd.f32 %v6419_v58, %v6175_v36  ;;  %v10220_v51 = vmul.f32 -1.442695, %v6479_v7  ;;  %v6501_v20 = vadd.f32 %v14145_v29, %v6461_v17 }
 0x8b7   : > { %v11189_v11 = vpop.f32.mrf.mxu1  ;;  %v6421_v23 = vpop.f32.mrf.mxu0 }
 0x8b8   : > { %v10219_v54 = vmul.f32 -1.442695, %v6466_v2  ;;  %v6480_v13 = vadd.f32 %v6421_v23, %v6177_v46 }
 0x8ba   : > { %12278 = vpow2.f32 %v10219_v54  ;;  %v10221_v35 = vmul.f32 -1.442695, %v6480_v13 }
 0x8bb   : > { %12280 = vpow2.f32 %v10220_v51 }
 0x8bc   : > { %12282 = vpow2.f32 %v10221_v35 }
 0x8c3   : > { %v12277_v40 = vpop.eup %12276 }
 0x8c4   : > { %v6473_v4 = vadd.f32 1.0, %v12277_v40 }
 0x8c6   : > { %12284 = vrcp.f32 %v6473_v4  ;;  %v6563_v4 = vrot.slane %v6558_v37, %v14900_v50 }
 0x8c7   : > { %v12279_v41 = vpop.eup %12278 }
 0x8c8   : > { %v6474_v3 = vadd.f32 1.0, %v12279_v41  ;;  %v12281_v12 = vpop.eup %12280 }
 0x8c9   : > { %v12283_v28 = vpop.eup %12282  ;;  %v6487_v0 = vadd.f32 1.0, %v12281_v12 }
 0x8ca   : > { %12286 = vrcp.f32 %v6474_v3  ;;  %v6488_v6 = vadd.f32 1.0, %v12283_v28 }
 0x8cb   : > { %12288 = vrcp.f32 %v6487_v0 }
 0x8cc   : > { %12290 = vrcp.f32 %v6488_v6 }
 0x8d1   : > { %v14148_v59 = vpop.f32.mrf.mxu1  ;;  %v6743_v7 = vpop.f32.mrf.mxu0 }
 0x8d2   : > { %v6744_v12 = vadd.f32 %v6743_v7, %v6563_v4 }
 0x8d3   : > { %v12285_v43 = vpop.eup %12284  ;;  %v11208_v39 = vpop.f32.mrf.mxu1 }
 0x8d4   : > { %v6502_v22 = vmul.f32 %v12285_v43, %v6500_v32  ;;  %v6745_v23 = vpop.f32.mrf.mxu0  ;;  %v6567_v43 = vrot.slane %v6558_v37, %v13038_v9 }
 0x8d5   : > { %v14152_v38 = vpop.f32.mrf.mxu1 }
 0x8d6   : > { %v6504_v19 = vadd.f32 %v6502_v22, %v6214_v15  ;;  %v6747_v40 = vpop.f32.mrf.mxu0 }
 0x8d7   : > { %v12287_v48 = vpop.eup %12286  ;;  %v11209_v47 = vpop.f32.mrf.mxu1  ;;  %v6748_v6 = vadd.f32 %v6747_v40, %v6563_v4 }
 0x8d8   : > { %12292 = vtanh.f32 %v6504_v19  ;;  %v6503_v36 = vmul.f32 %v12287_v48, %v6501_v20  ;;  %v12289_v24 = vpop.eup %12288  ;;  %v6749_v3 = vpop.f32.mrf.mxu0  ;;  %v6746_v20 = vadd.f32 %v6745_v23, %v6567_v43  ;;  %v6571_v23 = vrot.slane %v6558_v37, %v13041_v52 }
 0x8d9   : > { %v12291_v58 = vpop.eup %12290  ;;  %v6508_v16 = vsub.f32 1.0, %v12289_v24  ;;  %v6512_v54 = vmul.f32 %v12289_v24, %v13954_v42 }
 0x8da   : > { %v6505_v18 = vadd.f32 %v6503_v36, %v6217_v57  ;;  %v6509_v46 = vsub.f32 1.0, %v12291_v58  ;;  %v6513_v35 = vmul.f32 %v12291_v58, %v13961_v55  ;;  %v6750_v57 = vadd.f32 %v6749_v3, %v6567_v43 }
 0x8db   : > { %v6787_v4 = vadd.f32 %v14148_v59, %v6571_v23 }
 0x8dc   : > { %12294 = vtanh.f32 %v6505_v18 }
 0x8e5   : > { %v12293_v2 = vpop.eup %12292 }
 0x8e6   : > { %v6510_v11 = vmul.f32 %v12293_v2, %v6508_v16 }
 0x8e8   : > { %v14157_v17 = vadd.f32 %v6512_v54, %v6510_v11 }
 0x8e9   : > { %v12295_v13 = vpop.eup %12294 }
 0x8ea   : > { %v6511_v51 = vmul.f32 %v12295_v13, %v6509_v46 }
 0x8ec   : > { %v14164_v41 = vadd.f32 %v6513_v35, %v6511_v51 }
 0x8f1   : > { %v6988_v42 = vpop.f32.mrf.mxu0  ;;  %v7031_v28 = vpop.f32.mrf.mxu1 }
 0x8f2   : > { %v7038_v5 = vadd.f32 %v6988_v42, %v6744_v12  ;;  %v7073_v13 = vadd.f32 %v13967_v34, %v7031_v28 }
 0x8f3   : > { %v6990_v0 = vpop.f32.mrf.mxu0  ;;  %v11228_v32 = vpop.f32.mrf.mxu1 }
 0x8f4   : > { %v10275_v39 = vmul.f32 -1.442695, %v7038_v5  ;;  %v7052_v36 = vadd.f32 %v6990_v0, %v6746_v20  ;;  %v6790_v0 = vadd.f32 %v14152_v38, %v6571_v23  ;;  %v11935_v38 = vld [vmem:[#allocation9 + $0x170] ss:$12 sps:$4 sm:$0xff]   ;;  %v11970_v23 = vld [vmem:[#allocation7 + $0x20] ss:$12 sps:$4 sm:$0xff]  }
 0x8f5   : > { %v6992_v15 = vpop.f32.mrf.mxu0  ;;  %v7034_v22 = vpop.f32.mrf.mxu1 }
 0x8f6   : > { %12296 = vpow2.f32 %v10275_v39  ;;  %v7039_v55 = vadd.f32 %v6992_v15, %v6748_v6  ;;  %v10277_v24 = vmul.f32 -1.442695, %v7052_v36  ;;  %v7074_v42 = vadd.f32 %v13967_v34, %v7034_v22  ;;  %v11955_v36 = vld [vmem:[#allocation7 + $0x60] ss:$12 sps:$4 sm:$0xff]  }
 0x8f7   : > { %v11229_v19 = vpop.f32.mrf.mxu1  ;;  %v6994_v47 = vpop.f32.mrf.mxu0 }
 0x8f8   : > { %v10276_v48 = vmul.f32 -1.442695, %v7039_v55  ;;  %v7053_v18 = vadd.f32 %v6994_v47, %v6750_v57  ;;  %v11936_v57 = vld [vmem:[#allocation9 + $0x158] ss:$12 sps:$4 sm:$0xff]  }
 0x8fa   : > { %12298 = vpow2.f32 %v10276_v48  ;;  %v10278_v7 = vmul.f32 -1.442695, %v7053_v18  ;;  %v11958_v18 = vld [vmem:[#allocation7 + $0x68] ss:$12 sps:$4 sm:$0xff]  }
 0x8fb   : > { %12300 = vpow2.f32 %v10277_v24  ;;  %v11961_v24 = vld [vmem:[#allocation7 + $0x4c] ss:$12 sps:$4 sm:$0xff]  }
 0x8fc   : > { %12302 = vpow2.f32 %v10278_v7  ;;  %v11959_v7 = vld [vmem:[#allocation7 + $0x48] ss:$12 sps:$4 sm:$0xff]  }
 0x903   : > { %v12297_v58 = vpop.eup %12296 }
 0x904   : > { %v7046_v16 = vadd.f32 1.0, %v12297_v58  ;;  %v11962_v58 = vld [vmem:[#allocation7 + $0x50] ss:$12 sps:$4 sm:$0xff]  }
 0x906   : > { %12304 = vrcp.f32 %v7046_v16  ;;  %v11965_v16 = vld [vmem:[#allocation7 + $0x34] ss:$12 sps:$4 sm:$0xff]  }
 0x907   : > { %v12299_v2 = vpop.eup %12298 }
 0x908   : > { %v7047_v11 = vadd.f32 1.0, %v12299_v2  ;;  %v12301_v54 = vpop.eup %12300  ;;  %v11963_v2 = vld [vmem:[#allocation7 + $0x30] ss:$12 sps:$4 sm:$0xff]  }
 0x909   : > { %v12303_v46 = vpop.eup %12302  ;;  %v7060_v51 = vadd.f32 1.0, %v12301_v54  ;;  %v11969_v54 = vld [vmem:[#allocation7 + $0x1c] ss:$12 sps:$4 sm:$0xff]  }
 0x90a   : > { %12306 = vrcp.f32 %v7047_v11  ;;  %v7061_v40 = vadd.f32 1.0, %v12303_v46  ;;  %v11966_v11 = vld [vmem:[#allocation7 + $0x38] ss:$12 sps:$4 sm:$0xff]  }
 0x90b   : > { %12308 = vrcp.f32 %v7060_v51  ;;  %v11967_v46 = vld [vmem:[#allocation7 + $0x18] ss:$12 sps:$4 sm:$0xff]   ;;  %v11971_v51 = vld [vmem:[#allocation7] ss:$12 sps:$4 sm:$0xff]  }
 0x90c   : > { %12310 = vrcp.f32 %v7061_v40  ;;  %v11978_v40 = vld [vmem:[#allocation9 + $0xac] ss:$12 sps:$4 sm:$0xff]  }
 0x913   : > { %v12305_v35 = vpop.eup %12304 }
 0x914   : > { %v7075_v3 = vmul.f32 %v12305_v35, %v7073_v13  ;;  %v11973_v13 = vld [vmem:[#allocation7 + $0x4] ss:$12 sps:$4 sm:$0xff]   ;;  %v11974_v35 = vld [vmem:[#allocation7 + $0x8] ss:$12 sps:$4 sm:$0xff]  }
 0x916   : > { %v7077_v12 = vadd.f32 %v7075_v3, %v6787_v4  ;;  %v11975_v4 = vld [vmem:[%s12824_s25 + $0x30] sm:$0xff]   ;;  %v11976_v3 = vld [vmem:[#allocation9 + $0xa8] ss:$12 sps:$4 sm:$0xff]  }
 0x917   : > { %v12307_v5 = vpop.eup %12306 }
 0x918   : > { %12312 = vtanh.f32 %v7077_v12  ;;  %v7076_v32 = vmul.f32 %v12307_v5, %v7074_v42  ;;  %v12309_v37 = vpop.eup %12308  ;;  %v11979_v12 = vld [vmem:[#allocation9 + $0xb0] ss:$12 sps:$4 sm:$0xff]   ;;  %v11982_v42 = vld [vmem:[#allocation9 + $0x94] ss:$12 sps:$4 sm:$0xff]  }
 0x919   : > { %v12311_v28 = vpop.eup %12310  ;;  %v7081_v39 = vsub.f32 1.0, %v12309_v37  ;;  %v7085_v20 = vmul.f32 %v12309_v37, %v13976_v49  ;;  %v11937_v49 = vld [vmem:[#allocation9 + $0x140] ss:$12 sps:$4 sm:$0xff]   ;;  %v11980_v5 = vld [vmem:[#allocation9 + $0x90] ss:$12 sps:$4 sm:$0xff]  }
 0x91a   : > { %v7078_v43 = vadd.f32 %v7076_v32, %v6790_v0  ;;  %v7082_v15 = vsub.f32 1.0, %v12311_v28  ;;  %v7086_v34 = vmul.f32 %v12311_v28, %v13978_v62  ;;  %v11938_v62 = vld [vmem:[#allocation9 + $0x128] ss:$12 sps:$4 sm:$0xff]   ;;  %v11983_v0 = vld [vmem:[#allocation9 + $0x98] ss:$12 sps:$4 sm:$0xff]  }
 0x91b   : > { %v11986_v32 = vld [vmem:[#allocation9 + $0x7c] ss:$12 sps:$4 sm:$0xff]   ;;  %v11987_v37 = vld [vmem:[#allocation9 + $0x80] ss:$12 sps:$4 sm:$0xff]   ;;  %v11990_v28 = vld [vmem:[#allocation9 + $0x64] ss:$12 sps:$4 sm:$0xff]  }
 0x91c   : > { %12314 = vtanh.f32 %v7078_v43  ;;  %v11984_v43 = vld [vmem:[#allocation9 + $0x78] ss:$12 sps:$4 sm:$0xff]  }
 0x925   : > { %v12313_v6 = vpop.eup %12312 }
 0x926   : > { %v7083_v55 = vmul.f32 %v12313_v6, %v7081_v39  ;;  %v11988_v6 = vld [vmem:[#allocation9 + $0x60] ss:$12 sps:$4 sm:$0xff]   ;;  %v11991_v39 = vld [vmem:[#allocation9 + $0x68] ss:$12 sps:$4 sm:$0xff]  }
 0x928   : > { %v14174_v22 = vadd.f32 %v7085_v20, %v7083_v55  ;;  %v11992_v55 = vld [vmem:[#allocation9 + $0x48] ss:$12 sps:$4 sm:$0xff]   ;;  %v11996_v20 = vld [vmem:[#allocation9 + $0x30] ss:$12 sps:$4 sm:$0xff]  }
 0x929   : > { %v12315_v59 = vpop.eup %12314 }
 0x92a   : > { %v7084_v19 = vmul.f32 %v12315_v59, %v7082_v15  ;;  %v11994_v15 = vld [vmem:[#allocation9 + $0x4c] ss:$12 sps:$4 sm:$0xff]   ;;  %v11995_v59 = vld [vmem:[#allocation9 + $0x50] ss:$12 sps:$4 sm:$0xff]  }
 0x92c   : > { %v14176_v48 = vadd.f32 %v7086_v34, %v7084_v19  ;;  %v11998_v19 = vld [vmem:[#allocation9 + $0x34] ss:$12 sps:$4 sm:$0xff]   ;;  %v11999_v34 = vld [vmem:[#allocation9 + $0x38] ss:$12 sps:$4 sm:$0xff]  }
 0x92e   : > { %v14180_v47 = vpack.c.bf16 %v14176_v48, %v14174_v22 }
 0x930   : > { %7304 = vmatmul.mubr.bf16.vlgmr.msra.gmra.mxu0 %v14180_v47  ;;  %11247 = vmatmul.mubr.bf16.vlgmr.msra.gmra.mxu1 %v14180_v47 }
 0x931   : > { %7517 = vmatpush1.bf16.msra.mxu0 %v13980_v25  ;;  %11251 = vmatpush3.bf16.msra.mxu1 %v11935_v38  ;;  %v11939_v25 = vld [vmem:[#allocation9 + $0x110] ss:$12 sps:$4 sm:$0xff]  }
 0x932   : > { %7518 = vmatprep.subr.bf16.mxu0 %v13986_v33  ;;  %11252 = vmatprep.subr.bf16.mxu1 %v14875_v30  ;;  %v11940_v33 = vld [vmem:[#allocation9 + $0xf8] ss:$12 sps:$4 sm:$0xff]   ;;  %v12002_v38 = vld [vmem:[#allocation9 + $0x1c] ss:$12 sps:$4 sm:$0xff]  }
 0x933   : > { %7548 = vmatprep.mubr.bf16.mxu0 %v14876_v61  ;;  %11266 = vmatprep.mubr.msk.bf16.mxu1 %vm12638_vm0, %v14875_v30 }
 0x935   : > { %7519 = vmatpush1.bf16.msra.mxu0 %v13991_v60  ;;  %11253 = vmatpush3.bf16.msra.mxu1 %v11936_v57  ;;  %v11941_v60 = vld [vmem:[#allocation9 + $0xe0] ss:$12 sps:$4 sm:$0xff]   ;;  %v12000_v57 = vld [vmem:[#allocation9 + $0x18] ss:$12 sps:$4 sm:$0xff]  }
 0x936   : > { %7520 = vmatprep.subr.bf16.mxu0 %v13995_v63  ;;  %11254 = vmatprep.subr.bf16.mxu1 %v14875_v30  ;;  %v11942_v63 = vld [vmem:[#allocation9 + $0xc8] ss:$12 sps:$4 sm:$0xff]  }
 0x939   : > { %7521 = vmatpush1.bf16.msra.mxu0 %v14001_v26  ;;  %11255 = vmatpush3.bf16.msra.mxu1 %v11937_v49  ;;  %v11945_v26 = vld [vmem:[#allocation7 + $0xac] ss:$12 sps:$4 sm:$0xff]  }
 0x93a   : > { %7522 = vmatprep.subr.bf16.mxu0 %v14005_v21  ;;  %11256 = vmatprep.subr.bf16.mxu1 %v14875_v30  ;;  %v11943_v21 = vld [vmem:[#allocation7 + $0xa8] ss:$12 sps:$4 sm:$0xff]   ;;  %v12003_v49 = vld [vmem:[#allocation9 + $0x20] ss:$12 sps:$4 sm:$0xff]  }
 0x93d   : > { %7523 = vmatpush1.bf16.msra.mxu0 %v14008_v53  ;;  %11257 = vmatpush3.bf16.msra.mxu1 %v11938_v62  ;;  %v11946_v53 = vld [vmem:[#allocation7 + $0xb0] ss:$12 sps:$4 sm:$0xff]  }
 0x93e   : > { %7524 = vmatprep.subr.bf16.mxu0 %v14012_v1  ;;  %11258 = vmatprep.subr.bf16.mxu1 %v14875_v30  ;;  %v14211_v1 = vpack.c.bf16 %v14164_v41, %v14157_v17  ;;  %v12006_v62 = vld [vmem:[#allocation9 + $0x4] ss:$12 sps:$4 sm:$0xff]  }
 0x941   : > { %7525 = vmatpush1.bf16.msra.mxu0 %v14015_v14  ;;  %11259 = vmatpush3.bf16.msra.mxu1 %v11939_v25  ;;  %v11949_v14 = vld [vmem:[#allocation7 + $0x94] ss:$12 sps:$4 sm:$0xff]  }
 0x942   : > { %7526 = vmatprep.subr.bf16.mxu0 %v14019_v10  ;;  %11260 = vmatprep.subr.bf16.mxu1 %v14875_v30  ;;  %v11947_v10 = vld [vmem:[#allocation7 + $0x90] ss:$12 sps:$4 sm:$0xff]   ;;  %v12004_v25 = vld [vmem:[#allocation9] ss:$12 sps:$4 sm:$0xff]  }
 0x945   : > { %7527 = vmatpush1.bf16.msra.mxu0 %v14022_v45  ;;  %11261 = vmatpush3.bf16.msra.mxu1 %v11940_v33  ;;  %v11950_v45 = vld [vmem:[#allocation7 + $0x98] ss:$12 sps:$4 sm:$0xff]   ;;  %v12007_v33 = vld [vmem:[#allocation9 + $0x8] ss:$12 sps:$4 sm:$0xff]  }
 0x946   : > { %7528 = vmatprep.subr.bf16.mxu0 %v14026_v56  ;;  %11262 = vmatprep.subr.bf16.mxu1 %v14875_v30  ;;  %v11953_v56 = vld [vmem:[#allocation7 + $0x7c] ss:$12 sps:$4 sm:$0xff]  }
 0x949   : > { %7529 = vmatpush1.bf16.msra.mxu0 %v14029_v31  ;;  %11263 = vmatpush3.bf16.msra.mxu1 %v11941_v60  ;;  %v11951_v31 = vld [vmem:[#allocation7 + $0x78] ss:$12 sps:$4 sm:$0xff]  }
 0x94a   : > { %7530 = vmatprep.subr.bf16.mxu0 %v14033_v8  ;;  %11264 = vmatprep.subr.bf16.mxu1 %v14875_v30  ;;  %v11954_v8 = vld [vmem:[#allocation7 + $0x80] ss:$12 sps:$4 sm:$0xff]  }
 0x94b   : > { %v12010_v60 = vld [vmem:[#allocation7 + $0x16c] ss:$12 sps:$4 sm:$0xff]  }
 0x94d   : > { %7531 = vmatpush1.bf16.msra.mxu0 %v14036_v44  ;;  %11265 = vmatpush3.bf16.msra.mxu1 %v11942_v63  ;;  %v11957_v44 = vld [vmem:[#allocation7 + $0x64] ss:$12 sps:$4 sm:$0xff]   ;;  %v12008_v63 = vld [vmem:[#allocation7 + $0x168] ss:$12 sps:$4 sm:$0xff]  }
 0x94e   : > { %7844 = vmatprep.subr.bf16.mxu0 %v11945_v26  ;;  %11270 = vmatprep.subr.bf16.mxu1 %v14875_v30  ;;  %v12011_v26 = vld [vmem:[#allocation7 + $0x170] ss:$12 sps:$4 sm:$0xff]  }
 0x950   : > { %7549 = vmatmul.mubr.bf16.vlgmr.msra.gmra.mxu0 %v14211_v1  ;;  %11267 = vmatmul.mubr.bf16.vlgmr.msra.gmra.mxu1 %v14211_v1 }
 0x951   : > { %7845 = vmatpush1.bf16.msra.mxu0 %v11943_v21  ;;  %11271 = vmatpush3.bf16.msra.mxu1 %v11946_v53  ;;  %v12014_v53 = vld [vmem:[#allocation7 + $0x154] ss:$12 sps:$4 sm:$0xff]  }
 0x952   : > { %7846 = vmatprep.subr.bf16.mxu0 %v11949_v14  ;;  %11272 = vmatprep.subr.bf16.mxu1 %v14875_v30  ;;  %v12012_v14 = vld [vmem:[#allocation7 + $0x150] ss:$12 sps:$4 sm:$0xff]  }
 0x953   : > { %7876 = vmatprep.mubr.bf16.mxu0 %v14876_v61  ;;  %11286 = vmatprep.mubr.msk.bf16.mxu1 %vm12638_vm0, %v14875_v30 }
 0x955   : > { %7847 = vmatpush1.bf16.msra.mxu0 %v11947_v10  ;;  %11273 = vmatpush3.bf16.msra.mxu1 %v11950_v45  ;;  %v12015_v10 = vld [vmem:[#allocation7 + $0x158] ss:$12 sps:$4 sm:$0xff]  }
 0x956   : > { %7848 = vmatprep.subr.bf16.mxu0 %v11953_v56  ;;  %11274 = vmatprep.subr.bf16.mxu1 %v14875_v30  ;;  %v12018_v56 = vld [vmem:[#allocation7 + $0x13c] ss:$12 sps:$4 sm:$0xff]  }
 0x959   : > { %7849 = vmatpush1.bf16.msra.mxu0 %v11951_v31  ;;  %11275 = vmatpush3.bf16.msra.mxu1 %v11954_v8  ;;  %v12016_v31 = vld [vmem:[#allocation7 + $0x138] ss:$12 sps:$4 sm:$0xff]   ;;  %v12019_v8 = vld [vmem:[#allocation7 + $0x140] ss:$12 sps:$4 sm:$0xff]  }
 0x95a   : > { %7850 = vmatprep.subr.bf16.mxu0 %v11957_v44  ;;  %11276 = vmatprep.subr.bf16.mxu1 %v14875_v30 }
 0x95d   : > { %7851 = vmatpush1.bf16.msra.mxu0 %v11955_v36  ;;  %11277 = vmatpush3.bf16.msra.mxu1 %v11958_v18  ;;  %v12022_v36 = vld [vmem:[#allocation7 + $0x124] ss:$12 sps:$4 sm:$0xff]   ;;  %v12020_v18 = vld [vmem:[#allocation7 + $0x120] ss:$12 sps:$4 sm:$0xff]  }
 0x95e   : > { %7852 = vmatprep.subr.bf16.mxu0 %v11961_v24  ;;  %11278 = vmatprep.subr.bf16.mxu1 %v14875_v30  ;;  %v12023_v24 = vld [vmem:[#allocation7 + $0x128] ss:$12 sps:$4 sm:$0xff]  }
 0x961   : > { %7853 = vmatpush1.bf16.msra.mxu0 %v11959_v7  ;;  %11279 = vmatpush3.bf16.msra.mxu1 %v11962_v58  ;;  %v12024_v7 = vld [vmem:[#allocation7 + $0x108] ss:$12 sps:$4 sm:$0xff]   ;;  %v12026_v58 = vld [vmem:[#allocation7 + $0x10c] ss:$12 sps:$4 sm:$0xff]  }
 0x962   : > { %7854 = vmatprep.subr.bf16.mxu0 %v11965_v16  ;;  %11280 = vmatprep.subr.bf16.mxu1 %v14875_v30  ;;  %v12027_v16 = vld [vmem:[#allocation7 + $0x110] ss:$12 sps:$4 sm:$0xff]  }
 0x965   : > { %7855 = vmatpush1.bf16.msra.mxu0 %v11963_v2  ;;  %11281 = vmatpush3.bf16.msra.mxu1 %v11966_v11  ;;  %v12030_v2 = vld [vmem:[#allocation7 + $0xf4] ss:$12 sps:$4 sm:$0xff]   ;;  %v12028_v11 = vld [vmem:[#allocation7 + $0xf0] ss:$12 sps:$4 sm:$0xff]  }
 0x966   : > { %7856 = vmatprep.subr.bf16.mxu0 %v11969_v54  ;;  %11282 = vmatprep.subr.bf16.mxu1 %v14875_v30  ;;  %v12031_v54 = vld [vmem:[#allocation7 + $0xf8] ss:$12 sps:$4 sm:$0xff]  }
 0x969   : > { %7857 = vmatpush1.bf16.msra.mxu0 %v11967_v46  ;;  %11283 = vmatpush3.bf16.msra.mxu1 %v11970_v23  ;;  %v12034_v46 = vld [vmem:[#allocation7 + $0xdc] ss:$12 sps:$4 sm:$0xff]  }
 0x96a   : > { %7858 = vmatprep.subr.bf16.mxu0 %v11973_v13  ;;  %11284 = vmatprep.subr.bf16.mxu1 %v14875_v30  ;;  %v12032_v13 = vld [vmem:[#allocation7 + $0xd8] ss:$12 sps:$4 sm:$0xff]  }
 0x96d   : > { %7859 = vmatpush1.bf16.msra.mxu0 %v11971_v51  ;;  %11285 = vmatpush3.bf16.msra.mxu1 %v11974_v35  ;;  %v12035_v51 = vld [vmem:[#allocation7 + $0xe0] ss:$12 sps:$4 sm:$0xff]   ;;  %v12038_v35 = vld [vmem:[#allocation7 + $0xc4] ss:$12 sps:$4 sm:$0xff]  }
 0x96e   : > { %8089 = vmatprep.subr.bf16.mxu0 %v11978_v40  ;;  %11290 = vmatprep.subr.bf16.mxu1 %v14875_v30 }
 0x970   : > { %7877 = vmatmul.mubr.bf16.vlgmr.msra.gmra.mxu0 %v11975_v4  ;;  %11287 = vmatmul.mubr.bf16.vlgmr.msra.gmra.mxu1 %v11975_v4  ;;  %v12036_v4 = vld [vmem:[#allocation7 + $0xc0] ss:$12 sps:$4 sm:$0xff]  }
 0x971   : > { %8090 = vmatpush1.bf16.msra.mxu0 %v11976_v3  ;;  %11291 = vmatpush3.bf16.msra.mxu1 %v11979_v12  ;;  %v12039_v3 = vld [vmem:[#allocation7 + $0xc8] ss:$12 sps:$4 sm:$0xff]  }
 0x972   : > { %8091 = vmatprep.subr.bf16.mxu0 %v11982_v42  ;;  %11292 = vmatprep.subr.bf16.mxu1 %v14875_v30  ;;  %v10280_v12 = vld [vmem:[%s14752_s7 + $0x3] sm:$0x7]  ;;  %v12042_v42 = vld [vmem:[#allocation9 + $0x16c] ss:$12 sps:$4 sm:$0xff]  }
 0x973   : > { %8121 = vmatprep.mubr.bf16.mxu0 %v14876_v61  ;;  %11306 = vmatprep.mubr.msk.bf16.mxu1 %vm12638_vm0, %v14875_v30 }
 0x975   : > { %8092 = vmatpush1.bf16.msra.mxu0 %v11980_v5  ;;  %11293 = vmatpush3.bf16.msra.mxu1 %v11983_v0  ;;  %v7131_v0 = vrot.slane %v10280_v12, %v14900_v50 }
 0x976   : > { %8093 = vmatprep.subr.bf16.mxu0 %v11986_v32  ;;  %11294 = vmatprep.subr.bf16.mxu1 %v14875_v30  ;;  %v7135_v32 = vrot.slane %v10280_v12, %v13038_v9 }
 0x979   : > { %8094 = vmatpush1.bf16.msra.mxu0 %v11984_v43  ;;  %11295 = vmatpush3.bf16.msra.mxu1 %v11987_v37 }
 0x97a   : > { %8095 = vmatprep.subr.bf16.mxu0 %v11990_v28  ;;  %11296 = vmatprep.subr.bf16.mxu1 %v14875_v30 }
 0x97d   : > { %8096 = vmatpush1.bf16.msra.mxu0 %v11988_v6  ;;  %11297 = vmatpush3.bf16.msra.mxu1 %v11991_v39 }
 0x97e   : > { %8097 = vmatprep.subr.bf16.mxu0 %v11994_v15  ;;  %11298 = vmatprep.subr.bf16.mxu1 %v14875_v30 }
 0x981   : > { %8098 = vmatpush1.bf16.msra.mxu0 %v11992_v55  ;;  %11299 = vmatpush3.bf16.msra.mxu1 %v11995_v59 }
 0x982   : > { %8099 = vmatprep.subr.bf16.mxu0 %v11998_v19  ;;  %11300 = vmatprep.subr.bf16.mxu1 %v14875_v30 }
 0x985   : > { %8100 = vmatpush1.bf16.msra.mxu0 %v11996_v20  ;;  %11301 = vmatpush3.bf16.msra.mxu1 %v11999_v34 }
 0x986   : > { %8101 = vmatprep.subr.bf16.mxu0 %v12002_v38  ;;  %11302 = vmatprep.subr.bf16.mxu1 %v14875_v30 }
 0x989   : > { %8102 = vmatpush1.bf16.msra.mxu0 %v12000_v57  ;;  %11303 = vmatpush3.bf16.msra.mxu1 %v12003_v49 }
 0x98a   : > { %8103 = vmatprep.subr.bf16.mxu0 %v12006_v62  ;;  %11304 = vmatprep.subr.bf16.mxu1 %v14875_v30 }
 0x98d   : > { %8104 = vmatpush1.bf16.msra.mxu0 %v12004_v25  ;;  %11305 = vmatpush3.bf16.msra.mxu1 %v12007_v33 }
 0x98e   : > { %11310 = vmatprep.subr.bf16.mxu1 %v14875_v30  ;;  %8406 = vmatprep.subr.bf16.mxu0 %v12010_v60 }
 0x990   : > { %8122 = vmatmul.mubr.bf16.vlgmr.msra.gmra.mxu0 %v14180_v47  ;;  %11307 = vmatmul.mubr.bf16.vlgmr.msra.gmra.mxu1 %v14180_v47 }
 0x991   : > { %8438 = vmatprep.mubr.bf16.mxu0 %v14876_v61  ;;  %11326 = vmatprep.mubr.msk.bf16.mxu1 %vm12638_vm0, %v14875_v30 }
 0x992   : > { %8407 = vmatpush1.bf16.msra.mxu0 %v12008_v63  ;;  %11311 = vmatpush3.bf16.msra.mxu1 %v12011_v26 }
 0x993   : > { %11312 = vmatprep.subr.bf16.mxu1 %v14875_v30  ;;  %8408 = vmatprep.subr.bf16.mxu0 %v12014_v53 }
 0x996   : > { %8409 = vmatpush1.bf16.msra.mxu0 %v12012_v14  ;;  %11313 = vmatpush3.bf16.msra.mxu1 %v12015_v10 }
 0x997   : > { %11314 = vmatprep.subr.bf16.mxu1 %v14875_v30  ;;  %8410 = vmatprep.subr.bf16.mxu0 %v12018_v56 }
 0x99a   : > { %8411 = vmatpush1.bf16.msra.mxu0 %v12016_v31  ;;  %11315 = vmatpush3.bf16.msra.mxu1 %v12019_v8 }
 0x99b   : > { %11316 = vmatprep.subr.bf16.mxu1 %v14875_v30  ;;  %8412 = vmatprep.subr.bf16.mxu0 %v12022_v36 }
 0x99e   : > { %8413 = vmatpush1.bf16.msra.mxu0 %v12020_v18  ;;  %11317 = vmatpush3.bf16.msra.mxu1 %v12023_v24 }
 0x99f   : > { %11318 = vmatprep.subr.bf16.mxu1 %v14875_v30  ;;  %8414 = vmatprep.subr.bf16.mxu0 %v12026_v58 }
 0x9a2   : > { %8415 = vmatpush1.bf16.msra.mxu0 %v12024_v7  ;;  %11319 = vmatpush3.bf16.msra.mxu1 %v12027_v16 }
 0x9a3   : > { %8416 = vmatprep.subr.bf16.mxu0 %v12030_v2  ;;  %11320 = vmatprep.subr.bf16.mxu1 %v14875_v30 }
 0x9a6   : > { %8417 = vmatpush1.bf16.msra.mxu0 %v12028_v11  ;;  %11321 = vmatpush3.bf16.msra.mxu1 %v12031_v54 }
 0x9a7   : > { %8418 = vmatprep.subr.bf16.mxu0 %v12034_v46  ;;  %11322 = vmatprep.subr.bf16.mxu1 %v14875_v30 }
 0x9aa   : > { %8419 = vmatpush1.bf16.msra.mxu0 %v12032_v13  ;;  %11323 = vmatpush3.bf16.msra.mxu1 %v12035_v51 }
 0x9ab   : > { %8420 = vmatprep.subr.bf16.mxu0 %v12038_v35  ;;  %11324 = vmatprep.subr.bf16.mxu1 %v14875_v30 }
 0x9ae   : > { %8421 = vmatpush1.bf16.msra.mxu0 %v12036_v4  ;;  %11325 = vmatpush3.bf16.msra.mxu1 %v12039_v3 }
 0x9af   : > { %8651 = vmatprep.subr.bf16.mxu0 %v12042_v42  ;;  %11330 = vmatprep.subr.bf16.mxu1 %v14875_v30 }
 0x9f0   : > { %v14244_v21 = vpop.f32.mrf.mxu1  ;;  %v7305_v23 = vpop.f32.mrf.mxu0 }
 0x9f1   : > { %v7306_v37 = vadd.f32 %v7305_v23, %v7131_v0 }
 0x9f2   : > { %v11248_v45 = vpop.f32.mrf.mxu1  ;;  %v7307_v40 = vpop.f32.mrf.mxu0 }
 0x9f3   : > { %v7308_v39 = vadd.f32 %v7307_v40, %v7135_v32 }
 0x9f4   : > { %v14247_v47 = vpop.f32.mrf.mxu1  ;;  %v7309_v5 = vpop.f32.mrf.mxu0 }
 0x9f5   : > { %v7310_v19 = vadd.f32 %v7309_v5, %v7131_v0 }
 0x9f6   : > { %v11249_v44 = vpop.f32.mrf.mxu1  ;;  %v7311_v43 = vpop.f32.mrf.mxu0 }
 0x9f7   : > { %v7312_v60 = vadd.f32 %v7311_v43, %v7135_v32  ;;  %v7139_v44 = vrot.slane %v10280_v12, %v13041_v52 }
 0x9f9   : > { %v7349_v2 = vadd.f32 %v14244_v21, %v7139_v44  ;;  %v7352_v35 = vadd.f32 %v14247_v47, %v7139_v44  ;;  %v7693_v47 = vld [vmem:[%s14752_s7] sm:$0x7] }
 0xa10   : > { %v7550_v28 = vpop.f32.mrf.mxu0  ;;  %v7593_v6 = vpop.f32.mrf.mxu1 }
 0xa11   : > { %v7600_v15 = vadd.f32 %v7550_v28, %v7306_v37  ;;  %v7635_v24 = vadd.f32 %v14145_v29, %v7593_v6 }
 0xa12   : > { %v7552_v55 = vpop.f32.mrf.mxu0  ;;  %v11268_v59 = vpop.f32.mrf.mxu1 }
 0xa13   : > { %v10329_v20 = vmul.f32 -1.442695, %v7600_v15  ;;  %v7614_v34 = vadd.f32 %v7552_v55, %v7308_v39  ;;  %v7698_v55 = vrot.slane %v7693_v47, %v14900_v50 }
 0xa14   : > { %v7554_v38 = vpop.f32.mrf.mxu0  ;;  %v7596_v57 = vpop.f32.mrf.mxu1 }
 0xa15   : > { %12316 = vpow2.f32 %v10329_v20  ;;  %v7601_v49 = vadd.f32 %v7554_v38, %v7310_v19  ;;  %v10331_v26 = vmul.f32 -1.442695, %v7614_v34  ;;  %v7636_v23 = vadd.f32 %v14145_v29, %v7596_v57 }
 0xa16   : > { %v11269_v62 = vpop.f32.mrf.mxu1  ;;  %v7556_v33 = vpop.f32.mrf.mxu0 }
 0xa17   : > { %v10330_v25 = vmul.f32 -1.442695, %v7601_v49  ;;  %v7615_v63 = vadd.f32 %v7556_v33, %v7312_v60  ;;  %v7702_v62 = vrot.slane %v7693_v47, %v13038_v9 }
 0xa19   : > { %12318 = vpow2.f32 %v10330_v25  ;;  %v10332_v53 = vmul.f32 -1.442695, %v7615_v63 }
 0xa1a   : > { %12320 = vpow2.f32 %v10331_v26 }
 0xa1b   : > { %12322 = vpow2.f32 %v10332_v53 }
 0xa22   : > { %v12317_v14 = vpop.eup %12316 }
 0xa23   : > { %v7608_v10 = vadd.f32 1.0, %v12317_v14 }
 0xa25   : > { %12324 = vrcp.f32 %v7608_v10 }
 0xa26   : > { %v12319_v45 = vpop.eup %12318 }
 0xa27   : > { %v7609_v56 = vadd.f32 1.0, %v12319_v45  ;;  %v12321_v31 = vpop.eup %12320 }
 0xa28   : > { %v12323_v8 = vpop.eup %12322  ;;  %v7622_v36 = vadd.f32 1.0, %v12321_v31 }
 0xa29   : > { %12326 = vrcp.f32 %v7609_v56  ;;  %v7623_v58 = vadd.f32 1.0, %v12323_v8 }
 0xa2a   : > { %12328 = vrcp.f32 %v7622_v36 }
 0xa2b   : > { %12330 = vrcp.f32 %v7623_v58 }
 0xa30   : > { %v14262_v18 = vpop.f32.mrf.mxu1  ;;  %v7878_v12 = vpop.f32.mrf.mxu0 }
 0xa31   : > { %v7879_v20 = vadd.f32 %v7878_v12, %v7698_v55 }
 0xa32   : > { %v12325_v7 = vpop.eup %12324  ;;  %v11288_v16 = vpop.f32.mrf.mxu1 }
 0xa33   : > { %v7637_v11 = vmul.f32 %v12325_v7, %v7635_v24  ;;  %v7880_v43 = vpop.f32.mrf.mxu0 }
 0xa34   : > { %v14266_v54 = vpop.f32.mrf.mxu1  ;;  %v7881_v53 = vadd.f32 %v7880_v43, %v7702_v62 }
 0xa35   : > { %v7639_v46 = vadd.f32 %v7637_v11, %v7349_v2  ;;  %v7882_v15 = vpop.f32.mrf.mxu0  ;;  %v10390_v2 = vld [vmem:[%s14753_s8] ss:$0 sm:$0xff] }
 0xa36   : > { %v12327_v13 = vpop.eup %12326  ;;  %v11289_v51 = vpop.f32.mrf.mxu1  ;;  %v7883_v25 = vadd.f32 %v7882_v15, %v7698_v55  ;;  %v9238_v55 = vld [vmem:[%s12830_s13 + $0x28] sm:$0xff] }
 0xa37   : > { %12332 = vtanh.f32 %v7639_v46  ;;  %v7638_v40 = vmul.f32 %v12327_v13, %v7636_v23  ;;  %v12329_v3 = vpop.eup %12328  ;;  %v7884_v19 = vpop.f32.mrf.mxu0  ;;  %v7706_v46 = vrot.slane %v7693_v47, %v13041_v52  ;;  %v9237_v47 = vld [vmem:[%s12830_s13 + $0x20] sm:$0xff] }
 0xa38   : > { %v12331_v42 = vpop.eup %12330  ;;  %v7643_v21 = vsub.f32 1.0, %v12329_v3  ;;  %v7647_v32 = vmul.f32 %v12329_v3, %v14157_v17  ;;  %v7885_v45 = vadd.f32 %v7884_v19, %v7702_v62 }
 0xa39   : > { %v7640_v4 = vadd.f32 %v7638_v40, %v7352_v35  ;;  %v7644_v37 = vsub.f32 1.0, %v12331_v42  ;;  %v7648_v39 = vmul.f32 %v12331_v42, %v14164_v41  ;;  %v7922_v40 = vadd.f32 %v14262_v18, %v7706_v46  ;;  %v9234_v18 = vld [vmem:[%s12830_s13 + $0x8] sm:$0xff] }
 0xa3b   : > { %12334 = vtanh.f32 %v7640_v4 }
 0xa44   : > { %v12333_v5 = vpop.eup %12332 }
 0xa45   : > { %v7645_v0 = vmul.f32 %v12333_v5, %v7643_v21  ;;  %v7925_v21 = vadd.f32 %v14266_v54, %v7706_v46  ;;  %v12067_v46 = vld [vmem:[#allocation9 + $0xe0] ss:$12 sps:$4 sm:$0xff]  }
 0xa47   : > { %v14271_v29 = vadd.f32 %v7647_v32, %v7645_v0  ;;  %v9235_v0 = vld [vmem:[%s12830_s13 + $0x10] sm:$0xff]  ;;  %v9233_v32 = vld [vmem:[%s12830_s13] sm:$0xff] }
 0xa48   : > { %v12335_v28 = vpop.eup %12334  ;;  %9257 = vperm.xlu1 %11440, %v9235_v0   ;;  %9251 = vperm.xlu0 %11439, %v9233_v32   ;;  %v12081_v0 = vld [vmem:[#allocation10 + $0x40] ss:$8 sps:$4 sm:$0xff]   ;;  %v12086_v32 = vld [vmem:[#allocation10 + $0x34] ss:$8 sps:$4 sm:$0xff]  }
 0xa49   : > { %v7646_v6 = vmul.f32 %v12335_v28, %v7644_v37  ;;  %v9242_v37 = vld [vmem:[%s12830_s13 + $0x48] sm:$0xff]  ;;  %v9236_v28 = vld [vmem:[%s12830_s13 + $0x18] sm:$0xff] }
 0xa4b   : > { %v14278_v59 = vadd.f32 %v7648_v39, %v7646_v6 }
 0xa4c   : > { %9254 = vperm.xlu1 %11440, %v9234_v18   ;;  %9278 = vperm.xlu0 %11439, %v9242_v37   ;;  %v12089_v18 = vld [vmem:[#allocation10 + $0x24] ss:$8 sps:$4 sm:$0xff]   ;;  %v12087_v37 = vld [vmem:[#allocation10 + $0x20] ss:$8 sps:$4 sm:$0xff]  }
 0xa50   : > { %v8123_v17 = vpop.f32.mrf.mxu0  ;;  %v8166_v34 = vpop.f32.mrf.mxu1  ;;  %9260 = vperm.xlu1 %11440, %v9236_v28   ;;  %v12092_v28 = vld [vmem:[#allocation10 + $0x14] ss:$8 sps:$4 sm:$0xff]  }
 0xa51   : > { %v8173_v38 = vadd.f32 %v8123_v17, %v7879_v20  ;;  %v8208_v23 = vadd.f32 %v10390_v2, %v8166_v34 }
 0xa52   : > { %v8125_v57 = vpop.f32.mrf.mxu0  ;;  %v11308_v49 = vpop.f32.mrf.mxu1 }
 0xa53   : > { %v10386_v33 = vmul.f32 -1.442695, %v8173_v38  ;;  %v8187_v56 = vadd.f32 %v8125_v57, %v7881_v53  ;;  %v9239_v49 = vld [vmem:[%s12830_s13 + $0x30] sm:$0xff] }
 0xa54   : > { %v8127_v60 = vpop.f32.mrf.mxu0  ;;  %v8169_v63 = vpop.f32.mrf.mxu1  ;;  %9263 = vperm.xlu1 %11440, %v9237_v47   ;;  %v12047_v53 = vld [vmem:[#allocation9 + $0x158] ss:$12 sps:$4 sm:$0xff]  }
 0xa55   : > { %12336 = vpow2.f32 %v10386_v33  ;;  %v8174_v41 = vadd.f32 %v8127_v60, %v7883_v25  ;;  %v10388_v8 = vmul.f32 -1.442695, %v8187_v56  ;;  %v8209_v12 = vadd.f32 %v10390_v2, %v8169_v63  ;;  %v12040_v33 = vld [vmem:[#allocation9 + $0x168] ss:$12 sps:$4 sm:$0xff]   ;;  %v12043_v60 = vld [vmem:[#allocation9 + $0x170] ss:$12 sps:$4 sm:$0xff]  }
 0xa56   : > { %v11309_v26 = vpop.f32.mrf.mxu1  ;;  %v8129_v10 = vpop.f32.mrf.mxu0  ;;  %v12054_v56 = vld [vmem:[#allocation9 + $0x124] ss:$12 sps:$4 sm:$0xff]   ;;  %v12066_v2 = vld [vmem:[#allocation9 + $0xdc] ss:$12 sps:$4 sm:$0xff]  }
 0xa57   : > { %v10387_v14 = vmul.f32 -1.442695, %v8174_v41  ;;  %v8188_v31 = vadd.f32 %v8129_v10, %v7885_v45  ;;  %v12046_v41 = vld [vmem:[#allocation9 + $0x154] ss:$12 sps:$4 sm:$0xff]   ;;  %v12044_v26 = vld [vmem:[#allocation9 + $0x150] ss:$12 sps:$4 sm:$0xff]  }
 0xa58   : > { %9266 = vperm.xlu1 %11440, %v9238_v55   ;;  %v12051_v10 = vld [vmem:[#allocation9 + $0x140] ss:$12 sps:$4 sm:$0xff]   ;;  %v12090_v47 = vld [vmem:[#allocation10 + $0x10] ss:$8 sps:$4 sm:$0xff]  }
 0xa59   : > { %12338 = vpow2.f32 %v10387_v14  ;;  %v10389_v44 = vmul.f32 -1.442695, %v8188_v31  ;;  %v9240_v14 = vld [vmem:[%s12830_s13 + $0x38] sm:$0xff]  ;;  %v9241_v45 = vld [vmem:[%s12830_s13 + $0x40] sm:$0xff] }
 0xa5a   : > { %12340 = vpow2.f32 %v10388_v8  ;;  %v12052_v31 = vld [vmem:[#allocation9 + $0x120] ss:$12 sps:$4 sm:$0xff]   ;;  %v12055_v8 = vld [vmem:[#allocation9 + $0x128] ss:$12 sps:$4 sm:$0xff]  }
 0xa5b   : > { %12342 = vpow2.f32 %v10389_v44  ;;  %v12058_v44 = vld [vmem:[#allocation9 + $0x10c] ss:$12 sps:$4 sm:$0xff]   ;;  %v14950_v55 = vld [vmem:[#allocation21_spill] sm:$0xff] }
 0xa5c   : > { %9269 = vperm.xlu1 %11440, %v9239_v49   ;;  %v10391_v49 = vld [vmem:[%s14752_s7 + $0x3] sm:$0x7] }
 0xa60   : > { %9272 = vperm.xlu1 %11440, %v9240_v14  }
 0xa62   : > { %v12337_v36 = vpop.eup %12336 }
 0xa63   : > { %v8181_v24 = vadd.f32 1.0, %v12337_v36  ;;  %v12056_v36 = vld [vmem:[#allocation9 + $0x108] ss:$12 sps:$4 sm:$0xff]  }
 0xa64   : > { %9275 = vperm.xlu1 %11440, %v9241_v45  }
 0xa65   : > { %12344 = vrcp.f32 %v8181_v24  ;;  %v12059_v24 = vld [vmem:[#allocation9 + $0x110] ss:$12 sps:$4 sm:$0xff]  }
 0xa66   : > { %v12339_v7 = vpop.eup %12338 }
 0xa67   : > { %v8182_v58 = vadd.f32 1.0, %v12339_v7  ;;  %v12341_v16 = vpop.eup %12340  ;;  %v12062_v7 = vld [vmem:[#allocation9 + $0xf4] ss:$12 sps:$4 sm:$0xff]  }
 0xa68   : > { %v12343_v11 = vpop.eup %12342  ;;  %v8195_v13 = vadd.f32 1.0, %v12341_v16  ;;  %v12063_v16 = vld [vmem:[#allocation9 + $0xf8] ss:$12 sps:$4 sm:$0xff]  }
 0xa69   : > { %12346 = vrcp.f32 %v8182_v58  ;;  %v8196_v35 = vadd.f32 1.0, %v12343_v11  ;;  %v12060_v58 = vld [vmem:[#allocation9 + $0xf0] ss:$12 sps:$4 sm:$0xff]   ;;  %v12064_v11 = vld [vmem:[#allocation9 + $0xd8] ss:$12 sps:$4 sm:$0xff]  }
 0xa6a   : > { %12348 = vrcp.f32 %v8195_v13  ;;  %v12068_v13 = vld [vmem:[#allocation9 + $0xc0] ss:$12 sps:$4 sm:$0xff]  }
 0xa6b   : > { %12350 = vrcp.f32 %v8196_v35  ;;  %v12074_v35 = vld [vmem:[#allocation10 + $0x74] ss:$8 sps:$4 sm:$0xff]  }
 0xa72   : > { %v12345_v51 = vpop.eup %12344 }
 0xa73   : > { %v8210_v4 = vmul.f32 %v12345_v51, %v8208_v23  ;;  %v12070_v23 = vld [vmem:[#allocation9 + $0xc4] ss:$12 sps:$4 sm:$0xff]   ;;  %v12071_v51 = vld [vmem:[#allocation9 + $0xc8] ss:$12 sps:$4 sm:$0xff]  }
 0xa75   : > { %v8212_v3 = vadd.f32 %v8210_v4, %v7922_v40  ;;  %v12072_v40 = vld [vmem:[#allocation10 + $0x70] ss:$8 sps:$4 sm:$0xff]   ;;  %v8490_v4 = vpack.c.bf16 %v14278_v59, %v14271_v29 }
 0xa76   : > { %v12347_v42 = vpop.eup %12346 }
 0xa77   : > { %12352 = vtanh.f32 %v8212_v3  ;;  %v8211_v5 = vmul.f32 %v12347_v42, %v8209_v12  ;;  %v12349_v6 = vpop.eup %12348  ;;  %v12077_v3 = vld [vmem:[#allocation10 + $0x64] ss:$8 sps:$4 sm:$0xff]   ;;  %v12075_v12 = vld [vmem:[#allocation10 + $0x60] ss:$8 sps:$4 sm:$0xff]   ;;  %v12080_v42 = vld [vmem:[#allocation10 + $0x54] ss:$8 sps:$4 sm:$0xff]  }
 0xa78   : > { %v12351_v39 = vpop.eup %12350  ;;  %v8216_v15 = vsub.f32 1.0, %v12349_v6  ;;  %v8220_v38 = vmul.f32 %v12349_v6, %v14174_v22  ;;  %v12050_v22 = vld [vmem:[#allocation9 + $0x13c] ss:$12 sps:$4 sm:$0xff]   ;;  %v12095_v6 = vld [vmem:[#allocation10 + $0x4] ss:$8 sps:$4 sm:$0xff]  }
 0xa79   : > { %v8213_v43 = vadd.f32 %v8211_v5, %v7925_v21  ;;  %v8217_v19 = vsub.f32 1.0, %v12351_v39  ;;  %v8221_v57 = vmul.f32 %v12351_v39, %v14176_v48  ;;  %v12048_v48 = vld [vmem:[#allocation9 + $0x138] ss:$12 sps:$4 sm:$0xff]   ;;  %v12093_v39 = vld [vmem:[#allocation10] ss:$8 sps:$4 sm:$0xff]  }
 0xa7a   : > { %v12078_v21 = vld [vmem:[#allocation10 + $0x50] ss:$8 sps:$4 sm:$0xff]   ;;  %v12083_v5 = vld [vmem:[#allocation10 + $0x44] ss:$8 sps:$4 sm:$0xff]  }
 0xa7b   : > { %12354 = vtanh.f32 %v8213_v43  ;;  %v12084_v43 = vld [vmem:[#allocation10 + $0x30] ss:$8 sps:$4 sm:$0xff]  }
 0xa84   : > { %v12353_v54 = vpop.eup %12352 }
 0xa85   : > { %v8218_v20 = vmul.f32 %v12353_v54, %v8216_v15  ;;  %v14948_v54 = vld [vmem:[#allocation20_spill] sm:$0xff]  ;;  %v14949_v15 = vld [vmem:[#allocation43_spill] sm:$0xff] }
 0xa87   : > { %v8222_v62 = vadd.f32 %v8220_v38, %v8218_v20 }
 0xa88   : > { %v12355_v17 = vpop.eup %12354 }
 0xa89   : > { %v8219_v34 = vmul.f32 %v12355_v17, %v8217_v19 }
 0xa8b   : > { %v8223_v25 = vadd.f32 %v8221_v57, %v8219_v34 }
 0xa8d   : > { %v8226_v63 = vpack.c.bf16 %v8223_v25, %v8222_v62  ;;  %v8266_v62 = vrot.slane %v10391_v49, %v14900_v50 }
 0xa8f   : > { %8439 = vmatmul.mubr.bf16.vlgmr.msra.gmra.mxu0 %v8226_v63  ;;  %11327 = vmatmul.mubr.bf16.vlgmr.msra.gmra.mxu1 %v8226_v63 }
 0xa90   : > { %8652 = vmatpush1.bf16.msra.mxu0 %v12040_v33  ;;  %11331 = vmatpush3.bf16.msra.mxu1 %v12043_v60 }
 0xa91   : > { %8653 = vmatprep.subr.bf16.mxu0 %v12046_v41  ;;  %11332 = vmatprep.subr.bf16.mxu1 %v14875_v30 }
 0xa92   : > { %8683 = vmatprep.mubr.bf16.mxu0 %v14876_v61  ;;  %11346 = vmatprep.mubr.msk.bf16.mxu1 %vm12638_vm0, %v14875_v30 }
 0xa94   : > { %8654 = vmatpush1.bf16.msra.mxu0 %v12044_v26  ;;  %11333 = vmatpush3.bf16.msra.mxu1 %v12047_v53  ;;  %v8270_v26 = vrot.slane %v10391_v49, %v13038_v9 }
 0xa95   : > { %8655 = vmatprep.subr.bf16.mxu0 %v12050_v22  ;;  %11334 = vmatprep.subr.bf16.mxu1 %v14875_v30 }
 0xa98   : > { %8656 = vmatpush1.bf16.msra.mxu0 %v12048_v48  ;;  %11335 = vmatpush3.bf16.msra.mxu1 %v12051_v10 }
 0xa99   : > { %8657 = vmatprep.subr.bf16.mxu0 %v12054_v56  ;;  %11336 = vmatprep.subr.bf16.mxu1 %v14875_v30 }
 0xa9c   : > { %8658 = vmatpush1.bf16.msra.mxu0 %v12052_v31  ;;  %11337 = vmatpush3.bf16.msra.mxu1 %v12055_v8 }
 0xa9d   : > { %8659 = vmatprep.subr.bf16.mxu0 %v12058_v44  ;;  %11338 = vmatprep.subr.bf16.mxu1 %v14875_v30 }
 0xaa0   : > { %8660 = vmatpush1.bf16.msra.mxu0 %v12056_v36  ;;  %11339 = vmatpush3.bf16.msra.mxu1 %v12059_v24 }
 0xaa1   : > { %8661 = vmatprep.subr.bf16.mxu0 %v12062_v7  ;;  %11340 = vmatprep.subr.bf16.mxu1 %v14875_v30 }
 0xaa4   : > { %8662 = vmatpush1.bf16.msra.mxu0 %v12060_v58  ;;  %11341 = vmatpush3.bf16.msra.mxu1 %v12063_v16 }
 0xaa5   : > { %8663 = vmatprep.subr.bf16.mxu0 %v12066_v2  ;;  %11342 = vmatprep.subr.bf16.mxu1 %v14875_v30 }
 0xaa8   : > { %8664 = vmatpush1.bf16.msra.mxu0 %v12064_v11  ;;  %11343 = vmatpush3.bf16.msra.mxu1 %v12067_v46 }
 0xaa9   : > { %8665 = vmatprep.subr.bf16.mxu0 %v12070_v23  ;;  %11344 = vmatprep.subr.bf16.mxu1 %v14875_v30  ;;  %v8828_v23 = vld [vmem:[%s14755_s10] sm:$0x3] }
 0xaac   : > { %8666 = vmatpush1.bf16.msra.mxu0 %v12068_v13  ;;  %11345 = vmatpush3.bf16.msra.mxu1 %v12071_v51  ;;  %v10445_v51 = vld [vmem:[%s14753_s8 + $0x1] ss:$0 sm:$0xff] }
 0xaad   : > { %8920 = vmatprep.subr.bf16.mxu0 %v12074_v35 }
 0xaaf   : > { %8684 = vmatmul.mubr.bf16.vlgmr.msra.gmra.mxu0 %v8490_v4  ;;  %11347 = vmatmul.mubr.bf16.vlgmr.msra.gmra.mxu1 %v8490_v4 }
 0xab0   : > { %8921 = vmatpush1.bf16.msra.mxu0 %v12072_v40  ;;  %8952 = vmatprep.mubr.bf16.mxu0 %v14876_v61  ;;  %v8274_v40 = vrot.slane %v10391_v49, %v13041_v52 }
 0xab1   : > { %8922 = vmatprep.subr.bf16.mxu0 %v12077_v3  ;;  %v14339_v3 = vrot.slane %v8828_v23, %v13038_v9 }
 0xab4   : > { %8923 = vmatpush1.bf16.msra.mxu0 %v12075_v12 }
 0xab5   : > { %8924 = vmatprep.subr.bf16.mxu0 %v12080_v42 }
 0xab8   : > { %8925 = vmatpush1.bf16.msra.mxu0 %v12078_v21 }
 0xab9   : > { %8926 = vmatprep.subr.bf16.mxu0 %v12083_v5 }
 0xabc   : > { %8927 = vmatpush1.bf16.msra.mxu0 %v12081_v0 }
 0xabd   : > { %8928 = vmatprep.subr.bf16.mxu0 %v12086_v32 }
 0xac0   : > { %8929 = vmatpush1.bf16.msra.mxu0 %v12084_v43 }
 0xac1   : > { %8930 = vmatprep.subr.bf16.mxu0 %v12089_v18 }
 0xac4   : > { %8931 = vmatpush1.bf16.msra.mxu0 %v12087_v37 }
 0xac5   : > { %8932 = vmatprep.subr.bf16.mxu0 %v12092_v28 }
 0xac8   : > { %8933 = vmatpush1.bf16.msra.mxu0 %v12090_v47 }
 0xac9   : > { %8934 = vmatprep.subr.bf16.mxu0 %v12095_v6 }
 0xacc   : > { %8935 = vmatpush1.bf16.msra.mxu0 %v12093_v39 }
 0xacf   : > { %8953 = vmatmul.mubr.bf16.vlgmr.msra.gmra.mxu0 %v14948_v54 }
 0xad0   : > { %8962 = vmatprep.mubr.bf16.mxu0 %v14876_v61 }
 0xad7   : > { %8963 = vmatmul.mubr.bf16.gmra.mxu0 %v14949_v15 }
 0xad8   : > { %8972 = vmatprep.mubr.bf16.mxu0 %v14876_v61 }
 0xadf   : > { %8973 = vmatmul.mubr.bf16.gmra.mxu0 %v14950_v55 }
 0xae0   : > { %8982 = vmatprep.mubr.bf16.mxu0 %v14876_v61 }
 0xae7   : > { %8983 = vmatmul.mubr.bf16.gmra.mxu0 %v14043_v27 }
 0xae8   : > { %8992 = vmatprep.mubr.bf16.mxu0 %v14876_v61 }
 0xaef   : > { %8993 = vmatmul.mubr.bf16.gmra.mxu0 %v14211_v1 }
 0xaf0   : > { %9002 = vmatprep.mubr.bf16.mxu0 %v14876_v61 }
 0xaf7   : > { %9003 = vmatmul.mubr.bf16.gmra.mxu0 %v8490_v4  ;;  %v14336_v4 = vrot.slane %v8828_v23, %v14900_v50 }
 0xaf8   : > { %9012 = vmatprep.mubr.bf16.mxu0 %v14876_v61 }
 0xb4f   : > { %v8483_v19 = vpop.f32.mrf.mxu1  ;;  %v8440_v38 = vpop.f32.mrf.mxu0 }
 0xb50   : > { %v8441_v1 = vadd.f32 %v8440_v38, %v8266_v62  ;;  %v8484_v43 = vadd.f32 %v8483_v19, %v8274_v40 }
 0xb51   : > { %v11328_v20 = vpop.f32.mrf.mxu1  ;;  %v8442_v57 = vpop.f32.mrf.mxu0 }
 0xb52   : > { %v8443_v56 = vadd.f32 %v8442_v57, %v8270_v26 }
 0xb53   : > { %v8486_v17 = vpop.f32.mrf.mxu1  ;;  %v8444_v27 = vpop.f32.mrf.mxu0 }
 0xb54   : > { %v8445_v53 = vadd.f32 %v8444_v27, %v8266_v62  ;;  %v8487_v39 = vadd.f32 %v8486_v17, %v8274_v40 }
 0xb55   : > { %v11329_v34 = vpop.f32.mrf.mxu1  ;;  %v8446_v25 = vpop.f32.mrf.mxu0 }
 0xb56   : > { %v8447_v44 = vadd.f32 %v8446_v25, %v8270_v26 }
 0xb6f   : > { %v8685_v33 = vpop.f32.mrf.mxu0  ;;  %v8728_v60 = vpop.f32.mrf.mxu1 }
 0xb70   : > { %v8735_v63 = vadd.f32 %v8685_v33, %v8441_v1  ;;  %v8770_v42 = vadd.f32 %v10445_v51, %v8728_v60 }
 0xb71   : > { %v8687_v41 = vpop.f32.mrf.mxu0  ;;  %v11348_v61 = vpop.f32.mrf.mxu1 }
 0xb72   : > { %v10440_v14 = vmul.f32 -1.442695, %v8735_v63  ;;  %v8749_v36 = vadd.f32 %v8687_v41, %v8443_v56 }
 0xb73   : > { %v8689_v22 = vpop.f32.mrf.mxu0  ;;  %v8731_v48 = vpop.f32.mrf.mxu1 }
 0xb74   : > { %12356 = vpow2.f32 %v10440_v14  ;;  %v8736_v10 = vadd.f32 %v8689_v22, %v8445_v53  ;;  %v10442_v7 = vmul.f32 -1.442695, %v8749_v36  ;;  %v8771_v47 = vadd.f32 %v10445_v51, %v8731_v48 }
 0xb75   : > { %v11349_v45 = vpop.f32.mrf.mxu1  ;;  %v8691_v8 = vpop.f32.mrf.mxu0 }
 0xb76   : > { %v10441_v31 = vmul.f32 -1.442695, %v8736_v10  ;;  %v8750_v24 = vadd.f32 %v8691_v8, %v8447_v44 }
 0xb78   : > { %12358 = vpow2.f32 %v10441_v31  ;;  %v10443_v58 = vmul.f32 -1.442695, %v8750_v24 }
 0xb79   : > { %12360 = vpow2.f32 %v10442_v7 }
 0xb7a   : > { %12362 = vpow2.f32 %v10443_v58 }
 0xb81   : > { %v12357_v16 = vpop.eup %12356 }
 0xb82   : > { %v8743_v2 = vadd.f32 1.0, %v12357_v16 }
 0xb84   : > { %12364 = vrcp.f32 %v8743_v2 }
 0xb85   : > { %v12359_v11 = vpop.eup %12358 }
 0xb86   : > { %v8744_v46 = vadd.f32 1.0, %v12359_v11  ;;  %v12361_v13 = vpop.eup %12360 }
 0xb87   : > { %v12363_v35 = vpop.eup %12362  ;;  %v8757_v21 = vadd.f32 1.0, %v12361_v13 }
 0xb88   : > { %12366 = vrcp.f32 %v8744_v46  ;;  %v8758_v0 = vadd.f32 1.0, %v12363_v35 }
 0xb89   : > { %12368 = vrcp.f32 %v8757_v21 }
 0xb8a   : > { %12370 = vrcp.f32 %v8758_v0 }
 0xb8f   : > { %v8954_v12 = vpop.f32.mrf.mxu0 }
 0xb90   : > { %v14342_v37 = vadd.f32 %v8954_v12, %v14336_v4 }
 0xb91   : > { %v12365_v5 = vpop.eup %12364  ;;  %v8956_v32 = vpop.f32.mrf.mxu0 }
 0xb92   : > { %v8772_v18 = vmul.f32 %v12365_v5, %v8770_v42  ;;  %v14345_v28 = vadd.f32 %v8956_v32, %v14339_v3 }
 0xb93   : > { %v8958_v52 = vpop.f32.mrf.mxu0 }
 0xb94   : > { %v8774_v50 = vadd.f32 %v8772_v18, %v8484_v43  ;;  %v9023_v9 = vmax.f32 %v14342_v37, %v14345_v28  ;;  %v14350_v55 = vadd.f32 %v8958_v52, %v14336_v4 }
 0xb95   : > { %v12367_v6 = vpop.eup %12366  ;;  %v8960_v54 = vpop.f32.mrf.mxu0 }
 0xb96   : > { %12372 = vtanh.f32 %v8774_v50  ;;  %v8773_v15 = vmul.f32 %v12367_v6, %v8771_v47  ;;  %v14353_v19 = vadd.f32 %v8960_v54, %v14339_v3  ;;  %9024 = vmax.xlane.f32.xlu0 %v9023_v9  ;;  %v12369_v41 = vpop.eup %12368 }
 0xb97   : > { %v8964_v20 = vpop.f32.mrf.mxu0  ;;  %v12371_v26 = vpop.eup %12370  ;;  %v8778_v45 = vsub.f32 1.0, %v12369_v41  ;;  %v8782_v2 = vmul.f32 %v12369_v41, %v14271_v29 }
 0xb98   : > { %v8775_v34 = vadd.f32 %v8773_v15, %v8487_v39  ;;  %v9026_v38 = vmax.f32 %v14350_v55, %v14353_v19  ;;  %v14358_v17 = vadd.f32 %v8964_v20, %v14336_v4  ;;  %v8779_v44 = vsub.f32 1.0, %v12371_v26 }
 0xb99   : > { %v8966_v57 = vpop.f32.mrf.mxu0  ;;  %v8783_v11 = vmul.f32 %v12371_v26, %v14278_v59 }
 0xb9a   : > { %12374 = vtanh.f32 %v8775_v34  ;;  %v14361_v49 = vadd.f32 %v8966_v57, %v14339_v3  ;;  %9027 = vmax.xlane.f32.xlu1 %v9026_v38 }
 0xb9b   : > { %v8968_v27 = vpop.f32.mrf.mxu0 }
 0xb9c   : > { %v9029_v62 = vmax.f32 %v14358_v17, %v14361_v49  ;;  %v14366_v1 = vadd.f32 %v8968_v27, %v14336_v4 }
 0xb9d   : > { %v8970_v25 = vpop.f32.mrf.mxu0 }
 0xb9e   : > { %v14369_v33 = vadd.f32 %v8970_v25, %v14339_v3  ;;  %9030 = vmax.xlane.f32.xlu0 %v9029_v62 }
 0xb9f   : > { %v8974_v60 = vpop.f32.mrf.mxu0 }
 0xba0   : > { %v9032_v63 = vmax.f32 %v14366_v1, %v14369_v33  ;;  %v14374_v53 = vadd.f32 %v8974_v60, %v14336_v4 }
 0xba1   : > { %v8976_v61 = vpop.f32.mrf.mxu0 }
 0xba2   : > { %v14377_v14 = vadd.f32 %v8976_v61, %v14339_v3  ;;  %9033 = vmax.xlane.f32.xlu1 %v9032_v63  ;;  %v14439_v63 = vpop.permute.xlu1 %9257 }
 0xba3   : > { %v12373_v22 = vpop.eup %12372  ;;  %v8978_v48 = vpop.f32.mrf.mxu0 }
 0xba4   : > { %v9035_v10 = vmax.f32 %v14374_v53, %v14377_v14  ;;  %v14382_v31 = vadd.f32 %v8978_v48, %v14336_v4  ;;  %v8780_v36 = vmul.f32 %v12373_v22, %v8778_v45 }
 0xba5   : > { %v8980_v56 = vpop.f32.mrf.mxu0 }
 0xba6   : > { %v14385_v8 = vadd.f32 %v8980_v56, %v14339_v3  ;;  %9036 = vmax.xlane.f32.xlu0 %v9035_v10  ;;  %v8784_v51 = vadd.f32 %v8782_v2, %v8780_v36  ;;  %v14441_v41 = vpop.permute.xlu1 %9254 }
 0xba7   : > { %v12375_v24 = vpop.eup %12374  ;;  %v8984_v7 = vpop.f32.mrf.mxu0 }
 0xba8   : > { %v9038_v58 = vmax.f32 %v14382_v31, %v14385_v8  ;;  %v8781_v16 = vmul.f32 %v12375_v24, %v8779_v44  ;;  %v14392_v23 = vadd.f32 %v8984_v7, %v14336_v4 }
 0xba9   : > { %v8986_v46 = vpop.f32.mrf.mxu0 }
 0xbaa   : > { %v14395_v13 = vadd.f32 %v8986_v46, %v14339_v3  ;;  %9039 = vmax.xlane.f32.xlu1 %v9038_v58  ;;  %v8785_v35 = vadd.f32 %v8783_v11, %v8781_v16  ;;  %v14443_v26 = vpop.permute.xlu1 %9260  ;;  %v14467_v11 = vpop.permute.xlu0 %9251  ;;  %v14470_v46 = vld [vmem:[%s12830_s13 + $0x50] sm:$0xff] }
 0xbab   : > { %v8988_v40 = vpop.f32.mrf.mxu0  ;;  %14951 = vst [vmem:[#allocation22_spill] sm:$0xff] %v14470_v46 }
 0xbac   : > { %v9041_v12 = vmax.f32 %v14392_v23, %v14395_v13  ;;  %v8811_v42 = vpack.c.bf16 %v8785_v35, %v8784_v51  ;;  %v14400_v29 = vadd.f32 %v8988_v40, %v14336_v4  ;;  %v14477_v51 = vld [vmem:[%s12830_s13 + $0x58] sm:$0xff]  ;;  %v14482_v35 = vld [vmem:[%s12830_s13 + $0x60] sm:$0xff] }
 0xbad   : > { %v8990_v21 = vpop.f32.mrf.mxu0  ;;  %14952 = vst [vmem:[#allocation23_spill] sm:$0xff] %v14477_v51  ;;  %14953 = vst [vmem:[#allocation24_spill] sm:$0xff] %v14482_v35 }
 0xbae   : > { %v14403_v59 = vadd.f32 %v8990_v21, %v14339_v3  ;;  %9042 = vmax.xlane.f32.xlu0 %v9041_v12  ;;  %9013 = vmatmul.mubr.bf16.gmra.mxu0 %v8811_v42  ;;  %v14459_v7 = vpop.permute.xlu1 %9263  ;;  %v14487_v12 = vld [vmem:[%s12830_s13 + $0x68] sm:$0xff] }
 0xbaf   : > { %v8994_v5 = vpop.f32.mrf.mxu0  ;;  %14954 = vst [vmem:[#allocation25_spill] sm:$0xff] %v14487_v12 }
 0xbb0   : > { %v9044_v0 = vmax.f32 %v14400_v29, %v14403_v59  ;;  %v14408_v43 = vadd.f32 %v8994_v5, %v14336_v4 }
 0xbb1   : > { %v8996_v32 = vpop.f32.mrf.mxu0 }
 0xbb2   : > { %v14411_v18 = vadd.f32 %v8996_v32, %v14339_v3  ;;  %9045 = vmax.xlane.f32.xlu1 %v9044_v0  ;;  %v14463_v16 = vpop.permute.xlu1 %9266 }
 0xbb3   : > { %v8998_v52 = vpop.f32.mrf.mxu0 }
 0xbb4   : > { %v9047_v50 = vmax.f32 %v14408_v43, %v14411_v18  ;;  %v14416_v9 = vadd.f32 %v8998_v52, %v14336_v4 }
 0xbb5   : > { %v9000_v47 = vpop.f32.mrf.mxu0 }
 0xbb6   : > { %v14419_v6 = vadd.f32 %v9000_v47, %v14339_v3  ;;  %9048 = vmax.xlane.f32.xlu0 %v9047_v50  ;;  %v14465_v2 = vpop.permute.xlu1 %9269 }
 0xbb7   : > { %v9004_v39 = vpop.f32.mrf.mxu0 }
 0xbb8   : > { %v9050_v54 = vmax.f32 %v14416_v9, %v14419_v6  ;;  %v14424_v20 = vadd.f32 %v9004_v39, %v14336_v4 }
 0xbb9   : > { %v9006_v15 = vpop.f32.mrf.mxu0 }
 0xbba   : > { %v14427_v34 = vadd.f32 %v9006_v15, %v14339_v3  ;;  %9051 = vmax.xlane.f32.xlu1 %v9050_v54 }
 0xbbb   : > { %v9008_v38 = vpop.f32.mrf.mxu0 }
 0xbbc   : > { %v9053_v57 = vmax.f32 %v14424_v20, %v14427_v34  ;;  %v14432_v62 = vadd.f32 %v9008_v38, %v14336_v4 }
 0xbbd   : > { %v9010_v27 = vpop.f32.mrf.mxu0 }
 0xbbe   : > { %v14435_v25 = vadd.f32 %v9010_v27, %v14339_v3  ;;  %9054 = vmax.xlane.f32.xlu0 %v9053_v57 }
 0xbc0   : > { %v9056_v60 = vmax.f32 %v14432_v62, %v14435_v25 }
 0xbc2   : > { %9057 = vmax.xlane.f32.xlu1 %v9056_v60 }
 0xc6e   : > { %v9014_v61 = vpop.f32.mrf.mxu0 }
 0xc6f   : > { %v14446_v48 = vadd.f32 %v9014_v61, %v14336_v4 }
 0xc70   : > { %v9016_v22 = vpop.f32.mrf.mxu0 }
 0xc71   : > { %v14449_v10 = vadd.f32 %v9016_v22, %v14339_v3 }
 0xc72   : > { %v9018_v45 = vpop.f32.mrf.mxu0 }
 0xc73   : > { %v9059_v56 = vmax.f32 %v14446_v48, %v14449_v10  ;;  %v14454_v36 = vadd.f32 %v9018_v45, %v14336_v4  ;;  %v14472_v4 = vpop.permute.xlu1 %9272 }
 0xc74   : > { %v9020_v44 = vpop.f32.mrf.mxu0 }
 0xc75   : > { %v14457_v24 = vadd.f32 %v9020_v44, %v14339_v3  ;;  %9060 = vmax.xlane.f32.xlu0 %v9059_v56  ;;  %v14474_v3 = vpop.permute.xlu0 %9278 }
 0xc77   : > { %v9062_v58 = vmax.f32 %v14454_v36, %v14457_v24  ;;  %v14489_v42 = vpop.permute.xlu1 %9275 }
 0xc79   : > { %9063 = vmax.xlane.f32.xlu1 %v9062_v58  ;;  %v14484_v40 = vpop.xlane.xlu0 %9024 }
 0xc7a   : > { %v9065_v52 = vsub.f32 %v14342_v37, %v14484_v40  ;;  %v9066_v50 = vsub.f32 %v14345_v28, %v14484_v40 }
 0xc7b   : > { %v14495_v5 = vpop.xlane.xlu1 %9027 }
 0xc7c   : > { %14956 = vst [vmem:[#allocation27_spill] sm:$0xff] %v14495_v5  ;;  %v9067_v39 = vsub.f32 %v14350_v55, %v14495_v5  ;;  %v9068_v15 = vsub.f32 %v14353_v19, %v14495_v5  ;;  %v9093_v27 = vmul.f32 1.442695, %v9065_v52  ;;  %v9095_v61 = vmul.f32 1.442695, %v9066_v50 }
 0xc7d   : > { %v14493_v21 = vpop.xlane.xlu0 %9030 }
 0xc7e   : > { %14955 = vst [vmem:[#allocation26_spill] sm:$0xff] %v14493_v21  ;;  %v9069_v0 = vsub.f32 %v14358_v17, %v14493_v21  ;;  %v9070_v32 = vsub.f32 %v14361_v49, %v14493_v21  ;;  %v9097_v56 = vmul.f32 1.442695, %v9067_v39  ;;  %v9099_v58 = vmul.f32 1.442695, %v9068_v15 }
 0xc7f   : > { %v14505_v47 = vpop.xlane.xlu1 %9033 }
 0xc80   : > { %14957 = vst [vmem:[#allocation28_spill] sm:$0xff] %v14505_v47  ;;  %v9101_v54 = vmul.f32 1.442695, %v9069_v0  ;;  %v9103_v38 = vmul.f32 1.442695, %v9070_v32  ;;  %v9071_v60 = vsub.f32 %v14366_v1, %v14505_v47  ;;  %v9072_v22 = vsub.f32 %v14369_v33, %v14505_v47 }
 0xc81   : > { %v14511_v57 = vpop.xlane.xlu0 %9036 }
 0xc82   : > { %14958 = vst [vmem:[#allocation29_spill] sm:$0xff] %v14511_v57  ;;  %12376 = vpow2.f32 %v9101_v54  ;;  %v9073_v44 = vsub.f32 %v14374_v53, %v14511_v57  ;;  %v9074_v0 = vsub.f32 %v14377_v14, %v14511_v57  ;;  %v9105_v52 = vmul.f32 1.442695, %v9071_v60 }
 0xc83   : > { %v14517_v45 = vpop.xlane.xlu1 %9039  ;;  %12378 = vpow2.f32 %v9103_v38 }
 0xc84   : > { %14959 = vst [vmem:[#allocation30_spill] sm:$0xff] %v14517_v45  ;;  %12380 = vpow2.f32 %v9093_v27  ;;  %v9075_v50 = vsub.f32 %v14382_v31, %v14517_v45  ;;  %v9076_v39 = vsub.f32 %v14385_v8, %v14517_v45  ;;  %v9109_v15 = vmul.f32 1.442695, %v9073_v44 }
 0xc85   : > { %v14523_v32 = vpop.xlane.xlu0 %9042  ;;  %12382 = vpow2.f32 %v9095_v61 }
 0xc86   : > { %14960 = vst [vmem:[#allocation31_spill] sm:$0xff] %v14523_v32  ;;  %12384 = vpow2.f32 %v9097_v56  ;;  %v9077_v38 = vsub.f32 %v14392_v23, %v14523_v32  ;;  %v9078_v27 = vsub.f32 %v14395_v13, %v14523_v32  ;;  %v9113_v61 = vmul.f32 1.442695, %v9075_v50 }
 0xc87   : > { %v14529_v54 = vpop.xlane.xlu1 %9045  ;;  %12386 = vpow2.f32 %v9099_v58 }
 0xc88   : > { %14961 = vst [vmem:[#allocation32_spill] sm:$0xff] %v14529_v54  ;;  %12388 = vpow2.f32 %v9105_v52  ;;  %v9080_v56 = vsub.f32 %v14403_v59, %v14529_v54  ;;  %v9117_v58 = vmul.f32 1.442695, %v9077_v38 }
 0xc89   : > { %v14535_v60 = vpop.xlane.xlu0 %9048 }
 0xc8a   : > { %9281 = vperm.xlu1 %11440, %v14470_v46   ;;  %14962 = vst [vmem:[#allocation33_spill] sm:$0xff] %v14535_v60  ;;  %v9119_v46 = vmul.f32 1.442695, %v9078_v27  ;;  %v9082_v52 = vsub.f32 %v14411_v18, %v14535_v60 }
 0xc8b   : > { %9284 = vperm.xlu0 %11439, %v14477_v51   ;;  %v9115_v51 = vmul.f32 1.442695, %v9076_v39  ;;  %v14541_v44 = vpop.xlane.xlu1 %9051 }
 0xc8c   : > { %14963 = vst [vmem:[#allocation35_spill] sm:$0xff] %v14541_v44  ;;  %v9083_v39 = vsub.f32 %v14416_v9, %v14541_v44 }
 0xc8d   : > { %v14547_v50 = vpop.xlane.xlu0 %9054 }
 0xc8e   : > { %9287 = vperm.xlu1 %11440, %v14482_v35   ;;  %v9111_v35 = vmul.f32 1.442695, %v9074_v0  ;;  %v9081_v0 = vsub.f32 %v14408_v43, %v14535_v60  ;;  %14964 = vst [vmem:[#allocation34_spill] sm:$0xff] %v14547_v50  ;;  %v9127_v60 = vmul.f32 1.442695, %v9082_v52 }
 0xc8f   : > { %9290 = vperm.xlu0 %11439, %v14487_v12   ;;  %v9107_v12 = vmul.f32 1.442695, %v9072_v22  ;;  %v9079_v22 = vsub.f32 %v14400_v29, %v14529_v54  ;;  %v9123_v54 = vmul.f32 1.442695, %v9080_v56  ;;  %v12377_v27 = vpop.eup %12376 }
 0xc90   : > { %v9125_v38 = vmul.f32 1.442695, %v9081_v0  ;;  %v12379_v32 = vpop.eup %12378 }
 0xc91   : > { %12390 = vpow2.f32 %v9107_v12  ;;  %v9121_v12 = vmul.f32 1.442695, %v9079_v22  ;;  %v14557_v22 = vpop.xlane.xlu1 %9057  ;;  %v12381_v56 = vpop.eup %12380 }
 0xc92   : > { %12392 = vpow2.f32 %v9109_v15  ;;  %v9084_v15 = vsub.f32 %v14419_v6, %v14541_v44  ;;  %14965 = vst [vmem:[#allocation37_spill] sm:$0xff] %v14557_v22  ;;  %v12383_v44 = vpop.eup %12382  ;;  %v9087_v0 = vsub.f32 %v14432_v62, %v14557_v22  ;;  %v9088_v52 = vsub.f32 %v14435_v25, %v14557_v22 }
 0xc93   : > { %12394 = vpow2.f32 %v9111_v35  ;;  %v9085_v35 = vsub.f32 %v14424_v20, %v14547_v50  ;;  %v12385_v57 = vpop.eup %12384  ;;  %v14966_v22 = vlaneseq }
 0xc94   : > { %12396 = vpow2.f32 %v9113_v61  ;;  %v9086_v61 = vsub.f32 %v14427_v34, %v14547_v50  ;;  %v9131_v45 = vmul.f32 1.442695, %v9084_v15  ;;  %v9155_v50 = vadd.f32 %v12379_v32, %v12377_v27  ;;  %v12387_v47 = vpop.eup %12386 }
 0xc95   : > { %12398 = vpow2.f32 %v9115_v51  ;;  %v9129_v51 = vmul.f32 1.442695, %v9083_v39  ;;  %v9137_v39 = vmul.f32 1.442695, %v9087_v0  ;;  %v9152_v5 = vadd.f32 %v12387_v47, %v12385_v57 }
 0xc96   : > { %12400 = vpow2.f32 %v9117_v58  ;;  %v9133_v58 = vmul.f32 1.442695, %v9085_v35  ;;  %v9149_v35 = vadd.f32 %v12383_v44, %v12381_v56 }
 0xc97   : > { %12402 = vpow2.f32 %v9119_v46  ;;  %v9135_v46 = vmul.f32 1.442695, %v9086_v61 }
 0xc98   : > { %12404 = vpow2.f32 %v9121_v12  ;;  %v12389_v12 = vpop.eup %12388 }
 0xc99   : > { %12406 = vpow2.f32 %v9123_v54 }
 0xc9a   : > { %12408 = vpow2.f32 %v9125_v38  ;;  %v9139_v38 = vmul.f32 1.442695, %v9088_v52 }
 0xc9b   : > { %12410 = vpow2.f32 %v9127_v60 }
 0xc9c   : > { %12412 = vpow2.f32 %v9129_v51 }
 0xc9d   : > { %12414 = vpow2.f32 %v9131_v45 }
 0xc9e   : > { %v12391_v54 = vpop.eup %12390  ;;  %12416 = vpow2.f32 %v9133_v58  ;;  %v14564_v58 = vand.u32 127, %v14966_v22 }
 0xc9f   : > { %v12393_v15 = vpop.eup %12392  ;;  %12418 = vpow2.f32 %v9135_v46  ;;  %v9158_v27 = vadd.f32 %v12391_v54, %v12389_v12 }
 0xca0   : > { %v12395_v21 = vpop.eup %12394  ;;  %12420 = vpow2.f32 %v9137_v39  ;;  %vm9292_vm2 = vcmp.eq.s32.totalorder %v14564_v58, %v14467_v11  ;;  %vm9296_vm5 = vcmp.eq.s32.totalorder %v14564_v58, %v14439_v63  ;;  %vm9294_vm6 = vcmp.eq.s32.totalorder %v14564_v58, %v14441_v41 }
 0xca1   : > { %v12397_v60 = vpop.eup %12396  ;;  %12422 = vpow2.f32 %v9139_v38  ;;  %v9161_v51 = vadd.f32 %v12395_v21, %v12393_v15  ;;  %vm9298_vm8 = vcmp.eq.s32.totalorder %v14564_v58, %v14443_v26  ;;  %vm9300_vm10 = vcmp.eq.s32.totalorder %v14564_v58, %v14459_v7 }
 0xca2   : > { %v12399_v61 = vpop.eup %12398  ;;  %vm9302_vm13 = vcmp.eq.s32.totalorder %v14564_v58, %v14463_v16  ;;  %vm9304_vm14 = vcmp.eq.s32.totalorder %v14564_v58, %v14465_v2 }
 0xca3   : > { %v12401_v32 = vpop.eup %12400  ;;  %v9164_v47 = vadd.f32 %v12399_v61, %v12397_v60  ;;  %v9320_v61 = vsel %vm9292_vm2, %v14342_v37, 0.0  ;;  %v9322_v37 = vsel %vm9294_vm6, %v14350_v55, 0.0  ;;  %vm9308_vm2 = vcmp.eq.s32.totalorder %v14564_v58, %v14489_v42 }
 0xca4   : > { %v12403_v45 = vpop.eup %12402  ;;  %vm9310_vm6 = vcmp.eq.s32.totalorder %v14564_v58, %v14474_v3 }
 0xca5   : > { %v9167_v57 = vadd.f32 %v12403_v45, %v12401_v32 }
 0xcae   : > { %9156 = vadd.xlane.f32.xlu0 %v9155_v50  ;;  %v12405_v50 = vpop.eup %12404 }
 0xcaf   : > { %v12407_v0 = vpop.eup %12406 }
 0xcb0   : > { %v12409_v44 = vpop.eup %12408  ;;  %v9170_v12 = vadd.f32 %v12407_v0, %v12405_v50 }
 0xcb1   : > { %v12411_v56 = vpop.eup %12410 }
 0xcb2   : > { %9150 = vadd.xlane.f32.xlu1 %v9149_v35  ;;  %9153 = vadd.xlane.f32.xlu0 %v9152_v5  ;;  %v12413_v46 = vpop.eup %12412  ;;  %v14567_v5 = vadd.s32 128, %v14564_v58  ;;  %v9173_v54 = vadd.f32 %v12411_v56, %v12409_v44 }
 0xcb3   : > { %v12415_v52 = vpop.eup %12414 }
 0xcb4   : > { %v12417_v21 = vpop.eup %12416  ;;  %vm9293_vm1 = vcmp.eq.s32.totalorder %v14567_v5, %v14467_v11  ;;  %v9176_v15 = vadd.f32 %v12415_v52, %v12413_v46  ;;  %vm9297_vm3 = vcmp.eq.s32.totalorder %v14567_v5, %v14439_v63  ;;  %vm9295_vm4 = vcmp.eq.s32.totalorder %v14567_v5, %v14441_v41 }
 0xcb5   : > { %v12419_v39 = vpop.eup %12418  ;;  %v9321_v60 = vsel %vm9293_vm1, %v14345_v28, 0.0  ;;  %v9325_v28 = vsel %vm9297_vm3, %v14361_v49, 0.0  ;;  %vm9299_vm7 = vcmp.eq.s32.totalorder %v14567_v5, %v14443_v26  ;;  %vm9301_vm9 = vcmp.eq.s32.totalorder %v14567_v5, %v14459_v7 }
 0xcb6   : > { %9159 = vadd.xlane.f32.xlu1 %v9158_v27  ;;  %9162 = vadd.xlane.f32.xlu0 %v9161_v51  ;;  %v12421_v22 = vpop.eup %12420  ;;  %v9179_v38 = vadd.f32 %v12419_v39, %v12417_v21  ;;  %v9348_v32 = vadd.f32 %v9321_v60, %v9320_v61  ;;  %v9323_v27 = vsel %vm9295_vm4, %v14353_v19, 0.0  ;;  %v9324_v51 = vsel %vm9296_vm5, %v14358_v17, 0.0 }
 0xcb7   : > { %v12423_v35 = vpop.eup %12422  ;;  %v9354_v63 = vadd.f32 %v9325_v28, %v9324_v51  ;;  %v9351_v41 = vadd.f32 %v9323_v27, %v9322_v37  ;;  %v9327_v45 = vsel %vm9299_vm7, %v14369_v33, 0.0  ;;  %v9326_v19 = vsel %vm9298_vm8, %v14366_v1, 0.0 }
 0xcb8   : > { %v9182_v11 = vadd.f32 %v12423_v35, %v12421_v22  ;;  %v9357_v49 = vadd.f32 %v9327_v45, %v9326_v19  ;;  %v9329_v21 = vsel %vm9301_vm9, %v14377_v14, 0.0  ;;  %vm9303_vm11 = vcmp.eq.s32.totalorder %v14567_v5, %v14463_v16 }
 0xcb9   : > { %vm9305_vm12 = vcmp.eq.s32.totalorder %v14567_v5, %v14465_v2  ;;  %v9328_v39 = vsel %vm9300_vm10, %v14374_v53, 0.0  ;;  %vm9307_vm15 = vcmp.eq.s32.totalorder %v14567_v5, %v14472_v4  ;;  %vm9309_vm0 = vcmp.eq.s32.totalorder %v14567_v5, %v14489_v42 }
 0xcba   : > { %9165 = vadd.xlane.f32.xlu1 %v9164_v47  ;;  %9168 = vadd.xlane.f32.xlu0 %v9167_v57  ;;  %v9360_v22 = vadd.f32 %v9329_v21, %v9328_v39  ;;  %v9330_v53 = vsel %vm9302_vm13, %v14382_v31, 0.0  ;;  %v9332_v16 = vsel %vm9304_vm14, %v14392_v23, 0.0  ;;  %vm9306_vm1 = vcmp.eq.s32.totalorder %v14564_v58, %v14472_v4 }
 0xcbb   : > { %v9335_v35 = vsel %vm9307_vm15, %v14403_v59, 0.0  ;;  %v9337_v60 = vsel %vm9309_vm0, %v14411_v18, 0.0  ;;  %vm9311_vm3 = vcmp.eq.s32.totalorder %v14567_v5, %v14474_v3  ;;  %v9334_v23 = vsel %vm9306_vm1, %v14400_v29, 0.0 }
 0xcbc   : > { %v9336_v4 = vsel %vm9308_vm2, %v14408_v43, 0.0  ;;  %v9369_v59 = vadd.f32 %v9335_v35, %v9334_v23  ;;  %v9339_v18 = vsel %vm9311_vm3, %v14419_v6, 0.0  ;;  %v9338_v43 = vsel %vm9310_vm6, %v14416_v9, 0.0 }
 0xcbd   : > { %v9372_v42 = vadd.f32 %v9337_v60, %v9336_v4  ;;  %v9375_v3 = vadd.f32 %v9339_v18, %v9338_v43  ;;  %vm9460_vm1 = vcmask 7168  }
 0xcbe   : > { %9171 = vadd.xlane.f32.xlu1 %v9170_v12  ;;  %9174 = vadd.xlane.f32.xlu0 %v9173_v54 }
 0xcc2   : > { %9177 = vadd.xlane.f32.xlu1 %v9176_v15  ;;  %9180 = vadd.xlane.f32.xlu0 %v9179_v38  ;;  %v9331_v15 = vsel %vm9303_vm11, %v14385_v8, 0.0  ;;  %v9333_v38 = vsel %vm9305_vm12, %v14395_v13, 0.0 }
 0xcc3   : > { %v9363_v8 = vadd.f32 %v9331_v15, %v9330_v53  ;;  %v9366_v13 = vadd.f32 %v9333_v38, %v9332_v16  ;;  %v12495_v16 = vld [vmem:[%s12830_s13 + $0x18] sm:$0xff] }
 0xcc4   : > { %vm9393_vm0 = vcmp.ne.s32.totalorder %v12495_v16, 0 }
 0xcc5   : > { %v10465_v4 = vsel %vm9393_vm0, 1.0, %v14875_v30 }
 0xcc6   : > { %9183 = vadd.xlane.f32.xlu1 %v9182_v11  ;;  %9349 = vadd.xlane.f32.xlu0 %v9348_v32 }
 0xcca   : > { %9355 = vadd.xlane.f32.xlu1 %v9354_v63  ;;  %9352 = vadd.xlane.f32.xlu0 %v9351_v41 }
 0xcce   : > { %9358 = vadd.xlane.f32.xlu1 %v9357_v49 }
 0xcfe   : > { %v14593_v50 = vpop.xlane.xlu0 %9060 }
 0xcff   : > { %v9089_v17 = vsub.f32 %v14446_v48, %v14593_v50  ;;  %v9090_v55 = vsub.f32 %v14449_v10, %v14593_v50 }
 0xd01   : > { %v9141_v0 = vmul.f32 1.442695, %v9089_v17  ;;  %v9143_v26 = vmul.f32 1.442695, %v9090_v55 }
 0xd02   : > { %v14599_v44 = vpop.xlane.xlu1 %9063 }
 0xd03   : > { %12424 = vpow2.f32 %v9141_v0  ;;  %v9091_v33 = vsub.f32 %v14454_v36, %v14599_v44  ;;  %v9092_v1 = vsub.f32 %v14457_v24, %v14599_v44 }
 0xd04   : > { %12426 = vpow2.f32 %v9143_v26  ;;  %v12492_v26 = vld [vmem:[%s12830_s13] sm:$0xff] }
 0xd05   : > { %v9145_v47 = vmul.f32 1.442695, %v9091_v33  ;;  %v9147_v57 = vmul.f32 1.442695, %v9092_v1  ;;  %vm9390_vm13 = vcmp.ne.s32.totalorder %v12492_v26, 0 }
 0xd06   : > { %v9282_v14 = vpop.permute.xlu1 %9281  ;;  %v9285_v2 = vpop.permute.xlu0 %9284 }
 0xd07   : > { %12428 = vpow2.f32 %v9145_v47  ;;  %vm9312_vm4 = vcmp.eq.s32.totalorder %v14564_v58, %v9282_v14  ;;  %vm9313_vm5 = vcmp.eq.s32.totalorder %v14567_v5, %v9282_v14  ;;  %vm9314_vm7 = vcmp.eq.s32.totalorder %v14564_v58, %v9285_v2  ;;  %v14968_v14 = vld [vmem:[#allocation27_spill] sm:$0xff] }
 0xd08   : > { %12430 = vpow2.f32 %v9147_v57  ;;  %v9340_v61 = vsel %vm9312_vm4, %v14424_v20, 0.0  ;;  %v9341_v11 = vsel %vm9313_vm5, %v14427_v34, 0.0  ;;  %vm9315_vm8 = vcmp.eq.s32.totalorder %v14567_v5, %v9285_v2 }
 0xd09   : > { %v9378_v32 = vadd.f32 %v9341_v11, %v9340_v61  ;;  %v9342_v20 = vsel %vm9314_vm7, %v14432_v62, 0.0  ;;  %v9343_v34 = vsel %vm9315_vm8, %v14435_v25, 0.0 }
 0xd0a   : > { %v9288_v31 = vpop.permute.xlu1 %9287  ;;  %v9291_v29 = vpop.permute.xlu0 %9290  ;;  %v9381_v51 = vadd.f32 %v9343_v34, %v9342_v20 }
 0xd0b   : > { %vm9316_vm9 = vcmp.eq.s32.totalorder %v14564_v58, %v9288_v31  ;;  %vm9317_vm10 = vcmp.eq.s32.totalorder %v14567_v5, %v9288_v31  ;;  %vm9318_vm11 = vcmp.eq.s32.totalorder %v14564_v58, %v9291_v29  ;;  %vm9319_vm12 = vcmp.eq.s32.totalorder %v14567_v5, %v9291_v29  ;;  %v14969_v31 = vld [vmem:[#allocation28_spill] sm:$0xff] }
 0xd0c   : > { %v9344_v28 = vsel %vm9316_vm9, %v14446_v48, 0.0  ;;  %v9345_v6 = vsel %vm9317_vm10, %v14449_v10, 0.0  ;;  %v9346_v9 = vsel %vm9318_vm11, %v14454_v36, 0.0  ;;  %v9347_v37 = vsel %vm9319_vm12, %v14457_v24, 0.0 }
 0xd0d   : > { %v9384_v27 = vadd.f32 %v9345_v6, %v9344_v28  ;;  %v9387_v48 = vadd.f32 %v9347_v37, %v9346_v9  ;;  %v12496_v9 = vld [vmem:[%s12830_s13 + $0x20] sm:$0xff] }
 0xd0e   : > { %vm9394_vm2 = vcmp.ne.s32.totalorder %v12496_v9, 0  ;;  %v14977_v9 = vld [vmem:[#allocation34_spill] sm:$0xff] }
 0xd10   : > { %v12425_v56 = vpop.eup %12424 }
 0xd11   : > { %v12427_v46 = vpop.eup %12426 }
 0xd12   : > { %v9185_v52 = vadd.f32 %v12427_v46, %v12425_v56 }
 0xd14   : > { %v12429_v12 = vpop.eup %12428  ;;  %9186 = vadd.xlane.f32.xlu0 %v9185_v52  ;;  %v12493_v52 = vld [vmem:[%s12830_s13 + $0x10] sm:$0xff] }
 0xd15   : > { %v12431_v54 = vpop.eup %12430  ;;  %vm9392_vm14 = vcmp.ne.s32.totalorder %v12493_v52, 0 }
 0xd16   : > { %v9188_v7 = vadd.f32 %v12431_v54, %v12429_v12  ;;  %v10462_v12 = vsel %vm9390_vm13, 1.0, %v14875_v30  ;;  %v12494_v54 = vld [vmem:[%s12830_s13 + $0x8] sm:$0xff]  ;;  %v10464_v38 = vsel %vm9392_vm14, 1.0, %v14875_v30 }
 0xd17   : > { %vm9391_vm15 = vcmp.ne.s32.totalorder %v12494_v54, 0 }
 0xd18   : > { %9189 = vadd.xlane.f32.xlu1 %v9188_v7  ;;  %9361 = vadd.xlane.f32.xlu0 %v9360_v22  ;;  %v14967_v7 = vld [vmem:[#allocation26_spill] sm:$0xff]  ;;  %v10463_v35 = vsel %vm9391_vm15, 1.0, %v14875_v30 }
 0xd1c   : > { %9364 = vadd.xlane.f32.xlu1 %v9363_v8  ;;  %9367 = vadd.xlane.f32.xlu0 %v9366_v13 }
 0xd20   : > { %9370 = vadd.xlane.f32.xlu1 %v9369_v59  ;;  %9373 = vadd.xlane.f32.xlu0 %v9372_v42 }
 0xd24   : > { %9376 = vadd.xlane.f32.xlu1 %v9375_v3  ;;  %9379 = vadd.xlane.f32.xlu0 %v9378_v32 }
 0xd28   : > { %9385 = vadd.xlane.f32.xlu0 %v9384_v27  ;;  %9382 = vadd.xlane.f32.xlu1 %v9381_v51 }
 0xd2c   : > { %9388 = vadd.xlane.f32.xlu1 %v9387_v48 }
 0xd37   : > { %v9157_v10 = vpop.xlane.xlu0 %9156 }
 0xd3b   : > { %v9151_v62 = vpop.xlane.xlu1 %9150  ;;  %v9154_v63 = vpop.xlane.xlu0 %9153 }
 0xd3c   : > { %12432 = vlog2.f32 %v9151_v62  ;;  %v14970_v62 = vld [vmem:[#allocation29_spill] sm:$0xff] }
 0xd3d   : > { %12434 = vlog2.f32 %v9157_v10 }
 0xd3e   : > { %12436 = vlog2.f32 %v9154_v63 }
 0xd3f   : > { %v9160_v25 = vpop.xlane.xlu1 %9159  ;;  %v9163_v58 = vpop.xlane.xlu0 %9162 }
 0xd40   : > { %12438 = vlog2.f32 %v9160_v25 }
 0xd41   : > { %12440 = vlog2.f32 %v9163_v58 }
 0xd43   : > { %v9166_v5 = vpop.xlane.xlu1 %9165  ;;  %v9169_v41 = vpop.xlane.xlu0 %9168 }
 0xd44   : > { %12442 = vlog2.f32 %v9166_v5  ;;  %v10466_v5 = vsel %vm9394_vm2, 1.0, %v14875_v30 }
 0xd45   : > { %12444 = vlog2.f32 %v9169_v41 }
 0xd47   : > { %v9172_v45 = vpop.xlane.xlu1 %9171  ;;  %v9175_v36 = vpop.xlane.xlu0 %9174 }
 0xd48   : > { %12446 = vlog2.f32 %v9172_v45  ;;  %v12497_v45 = vld [vmem:[%s12830_s13 + $0x28] sm:$0xff] }
 0xd49   : > { %v12433_v24 = vpop.eup %12432  ;;  %12448 = vlog2.f32 %v9175_v36  ;;  %vm9395_vm3 = vcmp.ne.s32.totalorder %v12497_v45, 0  ;;  %v12498_v36 = vld [vmem:[%s12830_s13 + $0x30] sm:$0xff] }
 0xd4a   : > { %v12435_v19 = vpop.eup %12434  ;;  %v9192_v49 = vmul.f32 0.6931472, %v12433_v24  ;;  %vm9396_vm4 = vcmp.ne.s32.totalorder %v12498_v36, 0 }
 0xd4b   : > { %v12437_v17 = vpop.eup %12436  ;;  %v9178_v55 = vpop.xlane.xlu1 %9177  ;;  %v9196_v33 = vmul.f32 0.6931472, %v12435_v19  ;;  %v10468_v52 = vsel %vm9396_vm4, 1.0, %v14875_v30 }
 0xd4c   : > { %v9181_v0 = vpop.xlane.xlu0 %9180  ;;  %v9194_v1 = vmul.f32 0.6931472, %v12437_v17  ;;  %v9219_v47 = vadd.f32 %v9192_v49, %v14484_v40  ;;  %12450 = vlog2.f32 %v9178_v55 }
 0xd4d   : > { %v12439_v57 = vpop.eup %12438  ;;  %v9221_v22 = vadd.f32 %v9196_v33, %v14967_v7  ;;  %12452 = vlog2.f32 %v9181_v0  ;;  %v14971_v0 = vld [vmem:[#allocation30_spill] sm:$0xff]  ;;  %v14972_v33 = vld [vmem:[#allocation31_spill] sm:$0xff] }
 0xd4e   : > { %v9198_v39 = vmul.f32 0.6931472, %v12439_v57  ;;  %v9220_v15 = vadd.f32 %v9194_v1, %v14968_v14  ;;  %v12441_v6 = vpop.eup %12440  ;;  %v12499_v57 = vld [vmem:[%s12830_s13 + $0x38] sm:$0xff] }
 0xd4f   : > { %v9184_v56 = vpop.xlane.xlu1 %9183  ;;  %v9200_v34 = vmul.f32 0.6931472, %v12441_v6  ;;  %vm9397_vm5 = vcmp.ne.s32.totalorder %v12499_v57, 0  ;;  %v14976_v6 = vld [vmem:[#allocation35_spill] sm:$0xff] }
 0xd50   : > { %v9350_v46 = vpop.xlane.xlu0 %9349  ;;  %v9222_v23 = vadd.f32 %v9198_v39, %v14969_v31  ;;  %12454 = vlog2.f32 %v9184_v56  ;;  %v10467_v56 = vsel %vm9395_vm3, 1.0, %v14875_v30  ;;  %v10469_v31 = vsel %vm9397_vm5, 1.0, %v14875_v30 }
 0xd51   : > { %v9432_v21 = vsub.f32 %v9219_v47, %v9350_v46  ;;  %v12443_v20 = vpop.eup %12442  ;;  %v9223_v63 = vadd.f32 %v9200_v34, %v14970_v62 }
 0xd52   : > { %v12445_v27 = vpop.eup %12444  ;;  %v9202_v48 = vmul.f32 0.6931472, %v12443_v20 }
 0xd53   : > { %v9356_v53 = vpop.xlane.xlu1 %9355  ;;  %v9446_v8 = vmul.f32 %v10462_v12, %v9432_v21  ;;  %v9204_v10 = vmul.f32 0.6931472, %v12445_v27  ;;  %v12500_v12 = vld [vmem:[%s12830_s13 + $0x40] sm:$0xff] }
 0xd54   : > { %v9353_v40 = vpop.xlane.xlu0 %9352  ;;  %v9434_v13 = vsub.f32 %v9221_v22, %v9356_v53  ;;  %v9224_v26 = vadd.f32 %v9202_v48, %v14971_v0  ;;  %vm9398_vm6 = vcmp.ne.s32.totalorder %v12500_v12, 0  ;;  %v14978_v48 = vld [vmem:[#allocation23_spill] sm:$0xff] }
 0xd55   : > { %v9433_v2 = vsub.f32 %v9220_v15, %v9353_v40  ;;  %v9461_v42 = vsel %vm9460_vm1, %v9446_v8, 0.0  ;;  %v12447_v37 = vpop.eup %12446  ;;  %v9225_v1 = vadd.f32 %v9204_v10, %v14972_v33  ;;  %v14973_v15 = vld [vmem:[#allocation32_spill] sm:$0xff]  ;;  %vm9401_vm9 = vcmp.ne.s32.totalorder %v14978_v48, 0 }
 0xd56   : > { %v9448_v60 = vmul.f32 %v10464_v38, %v9434_v13  ;;  %v12449_v25 = vpop.eup %12448  ;;  %v9206_v19 = vmul.f32 0.6931472, %v12447_v37  ;;  %v14974_v13 = vld [vmem:[#allocation33_spill] sm:$0xff]  ;;  %v14979_v10 = vld [vmem:[#allocation24_spill] sm:$0xff] }
 0xd57   : > { %v9359_v59 = vpop.xlane.xlu1 %9358  ;;  %v9447_v61 = vmul.f32 %v10463_v35, %v9433_v2  ;;  %v9208_v17 = vmul.f32 0.6931472, %v12449_v25  ;;  %v12501_v35 = vld [vmem:[%s12830_s13 + $0x48] sm:$0xff]  ;;  %vm9402_vm10 = vcmp.ne.s32.totalorder %v14979_v10, 0 }
 0xd58   : > { %v9462_v18 = vsel %vm9460_vm1, %v9448_v60, 0.0  ;;  %v9435_v11 = vsub.f32 %v9222_v23, %v9359_v59  ;;  %v9226_v38 = vadd.f32 %v9206_v19, %v14973_v15  ;;  %vm9399_vm7 = vcmp.ne.s32.totalorder %v12501_v35, 0  ;;  %v14975_v60 = vld [vmem:[#allocation22_spill] sm:$0xff] }
 0xd59   : > { %v9463_v29 = vadd.f32 %v9462_v18, %v9461_v42  ;;  %v9474_v3 = vsel %vm9460_vm1, %v9447_v61, 0.0  ;;  %v12451_v49 = vpop.eup %12450  ;;  %v9227_v2 = vadd.f32 %v9208_v17, %v14974_v13  ;;  %vm9400_vm8 = vcmp.ne.s32.totalorder %v14975_v60, 0 }
 0xd5a   : > { %v9449_v43 = vmul.f32 %v10465_v4, %v9435_v11  ;;  %v12453_v47 = vpop.eup %12452  ;;  %v9210_v22 = vmul.f32 0.6931472, %v12451_v49  ;;  %v10470_v4 = vsel %vm9398_vm6, 1.0, %v14875_v30  ;;  %v10471_v62 = vsel %vm9399_vm7, 1.0, %v14875_v30  ;;  %v14980_v49 = vld [vmem:[#allocation37_spill] sm:$0xff] }
 0xd5b   : > { %v9212_v40 = vmul.f32 0.6931472, %v12453_v47  ;;  %v10473_v47 = vsel %vm9401_vm9, 1.0, %v14875_v30 }
 0xd5c   : > { %v9475_v32 = vsel %vm9460_vm1, %v9449_v43, 0.0  ;;  %v9228_v20 = vadd.f32 %v9210_v22, %v14976_v6 }
 0xd5d   : > { %v14673_v28 = vadd.f32 %v9475_v32, %v9474_v3  ;;  %v12455_v53 = vpop.eup %12454  ;;  %v9229_v37 = vadd.f32 %v9212_v40, %v14977_v9 }
 0xd5e   : > { %v9214_v43 = vmul.f32 0.6931472, %v12455_v53 }
 0xd60   : > { %v9230_v17 = vadd.f32 %v9214_v43, %v14980_v49 }
 0xd9d   : > { %v9187_v51 = vpop.xlane.xlu0 %9186 }
 0xd9e   : > { %12456 = vlog2.f32 %v9187_v51 }
 0xda1   : > { %v9190_v58 = vpop.xlane.xlu1 %9189  ;;  %v9362_v41 = vpop.xlane.xlu0 %9361 }
 0xda2   : > { %12458 = vlog2.f32 %v9190_v58  ;;  %v9436_v24 = vsub.f32 %v9223_v63, %v9362_v41 }
 0xda4   : > { %v9450_v55 = vmul.f32 %v10466_v5, %v9436_v24 }
 0xda5   : > { %v9365_v46 = vpop.xlane.xlu1 %9364  ;;  %v9368_v21 = vpop.xlane.xlu0 %9367 }
 0xda6   : > { %v9464_v54 = vsel %vm9460_vm1, %v9450_v55, 0.0  ;;  %v9437_v39 = vsub.f32 %v9224_v26, %v9365_v46  ;;  %v9438_v7 = vsub.f32 %v9225_v1, %v9368_v21  ;;  %v14981_v1 = vld [vmem:[#allocation25_spill] sm:$0xff] }
 0xda7   : > { %v9465_v14 = vadd.f32 %v9464_v54, %v9463_v29  ;;  %vm9403_vm11 = vcmp.ne.s32.totalorder %v14981_v1, 0 }
 0xda8   : > { %v9451_v16 = vmul.f32 %v10467_v56, %v9437_v39  ;;  %v9452_v8 = vmul.f32 %v10468_v52, %v9438_v7  ;;  %v10474_v56 = vsel %vm9402_vm10, 1.0, %v14875_v30  ;;  %v10475_v15 = vsel %vm9403_vm11, 1.0, %v14875_v30 }
 0xda9   : > { %v9371_v23 = vpop.xlane.xlu1 %9370  ;;  %v9374_v59 = vpop.xlane.xlu0 %9373 }
 0xdaa   : > { %v9477_v42 = vsel %vm9460_vm1, %v9451_v16, 0.0  ;;  %v9466_v18 = vsel %vm9460_vm1, %v9452_v8, 0.0  ;;  %v9439_v61 = vsub.f32 %v9226_v38, %v9371_v23  ;;  %v9440_v11 = vsub.f32 %v9227_v2, %v9374_v59 }
 0xdab   : > { %v12457_v29 = vpop.eup %12456  ;;  %v9478_v3 = vadd.f32 %v9477_v42, %v14673_v28  ;;  %v9467_v32 = vadd.f32 %v9466_v18, %v9465_v14  ;;  %v10472_v28 = vsel %vm9400_vm8, 1.0, %v14875_v30 }
 0xdac   : > { %v9216_v34 = vmul.f32 0.6931472, %v12457_v29  ;;  %v9453_v27 = vmul.f32 %v10469_v31, %v9439_v61  ;;  %v9454_v51 = vmul.f32 %v10470_v4, %v9440_v11 }
 0xdad   : > { %v9377_v63 = vpop.xlane.xlu1 %9376  ;;  %v9380_v25 = vpop.xlane.xlu0 %9379 }
 0xdae   : > { %v9479_v58 = vsel %vm9460_vm1, %v9453_v27, 0.0  ;;  %v9468_v5 = vsel %vm9460_vm1, %v9454_v51, 0.0  ;;  %v9441_v41 = vsub.f32 %v9228_v20, %v9377_v63  ;;  %v9442_v45 = vsub.f32 %v9229_v37, %v9380_v25 }
 0xdaf   : > { %v12459_v36 = vpop.eup %12458  ;;  %v9480_v24 = vadd.f32 %v9479_v58, %v9478_v3  ;;  %v9469_v19 = vadd.f32 %v9468_v5, %v9467_v32  ;;  %v9231_v33 = vadd.f32 %v9216_v34, %v14593_v50 }
 0xdb0   : > { %v9218_v55 = vmul.f32 0.6931472, %v12459_v36  ;;  %v9455_v0 = vmul.f32 %v10471_v62, %v9441_v41  ;;  %v9456_v26 = vmul.f32 %v10472_v28, %v9442_v45 }
 0xdb1   : > { %v9383_v57 = vpop.xlane.xlu1 %9382  ;;  %v9386_v46 = vpop.xlane.xlu0 %9385 }
 0xdb2   : > { %v9481_v52 = vsel %vm9460_vm1, %v9455_v0, 0.0  ;;  %v9470_v21 = vsel %vm9460_vm1, %v9456_v26, 0.0  ;;  %v9443_v12 = vsub.f32 %v9230_v17, %v9383_v57  ;;  %v9444_v54 = vsub.f32 %v9231_v33, %v9386_v46 }
 0xdb3   : > { %v9482_v50 = vadd.f32 %v9481_v52, %v9480_v24  ;;  %v9232_v22 = vadd.f32 %v9218_v55, %v14599_v44  ;;  %v9471_v14 = vadd.f32 %v9470_v21, %v9469_v19 }
 0xdb4   : > { %v9457_v39 = vmul.f32 %v10473_v47, %v9443_v12  ;;  %v9458_v7 = vmul.f32 %v10474_v56, %v9444_v54 }
 0xdb5   : > { %v9389_v38 = vpop.xlane.xlu1 %9388 }
 0xdb6   : > { %v9483_v53 = vsel %vm9460_vm1, %v9457_v39, 0.0  ;;  %v9472_v40 = vsel %vm9460_vm1, %v9458_v7, 0.0  ;;  %v9445_v16 = vsub.f32 %v9232_v22, %v9389_v38 }
 0xdb7   : > { %v9473_v8 = vadd.f32 %v9472_v40, %v9471_v14  ;;  %v9484_v2 = vadd.f32 %v9483_v53, %v9482_v50 }
 0xdb8   : > { %v9459_v13 = vmul.f32 %v10475_v15, %v9445_v16 }
 0xdb9   : > { %9487 = vst.msk [vmem:[%s607_s20] sm:$0xff] %vm9460_vm1, %v9473_v8 }
 0xdba   : > { %v9485_v44 = vsel %vm9460_vm1, %v9459_v13, 0.0 }
 0xdbb   : > { %v9486_v35 = vadd.f32 %v9485_v44, %v9484_v2 }
 0xdbd   : > { %9488 = vst.msk [vmem:[%s607_s20 + $0x8] sm:$0xff] %vm9460_vm1, %v9486_v35 }
 0xdbe PF: > { %s14982_s6 = sld [smem:[#allocation18_spill]]  ;;  %p23_p0 = scmp.ge.s32.totalorder %s12720_s22, 4  }
 0xdbf   : > { %s14983_s17 = smov %s12614_s18  ;;  %s14984_s18 = smov %s12618_s19 }
 0xdc0   : > { %s14986_s20 = smov %s12720_s22  ;;  %25 = sbr.rel (!%p23_p0) target bundleno = 9 (0x9), region = 189 }
 0xdc4   : > { %s14985_s19 = smov %s14982_s6 }
 0xdc5   :  { %9511 = vsyncpa [#allocation5], 1 }
 0xdc6   :  { %9513 = vsyncpa [#allocation5 + $0x1], 1 }
 0xdc7   :  { %9514 = vsyncpa [#allocation8], 1 }
 0xdc8   :  { %9515 = vsyncpa [#allocation11], 1 }

</bundles_post_ra>
